<compile_context>
chip_gen: v7x
topology: tpu7x:2x2x1
jax: 0.10.0
libtpu: 0.0.40
codegen_flags: <defaults>
</compile_context>

<pallas_src>
import functools
import numpy as np
import jax
import jax.numpy as jnp
from jax.experimental import pallas as pl
from jax.experimental.pallas import tpu as pltpu

# ---- MLP_last default hyper-parameters ----
IN_C = 2       # in_channels_C
IN_M = 1       # in_channels_M
C4 = 16        # pconv1 / pconv2 out channels
C2 = 64        # pconv3 out channels
K = 3          # kernel_size
STRIDE = 2
HID = 32       # hid_dim
HID2 = 16      # hid2_dim
OUT_DIM = 3    # output_dim


def _round_up(x, m):
    return ((x + m - 1) // m) * m


def conv_out_len(length):
    return (length - K) // STRIDE + 1


# ---- weight/bias slab layout (row offsets, all multiples of 8) ----
R_W1 = 0
R_W2 = R_W1 + C4          # 16
R_W3 = R_W2 + C4          # 32
R_WH1 = R_W3 + C2         # 96
R_WH2 = R_WH1 + HID       # 128
R_WO = R_WH2 + HID2       # 144
SLAB_ROWS = _round_up(R_WO + OUT_DIM, 8)                        # 152
SLAB_COLS = max(K * IN_C, K * C4, C2, HID, HID2)                # 64


def make_params(key):
    """Deterministic parameters with PyTorch-convention shapes."""
    ks = jax.random.split(key, 12)

    def u(k, shape, scale=0.3):
        return jax.random.uniform(k, shape, jnp.float32, -1.0, 1.0) * scale

    return dict(
        w1=u(ks[0], (C4, IN_C, K)),    b1=u(ks[1], (C4,)),
        w2=u(ks[2], (C4, C4, K)),      b2=u(ks[3], (C4,)),
        w3=u(ks[4], (C2, C4, K)),      b3=u(ks[5], (C2,)),
        wh1=u(ks[6], (HID, C2)),       bh1=u(ks[7], (HID,)),
        wh2=u(ks[8], (HID2, HID)),     bh2=u(ks[9], (HID2,)),
        wo=u(ks[10], (OUT_DIM, HID2)), bo=u(ks[11], (OUT_DIM,)),
    )


def _fuse_conv_weight(w):
    """(C_out, C_in, K) torch conv weight -> (C_out, K*C_in), column = k*C_in + c."""
    c_out, c_in, k = w.shape
    return jnp.transpose(w, (0, 2, 1)).reshape(c_out, k * c_in).astype(jnp.float32)


def _pack_slabs(params):
    """All weights into one (SLAB_ROWS, SLAB_COLS) slab; all biases into (SLAB_ROWS, 1)."""
    f32 = jnp.float32
    entries = [
        (R_W1, _fuse_conv_weight(params["w1"]), params["b1"]),
        (R_W2, _fuse_conv_weight(params["w2"]), params["b2"]),
        (R_W3, _fuse_conv_weight(params["w3"]), params["b3"]),
        (R_WH1, params["wh1"].astype(f32), params["bh1"]),
        (R_WH2, params["wh2"].astype(f32), params["bh2"]),
        (R_WO, params["wo"].astype(f32), params["bo"]),
    ]
    wslab = jnp.zeros((SLAB_ROWS, SLAB_COLS), f32)
    bslab = jnp.zeros((SLAB_ROWS, 1), f32)
    for r0, w, b in entries:
        rows, cols = w.shape
        wslab = wslab.at[r0:r0 + rows, :cols].set(w)
        bslab = bslab.at[r0:r0 + rows, 0].set(b.astype(f32))
    return wslab, bslab


@functools.partial(jax.jit, static_argnames=("b_tile",))
def _mlp_last_impl(x, mask, params, b_tile):
    N, _, L = x.shape
    l1 = conv_out_len(L)
    l2 = conv_out_len(l1)
    l3 = conv_out_len(l2)
    n_pad = _round_up(max(N, 1), b_tile)
    tiles = n_pad // b_tile
    f32 = jnp.float32

    # Feature-major / batch-on-lanes layout:
    #   xm0[l*IN_C + c, n] = (x * mask)[n, c, l]   (pconv1 consumes x*mask)
    #   m0[l, n]           = mask[n, 0, l]
    xm = x.astype(f32) * mask.astype(f32)
    xm0 = jnp.transpose(xm, (2, 1, 0)).reshape(L * IN_C, N)
    m0 = jnp.transpose(mask.astype(f32), (2, 1, 0)).reshape(L * IN_M, N)
    pad = n_pad - N
    if pad:
        xm0 = jnp.pad(xm0, ((0, 0), (0, pad)))     # padded samples: mask = 0 everywhere
        m0 = jnp.pad(m0, ((0, 0), (0, pad)))

    wslab, bslab = _pack_slabs(params)

    def kernel(xm_ref, m_ref, w_ref, b_ref, out_ref, s1x, s1m, s2x, s2m, zmax):

        def wview(r0, rows, cols):
            return w_ref[pl.ds(r0, rows), pl.ds(0, cols)]

        def bview(r0, rows):
            return b_ref[pl.ds(r0, rows), :]

        def pconv_layer(src_x, src_m, dst_x, dst_m, w, b,
                        c_prev, c_mask, c_out, n_pos, pool=None):
            # src_x rows already hold relu(prev) * prev_mask (identical, since the relu
            # output is 0 exactly where the mask is 0); src_m holds the mask row.
            for j in range(n_pos):
                # per-position mask math on a single (1, B) row
                m_a = src_m[pl.ds(STRIDE * j, 1), :]
                m_b = src_m[pl.ds(STRIDE * j + 1, 1), :]
                m_c = src_m[pl.ds(STRIDE * j + 2, 1), :]
                msum = (m_a + m_b + m_c) * float(c_mask)        # mask_conv output row
                hole = msum == 0.0
                keep = jnp.where(hole, 0.0, 1.0)                # (1, B)
                inv = jnp.where(hole, 0.0, 1.0 / msum)          # exact reciprocal row

                # K=3 stride-2 taps of position j are K*c_prev contiguous rows
                lhs = src_x[pl.ds(STRIDE * j * c_prev, K * c_prev), :]   # (K*c_prev, B)
                acc = jnp.dot(w, lhs, preferred_element_type=jnp.float32)  # (c_out, B)
                # output_pre = conv/mask_sum + bias ; holes -> 0 ; then ReLU
                a = jnp.maximum(acc * inv + b * keep, 0.0)

                if pool is None:
                    dst_x[pl.ds(j * c_out, c_out), :] = a
                    dst_m[pl.ds(j, 1), :] = keep
                else:
                    # fused AdaptiveMaxPool1d(1): running max over positions
                    if j == 0:
                        pool[...] = a
                    else:
                        pool[...] = jnp.maximum(pool[...], a)

        w1 = wview(R_W1, C4, K * IN_C)
        b1 = bview(R_W1, C4)
        pconv_layer(xm_ref, m_ref, s1x, s1m, w1, b1, IN_C, IN_M, C4, l1)

        w2 = wview(R_W2, C4, K * C4)
        b2 = bview(R_W2, C4)
        pconv_layer(s1x, s1m, s2x, s2m, w2, b2, C4, C4, C4, l2)

        w3 = wview(R_W3, C2, K * C4)
        b3 = bview(R_W3, C2)
        pconv_layer(s2x, s2m, None, None, w3, b3, C4, C4, C2, l3, pool=zmax)

        # MLP tail, batched over the whole tile (features on sublanes, batch on lanes)
        z = zmax[...]                                            # (C2, B)
        h1 = jnp.maximum(
            jnp.dot(wview(R_WH1, HID, C2), z,
                    preferred_element_type=jnp.float32) + bview(R_WH1, HID), 0.0)
        h2 = jnp.maximum(
            jnp.dot(wview(R_WH2, HID2, HID), h1,
                    preferred_element_type=jnp.float32) + bview(R_WH2, HID2), 0.0)
        out_ref[...] = (
            jnp.dot(wview(R_WO, OUT_DIM, HID2), h2,
                    preferred_element_type=jnp.float32) + bview(R_WO, OUT_DIM))

    out = pl.pallas_call(
        kernel,
        out_shape=jax.ShapeDtypeStruct((OUT_DIM, n_pad), f32),
        grid=(tiles,),
        in_specs=[
            pl.BlockSpec((L * IN_C, b_tile), lambda t: (0, t)),   # x*mask, one batch tile
            pl.BlockSpec((L * IN_M, b_tile), lambda t: (0, t)),   # mask row block
            pl.BlockSpec((SLAB_ROWS, SLAB_COLS), lambda t: (0, 0)),  # all weights
            pl.BlockSpec((SLAB_ROWS, 1), lambda t: (0, 0)),          # all biases
        ],
        out_specs=pl.BlockSpec((OUT_DIM, b_tile), lambda t: (0, t)),  # lane-dense output
        scratch_shapes=[
            pltpu.VMEM((l1 * C4, b_tile), jnp.float32),   # pconv1 activations
            pltpu.VMEM((l1, b_tile), jnp.float32),        # pconv1 mask rows
            pltpu.VMEM((l2 * C4, b_tile), jnp.float32),   # pconv2 activations
            pltpu.VMEM((l2, b_tile), jnp.float32),        # pconv2 mask rows
            pltpu.VMEM((C2, b_tile), jnp.float32),        # fused max-pool accumulator
        ],
        compiler_params=pltpu.CompilerParams(
            dimension_semantics=("parallel",)),           # batch tiles are independent
    )(xm0, m0, wslab, bslab)

    return out[:, :N].T


def mlp_last_forward(x, mask, p, amp, params, t=0, b_tile=1024):
    """x: (N, 2, L), mask: (N, 1, L) in PyTorch NCL. Returns (N, 3)."""
    assert t == 0
    # TODO(synk): use_period / use_amp concat of (p, amp) is dead code with the default
    # config (extras == 0); p and amp are accepted but unused.
    del p, amp
    N, cx, L = x.shape
    assert cx == IN_C and mask.shape == (N, IN_M, L)
    assert b_tile % 128 == 0
    assert conv_out_len(conv_out_len(conv_out_len(L))) >= 1, \
        "sequence too short for three stride-2 convs"
    # Clamp the lane tile so small batches are not over-padded; for big batches b_tile
    # is the per-grid-step lane width (sweep 512-4096 per TPU generation, see header).
    eff_tile = max(128, min(b_tile, _round_up(max(N, 1), 128)))
    return _mlp_last_impl(x, mask, params, b_tile=eff_tile)


# ---------------- pure-numpy reference (mirrors the PyTorch forward) ----------------
def ref_forward(x, mask, params):
    x = np.asarray(x, np.float64)
    m = np.asarray(mask, np.float64)

    def pconv(xx, mm, w, b):
        w = np.asarray(w, np.float64)
        b = np.asarray(b, np.float64)
        N, _, L = xx.shape
        c_out = w.shape[0]
        l_out = conv_out_len(L)
        xm = xx * mm
        out = np.zeros((N, c_out, l_out))
        msum = np.zeros((N, l_out))
        for l in range(l_out):
            s = l * STRIDE
            out[:, :, l] = np.einsum('nck,ock->no', xm[:, :, s:s + K], w) + b
            msum[:, l] = mm[:, :, s:s + K].sum(axis=(1, 2))
        holes = msum == 0.0
        denom = np.where(holes, 1.0, msum)[:, None, :]
        y = (out - b[None, :, None]) / denom + b[None, :, None]
        y = np.where(holes[:, None, :], 0.0, y)
        nm = np.where(holes[:, None, :], 0.0, 1.0) * np.ones_like(y)
        return y, nm

    relu = lambda a: np.maximum(a, 0.0)
    y, mm = pconv(x, m, params['w1'], params['b1']); y = relu(y)
    y, mm = pconv(y, mm, params['w2'], params['b2']); y = relu(y)
    y, mm = pconv(y, mm, params['w3'], params['b3']); y = relu(y)
    z = y.max(axis=2)                                            # (N, 64)
    h1 = relu(z @ np.asarray(params['wh1'], np.float64).T + np.asarray(params['bh1'], np.float64))
    h2 = relu(h1 @ np.asarray(params['wh2'], np.float64).T + np.asarray(params['bh2'], np.float64))
    return h2 @ np.asarray(params['wo'], np.float64).T + np.asarray(params['bo'], np.float64)


if __name__ == "__main__":
    key = jax.random.PRNGKey(0)
    kx, km, kp, ka, kw = jax.random.split(key, 5)

    # N=130 exercises batch padding; the b_tile=128 run exercises a multi-tile grid.
    N, L = 130, 64
    x = jax.random.normal(kx, (N, IN_C, L), jnp.float32)
    mask = (jax.random.uniform(km, (N, IN_M, L)) > 0.35).astype(jnp.float32)
    p = jax.random.normal(kp, (N, 1), jnp.float32)     # unused (use_period=False)
    amp = jax.random.normal(ka, (N, 1), jnp.float32)   # unused (use_amp=False)
    params = make_params(kw)

    ref = ref_forward(np.asarray(x), np.asarray(mask),
                      {k: np.asarray(v) for k, v in params.items()})

    out_wide = jax.block_until_ready(mlp_last_forward(x, mask, p, amp, params))
    out_multi = jax.block_until_ready(mlp_last_forward(x, mask, p, amp, params, b_tile=128))

    np.testing.assert_allclose(np.asarray(out_wide), ref, rtol=2e-4, atol=2e-4)
    np.testing.assert_allclose(np.asarray(out_multi), ref, rtol=2e-4, atol=2e-4)
    print("KERNEL_OK")
</pallas_src>

<mosaic_0001>
module attributes {stable_mosaic.version = 11 : i64} {
  func.func @kernel(%arg0: i32, %arg1: memref<128x256xf32, #tpu.memory_space<vmem>>, %arg2: memref<64x256xf32, #tpu.memory_space<vmem>>, %arg3: memref<152x64xf32, #tpu.memory_space<vmem>>, %arg4: memref<152x1xf32, #tpu.memory_space<vmem>>, %arg5: memref<3x256xf32, #tpu.memory_space<vmem>>, %arg6: memref<496x256xf32, #tpu.memory_space<vmem>>, %arg7: memref<31x256xf32, #tpu.memory_space<vmem>>, %arg8: memref<240x256xf32, #tpu.memory_space<vmem>>, %arg9: memref<15x256xf32, #tpu.memory_space<vmem>>, %arg10: memref<64x256xf32, #tpu.memory_space<vmem>>) attributes {dimension_semantics = [#tpu.dimension_semantics<parallel>], iteration_bounds = array<i64: 1>, scalar_prefetch = 0 : i64, scratch_operands = 5 : i64, tpu.core_type = #tpu.core_type<tc>, window_params = [{transform_indices = @transform_0, window_bounds = array<i64: 128, 256>}, {transform_indices = @transform_1, window_bounds = array<i64: 64, 256>}, {pipeline_mode = #tpu.pipeline_mode<synchronous>, transform_indices = @transform_2, window_bounds = array<i64: 152, 64>}, {pipeline_mode = #tpu.pipeline_mode<synchronous>, transform_indices = @transform_3, window_bounds = array<i64: 152, 1>}, {transform_indices = @transform_4, window_bounds = array<i64: 3, 256>}]} {
    %c0 = arith.constant 0 : index
    %c0_0 = arith.constant 0 : index
    %0 = vector.load %arg3[%c0, %c0_0] : memref<152x64xf32, #tpu.memory_space<vmem>>, vector<16x6xf32>
    %c0_1 = arith.constant 0 : index
    %c0_2 = arith.constant 0 : index
    %1 = vector.load %arg4[%c0_1, %c0_2] : memref<152x1xf32, #tpu.memory_space<vmem>>, vector<16x1xf32>
    %c0_3 = arith.constant 0 : index
    %c0_4 = arith.constant 0 : index
    %2 = vector.load %arg2[%c0_3, %c0_4] : memref<64x256xf32, #tpu.memory_space<vmem>>, vector<1x256xf32>
    %c1 = arith.constant 1 : index
    %c0_5 = arith.constant 0 : index
    %3 = vector.load %arg2[%c1, %c0_5] : memref<64x256xf32, #tpu.memory_space<vmem>>, vector<1x256xf32>
    %c2 = arith.constant 2 : index
    %c0_6 = arith.constant 0 : index
    %4 = vector.load %arg2[%c2, %c0_6] : memref<64x256xf32, #tpu.memory_space<vmem>>, vector<1x256xf32>
    %5 = arith.addf %2, %3 : vector<1x256xf32>
    %6 = arith.addf %5, %4 : vector<1x256xf32>
    %cst = arith.constant 1.000000e+00 : f32
    %7 = vector.broadcast %cst : f32 to vector<1x256xf32>
    %8 = arith.mulf %6, %7 : vector<1x256xf32>
    %cst_7 = arith.constant 0.000000e+00 : f32
    %9 = vector.broadcast %cst_7 : f32 to vector<1x256xf32>
    %10 = arith.cmpf oeq, %8, %9 : vector<1x256xf32>
    %cst_8 = arith.constant 0.000000e+00 : f32
    %cst_9 = arith.constant 1.000000e+00 : f32
    %11 = vector.broadcast %cst_8 : f32 to vector<1x256xf32>
    %12 = vector.broadcast %cst_9 : f32 to vector<1x256xf32>
    %13 = arith.select %10, %11, %12 : vector<1x256xi1>, vector<1x256xf32>
    %cst_10 = arith.constant 1.000000e+00 : f32
    %14 = vector.broadcast %cst_10 : f32 to vector<1x256xf32>
    %15 = arith.divf %14, %8 : vector<1x256xf32>
    %cst_11 = arith.constant 0.000000e+00 : f32
    %16 = vector.broadcast %cst_11 : f32 to vector<1x256xf32>
    %17 = arith.select %10, %16, %15 : vector<1x256xi1>, vector<1x256xf32>
    %c0_12 = arith.constant 0 : index
    %c0_13 = arith.constant 0 : index
    %18 = vector.load %arg1[%c0_12, %c0_13] : memref<128x256xf32, #tpu.memory_space<vmem>>, vector<6x256xf32>
    %cst_14 = arith.constant dense<0.000000e+00> : vector<16x256xf32>
    %19 = tpu.matmul %0, %18, %cst_14 {dimension_numbers = #tpu.dot_dimension_numbers<[1], [0], [0], [1], [0, 0, 1, 1], [], []>} : vector<16x6xf32>, vector<6x256xf32>, vector<16x256xf32> -> vector<16x256xf32>
    %20 = vector.broadcast %17 : vector<1x256xf32> to vector<16x256xf32>
    %21 = arith.mulf %19, %20 : vector<16x256xf32>
    %22 = vector.broadcast %1 : vector<16x1xf32> to vector<16x256xf32>
    %23 = vector.broadcast %13 : vector<1x256xf32> to vector<16x256xf32>
    %24 = arith.mulf %22, %23 : vector<16x256xf32>
    %25 = arith.addf %21, %24 : vector<16x256xf32>
    %cst_15 = arith.constant 0.000000e+00 : f32
    %26 = vector.broadcast %cst_15 : f32 to vector<16x256xf32>
    %27 = arith.maximumf %25, %26 : vector<16x256xf32>
    %c0_16 = arith.constant 0 : index
    %c0_17 = arith.constant 0 : index
    %28 = vector.load %arg6[%c0_16, %c0_17] : memref<496x256xf32, #tpu.memory_space<vmem>>, vector<16x256xf32>
    tpu.vector_store %arg6[%c0_16, %c0_17], %27 {strides = array<i32>} : memref<496x256xf32, #tpu.memory_space<vmem>>, vector<16x256xf32>,
    %c0_18 = arith.constant 0 : index
    %c0_19 = arith.constant 0 : index
    %29 = vector.load %arg7[%c0_18, %c0_19] : memref<31x256xf32, #tpu.memory_space<vmem>>, vector<1x256xf32>
    tpu.vector_store %arg7[%c0_18, %c0_19], %13 {strides = array<i32>} : memref<31x256xf32, #tpu.memory_space<vmem>>, vector<1x256xf32>,
    %c2_20 = arith.constant 2 : index
    %c0_21 = arith.constant 0 : index
    %30 = vector.load %arg2[%c2_20, %c0_21] : memref<64x256xf32, #tpu.memory_space<vmem>>, vector<1x256xf32>
    %c3 = arith.constant 3 : index
    %c0_22 = arith.constant 0 : index
    %31 = vector.load %arg2[%c3, %c0_22] : memref<64x256xf32, #tpu.memory_space<vmem>>, vector<1x256xf32>
    %c4 = arith.constant 4 : index
    %c0_23 = arith.constant 0 : index
    %32 = vector.load %arg2[%c4, %c0_23] : memref<64x256xf32, #tpu.memory_space<vmem>>, vector<1x256xf32>
    %33 = arith.addf %30, %31 : vector<1x256xf32>
    %34 = arith.addf %33, %32 : vector<1x256xf32>
    %cst_24 = arith.constant 1.000000e+00 : f32
    %35 = vector.broadcast %cst_24 : f32 to vector<1x256xf32>
    %36 = arith.mulf %34, %35 : vector<1x256xf32>
    %cst_25 = arith.constant 0.000000e+00 : f32
    %37 = vector.broadcast %cst_25 : f32 to vector<1x256xf32>
    %38 = arith.cmpf oeq, %36, %37 : vector<1x256xf32>
    %cst_26 = arith.constant 0.000000e+00 : f32
    %cst_27 = arith.constant 1.000000e+00 : f32
    %39 = vector.broadcast %cst_26 : f32 to vector<1x256xf32>
    %40 = vector.broadcast %cst_27 : f32 to vector<1x256xf32>
    %41 = arith.select %38, %39, %40 : vector<1x256xi1>, vector<1x256xf32>
    %cst_28 = arith.constant 1.000000e+00 : f32
    %42 = vector.broadcast %cst_28 : f32 to vector<1x256xf32>
    %43 = arith.divf %42, %36 : vector<1x256xf32>
    %cst_29 = arith.constant 0.000000e+00 : f32
    %44 = vector.broadcast %cst_29 : f32 to vector<1x256xf32>
    %45 = arith.select %38, %44, %43 : vector<1x256xi1>, vector<1x256xf32>
    %c4_30 = arith.constant 4 : index
    %c0_31 = arith.constant 0 : index
    %46 = vector.load %arg1[%c4_30, %c0_31] : memref<128x256xf32, #tpu.memory_space<vmem>>, vector<6x256xf32>
    %cst_32 = arith.constant dense<0.000000e+00> : vector<16x256xf32>
    %47 = tpu.matmul %0, %46, %cst_32 {dimension_numbers = #tpu.dot_dimension_numbers<[1], [0], [0], [1], [0, 0, 1, 1], [], []>} : vector<16x6xf32>, vector<6x256xf32>, vector<16x256xf32> -> vector<16x256xf32>
    %48 = vector.broadcast %45 : vector<1x256xf32> to vector<16x256xf32>
    %49 = arith.mulf %47, %48 : vector<16x256xf32>
    %50 = vector.broadcast %1 : vector<16x1xf32> to vector<16x256xf32>
    %51 = vector.broadcast %41 : vector<1x256xf32> to vector<16x256xf32>
    %52 = arith.mulf %50, %51 : vector<16x256xf32>
    %53 = arith.addf %49, %52 : vector<16x256xf32>
    %cst_33 = arith.constant 0.000000e+00 : f32
    %54 = vector.broadcast %cst_33 : f32 to vector<16x256xf32>
    %55 = arith.maximumf %53, %54 : vector<16x256xf32>
    %c16 = arith.constant 16 : index
    %c0_34 = arith.constant 0 : index
    %56 = vector.load %arg6[%c16, %c0_34] : memref<496x256xf32, #tpu.memory_space<vmem>>, vector<16x256xf32>
    tpu.vector_store %arg6[%c16, %c0_34], %55 {strides = array<i32>} : memref<496x256xf32, #tpu.memory_space<vmem>>, vector<16x256xf32>,
    %c1_35 = arith.constant 1 : index
    %c0_36 = arith.constant 0 : index
    %57 = vector.load %arg7[%c1_35, %c0_36] : memref<31x256xf32, #tpu.memory_space<vmem>>, vector<1x256xf32>
    tpu.vector_store %arg7[%c1_35, %c0_36], %41 {strides = array<i32>} : memref<31x256xf32, #tpu.memory_space<vmem>>, vector<1x256xf32>,
    %c4_37 = arith.constant 4 : index
    %c0_38 = arith.constant 0 : index
    %58 = vector.load %arg2[%c4_37, %c0_38] : memref<64x256xf32, #tpu.memory_space<vmem>>, vector<1x256xf32>
    %c5 = arith.constant 5 : index
    %c0_39 = arith.constant 0 : index
    %59 = vector.load %arg2[%c5, %c0_39] : memref<64x256xf32, #tpu.memory_space<vmem>>, vector<1x256xf32>
    %c6 = arith.constant 6 : index
    %c0_40 = arith.constant 0 : index
    %60 = vector.load %arg2[%c6, %c0_40] : memref<64x256xf32, #tpu.memory_space<vmem>>, vector<1x256xf32>
    %61 = arith.addf %58, %59 : vector<1x256xf32>
    %62 = arith.addf %61, %60 : vector<1x256xf32>
    %cst_41 = arith.constant 1.000000e+00 : f32
    %63 = vector.broadcast %cst_41 : f32 to vector<1x256xf32>
    %64 = arith.mulf %62, %63 : vector<1x256xf32>
    %cst_42 = arith.constant 0.000000e+00 : f32
    %65 = vector.broadcast %cst_42 : f32 to vector<1x256xf32>
    %66 = arith.cmpf oeq, %64, %65 : vector<1x256xf32>
    %cst_43 = arith.constant 0.000000e+00 : f32
    %cst_44 = arith.constant 1.000000e+00 : f32
    %67 = vector.broadcast %cst_43 : f32 to vector<1x256xf32>
    %68 = vector.broadcast %cst_44 : f32 to vector<1x256xf32>
    %69 = arith.select %66, %67, %68 : vector<1x256xi1>, vector<1x256xf32>
    %cst_45 = arith.constant 1.000000e+00 : f32
    %70 = vector.broadcast %cst_45 : f32 to vector<1x256xf32>
    %71 = arith.divf %70, %64 : vector<1x256xf32>
    %cst_46 = arith.constant 0.000000e+00 : f32
    %72 = vector.broadcast %cst_46 : f32 to vector<1x256xf32>
    %73 = arith.select %66, %72, %71 : vector<1x256xi1>, vector<1x256xf32>
    %c8 = arith.constant 8 : index
    %c0_47 = arith.constant 0 : index
    %74 = vector.load %arg1[%c8, %c0_47] : memref<128x256xf32, #tpu.memory_space<vmem>>, vector<6x256xf32>
    %cst_48 = arith.constant dense<0.000000e+00> : vector<16x256xf32>
    %75 = tpu.matmul %0, %74, %cst_48 {dimension_numbers = #tpu.dot_dimension_numbers<[1], [0], [0], [1], [0, 0, 1, 1], [], []>} : vector<16x6xf32>, vector<6x256xf32>, vector<16x256xf32> -> vector<16x256xf32>
    %76 = vector.broadcast %73 : vector<1x256xf32> to vector<16x256xf32>
    %77 = arith.mulf %75, %76 : vector<16x256xf32>
    %78 = vector.broadcast %1 : vector<16x1xf32> to vector<16x256xf32>
    %79 = vector.broadcast %69 : vector<1x256xf32> to vector<16x256xf32>
    %80 = arith.mulf %78, %79 : vector<16x256xf32>
    %81 = arith.addf %77, %80 : vector<16x256xf32>
    %cst_49 = arith.constant 0.000000e+00 : f32
    %82 = vector.broadcast %cst_49 : f32 to vector<16x256xf32>
    %83 = arith.maximumf %81, %82 : vector<16x256xf32>
    %c32 = arith.constant 32 : index
    %c0_50 = arith.constant 0 : index
    %84 = vector.load %arg6[%c32, %c0_50] : memref<496x256xf32, #tpu.memory_space<vmem>>, vector<16x256xf32>
    tpu.vector_store %arg6[%c32, %c0_50], %83 {strides = array<i32>} : memref<496x256xf32, #tpu.memory_space<vmem>>, vector<16x256xf32>,
    %c2_51 = arith.constant 2 : index
    %c0_52 = arith.constant 0 : index
    %85 = vector.load %arg7[%c2_51, %c0_52] : memref<31x256xf32, #tpu.memory_space<vmem>>, vector<1x256xf32>
    tpu.vector_store %arg7[%c2_51, %c0_52], %69 {strides = array<i32>} : memref<31x256xf32, #tpu.memory_space<vmem>>, vector<1x256xf32>,
    %c6_53 = arith.constant 6 : index
    %c0_54 = arith.constant 0 : index
    %86 = vector.load %arg2[%c6_53, %c0_54] : memref<64x256xf32, #tpu.memory_space<vmem>>, vector<1x256xf32>
    %c7 = arith.constant 7 : index
    %c0_55 = arith.constant 0 : index
    %87 = vector.load %arg2[%c7, %c0_55] : memref<64x256xf32, #tpu.memory_space<vmem>>, vector<1x256xf32>
    %c8_56 = arith.constant 8 : index
    %c0_57 = arith.constant 0 : index
    %88 = vector.load %arg2[%c8_56, %c0_57] : memref<64x256xf32, #tpu.memory_space<vmem>>, vector<1x256xf32>
    %89 = arith.addf %86, %87 : vector<1x256xf32>
    %90 = arith.addf %89, %88 : vector<1x256xf32>
    %cst_58 = arith.constant 1.000000e+00 : f32
    %91 = vector.broadcast %cst_58 : f32 to vector<1x256xf32>
    %92 = arith.mulf %90, %91 : vector<1x256xf32>
    %cst_59 = arith.constant 0.000000e+00 : f32
    %93 = vector.broadcast %cst_59 : f32 to vector<1x256xf32>
    %94 = arith.cmpf oeq, %92, %93 : vector<1x256xf32>
    %cst_60 = arith.constant 0.000000e+00 : f32
    %cst_61 = arith.constant 1.000000e+00 : f32
    %95 = vector.broadcast %cst_60 : f32 to vector<1x256xf32>
    %96 = vector.broadcast %cst_61 : f32 to vector<1x256xf32>
    %97 = arith.select %94, %95, %96 : vector<1x256xi1>, vector<1x256xf32>
    %cst_62 = arith.constant 1.000000e+00 : f32
    %98 = vector.broadcast %cst_62 : f32 to vector<1x256xf32>
    %99 = arith.divf %98, %92 : vector<1x256xf32>
    %cst_63 = arith.constant 0.000000e+00 : f32
    %100 = vector.broadcast %cst_63 : f32 to vector<1x256xf32>
    %101 = arith.select %94, %100, %99 : vector<1x256xi1>, vector<1x256xf32>
    %c12 = arith.constant 12 : index
    %c0_64 = arith.constant 0 : index
    %102 = vector.load %arg1[%c12, %c0_64] : memref<128x256xf32, #tpu.memory_space<vmem>>, vector<6x256xf32>
    %cst_65 = arith.constant dense<0.000000e+00> : vector<16x256xf32>
    %103 = tpu.matmul %0, %102, %cst_65 {dimension_numbers = #tpu.dot_dimension_numbers<[1], [0], [0], [1], [0, 0, 1, 1], [], []>} : vector<16x6xf32>, vector<6x256xf32>, vector<16x256xf32> -> vector<16x256xf32>
    %104 = vector.broadcast %101 : vector<1x256xf32> to vector<16x256xf32>
    %105 = arith.mulf %103, %104 : vector<16x256xf32>
    %106 = vector.broadcast %1 : vector<16x1xf32> to vector<16x256xf32>
    %107 = vector.broadcast %97 : vector<1x256xf32> to vector<16x256xf32>
    %108 = arith.mulf %106, %107 : vector<16x256xf32>
    %109 = arith.addf %105, %108 : vector<16x256xf32>
    %cst_66 = arith.constant 0.000000e+00 : f32
    %110 = vector.broadcast %cst_66 : f32 to vector<16x256xf32>
    %111 = arith.maximumf %109, %110 : vector<16x256xf32>
    %c48 = arith.constant 48 : index
    %c0_67 = arith.constant 0 : index
    %112 = vector.load %arg6[%c48, %c0_67] : memref<496x256xf32, #tpu.memory_space<vmem>>, vector<16x256xf32>
    tpu.vector_store %arg6[%c48, %c0_67], %111 {strides = array<i32>} : memref<496x256xf32, #tpu.memory_space<vmem>>, vector<16x256xf32>,
    %c3_68 = arith.constant 3 : index
    %c0_69 = arith.constant 0 : index
    %113 = vector.load %arg7[%c3_68, %c0_69] : memref<31x256xf32, #tpu.memory_space<vmem>>, vector<1x256xf32>
    tpu.vector_store %arg7[%c3_68, %c0_69], %97 {strides = array<i32>} : memref<31x256xf32, #tpu.memory_space<vmem>>, vector<1x256xf32>,
    %c8_70 = arith.constant 8 : index
    %c0_71 = arith.constant 0 : index
    %114 = vector.load %arg2[%c8_70, %c0_71] : memref<64x256xf32, #tpu.memory_space<vmem>>, vector<1x256xf32>
    %c9 = arith.constant 9 : index
    %c0_72 = arith.constant 0 : index
    %115 = vector.load %arg2[%c9, %c0_72] : memref<64x256xf32, #tpu.memory_space<vmem>>, vector<1x256xf32>
    %c10 = arith.constant 10 : index
    %c0_73 = arith.constant 0 : index
    %116 = vector.load %arg2[%c10, %c0_73] : memref<64x256xf32, #tpu.memory_space<vmem>>, vector<1x256xf32>
    %117 = arith.addf %114, %115 : vector<1x256xf32>
    %118 = arith.addf %117, %116 : vector<1x256xf32>
    %cst_74 = arith.constant 1.000000e+00 : f32
    %119 = vector.broadcast %cst_74 : f32 to vector<1x256xf32>
    %120 = arith.mulf %118, %119 : vector<1x256xf32>
    %cst_75 = arith.constant 0.000000e+00 : f32
    %121 = vector.broadcast %cst_75 : f32 to vector<1x256xf32>
    %122 = arith.cmpf oeq, %120, %121 : vector<1x256xf32>
    %cst_76 = arith.constant 0.000000e+00 : f32
    %cst_77 = arith.constant 1.000000e+00 : f32
    %123 = vector.broadcast %cst_76 : f32 to vector<1x256xf32>
    %124 = vector.broadcast %cst_77 : f32 to vector<1x256xf32>
    %125 = arith.select %122, %123, %124 : vector<1x256xi1>, vector<1x256xf32>
    %cst_78 = arith.constant 1.000000e+00 : f32
    %126 = vector.broadcast %cst_78 : f32 to vector<1x256xf32>
    %127 = arith.divf %126, %120 : vector<1x256xf32>
    %cst_79 = arith.constant 0.000000e+00 : f32
    %128 = vector.broadcast %cst_79 : f32 to vector<1x256xf32>
    %129 = arith.select %122, %128, %127 : vector<1x256xi1>, vector<1x256xf32>
    %c16_80 = arith.constant 16 : index
    %c0_81 = arith.constant 0 : index
    %130 = vector.load %arg1[%c16_80, %c0_81] : memref<128x256xf32, #tpu.memory_space<vmem>>, vector<6x256xf32>
    %cst_82 = arith.constant dense<0.000000e+00> : vector<16x256xf32>
    %131 = tpu.matmul %0, %130, %cst_82 {dimension_numbers = #tpu.dot_dimension_numbers<[1], [0], [0], [1], [0, 0, 1, 1], [], []>} : vector<16x6xf32>, vector<6x256xf32>, vector<16x256xf32> -> vector<16x256xf32>
    %132 = vector.broadcast %129 : vector<1x256xf32> to vector<16x256xf32>
    %133 = arith.mulf %131, %132 : vector<16x256xf32>
    %134 = vector.broadcast %1 : vector<16x1xf32> to vector<16x256xf32>
    %135 = vector.broadcast %125 : vector<1x256xf32> to vector<16x256xf32>
    %136 = arith.mulf %134, %135 : vector<16x256xf32>
    %137 = arith.addf %133, %136 : vector<16x256xf32>
    %cst_83 = arith.constant 0.000000e+00 : f32
    %138 = vector.broadcast %cst_83 : f32 to vector<16x256xf32>
    %139 = arith.maximumf %137, %138 : vector<16x256xf32>
    %c64 = arith.constant 64 : index
    %c0_84 = arith.constant 0 : index
    %140 = vector.load %arg6[%c64, %c0_84] : memref<496x256xf32, #tpu.memory_space<vmem>>, vector<16x256xf32>
    tpu.vector_store %arg6[%c64, %c0_84], %139 {strides = array<i32>} : memref<496x256xf32, #tpu.memory_space<vmem>>, vector<16x256xf32>,
    %c4_85 = arith.constant 4 : index
    %c0_86 = arith.constant 0 : index
    %141 = vector.load %arg7[%c4_85, %c0_86] : memref<31x256xf32, #tpu.memory_space<vmem>>, vector<1x256xf32>
    tpu.vector_store %arg7[%c4_85, %c0_86], %125 {strides = array<i32>} : memref<31x256xf32, #tpu.memory_space<vmem>>, vector<1x256xf32>,
    %c10_87 = arith.constant 10 : index
    %c0_88 = arith.constant 0 : index
    %142 = vector.load %arg2[%c10_87, %c0_88] : memref<64x256xf32, #tpu.memory_space<vmem>>, vector<1x256xf32>
    %c11 = arith.constant 11 : index
    %c0_89 = arith.constant 0 : index
    %143 = vector.load %arg2[%c11, %c0_89] : memref<64x256xf32, #tpu.memory_space<vmem>>, vector<1x256xf32>
    %c12_90 = arith.constant 12 : index
    %c0_91 = arith.constant 0 : index
    %144 = vector.load %arg2[%c12_90, %c0_91] : memref<64x256xf32, #tpu.memory_space<vmem>>, vector<1x256xf32>
    %145 = arith.addf %142, %143 : vector<1x256xf32>
    %146 = arith.addf %145, %144 : vector<1x256xf32>
    %cst_92 = arith.constant 1.000000e+00 : f32
    %147 = vector.broadcast %cst_92 : f32 to vector<1x256xf32>
    %148 = arith.mulf %146, %147 : vector<1x256xf32>
    %cst_93 = arith.constant 0.000000e+00 : f32
    %149 = vector.broadcast %cst_93 : f32 to vector<1x256xf32>
    %150 = arith.cmpf oeq, %148, %149 : vector<1x256xf32>
    %cst_94 = arith.constant 0.000000e+00 : f32
    %cst_95 = arith.constant 1.000000e+00 : f32
    %151 = vector.broadcast %cst_94 : f32 to vector<1x256xf32>
    %152 = vector.broadcast %cst_95 : f32 to vector<1x256xf32>
    %153 = arith.select %150, %151, %152 : vector<1x256xi1>, vector<1x256xf32>
    %cst_96 = arith.constant 1.000000e+00 : f32
    %154 = vector.broadcast %cst_96 : f32 to vector<1x256xf32>
    %155 = arith.divf %154, %148 : vector<1x256xf32>
    %cst_97 = arith.constant 0.000000e+00 : f32
    %156 = vector.broadcast %cst_97 : f32 to vector<1x256xf32>
    %157 = arith.select %150, %156, %155 : vector<1x256xi1>, vector<1x256xf32>
    %c20 = arith.constant 20 : index
    %c0_98 = arith.constant 0 : index
    %158 = vector.load %arg1[%c20, %c0_98] : memref<128x256xf32, #tpu.memory_space<vmem>>, vector<6x256xf32>
    %cst_99 = arith.constant dense<0.000000e+00> : vector<16x256xf32>
    %159 = tpu.matmul %0, %158, %cst_99 {dimension_numbers = #tpu.dot_dimension_numbers<[1], [0], [0], [1], [0, 0, 1, 1], [], []>} : vector<16x6xf32>, vector<6x256xf32>, vector<16x256xf32> -> vector<16x256xf32>
    %160 = vector.broadcast %157 : vector<1x256xf32> to vector<16x256xf32>
    %161 = arith.mulf %159, %160 : vector<16x256xf32>
    %162 = vector.broadcast %1 : vector<16x1xf32> to vector<16x256xf32>
    %163 = vector.broadcast %153 : vector<1x256xf32> to vector<16x256xf32>
    %164 = arith.mulf %162, %163 : vector<16x256xf32>
    %165 = arith.addf %161, %164 : vector<16x256xf32>
    %cst_100 = arith.constant 0.000000e+00 : f32
    %166 = vector.broadcast %cst_100 : f32 to vector<16x256xf32>
    %167 = arith.maximumf %165, %166 : vector<16x256xf32>
    %c80 = arith.constant 80 : index
    %c0_101 = arith.constant 0 : index
    %168 = vector.load %arg6[%c80, %c0_101] : memref<496x256xf32, #tpu.memory_space<vmem>>, vector<16x256xf32>
    tpu.vector_store %arg6[%c80, %c0_101], %167 {strides = array<i32>} : memref<496x256xf32, #tpu.memory_space<vmem>>, vector<16x256xf32>,
    %c5_102 = arith.constant 5 : index
    %c0_103 = arith.constant 0 : index
    %169 = vector.load %arg7[%c5_102, %c0_103] : memref<31x256xf32, #tpu.memory_space<vmem>>, vector<1x256xf32>
    tpu.vector_store %arg7[%c5_102, %c0_103], %153 {strides = array<i32>} : memref<31x256xf32, #tpu.memory_space<vmem>>, vector<1x256xf32>,
    %c12_104 = arith.constant 12 : index
    %c0_105 = arith.constant 0 : index
    %170 = vector.load %arg2[%c12_104, %c0_105] : memref<64x256xf32, #tpu.memory_space<vmem>>, vector<1x256xf32>
    %c13 = arith.constant 13 : index
    %c0_106 = arith.constant 0 : index
    %171 = vector.load %arg2[%c13, %c0_106] : memref<64x256xf32, #tpu.memory_space<vmem>>, vector<1x256xf32>
    %c14 = arith.constant 14 : index
    %c0_107 = arith.constant 0 : index
    %172 = vector.load %arg2[%c14, %c0_107] : memref<64x256xf32, #tpu.memory_space<vmem>>, vector<1x256xf32>
    %173 = arith.addf %170, %171 : vector<1x256xf32>
    %174 = arith.addf %173, %172 : vector<1x256xf32>
    %cst_108 = arith.constant 1.000000e+00 : f32
    %175 = vector.broadcast %cst_108 : f32 to vector<1x256xf32>
    %176 = arith.mulf %174, %175 : vector<1x256xf32>
    %cst_109 = arith.constant 0.000000e+00 : f32
    %177 = vector.broadcast %cst_109 : f32 to vector<1x256xf32>
    %178 = arith.cmpf oeq, %176, %177 : vector<1x256xf32>
    %cst_110 = arith.constant 0.000000e+00 : f32
    %cst_111 = arith.constant 1.000000e+00 : f32
    %179 = vector.broadcast %cst_110 : f32 to vector<1x256xf32>
    %180 = vector.broadcast %cst_111 : f32 to vector<1x256xf32>
    %181 = arith.select %178, %179, %180 : vector<1x256xi1>, vector<1x256xf32>
    %cst_112 = arith.constant 1.000000e+00 : f32
    %182 = vector.broadcast %cst_112 : f32 to vector<1x256xf32>
    %183 = arith.divf %182, %176 : vector<1x256xf32>
    %cst_113 = arith.constant 0.000000e+00 : f32
    %184 = vector.broadcast %cst_113 : f32 to vector<1x256xf32>
    %185 = arith.select %178, %184, %183 : vector<1x256xi1>, vector<1x256xf32>
    %c24 = arith.constant 24 : index
    %c0_114 = arith.constant 0 : index
    %186 = vector.load %arg1[%c24, %c0_114] : memref<128x256xf32, #tpu.memory_space<vmem>>, vector<6x256xf32>
    %cst_115 = arith.constant dense<0.000000e+00> : vector<16x256xf32>
    %187 = tpu.matmul %0, %186, %cst_115 {dimension_numbers = #tpu.dot_dimension_numbers<[1], [0], [0], [1], [0, 0, 1, 1], [], []>} : vector<16x6xf32>, vector<6x256xf32>, vector<16x256xf32> -> vector<16x256xf32>
    %188 = vector.broadcast %185 : vector<1x256xf32> to vector<16x256xf32>
    %189 = arith.mulf %187, %188 : vector<16x256xf32>
    %190 = vector.broadcast %1 : vector<16x1xf32> to vector<16x256xf32>
    %191 = vector.broadcast %181 : vector<1x256xf32> to vector<16x256xf32>
    %192 = arith.mulf %190, %191 : vector<16x256xf32>
    %193 = arith.addf %189, %192 : vector<16x256xf32>
    %cst_116 = arith.constant 0.000000e+00 : f32
    %194 = vector.broadcast %cst_116 : f32 to vector<16x256xf32>
    %195 = arith.maximumf %193, %194 : vector<16x256xf32>
    %c96 = arith.constant 96 : index
    %c0_117 = arith.constant 0 : index
    %196 = vector.load %arg6[%c96, %c0_117] : memref<496x256xf32, #tpu.memory_space<vmem>>, vector<16x256xf32>
    tpu.vector_store %arg6[%c96, %c0_117], %195 {strides = array<i32>} : memref<496x256xf32, #tpu.memory_space<vmem>>, vector<16x256xf32>,
    %c6_118 = arith.constant 6 : index
    %c0_119 = arith.constant 0 : index
    %197 = vector.load %arg7[%c6_118, %c0_119] : memref<31x256xf32, #tpu.memory_space<vmem>>, vector<1x256xf32>
    tpu.vector_store %arg7[%c6_118, %c0_119], %181 {strides = array<i32>} : memref<31x256xf32, #tpu.memory_space<vmem>>, vector<1x256xf32>,
    %c14_120 = arith.constant 14 : index
    %c0_121 = arith.constant 0 : index
    %198 = vector.load %arg2[%c14_120, %c0_121] : memref<64x256xf32, #tpu.memory_space<vmem>>, vector<1x256xf32>
    %c15 = arith.constant 15 : index
    %c0_122 = arith.constant 0 : index
    %199 = vector.load %arg2[%c15, %c0_122] : memref<64x256xf32, #tpu.memory_space<vmem>>, vector<1x256xf32>
    %c16_123 = arith.constant 16 : index
    %c0_124 = arith.constant 0 : index
    %200 = vector.load %arg2[%c16_123, %c0_124] : memref<64x256xf32, #tpu.memory_space<vmem>>, vector<1x256xf32>
    %201 = arith.addf %198, %199 : vector<1x256xf32>
    %202 = arith.addf %201, %200 : vector<1x256xf32>
    %cst_125 = arith.constant 1.000000e+00 : f32
    %203 = vector.broadcast %cst_125 : f32 to vector<1x256xf32>
    %204 = arith.mulf %202, %203 : vector<1x256xf32>
    %cst_126 = arith.constant 0.000000e+00 : f32
    %205 = vector.broadcast %cst_126 : f32 to vector<1x256xf32>
    %206 = arith.cmpf oeq, %204, %205 : vector<1x256xf32>
    %cst_127 = arith.constant 0.000000e+00 : f32
    %cst_128 = arith.constant 1.000000e+00 : f32
    %207 = vector.broadcast %cst_127 : f32 to vector<1x256xf32>
    %208 = vector.broadcast %cst_128 : f32 to vector<1x256xf32>
    %209 = arith.select %206, %207, %208 : vector<1x256xi1>, vector<1x256xf32>
    %cst_129 = arith.constant 1.000000e+00 : f32
    %210 = vector.broadcast %cst_129 : f32 to vector<1x256xf32>
    %211 = arith.divf %210, %204 : vector<1x256xf32>
    %cst_130 = arith.constant 0.000000e+00 : f32
    %212 = vector.broadcast %cst_130 : f32 to vector<1x256xf32>
    %213 = arith.select %206, %212, %211 : vector<1x256xi1>, vector<1x256xf32>
    %c28 = arith.constant 28 : index
    %c0_131 = arith.constant 0 : index
    %214 = vector.load %arg1[%c28, %c0_131] : memref<128x256xf32, #tpu.memory_space<vmem>>, vector<6x256xf32>
    %cst_132 = arith.constant dense<0.000000e+00> : vector<16x256xf32>
    %215 = tpu.matmul %0, %214, %cst_132 {dimension_numbers = #tpu.dot_dimension_numbers<[1], [0], [0], [1], [0, 0, 1, 1], [], []>} : vector<16x6xf32>, vector<6x256xf32>, vector<16x256xf32> -> vector<16x256xf32>
    %216 = vector.broadcast %213 : vector<1x256xf32> to vector<16x256xf32>
    %217 = arith.mulf %215, %216 : vector<16x256xf32>
    %218 = vector.broadcast %1 : vector<16x1xf32> to vector<16x256xf32>
    %219 = vector.broadcast %209 : vector<1x256xf32> to vector<16x256xf32>
    %220 = arith.mulf %218, %219 : vector<16x256xf32>
    %221 = arith.addf %217, %220 : vector<16x256xf32>
    %cst_133 = arith.constant 0.000000e+00 : f32
    %222 = vector.broadcast %cst_133 : f32 to vector<16x256xf32>
    %223 = arith.maximumf %221, %222 : vector<16x256xf32>
    %c112 = arith.constant 112 : index
    %c0_134 = arith.constant 0 : index
    %224 = vector.load %arg6[%c112, %c0_134] : memref<496x256xf32, #tpu.memory_space<vmem>>, vector<16x256xf32>
    tpu.vector_store %arg6[%c112, %c0_134], %223 {strides = array<i32>} : memref<496x256xf32, #tpu.memory_space<vmem>>, vector<16x256xf32>,
    %c7_135 = arith.constant 7 : index
    %c0_136 = arith.constant 0 : index
    %225 = vector.load %arg7[%c7_135, %c0_136] : memref<31x256xf32, #tpu.memory_space<vmem>>, vector<1x256xf32>
    tpu.vector_store %arg7[%c7_135, %c0_136], %209 {strides = array<i32>} : memref<31x256xf32, #tpu.memory_space<vmem>>, vector<1x256xf32>,
    %c16_137 = arith.constant 16 : index
    %c0_138 = arith.constant 0 : index
    %226 = vector.load %arg2[%c16_137, %c0_138] : memref<64x256xf32, #tpu.memory_space<vmem>>, vector<1x256xf32>
    %c17 = arith.constant 17 : index
    %c0_139 = arith.constant 0 : index
    %227 = vector.load %arg2[%c17, %c0_139] : memref<64x256xf32, #tpu.memory_space<vmem>>, vector<1x256xf32>
    %c18 = arith.constant 18 : index
    %c0_140 = arith.constant 0 : index
    %228 = vector.load %arg2[%c18, %c0_140] : memref<64x256xf32, #tpu.memory_space<vmem>>, vector<1x256xf32>
    %229 = arith.addf %226, %227 : vector<1x256xf32>
    %230 = arith.addf %229, %228 : vector<1x256xf32>
    %cst_141 = arith.constant 1.000000e+00 : f32
    %231 = vector.broadcast %cst_141 : f32 to vector<1x256xf32>
    %232 = arith.mulf %230, %231 : vector<1x256xf32>
    %cst_142 = arith.constant 0.000000e+00 : f32
    %233 = vector.broadcast %cst_142 : f32 to vector<1x256xf32>
    %234 = arith.cmpf oeq, %232, %233 : vector<1x256xf32>
    %cst_143 = arith.constant 0.000000e+00 : f32
    %cst_144 = arith.constant 1.000000e+00 : f32
    %235 = vector.broadcast %cst_143 : f32 to vector<1x256xf32>
    %236 = vector.broadcast %cst_144 : f32 to vector<1x256xf32>
    %237 = arith.select %234, %235, %236 : vector<1x256xi1>, vector<1x256xf32>
    %cst_145 = arith.constant 1.000000e+00 : f32
    %238 = vector.broadcast %cst_145 : f32 to vector<1x256xf32>
    %239 = arith.divf %238, %232 : vector<1x256xf32>
    %cst_146 = arith.constant 0.000000e+00 : f32
    %240 = vector.broadcast %cst_146 : f32 to vector<1x256xf32>
    %241 = arith.select %234, %240, %239 : vector<1x256xi1>, vector<1x256xf32>
    %c32_147 = arith.constant 32 : index
    %c0_148 = arith.constant 0 : index
    %242 = vector.load %arg1[%c32_147, %c0_148] : memref<128x256xf32, #tpu.memory_space<vmem>>, vector<6x256xf32>
    %cst_149 = arith.constant dense<0.000000e+00> : vector<16x256xf32>
    %243 = tpu.matmul %0, %242, %cst_149 {dimension_numbers = #tpu.dot_dimension_numbers<[1], [0], [0], [1], [0, 0, 1, 1], [], []>} : vector<16x6xf32>, vector<6x256xf32>, vector<16x256xf32> -> vector<16x256xf32>
    %244 = vector.broadcast %241 : vector<1x256xf32> to vector<16x256xf32>
    %245 = arith.mulf %243, %244 : vector<16x256xf32>
    %246 = vector.broadcast %1 : vector<16x1xf32> to vector<16x256xf32>
    %247 = vector.broadcast %237 : vector<1x256xf32> to vector<16x256xf32>
    %248 = arith.mulf %246, %247 : vector<16x256xf32>
    %249 = arith.addf %245, %248 : vector<16x256xf32>
    %cst_150 = arith.constant 0.000000e+00 : f32
    %250 = vector.broadcast %cst_150 : f32 to vector<16x256xf32>
    %251 = arith.maximumf %249, %250 : vector<16x256xf32>
    %c128 = arith.constant 128 : index
    %c0_151 = arith.constant 0 : index
    %252 = vector.load %arg6[%c128, %c0_151] : memref<496x256xf32, #tpu.memory_space<vmem>>, vector<16x256xf32>
    tpu.vector_store %arg6[%c128, %c0_151], %251 {strides = array<i32>} : memref<496x256xf32, #tpu.memory_space<vmem>>, vector<16x256xf32>,
    %c8_152 = arith.constant 8 : index
    %c0_153 = arith.constant 0 : index
    %253 = vector.load %arg7[%c8_152, %c0_153] : memref<31x256xf32, #tpu.memory_space<vmem>>, vector<1x256xf32>
    tpu.vector_store %arg7[%c8_152, %c0_153], %237 {strides = array<i32>} : memref<31x256xf32, #tpu.memory_space<vmem>>, vector<1x256xf32>,
    %c18_154 = arith.constant 18 : index
    %c0_155 = arith.constant 0 : index
    %254 = vector.load %arg2[%c18_154, %c0_155] : memref<64x256xf32, #tpu.memory_space<vmem>>, vector<1x256xf32>
    %c19 = arith.constant 19 : index
    %c0_156 = arith.constant 0 : index
    %255 = vector.load %arg2[%c19, %c0_156] : memref<64x256xf32, #tpu.memory_space<vmem>>, vector<1x256xf32>
    %c20_157 = arith.constant 20 : index
    %c0_158 = arith.constant 0 : index
    %256 = vector.load %arg2[%c20_157, %c0_158] : memref<64x256xf32, #tpu.memory_space<vmem>>, vector<1x256xf32>
    %257 = arith.addf %254, %255 : vector<1x256xf32>
    %258 = arith.addf %257, %256 : vector<1x256xf32>
    %cst_159 = arith.constant 1.000000e+00 : f32
    %259 = vector.broadcast %cst_159 : f32 to vector<1x256xf32>
    %260 = arith.mulf %258, %259 : vector<1x256xf32>
    %cst_160 = arith.constant 0.000000e+00 : f32
    %261 = vector.broadcast %cst_160 : f32 to vector<1x256xf32>
    %262 = arith.cmpf oeq, %260, %261 : vector<1x256xf32>
    %cst_161 = arith.constant 0.000000e+00 : f32
    %cst_162 = arith.constant 1.000000e+00 : f32
    %263 = vector.broadcast %cst_161 : f32 to vector<1x256xf32>
    %264 = vector.broadcast %cst_162 : f32 to vector<1x256xf32>
    %265 = arith.select %262, %263, %264 : vector<1x256xi1>, vector<1x256xf32>
    %cst_163 = arith.constant 1.000000e+00 : f32
    %266 = vector.broadcast %cst_163 : f32 to vector<1x256xf32>
    %267 = arith.divf %266, %260 : vector<1x256xf32>
    %cst_164 = arith.constant 0.000000e+00 : f32
    %268 = vector.broadcast %cst_164 : f32 to vector<1x256xf32>
    %269 = arith.select %262, %268, %267 : vector<1x256xi1>, vector<1x256xf32>
    %c36 = arith.constant 36 : index
    %c0_165 = arith.constant 0 : index
    %270 = vector.load %arg1[%c36, %c0_165] : memref<128x256xf32, #tpu.memory_space<vmem>>, vector<6x256xf32>
    %cst_166 = arith.constant dense<0.000000e+00> : vector<16x256xf32>
    %271 = tpu.matmul %0, %270, %cst_166 {dimension_numbers = #tpu.dot_dimension_numbers<[1], [0], [0], [1], [0, 0, 1, 1], [], []>} : vector<16x6xf32>, vector<6x256xf32>, vector<16x256xf32> -> vector<16x256xf32>
    %272 = vector.broadcast %269 : vector<1x256xf32> to vector<16x256xf32>
    %273 = arith.mulf %271, %272 : vector<16x256xf32>
    %274 = vector.broadcast %1 : vector<16x1xf32> to vector<16x256xf32>
    %275 = vector.broadcast %265 : vector<1x256xf32> to vector<16x256xf32>
    %276 = arith.mulf %274, %275 : vector<16x256xf32>
    %277 = arith.addf %273, %276 : vector<16x256xf32>
    %cst_167 = arith.constant 0.000000e+00 : f32
    %278 = vector.broadcast %cst_167 : f32 to vector<16x256xf32>
    %279 = arith.maximumf %277, %278 : vector<16x256xf32>
    %c144 = arith.constant 144 : index
    %c0_168 = arith.constant 0 : index
    %280 = vector.load %arg6[%c144, %c0_168] : memref<496x256xf32, #tpu.memory_space<vmem>>, vector<16x256xf32>
    tpu.vector_store %arg6[%c144, %c0_168], %279 {strides = array<i32>} : memref<496x256xf32, #tpu.memory_space<vmem>>, vector<16x256xf32>,
    %c9_169 = arith.constant 9 : index
    %c0_170 = arith.constant 0 : index
    %281 = vector.load %arg7[%c9_169, %c0_170] : memref<31x256xf32, #tpu.memory_space<vmem>>, vector<1x256xf32>
    tpu.vector_store %arg7[%c9_169, %c0_170], %265 {strides = array<i32>} : memref<31x256xf32, #tpu.memory_space<vmem>>, vector<1x256xf32>,
    %c20_171 = arith.constant 20 : index
    %c0_172 = arith.constant 0 : index
    %282 = vector.load %arg2[%c20_171, %c0_172] : memref<64x256xf32, #tpu.memory_space<vmem>>, vector<1x256xf32>
    %c21 = arith.constant 21 : index
    %c0_173 = arith.constant 0 : index
    %283 = vector.load %arg2[%c21, %c0_173] : memref<64x256xf32, #tpu.memory_space<vmem>>, vector<1x256xf32>
    %c22 = arith.constant 22 : index
    %c0_174 = arith.constant 0 : index
    %284 = vector.load %arg2[%c22, %c0_174] : memref<64x256xf32, #tpu.memory_space<vmem>>, vector<1x256xf32>
    %285 = arith.addf %282, %283 : vector<1x256xf32>
    %286 = arith.addf %285, %284 : vector<1x256xf32>
    %cst_175 = arith.constant 1.000000e+00 : f32
    %287 = vector.broadcast %cst_175 : f32 to vector<1x256xf32>
    %288 = arith.mulf %286, %287 : vector<1x256xf32>
    %cst_176 = arith.constant 0.000000e+00 : f32
    %289 = vector.broadcast %cst_176 : f32 to vector<1x256xf32>
    %290 = arith.cmpf oeq, %288, %289 : vector<1x256xf32>
    %cst_177 = arith.constant 0.000000e+00 : f32
    %cst_178 = arith.constant 1.000000e+00 : f32
    %291 = vector.broadcast %cst_177 : f32 to vector<1x256xf32>
    %292 = vector.broadcast %cst_178 : f32 to vector<1x256xf32>
    %293 = arith.select %290, %291, %292 : vector<1x256xi1>, vector<1x256xf32>
    %cst_179 = arith.constant 1.000000e+00 : f32
    %294 = vector.broadcast %cst_179 : f32 to vector<1x256xf32>
    %295 = arith.divf %294, %288 : vector<1x256xf32>
    %cst_180 = arith.constant 0.000000e+00 : f32
    %296 = vector.broadcast %cst_180 : f32 to vector<1x256xf32>
    %297 = arith.select %290, %296, %295 : vector<1x256xi1>, vector<1x256xf32>
    %c40 = arith.constant 40 : index
    %c0_181 = arith.constant 0 : index
    %298 = vector.load %arg1[%c40, %c0_181] : memref<128x256xf32, #tpu.memory_space<vmem>>, vector<6x256xf32>
    %cst_182 = arith.constant dense<0.000000e+00> : vector<16x256xf32>
    %299 = tpu.matmul %0, %298, %cst_182 {dimension_numbers = #tpu.dot_dimension_numbers<[1], [0], [0], [1], [0, 0, 1, 1], [], []>} : vector<16x6xf32>, vector<6x256xf32>, vector<16x256xf32> -> vector<16x256xf32>
    %300 = vector.broadcast %297 : vector<1x256xf32> to vector<16x256xf32>
    %301 = arith.mulf %299, %300 : vector<16x256xf32>
    %302 = vector.broadcast %1 : vector<16x1xf32> to vector<16x256xf32>
    %303 = vector.broadcast %293 : vector<1x256xf32> to vector<16x256xf32>
    %304 = arith.mulf %302, %303 : vector<16x256xf32>
    %305 = arith.addf %301, %304 : vector<16x256xf32>
    %cst_183 = arith.constant 0.000000e+00 : f32
    %306 = vector.broadcast %cst_183 : f32 to vector<16x256xf32>
    %307 = arith.maximumf %305, %306 : vector<16x256xf32>
    %c160 = arith.constant 160 : index
    %c0_184 = arith.constant 0 : index
    %308 = vector.load %arg6[%c160, %c0_184] : memref<496x256xf32, #tpu.memory_space<vmem>>, vector<16x256xf32>
    tpu.vector_store %arg6[%c160, %c0_184], %307 {strides = array<i32>} : memref<496x256xf32, #tpu.memory_space<vmem>>, vector<16x256xf32>,
    %c10_185 = arith.constant 10 : index
    %c0_186 = arith.constant 0 : index
    %309 = vector.load %arg7[%c10_185, %c0_186] : memref<31x256xf32, #tpu.memory_space<vmem>>, vector<1x256xf32>
    tpu.vector_store %arg7[%c10_185, %c0_186], %293 {strides = array<i32>} : memref<31x256xf32, #tpu.memory_space<vmem>>, vector<1x256xf32>,
    %c22_187 = arith.constant 22 : index
    %c0_188 = arith.constant 0 : index
    %310 = vector.load %arg2[%c22_187, %c0_188] : memref<64x256xf32, #tpu.memory_space<vmem>>, vector<1x256xf32>
    %c23 = arith.constant 23 : index
    %c0_189 = arith.constant 0 : index
    %311 = vector.load %arg2[%c23, %c0_189] : memref<64x256xf32, #tpu.memory_space<vmem>>, vector<1x256xf32>
    %c24_190 = arith.constant 24 : index
    %c0_191 = arith.constant 0 : index
    %312 = vector.load %arg2[%c24_190, %c0_191] : memref<64x256xf32, #tpu.memory_space<vmem>>, vector<1x256xf32>
    %313 = arith.addf %310, %311 : vector<1x256xf32>
    %314 = arith.addf %313, %312 : vector<1x256xf32>
    %cst_192 = arith.constant 1.000000e+00 : f32
    %315 = vector.broadcast %cst_192 : f32 to vector<1x256xf32>
    %316 = arith.mulf %314, %315 : vector<1x256xf32>
    %cst_193 = arith.constant 0.000000e+00 : f32
    %317 = vector.broadcast %cst_193 : f32 to vector<1x256xf32>
    %318 = arith.cmpf oeq, %316, %317 : vector<1x256xf32>
    %cst_194 = arith.constant 0.000000e+00 : f32
    %cst_195 = arith.constant 1.000000e+00 : f32
    %319 = vector.broadcast %cst_194 : f32 to vector<1x256xf32>
    %320 = vector.broadcast %cst_195 : f32 to vector<1x256xf32>
    %321 = arith.select %318, %319, %320 : vector<1x256xi1>, vector<1x256xf32>
    %cst_196 = arith.constant 1.000000e+00 : f32
    %322 = vector.broadcast %cst_196 : f32 to vector<1x256xf32>
    %323 = arith.divf %322, %316 : vector<1x256xf32>
    %cst_197 = arith.constant 0.000000e+00 : f32
    %324 = vector.broadcast %cst_197 : f32 to vector<1x256xf32>
    %325 = arith.select %318, %324, %323 : vector<1x256xi1>, vector<1x256xf32>
    %c44 = arith.constant 44 : index
    %c0_198 = arith.constant 0 : index
    %326 = vector.load %arg1[%c44, %c0_198] : memref<128x256xf32, #tpu.memory_space<vmem>>, vector<6x256xf32>
    %cst_199 = arith.constant dense<0.000000e+00> : vector<16x256xf32>
    %327 = tpu.matmul %0, %326, %cst_199 {dimension_numbers = #tpu.dot_dimension_numbers<[1], [0], [0], [1], [0, 0, 1, 1], [], []>} : vector<16x6xf32>, vector<6x256xf32>, vector<16x256xf32> -> vector<16x256xf32>
    %328 = vector.broadcast %325 : vector<1x256xf32> to vector<16x256xf32>
    %329 = arith.mulf %327, %328 : vector<16x256xf32>
    %330 = vector.broadcast %1 : vector<16x1xf32> to vector<16x256xf32>
    %331 = vector.broadcast %321 : vector<1x256xf32> to vector<16x256xf32>
    %332 = arith.mulf %330, %331 : vector<16x256xf32>
    %333 = arith.addf %329, %332 : vector<16x256xf32>
    %cst_200 = arith.constant 0.000000e+00 : f32
    %334 = vector.broadcast %cst_200 : f32 to vector<16x256xf32>
    %335 = arith.maximumf %333, %334 : vector<16x256xf32>
    %c176 = arith.constant 176 : index
    %c0_201 = arith.constant 0 : index
    %336 = vector.load %arg6[%c176, %c0_201] : memref<496x256xf32, #tpu.memory_space<vmem>>, vector<16x256xf32>
    tpu.vector_store %arg6[%c176, %c0_201], %335 {strides = array<i32>} : memref<496x256xf32, #tpu.memory_space<vmem>>, vector<16x256xf32>,
    %c11_202 = arith.constant 11 : index
    %c0_203 = arith.constant 0 : index
    %337 = vector.load %arg7[%c11_202, %c0_203] : memref<31x256xf32, #tpu.memory_space<vmem>>, vector<1x256xf32>
    tpu.vector_store %arg7[%c11_202, %c0_203], %321 {strides = array<i32>} : memref<31x256xf32, #tpu.memory_space<vmem>>, vector<1x256xf32>,
    %c24_204 = arith.constant 24 : index
    %c0_205 = arith.constant 0 : index
    %338 = vector.load %arg2[%c24_204, %c0_205] : memref<64x256xf32, #tpu.memory_space<vmem>>, vector<1x256xf32>
    %c25 = arith.constant 25 : index
    %c0_206 = arith.constant 0 : index
    %339 = vector.load %arg2[%c25, %c0_206] : memref<64x256xf32, #tpu.memory_space<vmem>>, vector<1x256xf32>
    %c26 = arith.constant 26 : index
    %c0_207 = arith.constant 0 : index
    %340 = vector.load %arg2[%c26, %c0_207] : memref<64x256xf32, #tpu.memory_space<vmem>>, vector<1x256xf32>
    %341 = arith.addf %338, %339 : vector<1x256xf32>
    %342 = arith.addf %341, %340 : vector<1x256xf32>
    %cst_208 = arith.constant 1.000000e+00 : f32
    %343 = vector.broadcast %cst_208 : f32 to vector<1x256xf32>
    %344 = arith.mulf %342, %343 : vector<1x256xf32>
    %cst_209 = arith.constant 0.000000e+00 : f32
    %345 = vector.broadcast %cst_209 : f32 to vector<1x256xf32>
    %346 = arith.cmpf oeq, %344, %345 : vector<1x256xf32>
    %cst_210 = arith.constant 0.000000e+00 : f32
    %cst_211 = arith.constant 1.000000e+00 : f32
    %347 = vector.broadcast %cst_210 : f32 to vector<1x256xf32>
    %348 = vector.broadcast %cst_211 : f32 to vector<1x256xf32>
    %349 = arith.select %346, %347, %348 : vector<1x256xi1>, vector<1x256xf32>
    %cst_212 = arith.constant 1.000000e+00 : f32
    %350 = vector.broadcast %cst_212 : f32 to vector<1x256xf32>
    %351 = arith.divf %350, %344 : vector<1x256xf32>
    %cst_213 = arith.constant 0.000000e+00 : f32
    %352 = vector.broadcast %cst_213 : f32 to vector<1x256xf32>
    %353 = arith.select %346, %352, %351 : vector<1x256xi1>, vector<1x256xf32>
    %c48_214 = arith.constant 48 : index
    %c0_215 = arith.constant 0 : index
    %354 = vector.load %arg1[%c48_214, %c0_215] : memref<128x256xf32, #tpu.memory_space<vmem>>, vector<6x256xf32>
    %cst_216 = arith.constant dense<0.000000e+00> : vector<16x256xf32>
    %355 = tpu.matmul %0, %354, %cst_216 {dimension_numbers = #tpu.dot_dimension_numbers<[1], [0], [0], [1], [0, 0, 1, 1], [], []>} : vector<16x6xf32>, vector<6x256xf32>, vector<16x256xf32> -> vector<16x256xf32>
    %356 = vector.broadcast %353 : vector<1x256xf32> to vector<16x256xf32>
    %357 = arith.mulf %355, %356 : vector<16x256xf32>
    %358 = vector.broadcast %1 : vector<16x1xf32> to vector<16x256xf32>
    %359 = vector.broadcast %349 : vector<1x256xf32> to vector<16x256xf32>
    %360 = arith.mulf %358, %359 : vector<16x256xf32>
    %361 = arith.addf %357, %360 : vector<16x256xf32>
    %cst_217 = arith.constant 0.000000e+00 : f32
    %362 = vector.broadcast %cst_217 : f32 to vector<16x256xf32>
    %363 = arith.maximumf %361, %362 : vector<16x256xf32>
    %c192 = arith.constant 192 : index
    %c0_218 = arith.constant 0 : index
    %364 = vector.load %arg6[%c192, %c0_218] : memref<496x256xf32, #tpu.memory_space<vmem>>, vector<16x256xf32>
    tpu.vector_store %arg6[%c192, %c0_218], %363 {strides = array<i32>} : memref<496x256xf32, #tpu.memory_space<vmem>>, vector<16x256xf32>,
    %c12_219 = arith.constant 12 : index
    %c0_220 = arith.constant 0 : index
    %365 = vector.load %arg7[%c12_219, %c0_220] : memref<31x256xf32, #tpu.memory_space<vmem>>, vector<1x256xf32>
    tpu.vector_store %arg7[%c12_219, %c0_220], %349 {strides = array<i32>} : memref<31x256xf32, #tpu.memory_space<vmem>>, vector<1x256xf32>,
    %c26_221 = arith.constant 26 : index
    %c0_222 = arith.constant 0 : index
    %366 = vector.load %arg2[%c26_221, %c0_222] : memref<64x256xf32, #tpu.memory_space<vmem>>, vector<1x256xf32>
    %c27 = arith.constant 27 : index
    %c0_223 = arith.constant 0 : index
    %367 = vector.load %arg2[%c27, %c0_223] : memref<64x256xf32, #tpu.memory_space<vmem>>, vector<1x256xf32>
    %c28_224 = arith.constant 28 : index
    %c0_225 = arith.constant 0 : index
    %368 = vector.load %arg2[%c28_224, %c0_225] : memref<64x256xf32, #tpu.memory_space<vmem>>, vector<1x256xf32>
    %369 = arith.addf %366, %367 : vector<1x256xf32>
    %370 = arith.addf %369, %368 : vector<1x256xf32>
    %cst_226 = arith.constant 1.000000e+00 : f32
    %371 = vector.broadcast %cst_226 : f32 to vector<1x256xf32>
    %372 = arith.mulf %370, %371 : vector<1x256xf32>
    %cst_227 = arith.constant 0.000000e+00 : f32
    %373 = vector.broadcast %cst_227 : f32 to vector<1x256xf32>
    %374 = arith.cmpf oeq, %372, %373 : vector<1x256xf32>
    %cst_228 = arith.constant 0.000000e+00 : f32
    %cst_229 = arith.constant 1.000000e+00 : f32
    %375 = vector.broadcast %cst_228 : f32 to vector<1x256xf32>
    %376 = vector.broadcast %cst_229 : f32 to vector<1x256xf32>
    %377 = arith.select %374, %375, %376 : vector<1x256xi1>, vector<1x256xf32>
    %cst_230 = arith.constant 1.000000e+00 : f32
    %378 = vector.broadcast %cst_230 : f32 to vector<1x256xf32>
    %379 = arith.divf %378, %372 : vector<1x256xf32>
    %cst_231 = arith.constant 0.000000e+00 : f32
    %380 = vector.broadcast %cst_231 : f32 to vector<1x256xf32>
    %381 = arith.select %374, %380, %379 : vector<1x256xi1>, vector<1x256xf32>
    %c52 = arith.constant 52 : index
    %c0_232 = arith.constant 0 : index
    %382 = vector.load %arg1[%c52, %c0_232] : memref<128x256xf32, #tpu.memory_space<vmem>>, vector<6x256xf32>
    %cst_233 = arith.constant dense<0.000000e+00> : vector<16x256xf32>
    %383 = tpu.matmul %0, %382, %cst_233 {dimension_numbers = #tpu.dot_dimension_numbers<[1], [0], [0], [1], [0, 0, 1, 1], [], []>} : vector<16x6xf32>, vector<6x256xf32>, vector<16x256xf32> -> vector<16x256xf32>
    %384 = vector.broadcast %381 : vector<1x256xf32> to vector<16x256xf32>
    %385 = arith.mulf %383, %384 : vector<16x256xf32>
    %386 = vector.broadcast %1 : vector<16x1xf32> to vector<16x256xf32>
    %387 = vector.broadcast %377 : vector<1x256xf32> to vector<16x256xf32>
    %388 = arith.mulf %386, %387 : vector<16x256xf32>
    %389 = arith.addf %385, %388 : vector<16x256xf32>
    %cst_234 = arith.constant 0.000000e+00 : f32
    %390 = vector.broadcast %cst_234 : f32 to vector<16x256xf32>
    %391 = arith.maximumf %389, %390 : vector<16x256xf32>
    %c208 = arith.constant 208 : index
    %c0_235 = arith.constant 0 : index
    %392 = vector.load %arg6[%c208, %c0_235] : memref<496x256xf32, #tpu.memory_space<vmem>>, vector<16x256xf32>
    tpu.vector_store %arg6[%c208, %c0_235], %391 {strides = array<i32>} : memref<496x256xf32, #tpu.memory_space<vmem>>, vector<16x256xf32>,
    %c13_236 = arith.constant 13 : index
    %c0_237 = arith.constant 0 : index
    %393 = vector.load %arg7[%c13_236, %c0_237] : memref<31x256xf32, #tpu.memory_space<vmem>>, vector<1x256xf32>
    tpu.vector_store %arg7[%c13_236, %c0_237], %377 {strides = array<i32>} : memref<31x256xf32, #tpu.memory_space<vmem>>, vector<1x256xf32>,
    %c28_238 = arith.constant 28 : index
    %c0_239 = arith.constant 0 : index
    %394 = vector.load %arg2[%c28_238, %c0_239] : memref<64x256xf32, #tpu.memory_space<vmem>>, vector<1x256xf32>
    %c29 = arith.constant 29 : index
    %c0_240 = arith.constant 0 : index
    %395 = vector.load %arg2[%c29, %c0_240] : memref<64x256xf32, #tpu.memory_space<vmem>>, vector<1x256xf32>
    %c30 = arith.constant 30 : index
    %c0_241 = arith.constant 0 : index
    %396 = vector.load %arg2[%c30, %c0_241] : memref<64x256xf32, #tpu.memory_space<vmem>>, vector<1x256xf32>
    %397 = arith.addf %394, %395 : vector<1x256xf32>
    %398 = arith.addf %397, %396 : vector<1x256xf32>
    %cst_242 = arith.constant 1.000000e+00 : f32
    %399 = vector.broadcast %cst_242 : f32 to vector<1x256xf32>
    %400 = arith.mulf %398, %399 : vector<1x256xf32>
    %cst_243 = arith.constant 0.000000e+00 : f32
    %401 = vector.broadcast %cst_243 : f32 to vector<1x256xf32>
    %402 = arith.cmpf oeq, %400, %401 : vector<1x256xf32>
    %cst_244 = arith.constant 0.000000e+00 : f32
    %cst_245 = arith.constant 1.000000e+00 : f32
    %403 = vector.broadcast %cst_244 : f32 to vector<1x256xf32>
    %404 = vector.broadcast %cst_245 : f32 to vector<1x256xf32>
    %405 = arith.select %402, %403, %404 : vector<1x256xi1>, vector<1x256xf32>
    %cst_246 = arith.constant 1.000000e+00 : f32
    %406 = vector.broadcast %cst_246 : f32 to vector<1x256xf32>
    %407 = arith.divf %406, %400 : vector<1x256xf32>
    %cst_247 = arith.constant 0.000000e+00 : f32
    %408 = vector.broadcast %cst_247 : f32 to vector<1x256xf32>
    %409 = arith.select %402, %408, %407 : vector<1x256xi1>, vector<1x256xf32>
    %c56 = arith.constant 56 : index
    %c0_248 = arith.constant 0 : index
    %410 = vector.load %arg1[%c56, %c0_248] : memref<128x256xf32, #tpu.memory_space<vmem>>, vector<6x256xf32>
    %cst_249 = arith.constant dense<0.000000e+00> : vector<16x256xf32>
    %411 = tpu.matmul %0, %410, %cst_249 {dimension_numbers = #tpu.dot_dimension_numbers<[1], [0], [0], [1], [0, 0, 1, 1], [], []>} : vector<16x6xf32>, vector<6x256xf32>, vector<16x256xf32> -> vector<16x256xf32>
    %412 = vector.broadcast %409 : vector<1x256xf32> to vector<16x256xf32>
    %413 = arith.mulf %411, %412 : vector<16x256xf32>
    %414 = vector.broadcast %1 : vector<16x1xf32> to vector<16x256xf32>
    %415 = vector.broadcast %405 : vector<1x256xf32> to vector<16x256xf32>
    %416 = arith.mulf %414, %415 : vector<16x256xf32>
    %417 = arith.addf %413, %416 : vector<16x256xf32>
    %cst_250 = arith.constant 0.000000e+00 : f32
    %418 = vector.broadcast %cst_250 : f32 to vector<16x256xf32>
    %419 = arith.maximumf %417, %418 : vector<16x256xf32>
    %c224 = arith.constant 224 : index
    %c0_251 = arith.constant 0 : index
    %420 = vector.load %arg6[%c224, %c0_251] : memref<496x256xf32, #tpu.memory_space<vmem>>, vector<16x256xf32>
    tpu.vector_store %arg6[%c224, %c0_251], %419 {strides = array<i32>} : memref<496x256xf32, #tpu.memory_space<vmem>>, vector<16x256xf32>,
    %c14_252 = arith.constant 14 : index
    %c0_253 = arith.constant 0 : index
    %421 = vector.load %arg7[%c14_252, %c0_253] : memref<31x256xf32, #tpu.memory_space<vmem>>, vector<1x256xf32>
    tpu.vector_store %arg7[%c14_252, %c0_253], %405 {strides = array<i32>} : memref<31x256xf32, #tpu.memory_space<vmem>>, vector<1x256xf32>,
    %c30_254 = arith.constant 30 : index
    %c0_255 = arith.constant 0 : index
    %422 = vector.load %arg2[%c30_254, %c0_255] : memref<64x256xf32, #tpu.memory_space<vmem>>, vector<1x256xf32>
    %c31 = arith.constant 31 : index
    %c0_256 = arith.constant 0 : index
    %423 = vector.load %arg2[%c31, %c0_256] : memref<64x256xf32, #tpu.memory_space<vmem>>, vector<1x256xf32>
    %c32_257 = arith.constant 32 : index
    %c0_258 = arith.constant 0 : index
    %424 = vector.load %arg2[%c32_257, %c0_258] : memref<64x256xf32, #tpu.memory_space<vmem>>, vector<1x256xf32>
    %425 = arith.addf %422, %423 : vector<1x256xf32>
    %426 = arith.addf %425, %424 : vector<1x256xf32>
    %cst_259 = arith.constant 1.000000e+00 : f32
    %427 = vector.broadcast %cst_259 : f32 to vector<1x256xf32>
    %428 = arith.mulf %426, %427 : vector<1x256xf32>
    %cst_260 = arith.constant 0.000000e+00 : f32
    %429 = vector.broadcast %cst_260 : f32 to vector<1x256xf32>
    %430 = arith.cmpf oeq, %428, %429 : vector<1x256xf32>
    %cst_261 = arith.constant 0.000000e+00 : f32
    %cst_262 = arith.constant 1.000000e+00 : f32
    %431 = vector.broadcast %cst_261 : f32 to vector<1x256xf32>
    %432 = vector.broadcast %cst_262 : f32 to vector<1x256xf32>
    %433 = arith.select %430, %431, %432 : vector<1x256xi1>, vector<1x256xf32>
    %cst_263 = arith.constant 1.000000e+00 : f32
    %434 = vector.broadcast %cst_263 : f32 to vector<1x256xf32>
    %435 = arith.divf %434, %428 : vector<1x256xf32>
    %cst_264 = arith.constant 0.000000e+00 : f32
    %436 = vector.broadcast %cst_264 : f32 to vector<1x256xf32>
    %437 = arith.select %430, %436, %435 : vector<1x256xi1>, vector<1x256xf32>
    %c60 = arith.constant 60 : index
    %c0_265 = arith.constant 0 : index
    %438 = vector.load %arg1[%c60, %c0_265] : memref<128x256xf32, #tpu.memory_space<vmem>>, vector<6x256xf32>
    %cst_266 = arith.constant dense<0.000000e+00> : vector<16x256xf32>
    %439 = tpu.matmul %0, %438, %cst_266 {dimension_numbers = #tpu.dot_dimension_numbers<[1], [0], [0], [1], [0, 0, 1, 1], [], []>} : vector<16x6xf32>, vector<6x256xf32>, vector<16x256xf32> -> vector<16x256xf32>
    %440 = vector.broadcast %437 : vector<1x256xf32> to vector<16x256xf32>
    %441 = arith.mulf %439, %440 : vector<16x256xf32>
    %442 = vector.broadcast %1 : vector<16x1xf32> to vector<16x256xf32>
    %443 = vector.broadcast %433 : vector<1x256xf32> to vector<16x256xf32>
    %444 = arith.mulf %442, %443 : vector<16x256xf32>
    %445 = arith.addf %441, %444 : vector<16x256xf32>
    %cst_267 = arith.constant 0.000000e+00 : f32
    %446 = vector.broadcast %cst_267 : f32 to vector<16x256xf32>
    %447 = arith.maximumf %445, %446 : vector<16x256xf32>
    %c240 = arith.constant 240 : index
    %c0_268 = arith.constant 0 : index
    %448 = vector.load %arg6[%c240, %c0_268] : memref<496x256xf32, #tpu.memory_space<vmem>>, vector<16x256xf32>
    tpu.vector_store %arg6[%c240, %c0_268], %447 {strides = array<i32>} : memref<496x256xf32, #tpu.memory_space<vmem>>, vector<16x256xf32>,
    %c15_269 = arith.constant 15 : index
    %c0_270 = arith.constant 0 : index
    %449 = vector.load %arg7[%c15_269, %c0_270] : memref<31x256xf32, #tpu.memory_space<vmem>>, vector<1x256xf32>
    tpu.vector_store %arg7[%c15_269, %c0_270], %433 {strides = array<i32>} : memref<31x256xf32, #tpu.memory_space<vmem>>, vector<1x256xf32>,
    %c32_271 = arith.constant 32 : index
    %c0_272 = arith.constant 0 : index
    %450 = vector.load %arg2[%c32_271, %c0_272] : memref<64x256xf32, #tpu.memory_space<vmem>>, vector<1x256xf32>
    %c33 = arith.constant 33 : index
    %c0_273 = arith.constant 0 : index
    %451 = vector.load %arg2[%c33, %c0_273] : memref<64x256xf32, #tpu.memory_space<vmem>>, vector<1x256xf32>
    %c34 = arith.constant 34 : index
    %c0_274 = arith.constant 0 : index
    %452 = vector.load %arg2[%c34, %c0_274] : memref<64x256xf32, #tpu.memory_space<vmem>>, vector<1x256xf32>
    %453 = arith.addf %450, %451 : vector<1x256xf32>
    %454 = arith.addf %453, %452 : vector<1x256xf32>
    %cst_275 = arith.constant 1.000000e+00 : f32
    %455 = vector.broadcast %cst_275 : f32 to vector<1x256xf32>
    %456 = arith.mulf %454, %455 : vector<1x256xf32>
    %cst_276 = arith.constant 0.000000e+00 : f32
    %457 = vector.broadcast %cst_276 : f32 to vector<1x256xf32>
    %458 = arith.cmpf oeq, %456, %457 : vector<1x256xf32>
    %cst_277 = arith.constant 0.000000e+00 : f32
    %cst_278 = arith.constant 1.000000e+00 : f32
    %459 = vector.broadcast %cst_277 : f32 to vector<1x256xf32>
    %460 = vector.broadcast %cst_278 : f32 to vector<1x256xf32>
    %461 = arith.select %458, %459, %460 : vector<1x256xi1>, vector<1x256xf32>
    %cst_279 = arith.constant 1.000000e+00 : f32
    %462 = vector.broadcast %cst_279 : f32 to vector<1x256xf32>
    %463 = arith.divf %462, %456 : vector<1x256xf32>
    %cst_280 = arith.constant 0.000000e+00 : f32
    %464 = vector.broadcast %cst_280 : f32 to vector<1x256xf32>
    %465 = arith.select %458, %464, %463 : vector<1x256xi1>, vector<1x256xf32>
    %c64_281 = arith.constant 64 : index
    %c0_282 = arith.constant 0 : index
    %466 = vector.load %arg1[%c64_281, %c0_282] : memref<128x256xf32, #tpu.memory_space<vmem>>, vector<6x256xf32>
    %cst_283 = arith.constant dense<0.000000e+00> : vector<16x256xf32>
    %467 = tpu.matmul %0, %466, %cst_283 {dimension_numbers = #tpu.dot_dimension_numbers<[1], [0], [0], [1], [0, 0, 1, 1], [], []>} : vector<16x6xf32>, vector<6x256xf32>, vector<16x256xf32> -> vector<16x256xf32>
    %468 = vector.broadcast %465 : vector<1x256xf32> to vector<16x256xf32>
    %469 = arith.mulf %467, %468 : vector<16x256xf32>
    %470 = vector.broadcast %1 : vector<16x1xf32> to vector<16x256xf32>
    %471 = vector.broadcast %461 : vector<1x256xf32> to vector<16x256xf32>
    %472 = arith.mulf %470, %471 : vector<16x256xf32>
    %473 = arith.addf %469, %472 : vector<16x256xf32>
    %cst_284 = arith.constant 0.000000e+00 : f32
    %474 = vector.broadcast %cst_284 : f32 to vector<16x256xf32>
    %475 = arith.maximumf %473, %474 : vector<16x256xf32>
    %c256 = arith.constant 256 : index
    %c0_285 = arith.constant 0 : index
    %476 = vector.load %arg6[%c256, %c0_285] : memref<496x256xf32, #tpu.memory_space<vmem>>, vector<16x256xf32>
    tpu.vector_store %arg6[%c256, %c0_285], %475 {strides = array<i32>} : memref<496x256xf32, #tpu.memory_space<vmem>>, vector<16x256xf32>,
    %c16_286 = arith.constant 16 : index
    %c0_287 = arith.constant 0 : index
    %477 = vector.load %arg7[%c16_286, %c0_287] : memref<31x256xf32, #tpu.memory_space<vmem>>, vector<1x256xf32>
    tpu.vector_store %arg7[%c16_286, %c0_287], %461 {strides = array<i32>} : memref<31x256xf32, #tpu.memory_space<vmem>>, vector<1x256xf32>,
    %c34_288 = arith.constant 34 : index
    %c0_289 = arith.constant 0 : index
    %478 = vector.load %arg2[%c34_288, %c0_289] : memref<64x256xf32, #tpu.memory_space<vmem>>, vector<1x256xf32>
    %c35 = arith.constant 35 : index
    %c0_290 = arith.constant 0 : index
    %479 = vector.load %arg2[%c35, %c0_290] : memref<64x256xf32, #tpu.memory_space<vmem>>, vector<1x256xf32>
    %c36_291 = arith.constant 36 : index
    %c0_292 = arith.constant 0 : index
    %480 = vector.load %arg2[%c36_291, %c0_292] : memref<64x256xf32, #tpu.memory_space<vmem>>, vector<1x256xf32>
    %481 = arith.addf %478, %479 : vector<1x256xf32>
    %482 = arith.addf %481, %480 : vector<1x256xf32>
    %cst_293 = arith.constant 1.000000e+00 : f32
    %483 = vector.broadcast %cst_293 : f32 to vector<1x256xf32>
    %484 = arith.mulf %482, %483 : vector<1x256xf32>
    %cst_294 = arith.constant 0.000000e+00 : f32
    %485 = vector.broadcast %cst_294 : f32 to vector<1x256xf32>
    %486 = arith.cmpf oeq, %484, %485 : vector<1x256xf32>
    %cst_295 = arith.constant 0.000000e+00 : f32
    %cst_296 = arith.constant 1.000000e+00 : f32
    %487 = vector.broadcast %cst_295 : f32 to vector<1x256xf32>
    %488 = vector.broadcast %cst_296 : f32 to vector<1x256xf32>
    %489 = arith.select %486, %487, %488 : vector<1x256xi1>, vector<1x256xf32>
    %cst_297 = arith.constant 1.000000e+00 : f32
    %490 = vector.broadcast %cst_297 : f32 to vector<1x256xf32>
    %491 = arith.divf %490, %484 : vector<1x256xf32>
    %cst_298 = arith.constant 0.000000e+00 : f32
    %492 = vector.broadcast %cst_298 : f32 to vector<1x256xf32>
    %493 = arith.select %486, %492, %491 : vector<1x256xi1>, vector<1x256xf32>
    %c68 = arith.constant 68 : index
    %c0_299 = arith.constant 0 : index
    %494 = vector.load %arg1[%c68, %c0_299] : memref<128x256xf32, #tpu.memory_space<vmem>>, vector<6x256xf32>
    %cst_300 = arith.constant dense<0.000000e+00> : vector<16x256xf32>
    %495 = tpu.matmul %0, %494, %cst_300 {dimension_numbers = #tpu.dot_dimension_numbers<[1], [0], [0], [1], [0, 0, 1, 1], [], []>} : vector<16x6xf32>, vector<6x256xf32>, vector<16x256xf32> -> vector<16x256xf32>
    %496 = vector.broadcast %493 : vector<1x256xf32> to vector<16x256xf32>
    %497 = arith.mulf %495, %496 : vector<16x256xf32>
    %498 = vector.broadcast %1 : vector<16x1xf32> to vector<16x256xf32>
    %499 = vector.broadcast %489 : vector<1x256xf32> to vector<16x256xf32>
    %500 = arith.mulf %498, %499 : vector<16x256xf32>
    %501 = arith.addf %497, %500 : vector<16x256xf32>
    %cst_301 = arith.constant 0.000000e+00 : f32
    %502 = vector.broadcast %cst_301 : f32 to vector<16x256xf32>
    %503 = arith.maximumf %501, %502 : vector<16x256xf32>
    %c272 = arith.constant 272 : index
    %c0_302 = arith.constant 0 : index
    %504 = vector.load %arg6[%c272, %c0_302] : memref<496x256xf32, #tpu.memory_space<vmem>>, vector<16x256xf32>
    tpu.vector_store %arg6[%c272, %c0_302], %503 {strides = array<i32>} : memref<496x256xf32, #tpu.memory_space<vmem>>, vector<16x256xf32>,
    %c17_303 = arith.constant 17 : index
    %c0_304 = arith.constant 0 : index
    %505 = vector.load %arg7[%c17_303, %c0_304] : memref<31x256xf32, #tpu.memory_space<vmem>>, vector<1x256xf32>
    tpu.vector_store %arg7[%c17_303, %c0_304], %489 {strides = array<i32>} : memref<31x256xf32, #tpu.memory_space<vmem>>, vector<1x256xf32>,
    %c36_305 = arith.constant 36 : index
    %c0_306 = arith.constant 0 : index
    %506 = vector.load %arg2[%c36_305, %c0_306] : memref<64x256xf32, #tpu.memory_space<vmem>>, vector<1x256xf32>
    %c37 = arith.constant 37 : index
    %c0_307 = arith.constant 0 : index
    %507 = vector.load %arg2[%c37, %c0_307] : memref<64x256xf32, #tpu.memory_space<vmem>>, vector<1x256xf32>
    %c38 = arith.constant 38 : index
    %c0_308 = arith.constant 0 : index
    %508 = vector.load %arg2[%c38, %c0_308] : memref<64x256xf32, #tpu.memory_space<vmem>>, vector<1x256xf32>
    %509 = arith.addf %506, %507 : vector<1x256xf32>
    %510 = arith.addf %509, %508 : vector<1x256xf32>
    %cst_309 = arith.constant 1.000000e+00 : f32
    %511 = vector.broadcast %cst_309 : f32 to vector<1x256xf32>
    %512 = arith.mulf %510, %511 : vector<1x256xf32>
    %cst_310 = arith.constant 0.000000e+00 : f32
    %513 = vector.broadcast %cst_310 : f32 to vector<1x256xf32>
    %514 = arith.cmpf oeq, %512, %513 : vector<1x256xf32>
    %cst_311 = arith.constant 0.000000e+00 : f32
    %cst_312 = arith.constant 1.000000e+00 : f32
    %515 = vector.broadcast %cst_311 : f32 to vector<1x256xf32>
    %516 = vector.broadcast %cst_312 : f32 to vector<1x256xf32>
    %517 = arith.select %514, %515, %516 : vector<1x256xi1>, vector<1x256xf32>
    %cst_313 = arith.constant 1.000000e+00 : f32
    %518 = vector.broadcast %cst_313 : f32 to vector<1x256xf32>
    %519 = arith.divf %518, %512 : vector<1x256xf32>
    %cst_314 = arith.constant 0.000000e+00 : f32
    %520 = vector.broadcast %cst_314 : f32 to vector<1x256xf32>
    %521 = arith.select %514, %520, %519 : vector<1x256xi1>, vector<1x256xf32>
    %c72 = arith.constant 72 : index
    %c0_315 = arith.constant 0 : index
    %522 = vector.load %arg1[%c72, %c0_315] : memref<128x256xf32, #tpu.memory_space<vmem>>, vector<6x256xf32>
    %cst_316 = arith.constant dense<0.000000e+00> : vector<16x256xf32>
    %523 = tpu.matmul %0, %522, %cst_316 {dimension_numbers = #tpu.dot_dimension_numbers<[1], [0], [0], [1], [0, 0, 1, 1], [], []>} : vector<16x6xf32>, vector<6x256xf32>, vector<16x256xf32> -> vector<16x256xf32>
    %524 = vector.broadcast %521 : vector<1x256xf32> to vector<16x256xf32>
    %525 = arith.mulf %523, %524 : vector<16x256xf32>
    %526 = vector.broadcast %1 : vector<16x1xf32> to vector<16x256xf32>
    %527 = vector.broadcast %517 : vector<1x256xf32> to vector<16x256xf32>
    %528 = arith.mulf %526, %527 : vector<16x256xf32>
    %529 = arith.addf %525, %528 : vector<16x256xf32>
    %cst_317 = arith.constant 0.000000e+00 : f32
    %530 = vector.broadcast %cst_317 : f32 to vector<16x256xf32>
    %531 = arith.maximumf %529, %530 : vector<16x256xf32>
    %c288 = arith.constant 288 : index
    %c0_318 = arith.constant 0 : index
    %532 = vector.load %arg6[%c288, %c0_318] : memref<496x256xf32, #tpu.memory_space<vmem>>, vector<16x256xf32>
    tpu.vector_store %arg6[%c288, %c0_318], %531 {strides = array<i32>} : memref<496x256xf32, #tpu.memory_space<vmem>>, vector<16x256xf32>,
    %c18_319 = arith.constant 18 : index
    %c0_320 = arith.constant 0 : index
    %533 = vector.load %arg7[%c18_319, %c0_320] : memref<31x256xf32, #tpu.memory_space<vmem>>, vector<1x256xf32>
    tpu.vector_store %arg7[%c18_319, %c0_320], %517 {strides = array<i32>} : memref<31x256xf32, #tpu.memory_space<vmem>>, vector<1x256xf32>,
    %c38_321 = arith.constant 38 : index
    %c0_322 = arith.constant 0 : index
    %534 = vector.load %arg2[%c38_321, %c0_322] : memref<64x256xf32, #tpu.memory_space<vmem>>, vector<1x256xf32>
    %c39 = arith.constant 39 : index
    %c0_323 = arith.constant 0 : index
    %535 = vector.load %arg2[%c39, %c0_323] : memref<64x256xf32, #tpu.memory_space<vmem>>, vector<1x256xf32>
    %c40_324 = arith.constant 40 : index
    %c0_325 = arith.constant 0 : index
    %536 = vector.load %arg2[%c40_324, %c0_325] : memref<64x256xf32, #tpu.memory_space<vmem>>, vector<1x256xf32>
    %537 = arith.addf %534, %535 : vector<1x256xf32>
    %538 = arith.addf %537, %536 : vector<1x256xf32>
    %cst_326 = arith.constant 1.000000e+00 : f32
    %539 = vector.broadcast %cst_326 : f32 to vector<1x256xf32>
    %540 = arith.mulf %538, %539 : vector<1x256xf32>
    %cst_327 = arith.constant 0.000000e+00 : f32
    %541 = vector.broadcast %cst_327 : f32 to vector<1x256xf32>
    %542 = arith.cmpf oeq, %540, %541 : vector<1x256xf32>
    %cst_328 = arith.constant 0.000000e+00 : f32
    %cst_329 = arith.constant 1.000000e+00 : f32
    %543 = vector.broadcast %cst_328 : f32 to vector<1x256xf32>
    %544 = vector.broadcast %cst_329 : f32 to vector<1x256xf32>
    %545 = arith.select %542, %543, %544 : vector<1x256xi1>, vector<1x256xf32>
    %cst_330 = arith.constant 1.000000e+00 : f32
    %546 = vector.broadcast %cst_330 : f32 to vector<1x256xf32>
    %547 = arith.divf %546, %540 : vector<1x256xf32>
    %cst_331 = arith.constant 0.000000e+00 : f32
    %548 = vector.broadcast %cst_331 : f32 to vector<1x256xf32>
    %549 = arith.select %542, %548, %547 : vector<1x256xi1>, vector<1x256xf32>
    %c76 = arith.constant 76 : index
    %c0_332 = arith.constant 0 : index
    %550 = vector.load %arg1[%c76, %c0_332] : memref<128x256xf32, #tpu.memory_space<vmem>>, vector<6x256xf32>
    %cst_333 = arith.constant dense<0.000000e+00> : vector<16x256xf32>
    %551 = tpu.matmul %0, %550, %cst_333 {dimension_numbers = #tpu.dot_dimension_numbers<[1], [0], [0], [1], [0, 0, 1, 1], [], []>} : vector<16x6xf32>, vector<6x256xf32>, vector<16x256xf32> -> vector<16x256xf32>
    %552 = vector.broadcast %549 : vector<1x256xf32> to vector<16x256xf32>
    %553 = arith.mulf %551, %552 : vector<16x256xf32>
    %554 = vector.broadcast %1 : vector<16x1xf32> to vector<16x256xf32>
    %555 = vector.broadcast %545 : vector<1x256xf32> to vector<16x256xf32>
    %556 = arith.mulf %554, %555 : vector<16x256xf32>
    %557 = arith.addf %553, %556 : vector<16x256xf32>
    %cst_334 = arith.constant 0.000000e+00 : f32
    %558 = vector.broadcast %cst_334 : f32 to vector<16x256xf32>
    %559 = arith.maximumf %557, %558 : vector<16x256xf32>
    %c304 = arith.constant 304 : index
    %c0_335 = arith.constant 0 : index
    %560 = vector.load %arg6[%c304, %c0_335] : memref<496x256xf32, #tpu.memory_space<vmem>>, vector<16x256xf32>
    tpu.vector_store %arg6[%c304, %c0_335], %559 {strides = array<i32>} : memref<496x256xf32, #tpu.memory_space<vmem>>, vector<16x256xf32>,
    %c19_336 = arith.constant 19 : index
    %c0_337 = arith.constant 0 : index
    %561 = vector.load %arg7[%c19_336, %c0_337] : memref<31x256xf32, #tpu.memory_space<vmem>>, vector<1x256xf32>
    tpu.vector_store %arg7[%c19_336, %c0_337], %545 {strides = array<i32>} : memref<31x256xf32, #tpu.memory_space<vmem>>, vector<1x256xf32>,
    %c40_338 = arith.constant 40 : index
    %c0_339 = arith.constant 0 : index
    %562 = vector.load %arg2[%c40_338, %c0_339] : memref<64x256xf32, #tpu.memory_space<vmem>>, vector<1x256xf32>
    %c41 = arith.constant 41 : index
    %c0_340 = arith.constant 0 : index
    %563 = vector.load %arg2[%c41, %c0_340] : memref<64x256xf32, #tpu.memory_space<vmem>>, vector<1x256xf32>
    %c42 = arith.constant 42 : index
    %c0_341 = arith.constant 0 : index
    %564 = vector.load %arg2[%c42, %c0_341] : memref<64x256xf32, #tpu.memory_space<vmem>>, vector<1x256xf32>
    %565 = arith.addf %562, %563 : vector<1x256xf32>
    %566 = arith.addf %565, %564 : vector<1x256xf32>
    %cst_342 = arith.constant 1.000000e+00 : f32
    %567 = vector.broadcast %cst_342 : f32 to vector<1x256xf32>
    %568 = arith.mulf %566, %567 : vector<1x256xf32>
    %cst_343 = arith.constant 0.000000e+00 : f32
    %569 = vector.broadcast %cst_343 : f32 to vector<1x256xf32>
    %570 = arith.cmpf oeq, %568, %569 : vector<1x256xf32>
    %cst_344 = arith.constant 0.000000e+00 : f32
    %cst_345 = arith.constant 1.000000e+00 : f32
    %571 = vector.broadcast %cst_344 : f32 to vector<1x256xf32>
    %572 = vector.broadcast %cst_345 : f32 to vector<1x256xf32>
    %573 = arith.select %570, %571, %572 : vector<1x256xi1>, vector<1x256xf32>
    %cst_346 = arith.constant 1.000000e+00 : f32
    %574 = vector.broadcast %cst_346 : f32 to vector<1x256xf32>
    %575 = arith.divf %574, %568 : vector<1x256xf32>
    %cst_347 = arith.constant 0.000000e+00 : f32
    %576 = vector.broadcast %cst_347 : f32 to vector<1x256xf32>
    %577 = arith.select %570, %576, %575 : vector<1x256xi1>, vector<1x256xf32>
    %c80_348 = arith.constant 80 : index
    %c0_349 = arith.constant 0 : index
    %578 = vector.load %arg1[%c80_348, %c0_349] : memref<128x256xf32, #tpu.memory_space<vmem>>, vector<6x256xf32>
    %cst_350 = arith.constant dense<0.000000e+00> : vector<16x256xf32>
    %579 = tpu.matmul %0, %578, %cst_350 {dimension_numbers = #tpu.dot_dimension_numbers<[1], [0], [0], [1], [0, 0, 1, 1], [], []>} : vector<16x6xf32>, vector<6x256xf32>, vector<16x256xf32> -> vector<16x256xf32>
    %580 = vector.broadcast %577 : vector<1x256xf32> to vector<16x256xf32>
    %581 = arith.mulf %579, %580 : vector<16x256xf32>
    %582 = vector.broadcast %1 : vector<16x1xf32> to vector<16x256xf32>
    %583 = vector.broadcast %573 : vector<1x256xf32> to vector<16x256xf32>
    %584 = arith.mulf %582, %583 : vector<16x256xf32>
    %585 = arith.addf %581, %584 : vector<16x256xf32>
    %cst_351 = arith.constant 0.000000e+00 : f32
    %586 = vector.broadcast %cst_351 : f32 to vector<16x256xf32>
    %587 = arith.maximumf %585, %586 : vector<16x256xf32>
    %c320 = arith.constant 320 : index
    %c0_352 = arith.constant 0 : index
    %588 = vector.load %arg6[%c320, %c0_352] : memref<496x256xf32, #tpu.memory_space<vmem>>, vector<16x256xf32>
    tpu.vector_store %arg6[%c320, %c0_352], %587 {strides = array<i32>} : memref<496x256xf32, #tpu.memory_space<vmem>>, vector<16x256xf32>,
    %c20_353 = arith.constant 20 : index
    %c0_354 = arith.constant 0 : index
    %589 = vector.load %arg7[%c20_353, %c0_354] : memref<31x256xf32, #tpu.memory_space<vmem>>, vector<1x256xf32>
    tpu.vector_store %arg7[%c20_353, %c0_354], %573 {strides = array<i32>} : memref<31x256xf32, #tpu.memory_space<vmem>>, vector<1x256xf32>,
    %c42_355 = arith.constant 42 : index
    %c0_356 = arith.constant 0 : index
    %590 = vector.load %arg2[%c42_355, %c0_356] : memref<64x256xf32, #tpu.memory_space<vmem>>, vector<1x256xf32>
    %c43 = arith.constant 43 : index
    %c0_357 = arith.constant 0 : index
    %591 = vector.load %arg2[%c43, %c0_357] : memref<64x256xf32, #tpu.memory_space<vmem>>, vector<1x256xf32>
    %c44_358 = arith.constant 44 : index
    %c0_359 = arith.constant 0 : index
    %592 = vector.load %arg2[%c44_358, %c0_359] : memref<64x256xf32, #tpu.memory_space<vmem>>, vector<1x256xf32>
    %593 = arith.addf %590, %591 : vector<1x256xf32>
    %594 = arith.addf %593, %592 : vector<1x256xf32>
    %cst_360 = arith.constant 1.000000e+00 : f32
    %595 = vector.broadcast %cst_360 : f32 to vector<1x256xf32>
    %596 = arith.mulf %594, %595 : vector<1x256xf32>
    %cst_361 = arith.constant 0.000000e+00 : f32
    %597 = vector.broadcast %cst_361 : f32 to vector<1x256xf32>
    %598 = arith.cmpf oeq, %596, %597 : vector<1x256xf32>
    %cst_362 = arith.constant 0.000000e+00 : f32
    %cst_363 = arith.constant 1.000000e+00 : f32
    %599 = vector.broadcast %cst_362 : f32 to vector<1x256xf32>
    %600 = vector.broadcast %cst_363 : f32 to vector<1x256xf32>
    %601 = arith.select %598, %599, %600 : vector<1x256xi1>, vector<1x256xf32>
    %cst_364 = arith.constant 1.000000e+00 : f32
    %602 = vector.broadcast %cst_364 : f32 to vector<1x256xf32>
    %603 = arith.divf %602, %596 : vector<1x256xf32>
    %cst_365 = arith.constant 0.000000e+00 : f32
    %604 = vector.broadcast %cst_365 : f32 to vector<1x256xf32>
    %605 = arith.select %598, %604, %603 : vector<1x256xi1>, vector<1x256xf32>
    %c84 = arith.constant 84 : index
    %c0_366 = arith.constant 0 : index
    %606 = vector.load %arg1[%c84, %c0_366] : memref<128x256xf32, #tpu.memory_space<vmem>>, vector<6x256xf32>
    %cst_367 = arith.constant dense<0.000000e+00> : vector<16x256xf32>
    %607 = tpu.matmul %0, %606, %cst_367 {dimension_numbers = #tpu.dot_dimension_numbers<[1], [0], [0], [1], [0, 0, 1, 1], [], []>} : vector<16x6xf32>, vector<6x256xf32>, vector<16x256xf32> -> vector<16x256xf32>
    %608 = vector.broadcast %605 : vector<1x256xf32> to vector<16x256xf32>
    %609 = arith.mulf %607, %608 : vector<16x256xf32>
    %610 = vector.broadcast %1 : vector<16x1xf32> to vector<16x256xf32>
    %611 = vector.broadcast %601 : vector<1x256xf32> to vector<16x256xf32>
    %612 = arith.mulf %610, %611 : vector<16x256xf32>
    %613 = arith.addf %609, %612 : vector<16x256xf32>
    %cst_368 = arith.constant 0.000000e+00 : f32
    %614 = vector.broadcast %cst_368 : f32 to vector<16x256xf32>
    %615 = arith.maximumf %613, %614 : vector<16x256xf32>
    %c336 = arith.constant 336 : index
    %c0_369 = arith.constant 0 : index
    %616 = vector.load %arg6[%c336, %c0_369] : memref<496x256xf32, #tpu.memory_space<vmem>>, vector<16x256xf32>
    tpu.vector_store %arg6[%c336, %c0_369], %615 {strides = array<i32>} : memref<496x256xf32, #tpu.memory_space<vmem>>, vector<16x256xf32>,
    %c21_370 = arith.constant 21 : index
    %c0_371 = arith.constant 0 : index
    %617 = vector.load %arg7[%c21_370, %c0_371] : memref<31x256xf32, #tpu.memory_space<vmem>>, vector<1x256xf32>
    tpu.vector_store %arg7[%c21_370, %c0_371], %601 {strides = array<i32>} : memref<31x256xf32, #tpu.memory_space<vmem>>, vector<1x256xf32>,
    %c44_372 = arith.constant 44 : index
    %c0_373 = arith.constant 0 : index
    %618 = vector.load %arg2[%c44_372, %c0_373] : memref<64x256xf32, #tpu.memory_space<vmem>>, vector<1x256xf32>
    %c45 = arith.constant 45 : index
    %c0_374 = arith.constant 0 : index
    %619 = vector.load %arg2[%c45, %c0_374] : memref<64x256xf32, #tpu.memory_space<vmem>>, vector<1x256xf32>
    %c46 = arith.constant 46 : index
    %c0_375 = arith.constant 0 : index
    %620 = vector.load %arg2[%c46, %c0_375] : memref<64x256xf32, #tpu.memory_space<vmem>>, vector<1x256xf32>
    %621 = arith.addf %618, %619 : vector<1x256xf32>
    %622 = arith.addf %621, %620 : vector<1x256xf32>
    %cst_376 = arith.constant 1.000000e+00 : f32
    %623 = vector.broadcast %cst_376 : f32 to vector<1x256xf32>
    %624 = arith.mulf %622, %623 : vector<1x256xf32>
    %cst_377 = arith.constant 0.000000e+00 : f32
    %625 = vector.broadcast %cst_377 : f32 to vector<1x256xf32>
    %626 = arith.cmpf oeq, %624, %625 : vector<1x256xf32>
    %cst_378 = arith.constant 0.000000e+00 : f32
    %cst_379 = arith.constant 1.000000e+00 : f32
    %627 = vector.broadcast %cst_378 : f32 to vector<1x256xf32>
    %628 = vector.broadcast %cst_379 : f32 to vector<1x256xf32>
    %629 = arith.select %626, %627, %628 : vector<1x256xi1>, vector<1x256xf32>
    %cst_380 = arith.constant 1.000000e+00 : f32
    %630 = vector.broadcast %cst_380 : f32 to vector<1x256xf32>
    %631 = arith.divf %630, %624 : vector<1x256xf32>
    %cst_381 = arith.constant 0.000000e+00 : f32
    %632 = vector.broadcast %cst_381 : f32 to vector<1x256xf32>
    %633 = arith.select %626, %632, %631 : vector<1x256xi1>, vector<1x256xf32>
    %c88 = arith.constant 88 : index
    %c0_382 = arith.constant 0 : index
    %634 = vector.load %arg1[%c88, %c0_382] : memref<128x256xf32, #tpu.memory_space<vmem>>, vector<6x256xf32>
    %cst_383 = arith.constant dense<0.000000e+00> : vector<16x256xf32>
    %635 = tpu.matmul %0, %634, %cst_383 {dimension_numbers = #tpu.dot_dimension_numbers<[1], [0], [0], [1], [0, 0, 1, 1], [], []>} : vector<16x6xf32>, vector<6x256xf32>, vector<16x256xf32> -> vector<16x256xf32>
    %636 = vector.broadcast %633 : vector<1x256xf32> to vector<16x256xf32>
    %637 = arith.mulf %635, %636 : vector<16x256xf32>
    %638 = vector.broadcast %1 : vector<16x1xf32> to vector<16x256xf32>
    %639 = vector.broadcast %629 : vector<1x256xf32> to vector<16x256xf32>
    %640 = arith.mulf %638, %639 : vector<16x256xf32>
    %641 = arith.addf %637, %640 : vector<16x256xf32>
    %cst_384 = arith.constant 0.000000e+00 : f32
    %642 = vector.broadcast %cst_384 : f32 to vector<16x256xf32>
    %643 = arith.maximumf %641, %642 : vector<16x256xf32>
    %c352 = arith.constant 352 : index
    %c0_385 = arith.constant 0 : index
    %644 = vector.load %arg6[%c352, %c0_385] : memref<496x256xf32, #tpu.memory_space<vmem>>, vector<16x256xf32>
    tpu.vector_store %arg6[%c352, %c0_385], %643 {strides = array<i32>} : memref<496x256xf32, #tpu.memory_space<vmem>>, vector<16x256xf32>,
    %c22_386 = arith.constant 22 : index
    %c0_387 = arith.constant 0 : index
    %645 = vector.load %arg7[%c22_386, %c0_387] : memref<31x256xf32, #tpu.memory_space<vmem>>, vector<1x256xf32>
    tpu.vector_store %arg7[%c22_386, %c0_387], %629 {strides = array<i32>} : memref<31x256xf32, #tpu.memory_space<vmem>>, vector<1x256xf32>,
    %c46_388 = arith.constant 46 : index
    %c0_389 = arith.constant 0 : index
    %646 = vector.load %arg2[%c46_388, %c0_389] : memref<64x256xf32, #tpu.memory_space<vmem>>, vector<1x256xf32>
    %c47 = arith.constant 47 : index
    %c0_390 = arith.constant 0 : index
    %647 = vector.load %arg2[%c47, %c0_390] : memref<64x256xf32, #tpu.memory_space<vmem>>, vector<1x256xf32>
    %c48_391 = arith.constant 48 : index
    %c0_392 = arith.constant 0 : index
    %648 = vector.load %arg2[%c48_391, %c0_392] : memref<64x256xf32, #tpu.memory_space<vmem>>, vector<1x256xf32>
    %649 = arith.addf %646, %647 : vector<1x256xf32>
    %650 = arith.addf %649, %648 : vector<1x256xf32>
    %cst_393 = arith.constant 1.000000e+00 : f32
    %651 = vector.broadcast %cst_393 : f32 to vector<1x256xf32>
    %652 = arith.mulf %650, %651 : vector<1x256xf32>
    %cst_394 = arith.constant 0.000000e+00 : f32
    %653 = vector.broadcast %cst_394 : f32 to vector<1x256xf32>
    %654 = arith.cmpf oeq, %652, %653 : vector<1x256xf32>
    %cst_395 = arith.constant 0.000000e+00 : f32
    %cst_396 = arith.constant 1.000000e+00 : f32
    %655 = vector.broadcast %cst_395 : f32 to vector<1x256xf32>
    %656 = vector.broadcast %cst_396 : f32 to vector<1x256xf32>
    %657 = arith.select %654, %655, %656 : vector<1x256xi1>, vector<1x256xf32>
    %cst_397 = arith.constant 1.000000e+00 : f32
    %658 = vector.broadcast %cst_397 : f32 to vector<1x256xf32>
    %659 = arith.divf %658, %652 : vector<1x256xf32>
    %cst_398 = arith.constant 0.000000e+00 : f32
    %660 = vector.broadcast %cst_398 : f32 to vector<1x256xf32>
    %661 = arith.select %654, %660, %659 : vector<1x256xi1>, vector<1x256xf32>
    %c92 = arith.constant 92 : index
    %c0_399 = arith.constant 0 : index
    %662 = vector.load %arg1[%c92, %c0_399] : memref<128x256xf32, #tpu.memory_space<vmem>>, vector<6x256xf32>
    %cst_400 = arith.constant dense<0.000000e+00> : vector<16x256xf32>
    %663 = tpu.matmul %0, %662, %cst_400 {dimension_numbers = #tpu.dot_dimension_numbers<[1], [0], [0], [1], [0, 0, 1, 1], [], []>} : vector<16x6xf32>, vector<6x256xf32>, vector<16x256xf32> -> vector<16x256xf32>
    %664 = vector.broadcast %661 : vector<1x256xf32> to vector<16x256xf32>
    %665 = arith.mulf %663, %664 : vector<16x256xf32>
    %666 = vector.broadcast %1 : vector<16x1xf32> to vector<16x256xf32>
    %667 = vector.broadcast %657 : vector<1x256xf32> to vector<16x256xf32>
    %668 = arith.mulf %666, %667 : vector<16x256xf32>
    %669 = arith.addf %665, %668 : vector<16x256xf32>
    %cst_401 = arith.constant 0.000000e+00 : f32
    %670 = vector.broadcast %cst_401 : f32 to vector<16x256xf32>
    %671 = arith.maximumf %669, %670 : vector<16x256xf32>
    %c368 = arith.constant 368 : index
    %c0_402 = arith.constant 0 : index
    %672 = vector.load %arg6[%c368, %c0_402] : memref<496x256xf32, #tpu.memory_space<vmem>>, vector<16x256xf32>
    tpu.vector_store %arg6[%c368, %c0_402], %671 {strides = array<i32>} : memref<496x256xf32, #tpu.memory_space<vmem>>, vector<16x256xf32>,
    %c23_403 = arith.constant 23 : index
    %c0_404 = arith.constant 0 : index
    %673 = vector.load %arg7[%c23_403, %c0_404] : memref<31x256xf32, #tpu.memory_space<vmem>>, vector<1x256xf32>
    tpu.vector_store %arg7[%c23_403, %c0_404], %657 {strides = array<i32>} : memref<31x256xf32, #tpu.memory_space<vmem>>, vector<1x256xf32>,
    %c48_405 = arith.constant 48 : index
    %c0_406 = arith.constant 0 : index
    %674 = vector.load %arg2[%c48_405, %c0_406] : memref<64x256xf32, #tpu.memory_space<vmem>>, vector<1x256xf32>
    %c49 = arith.constant 49 : index
    %c0_407 = arith.constant 0 : index
    %675 = vector.load %arg2[%c49, %c0_407] : memref<64x256xf32, #tpu.memory_space<vmem>>, vector<1x256xf32>
    %c50 = arith.constant 50 : index
    %c0_408 = arith.constant 0 : index
    %676 = vector.load %arg2[%c50, %c0_408] : memref<64x256xf32, #tpu.memory_space<vmem>>, vector<1x256xf32>
    %677 = arith.addf %674, %675 : vector<1x256xf32>
    %678 = arith.addf %677, %676 : vector<1x256xf32>
    %cst_409 = arith.constant 1.000000e+00 : f32
    %679 = vector.broadcast %cst_409 : f32 to vector<1x256xf32>
    %680 = arith.mulf %678, %679 : vector<1x256xf32>
    %cst_410 = arith.constant 0.000000e+00 : f32
    %681 = vector.broadcast %cst_410 : f32 to vector<1x256xf32>
    %682 = arith.cmpf oeq, %680, %681 : vector<1x256xf32>
    %cst_411 = arith.constant 0.000000e+00 : f32
    %cst_412 = arith.constant 1.000000e+00 : f32
    %683 = vector.broadcast %cst_411 : f32 to vector<1x256xf32>
    %684 = vector.broadcast %cst_412 : f32 to vector<1x256xf32>
    %685 = arith.select %682, %683, %684 : vector<1x256xi1>, vector<1x256xf32>
    %cst_413 = arith.constant 1.000000e+00 : f32
    %686 = vector.broadcast %cst_413 : f32 to vector<1x256xf32>
    %687 = arith.divf %686, %680 : vector<1x256xf32>
    %cst_414 = arith.constant 0.000000e+00 : f32
    %688 = vector.broadcast %cst_414 : f32 to vector<1x256xf32>
    %689 = arith.select %682, %688, %687 : vector<1x256xi1>, vector<1x256xf32>
    %c96_415 = arith.constant 96 : index
    %c0_416 = arith.constant 0 : index
    %690 = vector.load %arg1[%c96_415, %c0_416] : memref<128x256xf32, #tpu.memory_space<vmem>>, vector<6x256xf32>
    %cst_417 = arith.constant dense<0.000000e+00> : vector<16x256xf32>
    %691 = tpu.matmul %0, %690, %cst_417 {dimension_numbers = #tpu.dot_dimension_numbers<[1], [0], [0], [1], [0, 0, 1, 1], [], []>} : vector<16x6xf32>, vector<6x256xf32>, vector<16x256xf32> -> vector<16x256xf32>
    %692 = vector.broadcast %689 : vector<1x256xf32> to vector<16x256xf32>
    %693 = arith.mulf %691, %692 : vector<16x256xf32>
    %694 = vector.broadcast %1 : vector<16x1xf32> to vector<16x256xf32>
    %695 = vector.broadcast %685 : vector<1x256xf32> to vector<16x256xf32>
    %696 = arith.mulf %694, %695 : vector<16x256xf32>
    %697 = arith.addf %693, %696 : vector<16x256xf32>
    %cst_418 = arith.constant 0.000000e+00 : f32
    %698 = vector.broadcast %cst_418 : f32 to vector<16x256xf32>
    %699 = arith.maximumf %697, %698 : vector<16x256xf32>
    %c384 = arith.constant 384 : index
    %c0_419 = arith.constant 0 : index
    %700 = vector.load %arg6[%c384, %c0_419] : memref<496x256xf32, #tpu.memory_space<vmem>>, vector<16x256xf32>
    tpu.vector_store %arg6[%c384, %c0_419], %699 {strides = array<i32>} : memref<496x256xf32, #tpu.memory_space<vmem>>, vector<16x256xf32>,
    %c24_420 = arith.constant 24 : index
    %c0_421 = arith.constant 0 : index
    %701 = vector.load %arg7[%c24_420, %c0_421] : memref<31x256xf32, #tpu.memory_space<vmem>>, vector<1x256xf32>
    tpu.vector_store %arg7[%c24_420, %c0_421], %685 {strides = array<i32>} : memref<31x256xf32, #tpu.memory_space<vmem>>, vector<1x256xf32>,
    %c50_422 = arith.constant 50 : index
    %c0_423 = arith.constant 0 : index
    %702 = vector.load %arg2[%c50_422, %c0_423] : memref<64x256xf32, #tpu.memory_space<vmem>>, vector<1x256xf32>
    %c51 = arith.constant 51 : index
    %c0_424 = arith.constant 0 : index
    %703 = vector.load %arg2[%c51, %c0_424] : memref<64x256xf32, #tpu.memory_space<vmem>>, vector<1x256xf32>
    %c52_425 = arith.constant 52 : index
    %c0_426 = arith.constant 0 : index
    %704 = vector.load %arg2[%c52_425, %c0_426] : memref<64x256xf32, #tpu.memory_space<vmem>>, vector<1x256xf32>
    %705 = arith.addf %702, %703 : vector<1x256xf32>
    %706 = arith.addf %705, %704 : vector<1x256xf32>
    %cst_427 = arith.constant 1.000000e+00 : f32
    %707 = vector.broadcast %cst_427 : f32 to vector<1x256xf32>
    %708 = arith.mulf %706, %707 : vector<1x256xf32>
    %cst_428 = arith.constant 0.000000e+00 : f32
    %709 = vector.broadcast %cst_428 : f32 to vector<1x256xf32>
    %710 = arith.cmpf oeq, %708, %709 : vector<1x256xf32>
    %cst_429 = arith.constant 0.000000e+00 : f32
    %cst_430 = arith.constant 1.000000e+00 : f32
    %711 = vector.broadcast %cst_429 : f32 to vector<1x256xf32>
    %712 = vector.broadcast %cst_430 : f32 to vector<1x256xf32>
    %713 = arith.select %710, %711, %712 : vector<1x256xi1>, vector<1x256xf32>
    %cst_431 = arith.constant 1.000000e+00 : f32
    %714 = vector.broadcast %cst_431 : f32 to vector<1x256xf32>
    %715 = arith.divf %714, %708 : vector<1x256xf32>
    %cst_432 = arith.constant 0.000000e+00 : f32
    %716 = vector.broadcast %cst_432 : f32 to vector<1x256xf32>
    %717 = arith.select %710, %716, %715 : vector<1x256xi1>, vector<1x256xf32>
    %c100 = arith.constant 100 : index
    %c0_433 = arith.constant 0 : index
    %718 = vector.load %arg1[%c100, %c0_433] : memref<128x256xf32, #tpu.memory_space<vmem>>, vector<6x256xf32>
    %cst_434 = arith.constant dense<0.000000e+00> : vector<16x256xf32>
    %719 = tpu.matmul %0, %718, %cst_434 {dimension_numbers = #tpu.dot_dimension_numbers<[1], [0], [0], [1], [0, 0, 1, 1], [], []>} : vector<16x6xf32>, vector<6x256xf32>, vector<16x256xf32> -> vector<16x256xf32>
    %720 = vector.broadcast %717 : vector<1x256xf32> to vector<16x256xf32>
    %721 = arith.mulf %719, %720 : vector<16x256xf32>
    %722 = vector.broadcast %1 : vector<16x1xf32> to vector<16x256xf32>
    %723 = vector.broadcast %713 : vector<1x256xf32> to vector<16x256xf32>
    %724 = arith.mulf %722, %723 : vector<16x256xf32>
    %725 = arith.addf %721, %724 : vector<16x256xf32>
    %cst_435 = arith.constant 0.000000e+00 : f32
    %726 = vector.broadcast %cst_435 : f32 to vector<16x256xf32>
    %727 = arith.maximumf %725, %726 : vector<16x256xf32>
    %c400 = arith.constant 400 : index
    %c0_436 = arith.constant 0 : index
    %728 = vector.load %arg6[%c400, %c0_436] : memref<496x256xf32, #tpu.memory_space<vmem>>, vector<16x256xf32>
    tpu.vector_store %arg6[%c400, %c0_436], %727 {strides = array<i32>} : memref<496x256xf32, #tpu.memory_space<vmem>>, vector<16x256xf32>,
    %c25_437 = arith.constant 25 : index
    %c0_438 = arith.constant 0 : index
    %729 = vector.load %arg7[%c25_437, %c0_438] : memref<31x256xf32, #tpu.memory_space<vmem>>, vector<1x256xf32>
    tpu.vector_store %arg7[%c25_437, %c0_438], %713 {strides = array<i32>} : memref<31x256xf32, #tpu.memory_space<vmem>>, vector<1x256xf32>,
    %c52_439 = arith.constant 52 : index
    %c0_440 = arith.constant 0 : index
    %730 = vector.load %arg2[%c52_439, %c0_440] : memref<64x256xf32, #tpu.memory_space<vmem>>, vector<1x256xf32>
    %c53 = arith.constant 53 : index
    %c0_441 = arith.constant 0 : index
    %731 = vector.load %arg2[%c53, %c0_441] : memref<64x256xf32, #tpu.memory_space<vmem>>, vector<1x256xf32>
    %c54 = arith.constant 54 : index
    %c0_442 = arith.constant 0 : index
    %732 = vector.load %arg2[%c54, %c0_442] : memref<64x256xf32, #tpu.memory_space<vmem>>, vector<1x256xf32>
    %733 = arith.addf %730, %731 : vector<1x256xf32>
    %734 = arith.addf %733, %732 : vector<1x256xf32>
    %cst_443 = arith.constant 1.000000e+00 : f32
    %735 = vector.broadcast %cst_443 : f32 to vector<1x256xf32>
    %736 = arith.mulf %734, %735 : vector<1x256xf32>
    %cst_444 = arith.constant 0.000000e+00 : f32
    %737 = vector.broadcast %cst_444 : f32 to vector<1x256xf32>
    %738 = arith.cmpf oeq, %736, %737 : vector<1x256xf32>
    %cst_445 = arith.constant 0.000000e+00 : f32
    %cst_446 = arith.constant 1.000000e+00 : f32
    %739 = vector.broadcast %cst_445 : f32 to vector<1x256xf32>
    %740 = vector.broadcast %cst_446 : f32 to vector<1x256xf32>
    %741 = arith.select %738, %739, %740 : vector<1x256xi1>, vector<1x256xf32>
    %cst_447 = arith.constant 1.000000e+00 : f32
    %742 = vector.broadcast %cst_447 : f32 to vector<1x256xf32>
    %743 = arith.divf %742, %736 : vector<1x256xf32>
    %cst_448 = arith.constant 0.000000e+00 : f32
    %744 = vector.broadcast %cst_448 : f32 to vector<1x256xf32>
    %745 = arith.select %738, %744, %743 : vector<1x256xi1>, vector<1x256xf32>
    %c104 = arith.constant 104 : index
    %c0_449 = arith.constant 0 : index
    %746 = vector.load %arg1[%c104, %c0_449] : memref<128x256xf32, #tpu.memory_space<vmem>>, vector<6x256xf32>
    %cst_450 = arith.constant dense<0.000000e+00> : vector<16x256xf32>
    %747 = tpu.matmul %0, %746, %cst_450 {dimension_numbers = #tpu.dot_dimension_numbers<[1], [0], [0], [1], [0, 0, 1, 1], [], []>} : vector<16x6xf32>, vector<6x256xf32>, vector<16x256xf32> -> vector<16x256xf32>
    %748 = vector.broadcast %745 : vector<1x256xf32> to vector<16x256xf32>
    %749 = arith.mulf %747, %748 : vector<16x256xf32>
    %750 = vector.broadcast %1 : vector<16x1xf32> to vector<16x256xf32>
    %751 = vector.broadcast %741 : vector<1x256xf32> to vector<16x256xf32>
    %752 = arith.mulf %750, %751 : vector<16x256xf32>
    %753 = arith.addf %749, %752 : vector<16x256xf32>
    %cst_451 = arith.constant 0.000000e+00 : f32
    %754 = vector.broadcast %cst_451 : f32 to vector<16x256xf32>
    %755 = arith.maximumf %753, %754 : vector<16x256xf32>
    %c416 = arith.constant 416 : index
    %c0_452 = arith.constant 0 : index
    %756 = vector.load %arg6[%c416, %c0_452] : memref<496x256xf32, #tpu.memory_space<vmem>>, vector<16x256xf32>
    tpu.vector_store %arg6[%c416, %c0_452], %755 {strides = array<i32>} : memref<496x256xf32, #tpu.memory_space<vmem>>, vector<16x256xf32>,
    %c26_453 = arith.constant 26 : index
    %c0_454 = arith.constant 0 : index
    %757 = vector.load %arg7[%c26_453, %c0_454] : memref<31x256xf32, #tpu.memory_space<vmem>>, vector<1x256xf32>
    tpu.vector_store %arg7[%c26_453, %c0_454], %741 {strides = array<i32>} : memref<31x256xf32, #tpu.memory_space<vmem>>, vector<1x256xf32>,
    %c54_455 = arith.constant 54 : index
    %c0_456 = arith.constant 0 : index
    %758 = vector.load %arg2[%c54_455, %c0_456] : memref<64x256xf32, #tpu.memory_space<vmem>>, vector<1x256xf32>
    %c55 = arith.constant 55 : index
    %c0_457 = arith.constant 0 : index
    %759 = vector.load %arg2[%c55, %c0_457] : memref<64x256xf32, #tpu.memory_space<vmem>>, vector<1x256xf32>
    %c56_458 = arith.constant 56 : index
    %c0_459 = arith.constant 0 : index
    %760 = vector.load %arg2[%c56_458, %c0_459] : memref<64x256xf32, #tpu.memory_space<vmem>>, vector<1x256xf32>
    %761 = arith.addf %758, %759 : vector<1x256xf32>
    %762 = arith.addf %761, %760 : vector<1x256xf32>
    %cst_460 = arith.constant 1.000000e+00 : f32
    %763 = vector.broadcast %cst_460 : f32 to vector<1x256xf32>
    %764 = arith.mulf %762, %763 : vector<1x256xf32>
    %cst_461 = arith.constant 0.000000e+00 : f32
    %765 = vector.broadcast %cst_461 : f32 to vector<1x256xf32>
    %766 = arith.cmpf oeq, %764, %765 : vector<1x256xf32>
    %cst_462 = arith.constant 0.000000e+00 : f32
    %cst_463 = arith.constant 1.000000e+00 : f32
    %767 = vector.broadcast %cst_462 : f32 to vector<1x256xf32>
    %768 = vector.broadcast %cst_463 : f32 to vector<1x256xf32>
    %769 = arith.select %766, %767, %768 : vector<1x256xi1>, vector<1x256xf32>
    %cst_464 = arith.constant 1.000000e+00 : f32
    %770 = vector.broadcast %cst_464 : f32 to vector<1x256xf32>
    %771 = arith.divf %770, %764 : vector<1x256xf32>
    %cst_465 = arith.constant 0.000000e+00 : f32
    %772 = vector.broadcast %cst_465 : f32 to vector<1x256xf32>
    %773 = arith.select %766, %772, %771 : vector<1x256xi1>, vector<1x256xf32>
    %c108 = arith.constant 108 : index
    %c0_466 = arith.constant 0 : index
    %774 = vector.load %arg1[%c108, %c0_466] : memref<128x256xf32, #tpu.memory_space<vmem>>, vector<6x256xf32>
    %cst_467 = arith.constant dense<0.000000e+00> : vector<16x256xf32>
    %775 = tpu.matmul %0, %774, %cst_467 {dimension_numbers = #tpu.dot_dimension_numbers<[1], [0], [0], [1], [0, 0, 1, 1], [], []>} : vector<16x6xf32>, vector<6x256xf32>, vector<16x256xf32> -> vector<16x256xf32>
    %776 = vector.broadcast %773 : vector<1x256xf32> to vector<16x256xf32>
    %777 = arith.mulf %775, %776 : vector<16x256xf32>
    %778 = vector.broadcast %1 : vector<16x1xf32> to vector<16x256xf32>
    %779 = vector.broadcast %769 : vector<1x256xf32> to vector<16x256xf32>
    %780 = arith.mulf %778, %779 : vector<16x256xf32>
    %781 = arith.addf %777, %780 : vector<16x256xf32>
    %cst_468 = arith.constant 0.000000e+00 : f32
    %782 = vector.broadcast %cst_468 : f32 to vector<16x256xf32>
    %783 = arith.maximumf %781, %782 : vector<16x256xf32>
    %c432 = arith.constant 432 : index
    %c0_469 = arith.constant 0 : index
    %784 = vector.load %arg6[%c432, %c0_469] : memref<496x256xf32, #tpu.memory_space<vmem>>, vector<16x256xf32>
    tpu.vector_store %arg6[%c432, %c0_469], %783 {strides = array<i32>} : memref<496x256xf32, #tpu.memory_space<vmem>>, vector<16x256xf32>,
    %c27_470 = arith.constant 27 : index
    %c0_471 = arith.constant 0 : index
    %785 = vector.load %arg7[%c27_470, %c0_471] : memref<31x256xf32, #tpu.memory_space<vmem>>, vector<1x256xf32>
    tpu.vector_store %arg7[%c27_470, %c0_471], %769 {strides = array<i32>} : memref<31x256xf32, #tpu.memory_space<vmem>>, vector<1x256xf32>,
    %c56_472 = arith.constant 56 : index
    %c0_473 = arith.constant 0 : index
    %786 = vector.load %arg2[%c56_472, %c0_473] : memref<64x256xf32, #tpu.memory_space<vmem>>, vector<1x256xf32>
    %c57 = arith.constant 57 : index
    %c0_474 = arith.constant 0 : index
    %787 = vector.load %arg2[%c57, %c0_474] : memref<64x256xf32, #tpu.memory_space<vmem>>, vector<1x256xf32>
    %c58 = arith.constant 58 : index
    %c0_475 = arith.constant 0 : index
    %788 = vector.load %arg2[%c58, %c0_475] : memref<64x256xf32, #tpu.memory_space<vmem>>, vector<1x256xf32>
    %789 = arith.addf %786, %787 : vector<1x256xf32>
    %790 = arith.addf %789, %788 : vector<1x256xf32>
    %cst_476 = arith.constant 1.000000e+00 : f32
    %791 = vector.broadcast %cst_476 : f32 to vector<1x256xf32>
    %792 = arith.mulf %790, %791 : vector<1x256xf32>
    %cst_477 = arith.constant 0.000000e+00 : f32
    %793 = vector.broadcast %cst_477 : f32 to vector<1x256xf32>
    %794 = arith.cmpf oeq, %792, %793 : vector<1x256xf32>
    %cst_478 = arith.constant 0.000000e+00 : f32
    %cst_479 = arith.constant 1.000000e+00 : f32
    %795 = vector.broadcast %cst_478 : f32 to vector<1x256xf32>
    %796 = vector.broadcast %cst_479 : f32 to vector<1x256xf32>
    %797 = arith.select %794, %795, %796 : vector<1x256xi1>, vector<1x256xf32>
    %cst_480 = arith.constant 1.000000e+00 : f32
    %798 = vector.broadcast %cst_480 : f32 to vector<1x256xf32>
    %799 = arith.divf %798, %792 : vector<1x256xf32>
    %cst_481 = arith.constant 0.000000e+00 : f32
    %800 = vector.broadcast %cst_481 : f32 to vector<1x256xf32>
    %801 = arith.select %794, %800, %799 : vector<1x256xi1>, vector<1x256xf32>
    %c112_482 = arith.constant 112 : index
    %c0_483 = arith.constant 0 : index
    %802 = vector.load %arg1[%c112_482, %c0_483] : memref<128x256xf32, #tpu.memory_space<vmem>>, vector<6x256xf32>
    %cst_484 = arith.constant dense<0.000000e+00> : vector<16x256xf32>
    %803 = tpu.matmul %0, %802, %cst_484 {dimension_numbers = #tpu.dot_dimension_numbers<[1], [0], [0], [1], [0, 0, 1, 1], [], []>} : vector<16x6xf32>, vector<6x256xf32>, vector<16x256xf32> -> vector<16x256xf32>
    %804 = vector.broadcast %801 : vector<1x256xf32> to vector<16x256xf32>
    %805 = arith.mulf %803, %804 : vector<16x256xf32>
    %806 = vector.broadcast %1 : vector<16x1xf32> to vector<16x256xf32>
    %807 = vector.broadcast %797 : vector<1x256xf32> to vector<16x256xf32>
    %808 = arith.mulf %806, %807 : vector<16x256xf32>
    %809 = arith.addf %805, %808 : vector<16x256xf32>
    %cst_485 = arith.constant 0.000000e+00 : f32
    %810 = vector.broadcast %cst_485 : f32 to vector<16x256xf32>
    %811 = arith.maximumf %809, %810 : vector<16x256xf32>
    %c448 = arith.constant 448 : index
    %c0_486 = arith.constant 0 : index
    %812 = vector.load %arg6[%c448, %c0_486] : memref<496x256xf32, #tpu.memory_space<vmem>>, vector<16x256xf32>
    tpu.vector_store %arg6[%c448, %c0_486], %811 {strides = array<i32>} : memref<496x256xf32, #tpu.memory_space<vmem>>, vector<16x256xf32>,
    %c28_487 = arith.constant 28 : index
    %c0_488 = arith.constant 0 : index
    %813 = vector.load %arg7[%c28_487, %c0_488] : memref<31x256xf32, #tpu.memory_space<vmem>>, vector<1x256xf32>
    tpu.vector_store %arg7[%c28_487, %c0_488], %797 {strides = array<i32>} : memref<31x256xf32, #tpu.memory_space<vmem>>, vector<1x256xf32>,
    %c58_489 = arith.constant 58 : index
    %c0_490 = arith.constant 0 : index
    %814 = vector.load %arg2[%c58_489, %c0_490] : memref<64x256xf32, #tpu.memory_space<vmem>>, vector<1x256xf32>
    %c59 = arith.constant 59 : index
    %c0_491 = arith.constant 0 : index
    %815 = vector.load %arg2[%c59, %c0_491] : memref<64x256xf32, #tpu.memory_space<vmem>>, vector<1x256xf32>
    %c60_492 = arith.constant 60 : index
    %c0_493 = arith.constant 0 : index
    %816 = vector.load %arg2[%c60_492, %c0_493] : memref<64x256xf32, #tpu.memory_space<vmem>>, vector<1x256xf32>
    %817 = arith.addf %814, %815 : vector<1x256xf32>
    %818 = arith.addf %817, %816 : vector<1x256xf32>
    %cst_494 = arith.constant 1.000000e+00 : f32
    %819 = vector.broadcast %cst_494 : f32 to vector<1x256xf32>
    %820 = arith.mulf %818, %819 : vector<1x256xf32>
    %cst_495 = arith.constant 0.000000e+00 : f32
    %821 = vector.broadcast %cst_495 : f32 to vector<1x256xf32>
    %822 = arith.cmpf oeq, %820, %821 : vector<1x256xf32>
    %cst_496 = arith.constant 0.000000e+00 : f32
    %cst_497 = arith.constant 1.000000e+00 : f32
    %823 = vector.broadcast %cst_496 : f32 to vector<1x256xf32>
    %824 = vector.broadcast %cst_497 : f32 to vector<1x256xf32>
    %825 = arith.select %822, %823, %824 : vector<1x256xi1>, vector<1x256xf32>
    %cst_498 = arith.constant 1.000000e+00 : f32
    %826 = vector.broadcast %cst_498 : f32 to vector<1x256xf32>
    %827 = arith.divf %826, %820 : vector<1x256xf32>
    %cst_499 = arith.constant 0.000000e+00 : f32
    %828 = vector.broadcast %cst_499 : f32 to vector<1x256xf32>
    %829 = arith.select %822, %828, %827 : vector<1x256xi1>, vector<1x256xf32>
    %c116 = arith.constant 116 : index
    %c0_500 = arith.constant 0 : index
    %830 = vector.load %arg1[%c116, %c0_500] : memref<128x256xf32, #tpu.memory_space<vmem>>, vector<6x256xf32>
    %cst_501 = arith.constant dense<0.000000e+00> : vector<16x256xf32>
    %831 = tpu.matmul %0, %830, %cst_501 {dimension_numbers = #tpu.dot_dimension_numbers<[1], [0], [0], [1], [0, 0, 1, 1], [], []>} : vector<16x6xf32>, vector<6x256xf32>, vector<16x256xf32> -> vector<16x256xf32>
    %832 = vector.broadcast %829 : vector<1x256xf32> to vector<16x256xf32>
    %833 = arith.mulf %831, %832 : vector<16x256xf32>
    %834 = vector.broadcast %1 : vector<16x1xf32> to vector<16x256xf32>
    %835 = vector.broadcast %825 : vector<1x256xf32> to vector<16x256xf32>
    %836 = arith.mulf %834, %835 : vector<16x256xf32>
    %837 = arith.addf %833, %836 : vector<16x256xf32>
    %cst_502 = arith.constant 0.000000e+00 : f32
    %838 = vector.broadcast %cst_502 : f32 to vector<16x256xf32>
    %839 = arith.maximumf %837, %838 : vector<16x256xf32>
    %c464 = arith.constant 464 : index
    %c0_503 = arith.constant 0 : index
    %840 = vector.load %arg6[%c464, %c0_503] : memref<496x256xf32, #tpu.memory_space<vmem>>, vector<16x256xf32>
    tpu.vector_store %arg6[%c464, %c0_503], %839 {strides = array<i32>} : memref<496x256xf32, #tpu.memory_space<vmem>>, vector<16x256xf32>,
    %c29_504 = arith.constant 29 : index
    %c0_505 = arith.constant 0 : index
    %841 = vector.load %arg7[%c29_504, %c0_505] : memref<31x256xf32, #tpu.memory_space<vmem>>, vector<1x256xf32>
    tpu.vector_store %arg7[%c29_504, %c0_505], %825 {strides = array<i32>} : memref<31x256xf32, #tpu.memory_space<vmem>>, vector<1x256xf32>,
    %c60_506 = arith.constant 60 : index
    %c0_507 = arith.constant 0 : index
    %842 = vector.load %arg2[%c60_506, %c0_507] : memref<64x256xf32, #tpu.memory_space<vmem>>, vector<1x256xf32>
    %c61 = arith.constant 61 : index
    %c0_508 = arith.constant 0 : index
    %843 = vector.load %arg2[%c61, %c0_508] : memref<64x256xf32, #tpu.memory_space<vmem>>, vector<1x256xf32>
    %c62 = arith.constant 62 : index
    %c0_509 = arith.constant 0 : index
    %844 = vector.load %arg2[%c62, %c0_509] : memref<64x256xf32, #tpu.memory_space<vmem>>, vector<1x256xf32>
    %845 = arith.addf %842, %843 : vector<1x256xf32>
    %846 = arith.addf %845, %844 : vector<1x256xf32>
    %cst_510 = arith.constant 1.000000e+00 : f32
    %847 = vector.broadcast %cst_510 : f32 to vector<1x256xf32>
    %848 = arith.mulf %846, %847 : vector<1x256xf32>
    %cst_511 = arith.constant 0.000000e+00 : f32
    %849 = vector.broadcast %cst_511 : f32 to vector<1x256xf32>
    %850 = arith.cmpf oeq, %848, %849 : vector<1x256xf32>
    %cst_512 = arith.constant 0.000000e+00 : f32
    %cst_513 = arith.constant 1.000000e+00 : f32
    %851 = vector.broadcast %cst_512 : f32 to vector<1x256xf32>
    %852 = vector.broadcast %cst_513 : f32 to vector<1x256xf32>
    %853 = arith.select %850, %851, %852 : vector<1x256xi1>, vector<1x256xf32>
    %cst_514 = arith.constant 1.000000e+00 : f32
    %854 = vector.broadcast %cst_514 : f32 to vector<1x256xf32>
    %855 = arith.divf %854, %848 : vector<1x256xf32>
    %cst_515 = arith.constant 0.000000e+00 : f32
    %856 = vector.broadcast %cst_515 : f32 to vector<1x256xf32>
    %857 = arith.select %850, %856, %855 : vector<1x256xi1>, vector<1x256xf32>
    %c120 = arith.constant 120 : index
    %c0_516 = arith.constant 0 : index
    %858 = vector.load %arg1[%c120, %c0_516] : memref<128x256xf32, #tpu.memory_space<vmem>>, vector<6x256xf32>
    %cst_517 = arith.constant dense<0.000000e+00> : vector<16x256xf32>
    %859 = tpu.matmul %0, %858, %cst_517 {dimension_numbers = #tpu.dot_dimension_numbers<[1], [0], [0], [1], [0, 0, 1, 1], [], []>} : vector<16x6xf32>, vector<6x256xf32>, vector<16x256xf32> -> vector<16x256xf32>
    %860 = vector.broadcast %857 : vector<1x256xf32> to vector<16x256xf32>
    %861 = arith.mulf %859, %860 : vector<16x256xf32>
    %862 = vector.broadcast %1 : vector<16x1xf32> to vector<16x256xf32>
    %863 = vector.broadcast %853 : vector<1x256xf32> to vector<16x256xf32>
    %864 = arith.mulf %862, %863 : vector<16x256xf32>
    %865 = arith.addf %861, %864 : vector<16x256xf32>
    %cst_518 = arith.constant 0.000000e+00 : f32
    %866 = vector.broadcast %cst_518 : f32 to vector<16x256xf32>
    %867 = arith.maximumf %865, %866 : vector<16x256xf32>
    %c480 = arith.constant 480 : index
    %c0_519 = arith.constant 0 : index
    %868 = vector.load %arg6[%c480, %c0_519] : memref<496x256xf32, #tpu.memory_space<vmem>>, vector<16x256xf32>
    tpu.vector_store %arg6[%c480, %c0_519], %867 {strides = array<i32>} : memref<496x256xf32, #tpu.memory_space<vmem>>, vector<16x256xf32>,
    %c30_520 = arith.constant 30 : index
    %c0_521 = arith.constant 0 : index
    %869 = vector.load %arg7[%c30_520, %c0_521] : memref<31x256xf32, #tpu.memory_space<vmem>>, vector<1x256xf32>
    tpu.vector_store %arg7[%c30_520, %c0_521], %853 {strides = array<i32>} : memref<31x256xf32, #tpu.memory_space<vmem>>, vector<1x256xf32>,
    %c16_522 = arith.constant 16 : index
    %c0_523 = arith.constant 0 : index
    %870 = vector.load %arg3[%c16_522, %c0_523] : memref<152x64xf32, #tpu.memory_space<vmem>>, vector<16x48xf32>
    %c16_524 = arith.constant 16 : index
    %c0_525 = arith.constant 0 : index
    %871 = vector.load %arg4[%c16_524, %c0_525] : memref<152x1xf32, #tpu.memory_space<vmem>>, vector<16x1xf32>
    %c0_526 = arith.constant 0 : index
    %c0_527 = arith.constant 0 : index
    %872 = vector.load %arg7[%c0_526, %c0_527] : memref<31x256xf32, #tpu.memory_space<vmem>>, vector<1x256xf32>
    %c1_528 = arith.constant 1 : index
    %c0_529 = arith.constant 0 : index
    %873 = vector.load %arg7[%c1_528, %c0_529] : memref<31x256xf32, #tpu.memory_space<vmem>>, vector<1x256xf32>
    %c2_530 = arith.constant 2 : index
    %c0_531 = arith.constant 0 : index
    %874 = vector.load %arg7[%c2_530, %c0_531] : memref<31x256xf32, #tpu.memory_space<vmem>>, vector<1x256xf32>
    %875 = arith.addf %872, %873 : vector<1x256xf32>
    %876 = arith.addf %875, %874 : vector<1x256xf32>
    %cst_532 = arith.constant 1.600000e+01 : f32
    %877 = vector.broadcast %cst_532 : f32 to vector<1x256xf32>
    %878 = arith.mulf %876, %877 : vector<1x256xf32>
    %cst_533 = arith.constant 0.000000e+00 : f32
    %879 = vector.broadcast %cst_533 : f32 to vector<1x256xf32>
    %880 = arith.cmpf oeq, %878, %879 : vector<1x256xf32>
    %cst_534 = arith.constant 0.000000e+00 : f32
    %cst_535 = arith.constant 1.000000e+00 : f32
    %881 = vector.broadcast %cst_534 : f32 to vector<1x256xf32>
    %882 = vector.broadcast %cst_535 : f32 to vector<1x256xf32>
    %883 = arith.select %880, %881, %882 : vector<1x256xi1>, vector<1x256xf32>
    %cst_536 = arith.constant 1.000000e+00 : f32
    %884 = vector.broadcast %cst_536 : f32 to vector<1x256xf32>
    %885 = arith.divf %884, %878 : vector<1x256xf32>
    %cst_537 = arith.constant 0.000000e+00 : f32
    %886 = vector.broadcast %cst_537 : f32 to vector<1x256xf32>
    %887 = arith.select %880, %886, %885 : vector<1x256xi1>, vector<1x256xf32>
    %c0_538 = arith.constant 0 : index
    %c0_539 = arith.constant 0 : index
    %888 = vector.load %arg6[%c0_538, %c0_539] : memref<496x256xf32, #tpu.memory_space<vmem>>, vector<48x256xf32>
    %cst_540 = arith.constant dense<0.000000e+00> : vector<16x256xf32>
    %889 = tpu.matmul %870, %888, %cst_540 {dimension_numbers = #tpu.dot_dimension_numbers<[1], [0], [0], [1], [0, 0, 1, 1], [], []>} : vector<16x48xf32>, vector<48x256xf32>, vector<16x256xf32> -> vector<16x256xf32>
    %890 = vector.broadcast %887 : vector<1x256xf32> to vector<16x256xf32>
    %891 = arith.mulf %889, %890 : vector<16x256xf32>
    %892 = vector.broadcast %871 : vector<16x1xf32> to vector<16x256xf32>
    %893 = vector.broadcast %883 : vector<1x256xf32> to vector<16x256xf32>
    %894 = arith.mulf %892, %893 : vector<16x256xf32>
    %895 = arith.addf %891, %894 : vector<16x256xf32>
    %cst_541 = arith.constant 0.000000e+00 : f32
    %896 = vector.broadcast %cst_541 : f32 to vector<16x256xf32>
    %897 = arith.maximumf %895, %896 : vector<16x256xf32>
    %c0_542 = arith.constant 0 : index
    %c0_543 = arith.constant 0 : index
    %898 = vector.load %arg8[%c0_542, %c0_543] : memref<240x256xf32, #tpu.memory_space<vmem>>, vector<16x256xf32>
    tpu.vector_store %arg8[%c0_542, %c0_543], %897 {strides = array<i32>} : memref<240x256xf32, #tpu.memory_space<vmem>>, vector<16x256xf32>,
    %c0_544 = arith.constant 0 : index
    %c0_545 = arith.constant 0 : index
    %899 = vector.load %arg9[%c0_544, %c0_545] : memref<15x256xf32, #tpu.memory_space<vmem>>, vector<1x256xf32>
    tpu.vector_store %arg9[%c0_544, %c0_545], %883 {strides = array<i32>} : memref<15x256xf32, #tpu.memory_space<vmem>>, vector<1x256xf32>,
    %c2_546 = arith.constant 2 : index
    %c0_547 = arith.constant 0 : index
    %900 = vector.load %arg7[%c2_546, %c0_547] : memref<31x256xf32, #tpu.memory_space<vmem>>, vector<1x256xf32>
    %c3_548 = arith.constant 3 : index
    %c0_549 = arith.constant 0 : index
    %901 = vector.load %arg7[%c3_548, %c0_549] : memref<31x256xf32, #tpu.memory_space<vmem>>, vector<1x256xf32>
    %c4_550 = arith.constant 4 : index
    %c0_551 = arith.constant 0 : index
    %902 = vector.load %arg7[%c4_550, %c0_551] : memref<31x256xf32, #tpu.memory_space<vmem>>, vector<1x256xf32>
    %903 = arith.addf %900, %901 : vector<1x256xf32>
    %904 = arith.addf %903, %902 : vector<1x256xf32>
    %cst_552 = arith.constant 1.600000e+01 : f32
    %905 = vector.broadcast %cst_552 : f32 to vector<1x256xf32>
    %906 = arith.mulf %904, %905 : vector<1x256xf32>
    %cst_553 = arith.constant 0.000000e+00 : f32
    %907 = vector.broadcast %cst_553 : f32 to vector<1x256xf32>
    %908 = arith.cmpf oeq, %906, %907 : vector<1x256xf32>
    %cst_554 = arith.constant 0.000000e+00 : f32
    %cst_555 = arith.constant 1.000000e+00 : f32
    %909 = vector.broadcast %cst_554 : f32 to vector<1x256xf32>
    %910 = vector.broadcast %cst_555 : f32 to vector<1x256xf32>
    %911 = arith.select %908, %909, %910 : vector<1x256xi1>, vector<1x256xf32>
    %cst_556 = arith.constant 1.000000e+00 : f32
    %912 = vector.broadcast %cst_556 : f32 to vector<1x256xf32>
    %913 = arith.divf %912, %906 : vector<1x256xf32>
    %cst_557 = arith.constant 0.000000e+00 : f32
    %914 = vector.broadcast %cst_557 : f32 to vector<1x256xf32>
    %915 = arith.select %908, %914, %913 : vector<1x256xi1>, vector<1x256xf32>
    %c32_558 = arith.constant 32 : index
    %c0_559 = arith.constant 0 : index
    %916 = vector.load %arg6[%c32_558, %c0_559] : memref<496x256xf32, #tpu.memory_space<vmem>>, vector<48x256xf32>
    %cst_560 = arith.constant dense<0.000000e+00> : vector<16x256xf32>
    %917 = tpu.matmul %870, %916, %cst_560 {dimension_numbers = #tpu.dot_dimension_numbers<[1], [0], [0], [1], [0, 0, 1, 1], [], []>} : vector<16x48xf32>, vector<48x256xf32>, vector<16x256xf32> -> vector<16x256xf32>
    %918 = vector.broadcast %915 : vector<1x256xf32> to vector<16x256xf32>
    %919 = arith.mulf %917, %918 : vector<16x256xf32>
    %920 = vector.broadcast %871 : vector<16x1xf32> to vector<16x256xf32>
    %921 = vector.broadcast %911 : vector<1x256xf32> to vector<16x256xf32>
    %922 = arith.mulf %920, %921 : vector<16x256xf32>
    %923 = arith.addf %919, %922 : vector<16x256xf32>
    %cst_561 = arith.constant 0.000000e+00 : f32
    %924 = vector.broadcast %cst_561 : f32 to vector<16x256xf32>
    %925 = arith.maximumf %923, %924 : vector<16x256xf32>
    %c16_562 = arith.constant 16 : index
    %c0_563 = arith.constant 0 : index
    %926 = vector.load %arg8[%c16_562, %c0_563] : memref<240x256xf32, #tpu.memory_space<vmem>>, vector<16x256xf32>
    tpu.vector_store %arg8[%c16_562, %c0_563], %925 {strides = array<i32>} : memref<240x256xf32, #tpu.memory_space<vmem>>, vector<16x256xf32>,
    %c1_564 = arith.constant 1 : index
    %c0_565 = arith.constant 0 : index
    %927 = vector.load %arg9[%c1_564, %c0_565] : memref<15x256xf32, #tpu.memory_space<vmem>>, vector<1x256xf32>
    tpu.vector_store %arg9[%c1_564, %c0_565], %911 {strides = array<i32>} : memref<15x256xf32, #tpu.memory_space<vmem>>, vector<1x256xf32>,
    %c4_566 = arith.constant 4 : index
    %c0_567 = arith.constant 0 : index
    %928 = vector.load %arg7[%c4_566, %c0_567] : memref<31x256xf32, #tpu.memory_space<vmem>>, vector<1x256xf32>
    %c5_568 = arith.constant 5 : index
    %c0_569 = arith.constant 0 : index
    %929 = vector.load %arg7[%c5_568, %c0_569] : memref<31x256xf32, #tpu.memory_space<vmem>>, vector<1x256xf32>
    %c6_570 = arith.constant 6 : index
    %c0_571 = arith.constant 0 : index
    %930 = vector.load %arg7[%c6_570, %c0_571] : memref<31x256xf32, #tpu.memory_space<vmem>>, vector<1x256xf32>
    %931 = arith.addf %928, %929 : vector<1x256xf32>
    %932 = arith.addf %931, %930 : vector<1x256xf32>
    %cst_572 = arith.constant 1.600000e+01 : f32
    %933 = vector.broadcast %cst_572 : f32 to vector<1x256xf32>
    %934 = arith.mulf %932, %933 : vector<1x256xf32>
    %cst_573 = arith.constant 0.000000e+00 : f32
    %935 = vector.broadcast %cst_573 : f32 to vector<1x256xf32>
    %936 = arith.cmpf oeq, %934, %935 : vector<1x256xf32>
    %cst_574 = arith.constant 0.000000e+00 : f32
    %cst_575 = arith.constant 1.000000e+00 : f32
    %937 = vector.broadcast %cst_574 : f32 to vector<1x256xf32>
    %938 = vector.broadcast %cst_575 : f32 to vector<1x256xf32>
    %939 = arith.select %936, %937, %938 : vector<1x256xi1>, vector<1x256xf32>
    %cst_576 = arith.constant 1.000000e+00 : f32
    %940 = vector.broadcast %cst_576 : f32 to vector<1x256xf32>
    %941 = arith.divf %940, %934 : vector<1x256xf32>
    %cst_577 = arith.constant 0.000000e+00 : f32
    %942 = vector.broadcast %cst_577 : f32 to vector<1x256xf32>
    %943 = arith.select %936, %942, %941 : vector<1x256xi1>, vector<1x256xf32>
    %c64_578 = arith.constant 64 : index
    %c0_579 = arith.constant 0 : index
    %944 = vector.load %arg6[%c64_578, %c0_579] : memref<496x256xf32, #tpu.memory_space<vmem>>, vector<48x256xf32>
    %cst_580 = arith.constant dense<0.000000e+00> : vector<16x256xf32>
    %945 = tpu.matmul %870, %944, %cst_580 {dimension_numbers = #tpu.dot_dimension_numbers<[1], [0], [0], [1], [0, 0, 1, 1], [], []>} : vector<16x48xf32>, vector<48x256xf32>, vector<16x256xf32> -> vector<16x256xf32>
    %946 = vector.broadcast %943 : vector<1x256xf32> to vector<16x256xf32>
    %947 = arith.mulf %945, %946 : vector<16x256xf32>
    %948 = vector.broadcast %871 : vector<16x1xf32> to vector<16x256xf32>
    %949 = vector.broadcast %939 : vector<1x256xf32> to vector<16x256xf32>
    %950 = arith.mulf %948, %949 : vector<16x256xf32>
    %951 = arith.addf %947, %950 : vector<16x256xf32>
    %cst_581 = arith.constant 0.000000e+00 : f32
    %952 = vector.broadcast %cst_581 : f32 to vector<16x256xf32>
    %953 = arith.maximumf %951, %952 : vector<16x256xf32>
    %c32_582 = arith.constant 32 : index
    %c0_583 = arith.constant 0 : index
    %954 = vector.load %arg8[%c32_582, %c0_583] : memref<240x256xf32, #tpu.memory_space<vmem>>, vector<16x256xf32>
    tpu.vector_store %arg8[%c32_582, %c0_583], %953 {strides = array<i32>} : memref<240x256xf32, #tpu.memory_space<vmem>>, vector<16x256xf32>,
    %c2_584 = arith.constant 2 : index
    %c0_585 = arith.constant 0 : index
    %955 = vector.load %arg9[%c2_584, %c0_585] : memref<15x256xf32, #tpu.memory_space<vmem>>, vector<1x256xf32>
    tpu.vector_store %arg9[%c2_584, %c0_585], %939 {strides = array<i32>} : memref<15x256xf32, #tpu.memory_space<vmem>>, vector<1x256xf32>,
    %c6_586 = arith.constant 6 : index
    %c0_587 = arith.constant 0 : index
    %956 = vector.load %arg7[%c6_586, %c0_587] : memref<31x256xf32, #tpu.memory_space<vmem>>, vector<1x256xf32>
    %c7_588 = arith.constant 7 : index
    %c0_589 = arith.constant 0 : index
    %957 = vector.load %arg7[%c7_588, %c0_589] : memref<31x256xf32, #tpu.memory_space<vmem>>, vector<1x256xf32>
    %c8_590 = arith.constant 8 : index
    %c0_591 = arith.constant 0 : index
    %958 = vector.load %arg7[%c8_590, %c0_591] : memref<31x256xf32, #tpu.memory_space<vmem>>, vector<1x256xf32>
    %959 = arith.addf %956, %957 : vector<1x256xf32>
    %960 = arith.addf %959, %958 : vector<1x256xf32>
    %cst_592 = arith.constant 1.600000e+01 : f32
    %961 = vector.broadcast %cst_592 : f32 to vector<1x256xf32>
    %962 = arith.mulf %960, %961 : vector<1x256xf32>
    %cst_593 = arith.constant 0.000000e+00 : f32
    %963 = vector.broadcast %cst_593 : f32 to vector<1x256xf32>
    %964 = arith.cmpf oeq, %962, %963 : vector<1x256xf32>
    %cst_594 = arith.constant 0.000000e+00 : f32
    %cst_595 = arith.constant 1.000000e+00 : f32
    %965 = vector.broadcast %cst_594 : f32 to vector<1x256xf32>
    %966 = vector.broadcast %cst_595 : f32 to vector<1x256xf32>
    %967 = arith.select %964, %965, %966 : vector<1x256xi1>, vector<1x256xf32>
    %cst_596 = arith.constant 1.000000e+00 : f32
    %968 = vector.broadcast %cst_596 : f32 to vector<1x256xf32>
    %969 = arith.divf %968, %962 : vector<1x256xf32>
    %cst_597 = arith.constant 0.000000e+00 : f32
    %970 = vector.broadcast %cst_597 : f32 to vector<1x256xf32>
    %971 = arith.select %964, %970, %969 : vector<1x256xi1>, vector<1x256xf32>
    %c96_598 = arith.constant 96 : index
    %c0_599 = arith.constant 0 : index
    %972 = vector.load %arg6[%c96_598, %c0_599] : memref<496x256xf32, #tpu.memory_space<vmem>>, vector<48x256xf32>
    %cst_600 = arith.constant dense<0.000000e+00> : vector<16x256xf32>
    %973 = tpu.matmul %870, %972, %cst_600 {dimension_numbers = #tpu.dot_dimension_numbers<[1], [0], [0], [1], [0, 0, 1, 1], [], []>} : vector<16x48xf32>, vector<48x256xf32>, vector<16x256xf32> -> vector<16x256xf32>
    %974 = vector.broadcast %971 : vector<1x256xf32> to vector<16x256xf32>
    %975 = arith.mulf %973, %974 : vector<16x256xf32>
    %976 = vector.broadcast %871 : vector<16x1xf32> to vector<16x256xf32>
    %977 = vector.broadcast %967 : vector<1x256xf32> to vector<16x256xf32>
    %978 = arith.mulf %976, %977 : vector<16x256xf32>
    %979 = arith.addf %975, %978 : vector<16x256xf32>
    %cst_601 = arith.constant 0.000000e+00 : f32
    %980 = vector.broadcast %cst_601 : f32 to vector<16x256xf32>
    %981 = arith.maximumf %979, %980 : vector<16x256xf32>
    %c48_602 = arith.constant 48 : index
    %c0_603 = arith.constant 0 : index
    %982 = vector.load %arg8[%c48_602, %c0_603] : memref<240x256xf32, #tpu.memory_space<vmem>>, vector<16x256xf32>
    tpu.vector_store %arg8[%c48_602, %c0_603], %981 {strides = array<i32>} : memref<240x256xf32, #tpu.memory_space<vmem>>, vector<16x256xf32>,
    %c3_604 = arith.constant 3 : index
    %c0_605 = arith.constant 0 : index
    %983 = vector.load %arg9[%c3_604, %c0_605] : memref<15x256xf32, #tpu.memory_space<vmem>>, vector<1x256xf32>
    tpu.vector_store %arg9[%c3_604, %c0_605], %967 {strides = array<i32>} : memref<15x256xf32, #tpu.memory_space<vmem>>, vector<1x256xf32>,
    %c8_606 = arith.constant 8 : index
    %c0_607 = arith.constant 0 : index
    %984 = vector.load %arg7[%c8_606, %c0_607] : memref<31x256xf32, #tpu.memory_space<vmem>>, vector<1x256xf32>
    %c9_608 = arith.constant 9 : index
    %c0_609 = arith.constant 0 : index
    %985 = vector.load %arg7[%c9_608, %c0_609] : memref<31x256xf32, #tpu.memory_space<vmem>>, vector<1x256xf32>
    %c10_610 = arith.constant 10 : index
    %c0_611 = arith.constant 0 : index
    %986 = vector.load %arg7[%c10_610, %c0_611] : memref<31x256xf32, #tpu.memory_space<vmem>>, vector<1x256xf32>
    %987 = arith.addf %984, %985 : vector<1x256xf32>
    %988 = arith.addf %987, %986 : vector<1x256xf32>
    %cst_612 = arith.constant 1.600000e+01 : f32
    %989 = vector.broadcast %cst_612 : f32 to vector<1x256xf32>
    %990 = arith.mulf %988, %989 : vector<1x256xf32>
    %cst_613 = arith.constant 0.000000e+00 : f32
    %991 = vector.broadcast %cst_613 : f32 to vector<1x256xf32>
    %992 = arith.cmpf oeq, %990, %991 : vector<1x256xf32>
    %cst_614 = arith.constant 0.000000e+00 : f32
    %cst_615 = arith.constant 1.000000e+00 : f32
    %993 = vector.broadcast %cst_614 : f32 to vector<1x256xf32>
    %994 = vector.broadcast %cst_615 : f32 to vector<1x256xf32>
    %995 = arith.select %992, %993, %994 : vector<1x256xi1>, vector<1x256xf32>
    %cst_616 = arith.constant 1.000000e+00 : f32
    %996 = vector.broadcast %cst_616 : f32 to vector<1x256xf32>
    %997 = arith.divf %996, %990 : vector<1x256xf32>
    %cst_617 = arith.constant 0.000000e+00 : f32
    %998 = vector.broadcast %cst_617 : f32 to vector<1x256xf32>
    %999 = arith.select %992, %998, %997 : vector<1x256xi1>, vector<1x256xf32>
    %c128_618 = arith.constant 128 : index
    %c0_619 = arith.constant 0 : index
    %1000 = vector.load %arg6[%c128_618, %c0_619] : memref<496x256xf32, #tpu.memory_space<vmem>>, vector<48x256xf32>
    %cst_620 = arith.constant dense<0.000000e+00> : vector<16x256xf32>
    %1001 = tpu.matmul %870, %1000, %cst_620 {dimension_numbers = #tpu.dot_dimension_numbers<[1], [0], [0], [1], [0, 0, 1, 1], [], []>} : vector<16x48xf32>, vector<48x256xf32>, vector<16x256xf32> -> vector<16x256xf32>
    %1002 = vector.broadcast %999 : vector<1x256xf32> to vector<16x256xf32>
    %1003 = arith.mulf %1001, %1002 : vector<16x256xf32>
    %1004 = vector.broadcast %871 : vector<16x1xf32> to vector<16x256xf32>
    %1005 = vector.broadcast %995 : vector<1x256xf32> to vector<16x256xf32>
    %1006 = arith.mulf %1004, %1005 : vector<16x256xf32>
    %1007 = arith.addf %1003, %1006 : vector<16x256xf32>
    %cst_621 = arith.constant 0.000000e+00 : f32
    %1008 = vector.broadcast %cst_621 : f32 to vector<16x256xf32>
    %1009 = arith.maximumf %1007, %1008 : vector<16x256xf32>
    %c64_622 = arith.constant 64 : index
    %c0_623 = arith.constant 0 : index
    %1010 = vector.load %arg8[%c64_622, %c0_623] : memref<240x256xf32, #tpu.memory_space<vmem>>, vector<16x256xf32>
    tpu.vector_store %arg8[%c64_622, %c0_623], %1009 {strides = array<i32>} : memref<240x256xf32, #tpu.memory_space<vmem>>, vector<16x256xf32>,
    %c4_624 = arith.constant 4 : index
    %c0_625 = arith.constant 0 : index
    %1011 = vector.load %arg9[%c4_624, %c0_625] : memref<15x256xf32, #tpu.memory_space<vmem>>, vector<1x256xf32>
    tpu.vector_store %arg9[%c4_624, %c0_625], %995 {strides = array<i32>} : memref<15x256xf32, #tpu.memory_space<vmem>>, vector<1x256xf32>,
    %c10_626 = arith.constant 10 : index
    %c0_627 = arith.constant 0 : index
    %1012 = vector.load %arg7[%c10_626, %c0_627] : memref<31x256xf32, #tpu.memory_space<vmem>>, vector<1x256xf32>
    %c11_628 = arith.constant 11 : index
    %c0_629 = arith.constant 0 : index
    %1013 = vector.load %arg7[%c11_628, %c0_629] : memref<31x256xf32, #tpu.memory_space<vmem>>, vector<1x256xf32>
    %c12_630 = arith.constant 12 : index
    %c0_631 = arith.constant 0 : index
    %1014 = vector.load %arg7[%c12_630, %c0_631] : memref<31x256xf32, #tpu.memory_space<vmem>>, vector<1x256xf32>
    %1015 = arith.addf %1012, %1013 : vector<1x256xf32>
    %1016 = arith.addf %1015, %1014 : vector<1x256xf32>
    %cst_632 = arith.constant 1.600000e+01 : f32
    %1017 = vector.broadcast %cst_632 : f32 to vector<1x256xf32>
    %1018 = arith.mulf %1016, %1017 : vector<1x256xf32>
    %cst_633 = arith.constant 0.000000e+00 : f32
    %1019 = vector.broadcast %cst_633 : f32 to vector<1x256xf32>
    %1020 = arith.cmpf oeq, %1018, %1019 : vector<1x256xf32>
    %cst_634 = arith.constant 0.000000e+00 : f32
    %cst_635 = arith.constant 1.000000e+00 : f32
    %1021 = vector.broadcast %cst_634 : f32 to vector<1x256xf32>
    %1022 = vector.broadcast %cst_635 : f32 to vector<1x256xf32>
    %1023 = arith.select %1020, %1021, %1022 : vector<1x256xi1>, vector<1x256xf32>
    %cst_636 = arith.constant 1.000000e+00 : f32
    %1024 = vector.broadcast %cst_636 : f32 to vector<1x256xf32>
    %1025 = arith.divf %1024, %1018 : vector<1x256xf32>
    %cst_637 = arith.constant 0.000000e+00 : f32
    %1026 = vector.broadcast %cst_637 : f32 to vector<1x256xf32>
    %1027 = arith.select %1020, %1026, %1025 : vector<1x256xi1>, vector<1x256xf32>
    %c160_638 = arith.constant 160 : index
    %c0_639 = arith.constant 0 : index
    %1028 = vector.load %arg6[%c160_638, %c0_639] : memref<496x256xf32, #tpu.memory_space<vmem>>, vector<48x256xf32>
    %cst_640 = arith.constant dense<0.000000e+00> : vector<16x256xf32>
    %1029 = tpu.matmul %870, %1028, %cst_640 {dimension_numbers = #tpu.dot_dimension_numbers<[1], [0], [0], [1], [0, 0, 1, 1], [], []>} : vector<16x48xf32>, vector<48x256xf32>, vector<16x256xf32> -> vector<16x256xf32>
    %1030 = vector.broadcast %1027 : vector<1x256xf32> to vector<16x256xf32>
    %1031 = arith.mulf %1029, %1030 : vector<16x256xf32>
    %1032 = vector.broadcast %871 : vector<16x1xf32> to vector<16x256xf32>
    %1033 = vector.broadcast %1023 : vector<1x256xf32> to vector<16x256xf32>
    %1034 = arith.mulf %1032, %1033 : vector<16x256xf32>
    %1035 = arith.addf %1031, %1034 : vector<16x256xf32>
    %cst_641 = arith.constant 0.000000e+00 : f32
    %1036 = vector.broadcast %cst_641 : f32 to vector<16x256xf32>
    %1037 = arith.maximumf %1035, %1036 : vector<16x256xf32>
    %c80_642 = arith.constant 80 : index
    %c0_643 = arith.constant 0 : index
    %1038 = vector.load %arg8[%c80_642, %c0_643] : memref<240x256xf32, #tpu.memory_space<vmem>>, vector<16x256xf32>
    tpu.vector_store %arg8[%c80_642, %c0_643], %1037 {strides = array<i32>} : memref<240x256xf32, #tpu.memory_space<vmem>>, vector<16x256xf32>,
    %c5_644 = arith.constant 5 : index
    %c0_645 = arith.constant 0 : index
    %1039 = vector.load %arg9[%c5_644, %c0_645] : memref<15x256xf32, #tpu.memory_space<vmem>>, vector<1x256xf32>
    tpu.vector_store %arg9[%c5_644, %c0_645], %1023 {strides = array<i32>} : memref<15x256xf32, #tpu.memory_space<vmem>>, vector<1x256xf32>,
    %c12_646 = arith.constant 12 : index
    %c0_647 = arith.constant 0 : index
    %1040 = vector.load %arg7[%c12_646, %c0_647] : memref<31x256xf32, #tpu.memory_space<vmem>>, vector<1x256xf32>
    %c13_648 = arith.constant 13 : index
    %c0_649 = arith.constant 0 : index
    %1041 = vector.load %arg7[%c13_648, %c0_649] : memref<31x256xf32, #tpu.memory_space<vmem>>, vector<1x256xf32>
    %c14_650 = arith.constant 14 : index
    %c0_651 = arith.constant 0 : index
    %1042 = vector.load %arg7[%c14_650, %c0_651] : memref<31x256xf32, #tpu.memory_space<vmem>>, vector<1x256xf32>
    %1043 = arith.addf %1040, %1041 : vector<1x256xf32>
    %1044 = arith.addf %1043, %1042 : vector<1x256xf32>
    %cst_652 = arith.constant 1.600000e+01 : f32
    %1045 = vector.broadcast %cst_652 : f32 to vector<1x256xf32>
    %1046 = arith.mulf %1044, %1045 : vector<1x256xf32>
    %cst_653 = arith.constant 0.000000e+00 : f32
    %1047 = vector.broadcast %cst_653 : f32 to vector<1x256xf32>
    %1048 = arith.cmpf oeq, %1046, %1047 : vector<1x256xf32>
    %cst_654 = arith.constant 0.000000e+00 : f32
    %cst_655 = arith.constant 1.000000e+00 : f32
    %1049 = vector.broadcast %cst_654 : f32 to vector<1x256xf32>
    %1050 = vector.broadcast %cst_655 : f32 to vector<1x256xf32>
    %1051 = arith.select %1048, %1049, %1050 : vector<1x256xi1>, vector<1x256xf32>
    %cst_656 = arith.constant 1.000000e+00 : f32
    %1052 = vector.broadcast %cst_656 : f32 to vector<1x256xf32>
    %1053 = arith.divf %1052, %1046 : vector<1x256xf32>
    %cst_657 = arith.constant 0.000000e+00 : f32
    %1054 = vector.broadcast %cst_657 : f32 to vector<1x256xf32>
    %1055 = arith.select %1048, %1054, %1053 : vector<1x256xi1>, vector<1x256xf32>
    %c192_658 = arith.constant 192 : index
    %c0_659 = arith.constant 0 : index
    %1056 = vector.load %arg6[%c192_658, %c0_659] : memref<496x256xf32, #tpu.memory_space<vmem>>, vector<48x256xf32>
    %cst_660 = arith.constant dense<0.000000e+00> : vector<16x256xf32>
    %1057 = tpu.matmul %870, %1056, %cst_660 {dimension_numbers = #tpu.dot_dimension_numbers<[1], [0], [0], [1], [0, 0, 1, 1], [], []>} : vector<16x48xf32>, vector<48x256xf32>, vector<16x256xf32> -> vector<16x256xf32>
    %1058 = vector.broadcast %1055 : vector<1x256xf32> to vector<16x256xf32>
    %1059 = arith.mulf %1057, %1058 : vector<16x256xf32>
    %1060 = vector.broadcast %871 : vector<16x1xf32> to vector<16x256xf32>
    %1061 = vector.broadcast %1051 : vector<1x256xf32> to vector<16x256xf32>
    %1062 = arith.mulf %1060, %1061 : vector<16x256xf32>
    %1063 = arith.addf %1059, %1062 : vector<16x256xf32>
    %cst_661 = arith.constant 0.000000e+00 : f32
    %1064 = vector.broadcast %cst_661 : f32 to vector<16x256xf32>
    %1065 = arith.maximumf %1063, %1064 : vector<16x256xf32>
    %c96_662 = arith.constant 96 : index
    %c0_663 = arith.constant 0 : index
    %1066 = vector.load %arg8[%c96_662, %c0_663] : memref<240x256xf32, #tpu.memory_space<vmem>>, vector<16x256xf32>
    tpu.vector_store %arg8[%c96_662, %c0_663], %1065 {strides = array<i32>} : memref<240x256xf32, #tpu.memory_space<vmem>>, vector<16x256xf32>,
    %c6_664 = arith.constant 6 : index
    %c0_665 = arith.constant 0 : index
    %1067 = vector.load %arg9[%c6_664, %c0_665] : memref<15x256xf32, #tpu.memory_space<vmem>>, vector<1x256xf32>
    tpu.vector_store %arg9[%c6_664, %c0_665], %1051 {strides = array<i32>} : memref<15x256xf32, #tpu.memory_space<vmem>>, vector<1x256xf32>,
    %c14_666 = arith.constant 14 : index
    %c0_667 = arith.constant 0 : index
    %1068 = vector.load %arg7[%c14_666, %c0_667] : memref<31x256xf32, #tpu.memory_space<vmem>>, vector<1x256xf32>
    %c15_668 = arith.constant 15 : index
    %c0_669 = arith.constant 0 : index
    %1069 = vector.load %arg7[%c15_668, %c0_669] : memref<31x256xf32, #tpu.memory_space<vmem>>, vector<1x256xf32>
    %c16_670 = arith.constant 16 : index
    %c0_671 = arith.constant 0 : index
    %1070 = vector.load %arg7[%c16_670, %c0_671] : memref<31x256xf32, #tpu.memory_space<vmem>>, vector<1x256xf32>
    %1071 = arith.addf %1068, %1069 : vector<1x256xf32>
    %1072 = arith.addf %1071, %1070 : vector<1x256xf32>
    %cst_672 = arith.constant 1.600000e+01 : f32
    %1073 = vector.broadcast %cst_672 : f32 to vector<1x256xf32>
    %1074 = arith.mulf %1072, %1073 : vector<1x256xf32>
    %cst_673 = arith.constant 0.000000e+00 : f32
    %1075 = vector.broadcast %cst_673 : f32 to vector<1x256xf32>
    %1076 = arith.cmpf oeq, %1074, %1075 : vector<1x256xf32>
    %cst_674 = arith.constant 0.000000e+00 : f32
    %cst_675 = arith.constant 1.000000e+00 : f32
    %1077 = vector.broadcast %cst_674 : f32 to vector<1x256xf32>
    %1078 = vector.broadcast %cst_675 : f32 to vector<1x256xf32>
    %1079 = arith.select %1076, %1077, %1078 : vector<1x256xi1>, vector<1x256xf32>
    %cst_676 = arith.constant 1.000000e+00 : f32
    %1080 = vector.broadcast %cst_676 : f32 to vector<1x256xf32>
    %1081 = arith.divf %1080, %1074 : vector<1x256xf32>
    %cst_677 = arith.constant 0.000000e+00 : f32
    %1082 = vector.broadcast %cst_677 : f32 to vector<1x256xf32>
    %1083 = arith.select %1076, %1082, %1081 : vector<1x256xi1>, vector<1x256xf32>
    %c224_678 = arith.constant 224 : index
    %c0_679 = arith.constant 0 : index
    %1084 = vector.load %arg6[%c224_678, %c0_679] : memref<496x256xf32, #tpu.memory_space<vmem>>, vector<48x256xf32>
    %cst_680 = arith.constant dense<0.000000e+00> : vector<16x256xf32>
    %1085 = tpu.matmul %870, %1084, %cst_680 {dimension_numbers = #tpu.dot_dimension_numbers<[1], [0], [0], [1], [0, 0, 1, 1], [], []>} : vector<16x48xf32>, vector<48x256xf32>, vector<16x256xf32> -> vector<16x256xf32>
    %1086 = vector.broadcast %1083 : vector<1x256xf32> to vector<16x256xf32>
    %1087 = arith.mulf %1085, %1086 : vector<16x256xf32>
    %1088 = vector.broadcast %871 : vector<16x1xf32> to vector<16x256xf32>
    %1089 = vector.broadcast %1079 : vector<1x256xf32> to vector<16x256xf32>
    %1090 = arith.mulf %1088, %1089 : vector<16x256xf32>
    %1091 = arith.addf %1087, %1090 : vector<16x256xf32>
    %cst_681 = arith.constant 0.000000e+00 : f32
    %1092 = vector.broadcast %cst_681 : f32 to vector<16x256xf32>
    %1093 = arith.maximumf %1091, %1092 : vector<16x256xf32>
    %c112_682 = arith.constant 112 : index
    %c0_683 = arith.constant 0 : index
    %1094 = vector.load %arg8[%c112_682, %c0_683] : memref<240x256xf32, #tpu.memory_space<vmem>>, vector<16x256xf32>
    tpu.vector_store %arg8[%c112_682, %c0_683], %1093 {strides = array<i32>} : memref<240x256xf32, #tpu.memory_space<vmem>>, vector<16x256xf32>,
    %c7_684 = arith.constant 7 : index
    %c0_685 = arith.constant 0 : index
    %1095 = vector.load %arg9[%c7_684, %c0_685] : memref<15x256xf32, #tpu.memory_space<vmem>>, vector<1x256xf32>
    tpu.vector_store %arg9[%c7_684, %c0_685], %1079 {strides = array<i32>} : memref<15x256xf32, #tpu.memory_space<vmem>>, vector<1x256xf32>,
    %c16_686 = arith.constant 16 : index
    %c0_687 = arith.constant 0 : index
    %1096 = vector.load %arg7[%c16_686, %c0_687] : memref<31x256xf32, #tpu.memory_space<vmem>>, vector<1x256xf32>
    %c17_688 = arith.constant 17 : index
    %c0_689 = arith.constant 0 : index
    %1097 = vector.load %arg7[%c17_688, %c0_689] : memref<31x256xf32, #tpu.memory_space<vmem>>, vector<1x256xf32>
    %c18_690 = arith.constant 18 : index
    %c0_691 = arith.constant 0 : index
    %1098 = vector.load %arg7[%c18_690, %c0_691] : memref<31x256xf32, #tpu.memory_space<vmem>>, vector<1x256xf32>
    %1099 = arith.addf %1096, %1097 : vector<1x256xf32>
    %1100 = arith.addf %1099, %1098 : vector<1x256xf32>
    %cst_692 = arith.constant 1.600000e+01 : f32
    %1101 = vector.broadcast %cst_692 : f32 to vector<1x256xf32>
    %1102 = arith.mulf %1100, %1101 : vector<1x256xf32>
    %cst_693 = arith.constant 0.000000e+00 : f32
    %1103 = vector.broadcast %cst_693 : f32 to vector<1x256xf32>
    %1104 = arith.cmpf oeq, %1102, %1103 : vector<1x256xf32>
    %cst_694 = arith.constant 0.000000e+00 : f32
    %cst_695 = arith.constant 1.000000e+00 : f32
    %1105 = vector.broadcast %cst_694 : f32 to vector<1x256xf32>
    %1106 = vector.broadcast %cst_695 : f32 to vector<1x256xf32>
    %1107 = arith.select %1104, %1105, %1106 : vector<1x256xi1>, vector<1x256xf32>
    %cst_696 = arith.constant 1.000000e+00 : f32
    %1108 = vector.broadcast %cst_696 : f32 to vector<1x256xf32>
    %1109 = arith.divf %1108, %1102 : vector<1x256xf32>
    %cst_697 = arith.constant 0.000000e+00 : f32
    %1110 = vector.broadcast %cst_697 : f32 to vector<1x256xf32>
    %1111 = arith.select %1104, %1110, %1109 : vector<1x256xi1>, vector<1x256xf32>
    %c256_698 = arith.constant 256 : index
    %c0_699 = arith.constant 0 : index
    %1112 = vector.load %arg6[%c256_698, %c0_699] : memref<496x256xf32, #tpu.memory_space<vmem>>, vector<48x256xf32>
    %cst_700 = arith.constant dense<0.000000e+00> : vector<16x256xf32>
    %1113 = tpu.matmul %870, %1112, %cst_700 {dimension_numbers = #tpu.dot_dimension_numbers<[1], [0], [0], [1], [0, 0, 1, 1], [], []>} : vector<16x48xf32>, vector<48x256xf32>, vector<16x256xf32> -> vector<16x256xf32>
    %1114 = vector.broadcast %1111 : vector<1x256xf32> to vector<16x256xf32>
    %1115 = arith.mulf %1113, %1114 : vector<16x256xf32>
    %1116 = vector.broadcast %871 : vector<16x1xf32> to vector<16x256xf32>
    %1117 = vector.broadcast %1107 : vector<1x256xf32> to vector<16x256xf32>
    %1118 = arith.mulf %1116, %1117 : vector<16x256xf32>
    %1119 = arith.addf %1115, %1118 : vector<16x256xf32>
    %cst_701 = arith.constant 0.000000e+00 : f32
    %1120 = vector.broadcast %cst_701 : f32 to vector<16x256xf32>
    %1121 = arith.maximumf %1119, %1120 : vector<16x256xf32>
    %c128_702 = arith.constant 128 : index
    %c0_703 = arith.constant 0 : index
    %1122 = vector.load %arg8[%c128_702, %c0_703] : memref<240x256xf32, #tpu.memory_space<vmem>>, vector<16x256xf32>
    tpu.vector_store %arg8[%c128_702, %c0_703], %1121 {strides = array<i32>} : memref<240x256xf32, #tpu.memory_space<vmem>>, vector<16x256xf32>,
    %c8_704 = arith.constant 8 : index
    %c0_705 = arith.constant 0 : index
    %1123 = vector.load %arg9[%c8_704, %c0_705] : memref<15x256xf32, #tpu.memory_space<vmem>>, vector<1x256xf32>
    tpu.vector_store %arg9[%c8_704, %c0_705], %1107 {strides = array<i32>} : memref<15x256xf32, #tpu.memory_space<vmem>>, vector<1x256xf32>,
    %c18_706 = arith.constant 18 : index
    %c0_707 = arith.constant 0 : index
    %1124 = vector.load %arg7[%c18_706, %c0_707] : memref<31x256xf32, #tpu.memory_space<vmem>>, vector<1x256xf32>
    %c19_708 = arith.constant 19 : index
    %c0_709 = arith.constant 0 : index
    %1125 = vector.load %arg7[%c19_708, %c0_709] : memref<31x256xf32, #tpu.memory_space<vmem>>, vector<1x256xf32>
    %c20_710 = arith.constant 20 : index
    %c0_711 = arith.constant 0 : index
    %1126 = vector.load %arg7[%c20_710, %c0_711] : memref<31x256xf32, #tpu.memory_space<vmem>>, vector<1x256xf32>
    %1127 = arith.addf %1124, %1125 : vector<1x256xf32>
    %1128 = arith.addf %1127, %1126 : vector<1x256xf32>
    %cst_712 = arith.constant 1.600000e+01 : f32
    %1129 = vector.broadcast %cst_712 : f32 to vector<1x256xf32>
    %1130 = arith.mulf %1128, %1129 : vector<1x256xf32>
    %cst_713 = arith.constant 0.000000e+00 : f32
    %1131 = vector.broadcast %cst_713 : f32 to vector<1x256xf32>
    %1132 = arith.cmpf oeq, %1130, %1131 : vector<1x256xf32>
    %cst_714 = arith.constant 0.000000e+00 : f32
    %cst_715 = arith.constant 1.000000e+00 : f32
    %1133 = vector.broadcast %cst_714 : f32 to vector<1x256xf32>
    %1134 = vector.broadcast %cst_715 : f32 to vector<1x256xf32>
    %1135 = arith.select %1132, %1133, %1134 : vector<1x256xi1>, vector<1x256xf32>
    %cst_716 = arith.constant 1.000000e+00 : f32
    %1136 = vector.broadcast %cst_716 : f32 to vector<1x256xf32>
    %1137 = arith.divf %1136, %1130 : vector<1x256xf32>
    %cst_717 = arith.constant 0.000000e+00 : f32
    %1138 = vector.broadcast %cst_717 : f32 to vector<1x256xf32>
    %1139 = arith.select %1132, %1138, %1137 : vector<1x256xi1>, vector<1x256xf32>
    %c288_718 = arith.constant 288 : index
    %c0_719 = arith.constant 0 : index
    %1140 = vector.load %arg6[%c288_718, %c0_719] : memref<496x256xf32, #tpu.memory_space<vmem>>, vector<48x256xf32>
    %cst_720 = arith.constant dense<0.000000e+00> : vector<16x256xf32>
    %1141 = tpu.matmul %870, %1140, %cst_720 {dimension_numbers = #tpu.dot_dimension_numbers<[1], [0], [0], [1], [0, 0, 1, 1], [], []>} : vector<16x48xf32>, vector<48x256xf32>, vector<16x256xf32> -> vector<16x256xf32>
    %1142 = vector.broadcast %1139 : vector<1x256xf32> to vector<16x256xf32>
    %1143 = arith.mulf %1141, %1142 : vector<16x256xf32>
    %1144 = vector.broadcast %871 : vector<16x1xf32> to vector<16x256xf32>
    %1145 = vector.broadcast %1135 : vector<1x256xf32> to vector<16x256xf32>
    %1146 = arith.mulf %1144, %1145 : vector<16x256xf32>
    %1147 = arith.addf %1143, %1146 : vector<16x256xf32>
    %cst_721 = arith.constant 0.000000e+00 : f32
    %1148 = vector.broadcast %cst_721 : f32 to vector<16x256xf32>
    %1149 = arith.maximumf %1147, %1148 : vector<16x256xf32>
    %c144_722 = arith.constant 144 : index
    %c0_723 = arith.constant 0 : index
    %1150 = vector.load %arg8[%c144_722, %c0_723] : memref<240x256xf32, #tpu.memory_space<vmem>>, vector<16x256xf32>
    tpu.vector_store %arg8[%c144_722, %c0_723], %1149 {strides = array<i32>} : memref<240x256xf32, #tpu.memory_space<vmem>>, vector<16x256xf32>,
    %c9_724 = arith.constant 9 : index
    %c0_725 = arith.constant 0 : index
    %1151 = vector.load %arg9[%c9_724, %c0_725] : memref<15x256xf32, #tpu.memory_space<vmem>>, vector<1x256xf32>
    tpu.vector_store %arg9[%c9_724, %c0_725], %1135 {strides = array<i32>} : memref<15x256xf32, #tpu.memory_space<vmem>>, vector<1x256xf32>,
    %c20_726 = arith.constant 20 : index
    %c0_727 = arith.constant 0 : index
    %1152 = vector.load %arg7[%c20_726, %c0_727] : memref<31x256xf32, #tpu.memory_space<vmem>>, vector<1x256xf32>
    %c21_728 = arith.constant 21 : index
    %c0_729 = arith.constant 0 : index
    %1153 = vector.load %arg7[%c21_728, %c0_729] : memref<31x256xf32, #tpu.memory_space<vmem>>, vector<1x256xf32>
    %c22_730 = arith.constant 22 : index
    %c0_731 = arith.constant 0 : index
    %1154 = vector.load %arg7[%c22_730, %c0_731] : memref<31x256xf32, #tpu.memory_space<vmem>>, vector<1x256xf32>
    %1155 = arith.addf %1152, %1153 : vector<1x256xf32>
    %1156 = arith.addf %1155, %1154 : vector<1x256xf32>
    %cst_732 = arith.constant 1.600000e+01 : f32
    %1157 = vector.broadcast %cst_732 : f32 to vector<1x256xf32>
    %1158 = arith.mulf %1156, %1157 : vector<1x256xf32>
    %cst_733 = arith.constant 0.000000e+00 : f32
    %1159 = vector.broadcast %cst_733 : f32 to vector<1x256xf32>
    %1160 = arith.cmpf oeq, %1158, %1159 : vector<1x256xf32>
    %cst_734 = arith.constant 0.000000e+00 : f32
    %cst_735 = arith.constant 1.000000e+00 : f32
    %1161 = vector.broadcast %cst_734 : f32 to vector<1x256xf32>
    %1162 = vector.broadcast %cst_735 : f32 to vector<1x256xf32>
    %1163 = arith.select %1160, %1161, %1162 : vector<1x256xi1>, vector<1x256xf32>
    %cst_736 = arith.constant 1.000000e+00 : f32
    %1164 = vector.broadcast %cst_736 : f32 to vector<1x256xf32>
    %1165 = arith.divf %1164, %1158 : vector<1x256xf32>
    %cst_737 = arith.constant 0.000000e+00 : f32
    %1166 = vector.broadcast %cst_737 : f32 to vector<1x256xf32>
    %1167 = arith.select %1160, %1166, %1165 : vector<1x256xi1>, vector<1x256xf32>
    %c320_738 = arith.constant 320 : index
    %c0_739 = arith.constant 0 : index
    %1168 = vector.load %arg6[%c320_738, %c0_739] : memref<496x256xf32, #tpu.memory_space<vmem>>, vector<48x256xf32>
    %cst_740 = arith.constant dense<0.000000e+00> : vector<16x256xf32>
    %1169 = tpu.matmul %870, %1168, %cst_740 {dimension_numbers = #tpu.dot_dimension_numbers<[1], [0], [0], [1], [0, 0, 1, 1], [], []>} : vector<16x48xf32>, vector<48x256xf32>, vector<16x256xf32> -> vector<16x256xf32>
    %1170 = vector.broadcast %1167 : vector<1x256xf32> to vector<16x256xf32>
    %1171 = arith.mulf %1169, %1170 : vector<16x256xf32>
    %1172 = vector.broadcast %871 : vector<16x1xf32> to vector<16x256xf32>
    %1173 = vector.broadcast %1163 : vector<1x256xf32> to vector<16x256xf32>
    %1174 = arith.mulf %1172, %1173 : vector<16x256xf32>
    %1175 = arith.addf %1171, %1174 : vector<16x256xf32>
    %cst_741 = arith.constant 0.000000e+00 : f32
    %1176 = vector.broadcast %cst_741 : f32 to vector<16x256xf32>
    %1177 = arith.maximumf %1175, %1176 : vector<16x256xf32>
    %c160_742 = arith.constant 160 : index
    %c0_743 = arith.constant 0 : index
    %1178 = vector.load %arg8[%c160_742, %c0_743] : memref<240x256xf32, #tpu.memory_space<vmem>>, vector<16x256xf32>
    tpu.vector_store %arg8[%c160_742, %c0_743], %1177 {strides = array<i32>} : memref<240x256xf32, #tpu.memory_space<vmem>>, vector<16x256xf32>,
    %c10_744 = arith.constant 10 : index
    %c0_745 = arith.constant 0 : index
    %1179 = vector.load %arg9[%c10_744, %c0_745] : memref<15x256xf32, #tpu.memory_space<vmem>>, vector<1x256xf32>
    tpu.vector_store %arg9[%c10_744, %c0_745], %1163 {strides = array<i32>} : memref<15x256xf32, #tpu.memory_space<vmem>>, vector<1x256xf32>,
    %c22_746 = arith.constant 22 : index
    %c0_747 = arith.constant 0 : index
    %1180 = vector.load %arg7[%c22_746, %c0_747] : memref<31x256xf32, #tpu.memory_space<vmem>>, vector<1x256xf32>
    %c23_748 = arith.constant 23 : index
    %c0_749 = arith.constant 0 : index
    %1181 = vector.load %arg7[%c23_748, %c0_749] : memref<31x256xf32, #tpu.memory_space<vmem>>, vector<1x256xf32>
    %c24_750 = arith.constant 24 : index
    %c0_751 = arith.constant 0 : index
    %1182 = vector.load %arg7[%c24_750, %c0_751] : memref<31x256xf32, #tpu.memory_space<vmem>>, vector<1x256xf32>
    %1183 = arith.addf %1180, %1181 : vector<1x256xf32>
    %1184 = arith.addf %1183, %1182 : vector<1x256xf32>
    %cst_752 = arith.constant 1.600000e+01 : f32
    %1185 = vector.broadcast %cst_752 : f32 to vector<1x256xf32>
    %1186 = arith.mulf %1184, %1185 : vector<1x256xf32>
    %cst_753 = arith.constant 0.000000e+00 : f32
    %1187 = vector.broadcast %cst_753 : f32 to vector<1x256xf32>
    %1188 = arith.cmpf oeq, %1186, %1187 : vector<1x256xf32>
    %cst_754 = arith.constant 0.000000e+00 : f32
    %cst_755 = arith.constant 1.000000e+00 : f32
    %1189 = vector.broadcast %cst_754 : f32 to vector<1x256xf32>
    %1190 = vector.broadcast %cst_755 : f32 to vector<1x256xf32>
    %1191 = arith.select %1188, %1189, %1190 : vector<1x256xi1>, vector<1x256xf32>
    %cst_756 = arith.constant 1.000000e+00 : f32
    %1192 = vector.broadcast %cst_756 : f32 to vector<1x256xf32>
    %1193 = arith.divf %1192, %1186 : vector<1x256xf32>
    %cst_757 = arith.constant 0.000000e+00 : f32
    %1194 = vector.broadcast %cst_757 : f32 to vector<1x256xf32>
    %1195 = arith.select %1188, %1194, %1193 : vector<1x256xi1>, vector<1x256xf32>
    %c352_758 = arith.constant 352 : index
    %c0_759 = arith.constant 0 : index
    %1196 = vector.load %arg6[%c352_758, %c0_759] : memref<496x256xf32, #tpu.memory_space<vmem>>, vector<48x256xf32>
    %cst_760 = arith.constant dense<0.000000e+00> : vector<16x256xf32>
    %1197 = tpu.matmul %870, %1196, %cst_760 {dimension_numbers = #tpu.dot_dimension_numbers<[1], [0], [0], [1], [0, 0, 1, 1], [], []>} : vector<16x48xf32>, vector<48x256xf32>, vector<16x256xf32> -> vector<16x256xf32>
    %1198 = vector.broadcast %1195 : vector<1x256xf32> to vector<16x256xf32>
    %1199 = arith.mulf %1197, %1198 : vector<16x256xf32>
    %1200 = vector.broadcast %871 : vector<16x1xf32> to vector<16x256xf32>
    %1201 = vector.broadcast %1191 : vector<1x256xf32> to vector<16x256xf32>
    %1202 = arith.mulf %1200, %1201 : vector<16x256xf32>
    %1203 = arith.addf %1199, %1202 : vector<16x256xf32>
    %cst_761 = arith.constant 0.000000e+00 : f32
    %1204 = vector.broadcast %cst_761 : f32 to vector<16x256xf32>
    %1205 = arith.maximumf %1203, %1204 : vector<16x256xf32>
    %c176_762 = arith.constant 176 : index
    %c0_763 = arith.constant 0 : index
    %1206 = vector.load %arg8[%c176_762, %c0_763] : memref<240x256xf32, #tpu.memory_space<vmem>>, vector<16x256xf32>
    tpu.vector_store %arg8[%c176_762, %c0_763], %1205 {strides = array<i32>} : memref<240x256xf32, #tpu.memory_space<vmem>>, vector<16x256xf32>,
    %c11_764 = arith.constant 11 : index
    %c0_765 = arith.constant 0 : index
    %1207 = vector.load %arg9[%c11_764, %c0_765] : memref<15x256xf32, #tpu.memory_space<vmem>>, vector<1x256xf32>
    tpu.vector_store %arg9[%c11_764, %c0_765], %1191 {strides = array<i32>} : memref<15x256xf32, #tpu.memory_space<vmem>>, vector<1x256xf32>,
    %c24_766 = arith.constant 24 : index
    %c0_767 = arith.constant 0 : index
    %1208 = vector.load %arg7[%c24_766, %c0_767] : memref<31x256xf32, #tpu.memory_space<vmem>>, vector<1x256xf32>
    %c25_768 = arith.constant 25 : index
    %c0_769 = arith.constant 0 : index
    %1209 = vector.load %arg7[%c25_768, %c0_769] : memref<31x256xf32, #tpu.memory_space<vmem>>, vector<1x256xf32>
    %c26_770 = arith.constant 26 : index
    %c0_771 = arith.constant 0 : index
    %1210 = vector.load %arg7[%c26_770, %c0_771] : memref<31x256xf32, #tpu.memory_space<vmem>>, vector<1x256xf32>
    %1211 = arith.addf %1208, %1209 : vector<1x256xf32>
    %1212 = arith.addf %1211, %1210 : vector<1x256xf32>
    %cst_772 = arith.constant 1.600000e+01 : f32
    %1213 = vector.broadcast %cst_772 : f32 to vector<1x256xf32>
    %1214 = arith.mulf %1212, %1213 : vector<1x256xf32>
    %cst_773 = arith.constant 0.000000e+00 : f32
    %1215 = vector.broadcast %cst_773 : f32 to vector<1x256xf32>
    %1216 = arith.cmpf oeq, %1214, %1215 : vector<1x256xf32>
    %cst_774 = arith.constant 0.000000e+00 : f32
    %cst_775 = arith.constant 1.000000e+00 : f32
    %1217 = vector.broadcast %cst_774 : f32 to vector<1x256xf32>
    %1218 = vector.broadcast %cst_775 : f32 to vector<1x256xf32>
    %1219 = arith.select %1216, %1217, %1218 : vector<1x256xi1>, vector<1x256xf32>
    %cst_776 = arith.constant 1.000000e+00 : f32
    %1220 = vector.broadcast %cst_776 : f32 to vector<1x256xf32>
    %1221 = arith.divf %1220, %1214 : vector<1x256xf32>
    %cst_777 = arith.constant 0.000000e+00 : f32
    %1222 = vector.broadcast %cst_777 : f32 to vector<1x256xf32>
    %1223 = arith.select %1216, %1222, %1221 : vector<1x256xi1>, vector<1x256xf32>
    %c384_778 = arith.constant 384 : index
    %c0_779 = arith.constant 0 : index
    %1224 = vector.load %arg6[%c384_778, %c0_779] : memref<496x256xf32, #tpu.memory_space<vmem>>, vector<48x256xf32>
    %cst_780 = arith.constant dense<0.000000e+00> : vector<16x256xf32>
    %1225 = tpu.matmul %870, %1224, %cst_780 {dimension_numbers = #tpu.dot_dimension_numbers<[1], [0], [0], [1], [0, 0, 1, 1], [], []>} : vector<16x48xf32>, vector<48x256xf32>, vector<16x256xf32> -> vector<16x256xf32>
    %1226 = vector.broadcast %1223 : vector<1x256xf32> to vector<16x256xf32>
    %1227 = arith.mulf %1225, %1226 : vector<16x256xf32>
    %1228 = vector.broadcast %871 : vector<16x1xf32> to vector<16x256xf32>
    %1229 = vector.broadcast %1219 : vector<1x256xf32> to vector<16x256xf32>
    %1230 = arith.mulf %1228, %1229 : vector<16x256xf32>
    %1231 = arith.addf %1227, %1230 : vector<16x256xf32>
    %cst_781 = arith.constant 0.000000e+00 : f32
    %1232 = vector.broadcast %cst_781 : f32 to vector<16x256xf32>
    %1233 = arith.maximumf %1231, %1232 : vector<16x256xf32>
    %c192_782 = arith.constant 192 : index
    %c0_783 = arith.constant 0 : index
    %1234 = vector.load %arg8[%c192_782, %c0_783] : memref<240x256xf32, #tpu.memory_space<vmem>>, vector<16x256xf32>
    tpu.vector_store %arg8[%c192_782, %c0_783], %1233 {strides = array<i32>} : memref<240x256xf32, #tpu.memory_space<vmem>>, vector<16x256xf32>,
    %c12_784 = arith.constant 12 : index
    %c0_785 = arith.constant 0 : index
    %1235 = vector.load %arg9[%c12_784, %c0_785] : memref<15x256xf32, #tpu.memory_space<vmem>>, vector<1x256xf32>
    tpu.vector_store %arg9[%c12_784, %c0_785], %1219 {strides = array<i32>} : memref<15x256xf32, #tpu.memory_space<vmem>>, vector<1x256xf32>,
    %c26_786 = arith.constant 26 : index
    %c0_787 = arith.constant 0 : index
    %1236 = vector.load %arg7[%c26_786, %c0_787] : memref<31x256xf32, #tpu.memory_space<vmem>>, vector<1x256xf32>
    %c27_788 = arith.constant 27 : index
    %c0_789 = arith.constant 0 : index
    %1237 = vector.load %arg7[%c27_788, %c0_789] : memref<31x256xf32, #tpu.memory_space<vmem>>, vector<1x256xf32>
    %c28_790 = arith.constant 28 : index
    %c0_791 = arith.constant 0 : index
    %1238 = vector.load %arg7[%c28_790, %c0_791] : memref<31x256xf32, #tpu.memory_space<vmem>>, vector<1x256xf32>
    %1239 = arith.addf %1236, %1237 : vector<1x256xf32>
    %1240 = arith.addf %1239, %1238 : vector<1x256xf32>
    %cst_792 = arith.constant 1.600000e+01 : f32
    %1241 = vector.broadcast %cst_792 : f32 to vector<1x256xf32>
    %1242 = arith.mulf %1240, %1241 : vector<1x256xf32>
    %cst_793 = arith.constant 0.000000e+00 : f32
    %1243 = vector.broadcast %cst_793 : f32 to vector<1x256xf32>
    %1244 = arith.cmpf oeq, %1242, %1243 : vector<1x256xf32>
    %cst_794 = arith.constant 0.000000e+00 : f32
    %cst_795 = arith.constant 1.000000e+00 : f32
    %1245 = vector.broadcast %cst_794 : f32 to vector<1x256xf32>
    %1246 = vector.broadcast %cst_795 : f32 to vector<1x256xf32>
    %1247 = arith.select %1244, %1245, %1246 : vector<1x256xi1>, vector<1x256xf32>
    %cst_796 = arith.constant 1.000000e+00 : f32
    %1248 = vector.broadcast %cst_796 : f32 to vector<1x256xf32>
    %1249 = arith.divf %1248, %1242 : vector<1x256xf32>
    %cst_797 = arith.constant 0.000000e+00 : f32
    %1250 = vector.broadcast %cst_797 : f32 to vector<1x256xf32>
    %1251 = arith.select %1244, %1250, %1249 : vector<1x256xi1>, vector<1x256xf32>
    %c416_798 = arith.constant 416 : index
    %c0_799 = arith.constant 0 : index
    %1252 = vector.load %arg6[%c416_798, %c0_799] : memref<496x256xf32, #tpu.memory_space<vmem>>, vector<48x256xf32>
    %cst_800 = arith.constant dense<0.000000e+00> : vector<16x256xf32>
    %1253 = tpu.matmul %870, %1252, %cst_800 {dimension_numbers = #tpu.dot_dimension_numbers<[1], [0], [0], [1], [0, 0, 1, 1], [], []>} : vector<16x48xf32>, vector<48x256xf32>, vector<16x256xf32> -> vector<16x256xf32>
    %1254 = vector.broadcast %1251 : vector<1x256xf32> to vector<16x256xf32>
    %1255 = arith.mulf %1253, %1254 : vector<16x256xf32>
    %1256 = vector.broadcast %871 : vector<16x1xf32> to vector<16x256xf32>
    %1257 = vector.broadcast %1247 : vector<1x256xf32> to vector<16x256xf32>
    %1258 = arith.mulf %1256, %1257 : vector<16x256xf32>
    %1259 = arith.addf %1255, %1258 : vector<16x256xf32>
    %cst_801 = arith.constant 0.000000e+00 : f32
    %1260 = vector.broadcast %cst_801 : f32 to vector<16x256xf32>
    %1261 = arith.maximumf %1259, %1260 : vector<16x256xf32>
    %c208_802 = arith.constant 208 : index
    %c0_803 = arith.constant 0 : index
    %1262 = vector.load %arg8[%c208_802, %c0_803] : memref<240x256xf32, #tpu.memory_space<vmem>>, vector<16x256xf32>
    tpu.vector_store %arg8[%c208_802, %c0_803], %1261 {strides = array<i32>} : memref<240x256xf32, #tpu.memory_space<vmem>>, vector<16x256xf32>,
    %c13_804 = arith.constant 13 : index
    %c0_805 = arith.constant 0 : index
    %1263 = vector.load %arg9[%c13_804, %c0_805] : memref<15x256xf32, #tpu.memory_space<vmem>>, vector<1x256xf32>
    tpu.vector_store %arg9[%c13_804, %c0_805], %1247 {strides = array<i32>} : memref<15x256xf32, #tpu.memory_space<vmem>>, vector<1x256xf32>,
    %c28_806 = arith.constant 28 : index
    %c0_807 = arith.constant 0 : index
    %1264 = vector.load %arg7[%c28_806, %c0_807] : memref<31x256xf32, #tpu.memory_space<vmem>>, vector<1x256xf32>
    %c29_808 = arith.constant 29 : index
    %c0_809 = arith.constant 0 : index
    %1265 = vector.load %arg7[%c29_808, %c0_809] : memref<31x256xf32, #tpu.memory_space<vmem>>, vector<1x256xf32>
    %c30_810 = arith.constant 30 : index
    %c0_811 = arith.constant 0 : index
    %1266 = vector.load %arg7[%c30_810, %c0_811] : memref<31x256xf32, #tpu.memory_space<vmem>>, vector<1x256xf32>
    %1267 = arith.addf %1264, %1265 : vector<1x256xf32>
    %1268 = arith.addf %1267, %1266 : vector<1x256xf32>
    %cst_812 = arith.constant 1.600000e+01 : f32
    %1269 = vector.broadcast %cst_812 : f32 to vector<1x256xf32>
    %1270 = arith.mulf %1268, %1269 : vector<1x256xf32>
    %cst_813 = arith.constant 0.000000e+00 : f32
    %1271 = vector.broadcast %cst_813 : f32 to vector<1x256xf32>
    %1272 = arith.cmpf oeq, %1270, %1271 : vector<1x256xf32>
    %cst_814 = arith.constant 0.000000e+00 : f32
    %cst_815 = arith.constant 1.000000e+00 : f32
    %1273 = vector.broadcast %cst_814 : f32 to vector<1x256xf32>
    %1274 = vector.broadcast %cst_815 : f32 to vector<1x256xf32>
    %1275 = arith.select %1272, %1273, %1274 : vector<1x256xi1>, vector<1x256xf32>
    %cst_816 = arith.constant 1.000000e+00 : f32
    %1276 = vector.broadcast %cst_816 : f32 to vector<1x256xf32>
    %1277 = arith.divf %1276, %1270 : vector<1x256xf32>
    %cst_817 = arith.constant 0.000000e+00 : f32
    %1278 = vector.broadcast %cst_817 : f32 to vector<1x256xf32>
    %1279 = arith.select %1272, %1278, %1277 : vector<1x256xi1>, vector<1x256xf32>
    %c448_818 = arith.constant 448 : index
    %c0_819 = arith.constant 0 : index
    %1280 = vector.load %arg6[%c448_818, %c0_819] : memref<496x256xf32, #tpu.memory_space<vmem>>, vector<48x256xf32>
    %cst_820 = arith.constant dense<0.000000e+00> : vector<16x256xf32>
    %1281 = tpu.matmul %870, %1280, %cst_820 {dimension_numbers = #tpu.dot_dimension_numbers<[1], [0], [0], [1], [0, 0, 1, 1], [], []>} : vector<16x48xf32>, vector<48x256xf32>, vector<16x256xf32> -> vector<16x256xf32>
    %1282 = vector.broadcast %1279 : vector<1x256xf32> to vector<16x256xf32>
    %1283 = arith.mulf %1281, %1282 : vector<16x256xf32>
    %1284 = vector.broadcast %871 : vector<16x1xf32> to vector<16x256xf32>
    %1285 = vector.broadcast %1275 : vector<1x256xf32> to vector<16x256xf32>
    %1286 = arith.mulf %1284, %1285 : vector<16x256xf32>
    %1287 = arith.addf %1283, %1286 : vector<16x256xf32>
    %cst_821 = arith.constant 0.000000e+00 : f32
    %1288 = vector.broadcast %cst_821 : f32 to vector<16x256xf32>
    %1289 = arith.maximumf %1287, %1288 : vector<16x256xf32>
    %c224_822 = arith.constant 224 : index
    %c0_823 = arith.constant 0 : index
    %1290 = vector.load %arg8[%c224_822, %c0_823] : memref<240x256xf32, #tpu.memory_space<vmem>>, vector<16x256xf32>
    tpu.vector_store %arg8[%c224_822, %c0_823], %1289 {strides = array<i32>} : memref<240x256xf32, #tpu.memory_space<vmem>>, vector<16x256xf32>,
    %c14_824 = arith.constant 14 : index
    %c0_825 = arith.constant 0 : index
    %1291 = vector.load %arg9[%c14_824, %c0_825] : memref<15x256xf32, #tpu.memory_space<vmem>>, vector<1x256xf32>
    tpu.vector_store %arg9[%c14_824, %c0_825], %1275 {strides = array<i32>} : memref<15x256xf32, #tpu.memory_space<vmem>>, vector<1x256xf32>,
    %c32_826 = arith.constant 32 : index
    %c0_827 = arith.constant 0 : index
    %1292 = vector.load %arg3[%c32_826, %c0_827] : memref<152x64xf32, #tpu.memory_space<vmem>>, vector<64x48xf32>
    %c32_828 = arith.constant 32 : index
    %c0_829 = arith.constant 0 : index
    %1293 = vector.load %arg4[%c32_828, %c0_829] : memref<152x1xf32, #tpu.memory_space<vmem>>, vector<64x1xf32>
    %c0_830 = arith.constant 0 : index
    %c0_831 = arith.constant 0 : index
    %1294 = vector.load %arg9[%c0_830, %c0_831] : memref<15x256xf32, #tpu.memory_space<vmem>>, vector<1x256xf32>
    %c1_832 = arith.constant 1 : index
    %c0_833 = arith.constant 0 : index
    %1295 = vector.load %arg9[%c1_832, %c0_833] : memref<15x256xf32, #tpu.memory_space<vmem>>, vector<1x256xf32>
    %c2_834 = arith.constant 2 : index
    %c0_835 = arith.constant 0 : index
    %1296 = vector.load %arg9[%c2_834, %c0_835] : memref<15x256xf32, #tpu.memory_space<vmem>>, vector<1x256xf32>
    %1297 = arith.addf %1294, %1295 : vector<1x256xf32>
    %1298 = arith.addf %1297, %1296 : vector<1x256xf32>
    %cst_836 = arith.constant 1.600000e+01 : f32
    %1299 = vector.broadcast %cst_836 : f32 to vector<1x256xf32>
    %1300 = arith.mulf %1298, %1299 : vector<1x256xf32>
    %cst_837 = arith.constant 0.000000e+00 : f32
    %1301 = vector.broadcast %cst_837 : f32 to vector<1x256xf32>
    %1302 = arith.cmpf oeq, %1300, %1301 : vector<1x256xf32>
    %cst_838 = arith.constant 0.000000e+00 : f32
    %cst_839 = arith.constant 1.000000e+00 : f32
    %1303 = vector.broadcast %cst_838 : f32 to vector<1x256xf32>
    %1304 = vector.broadcast %cst_839 : f32 to vector<1x256xf32>
    %1305 = arith.select %1302, %1303, %1304 : vector<1x256xi1>, vector<1x256xf32>
    %cst_840 = arith.constant 1.000000e+00 : f32
    %1306 = vector.broadcast %cst_840 : f32 to vector<1x256xf32>
    %1307 = arith.divf %1306, %1300 : vector<1x256xf32>
    %cst_841 = arith.constant 0.000000e+00 : f32
    %1308 = vector.broadcast %cst_841 : f32 to vector<1x256xf32>
    %1309 = arith.select %1302, %1308, %1307 : vector<1x256xi1>, vector<1x256xf32>
    %c0_842 = arith.constant 0 : index
    %c0_843 = arith.constant 0 : index
    %1310 = vector.load %arg8[%c0_842, %c0_843] : memref<240x256xf32, #tpu.memory_space<vmem>>, vector<48x256xf32>
    %cst_844 = arith.constant dense<0.000000e+00> : vector<64x256xf32>
    %1311 = tpu.matmul %1292, %1310, %cst_844 {dimension_numbers = #tpu.dot_dimension_numbers<[1], [0], [0], [1], [0, 0, 1, 1], [], []>} : vector<64x48xf32>, vector<48x256xf32>, vector<64x256xf32> -> vector<64x256xf32>
    %1312 = vector.broadcast %1309 : vector<1x256xf32> to vector<64x256xf32>
    %1313 = arith.mulf %1311, %1312 : vector<64x256xf32>
    %1314 = vector.broadcast %1293 : vector<64x1xf32> to vector<64x256xf32>
    %1315 = vector.broadcast %1305 : vector<1x256xf32> to vector<64x256xf32>
    %1316 = arith.mulf %1314, %1315 : vector<64x256xf32>
    %1317 = arith.addf %1313, %1316 : vector<64x256xf32>
    %cst_845 = arith.constant 0.000000e+00 : f32
    %1318 = vector.broadcast %cst_845 : f32 to vector<64x256xf32>
    %1319 = arith.maximumf %1317, %1318 : vector<64x256xf32>
    %c0_846 = arith.constant 0 : index
    %c0_847 = arith.constant 0 : index
    %1320 = vector.load %arg10[%c0_846, %c0_847] : memref<64x256xf32, #tpu.memory_space<vmem>>, vector<64x256xf32>
    tpu.vector_store %arg10[%c0_846, %c0_847], %1319 {strides = array<i32>} : memref<64x256xf32, #tpu.memory_space<vmem>>, vector<64x256xf32>,
    %c2_848 = arith.constant 2 : index
    %c0_849 = arith.constant 0 : index
    %1321 = vector.load %arg9[%c2_848, %c0_849] : memref<15x256xf32, #tpu.memory_space<vmem>>, vector<1x256xf32>
    %c3_850 = arith.constant 3 : index
    %c0_851 = arith.constant 0 : index
    %1322 = vector.load %arg9[%c3_850, %c0_851] : memref<15x256xf32, #tpu.memory_space<vmem>>, vector<1x256xf32>
    %c4_852 = arith.constant 4 : index
    %c0_853 = arith.constant 0 : index
    %1323 = vector.load %arg9[%c4_852, %c0_853] : memref<15x256xf32, #tpu.memory_space<vmem>>, vector<1x256xf32>
    %1324 = arith.addf %1321, %1322 : vector<1x256xf32>
    %1325 = arith.addf %1324, %1323 : vector<1x256xf32>
    %cst_854 = arith.constant 1.600000e+01 : f32
    %1326 = vector.broadcast %cst_854 : f32 to vector<1x256xf32>
    %1327 = arith.mulf %1325, %1326 : vector<1x256xf32>
    %cst_855 = arith.constant 0.000000e+00 : f32
    %1328 = vector.broadcast %cst_855 : f32 to vector<1x256xf32>
    %1329 = arith.cmpf oeq, %1327, %1328 : vector<1x256xf32>
    %cst_856 = arith.constant 0.000000e+00 : f32
    %cst_857 = arith.constant 1.000000e+00 : f32
    %1330 = vector.broadcast %cst_856 : f32 to vector<1x256xf32>
    %1331 = vector.broadcast %cst_857 : f32 to vector<1x256xf32>
    %1332 = arith.select %1329, %1330, %1331 : vector<1x256xi1>, vector<1x256xf32>
    %cst_858 = arith.constant 1.000000e+00 : f32
    %1333 = vector.broadcast %cst_858 : f32 to vector<1x256xf32>
    %1334 = arith.divf %1333, %1327 : vector<1x256xf32>
    %cst_859 = arith.constant 0.000000e+00 : f32
    %1335 = vector.broadcast %cst_859 : f32 to vector<1x256xf32>
    %1336 = arith.select %1329, %1335, %1334 : vector<1x256xi1>, vector<1x256xf32>
    %c32_860 = arith.constant 32 : index
    %c0_861 = arith.constant 0 : index
    %1337 = vector.load %arg8[%c32_860, %c0_861] : memref<240x256xf32, #tpu.memory_space<vmem>>, vector<48x256xf32>
    %cst_862 = arith.constant dense<0.000000e+00> : vector<64x256xf32>
    %1338 = tpu.matmul %1292, %1337, %cst_862 {dimension_numbers = #tpu.dot_dimension_numbers<[1], [0], [0], [1], [0, 0, 1, 1], [], []>} : vector<64x48xf32>, vector<48x256xf32>, vector<64x256xf32> -> vector<64x256xf32>
    %1339 = vector.broadcast %1336 : vector<1x256xf32> to vector<64x256xf32>
    %1340 = arith.mulf %1338, %1339 : vector<64x256xf32>
    %1341 = vector.broadcast %1293 : vector<64x1xf32> to vector<64x256xf32>
    %1342 = vector.broadcast %1332 : vector<1x256xf32> to vector<64x256xf32>
    %1343 = arith.mulf %1341, %1342 : vector<64x256xf32>
    %1344 = arith.addf %1340, %1343 : vector<64x256xf32>
    %cst_863 = arith.constant 0.000000e+00 : f32
    %1345 = vector.broadcast %cst_863 : f32 to vector<64x256xf32>
    %1346 = arith.maximumf %1344, %1345 : vector<64x256xf32>
    %c0_864 = arith.constant 0 : index
    %c0_865 = arith.constant 0 : index
    %1347 = vector.load %arg10[%c0_864, %c0_865] : memref<64x256xf32, #tpu.memory_space<vmem>>, vector<64x256xf32>
    %1348 = arith.maximumf %1347, %1346 : vector<64x256xf32>
    %c0_866 = arith.constant 0 : index
    %c0_867 = arith.constant 0 : index
    %1349 = vector.load %arg10[%c0_866, %c0_867] : memref<64x256xf32, #tpu.memory_space<vmem>>, vector<64x256xf32>
    tpu.vector_store %arg10[%c0_866, %c0_867], %1348 {strides = array<i32>} : memref<64x256xf32, #tpu.memory_space<vmem>>, vector<64x256xf32>,
    %c4_868 = arith.constant 4 : index
    %c0_869 = arith.constant 0 : index
    %1350 = vector.load %arg9[%c4_868, %c0_869] : memref<15x256xf32, #tpu.memory_space<vmem>>, vector<1x256xf32>
    %c5_870 = arith.constant 5 : index
    %c0_871 = arith.constant 0 : index
    %1351 = vector.load %arg9[%c5_870, %c0_871] : memref<15x256xf32, #tpu.memory_space<vmem>>, vector<1x256xf32>
    %c6_872 = arith.constant 6 : index
    %c0_873 = arith.constant 0 : index
    %1352 = vector.load %arg9[%c6_872, %c0_873] : memref<15x256xf32, #tpu.memory_space<vmem>>, vector<1x256xf32>
    %1353 = arith.addf %1350, %1351 : vector<1x256xf32>
    %1354 = arith.addf %1353, %1352 : vector<1x256xf32>
    %cst_874 = arith.constant 1.600000e+01 : f32
    %1355 = vector.broadcast %cst_874 : f32 to vector<1x256xf32>
    %1356 = arith.mulf %1354, %1355 : vector<1x256xf32>
    %cst_875 = arith.constant 0.000000e+00 : f32
    %1357 = vector.broadcast %cst_875 : f32 to vector<1x256xf32>
    %1358 = arith.cmpf oeq, %1356, %1357 : vector<1x256xf32>
    %cst_876 = arith.constant 0.000000e+00 : f32
    %cst_877 = arith.constant 1.000000e+00 : f32
    %1359 = vector.broadcast %cst_876 : f32 to vector<1x256xf32>
    %1360 = vector.broadcast %cst_877 : f32 to vector<1x256xf32>
    %1361 = arith.select %1358, %1359, %1360 : vector<1x256xi1>, vector<1x256xf32>
    %cst_878 = arith.constant 1.000000e+00 : f32
    %1362 = vector.broadcast %cst_878 : f32 to vector<1x256xf32>
    %1363 = arith.divf %1362, %1356 : vector<1x256xf32>
    %cst_879 = arith.constant 0.000000e+00 : f32
    %1364 = vector.broadcast %cst_879 : f32 to vector<1x256xf32>
    %1365 = arith.select %1358, %1364, %1363 : vector<1x256xi1>, vector<1x256xf32>
    %c64_880 = arith.constant 64 : index
    %c0_881 = arith.constant 0 : index
    %1366 = vector.load %arg8[%c64_880, %c0_881] : memref<240x256xf32, #tpu.memory_space<vmem>>, vector<48x256xf32>
    %cst_882 = arith.constant dense<0.000000e+00> : vector<64x256xf32>
    %1367 = tpu.matmul %1292, %1366, %cst_882 {dimension_numbers = #tpu.dot_dimension_numbers<[1], [0], [0], [1], [0, 0, 1, 1], [], []>} : vector<64x48xf32>, vector<48x256xf32>, vector<64x256xf32> -> vector<64x256xf32>
    %1368 = vector.broadcast %1365 : vector<1x256xf32> to vector<64x256xf32>
    %1369 = arith.mulf %1367, %1368 : vector<64x256xf32>
    %1370 = vector.broadcast %1293 : vector<64x1xf32> to vector<64x256xf32>
    %1371 = vector.broadcast %1361 : vector<1x256xf32> to vector<64x256xf32>
    %1372 = arith.mulf %1370, %1371 : vector<64x256xf32>
    %1373 = arith.addf %1369, %1372 : vector<64x256xf32>
    %cst_883 = arith.constant 0.000000e+00 : f32
    %1374 = vector.broadcast %cst_883 : f32 to vector<64x256xf32>
    %1375 = arith.maximumf %1373, %1374 : vector<64x256xf32>
    %c0_884 = arith.constant 0 : index
    %c0_885 = arith.constant 0 : index
    %1376 = vector.load %arg10[%c0_884, %c0_885] : memref<64x256xf32, #tpu.memory_space<vmem>>, vector<64x256xf32>
    %1377 = arith.maximumf %1376, %1375 : vector<64x256xf32>
    %c0_886 = arith.constant 0 : index
    %c0_887 = arith.constant 0 : index
    %1378 = vector.load %arg10[%c0_886, %c0_887] : memref<64x256xf32, #tpu.memory_space<vmem>>, vector<64x256xf32>
    tpu.vector_store %arg10[%c0_886, %c0_887], %1377 {strides = array<i32>} : memref<64x256xf32, #tpu.memory_space<vmem>>, vector<64x256xf32>,
    %c6_888 = arith.constant 6 : index
    %c0_889 = arith.constant 0 : index
    %1379 = vector.load %arg9[%c6_888, %c0_889] : memref<15x256xf32, #tpu.memory_space<vmem>>, vector<1x256xf32>
    %c7_890 = arith.constant 7 : index
    %c0_891 = arith.constant 0 : index
    %1380 = vector.load %arg9[%c7_890, %c0_891] : memref<15x256xf32, #tpu.memory_space<vmem>>, vector<1x256xf32>
    %c8_892 = arith.constant 8 : index
    %c0_893 = arith.constant 0 : index
    %1381 = vector.load %arg9[%c8_892, %c0_893] : memref<15x256xf32, #tpu.memory_space<vmem>>, vector<1x256xf32>
    %1382 = arith.addf %1379, %1380 : vector<1x256xf32>
    %1383 = arith.addf %1382, %1381 : vector<1x256xf32>
    %cst_894 = arith.constant 1.600000e+01 : f32
    %1384 = vector.broadcast %cst_894 : f32 to vector<1x256xf32>
    %1385 = arith.mulf %1383, %1384 : vector<1x256xf32>
    %cst_895 = arith.constant 0.000000e+00 : f32
    %1386 = vector.broadcast %cst_895 : f32 to vector<1x256xf32>
    %1387 = arith.cmpf oeq, %1385, %1386 : vector<1x256xf32>
    %cst_896 = arith.constant 0.000000e+00 : f32
    %cst_897 = arith.constant 1.000000e+00 : f32
    %1388 = vector.broadcast %cst_896 : f32 to vector<1x256xf32>
    %1389 = vector.broadcast %cst_897 : f32 to vector<1x256xf32>
    %1390 = arith.select %1387, %1388, %1389 : vector<1x256xi1>, vector<1x256xf32>
    %cst_898 = arith.constant 1.000000e+00 : f32
    %1391 = vector.broadcast %cst_898 : f32 to vector<1x256xf32>
    %1392 = arith.divf %1391, %1385 : vector<1x256xf32>
    %cst_899 = arith.constant 0.000000e+00 : f32
    %1393 = vector.broadcast %cst_899 : f32 to vector<1x256xf32>
    %1394 = arith.select %1387, %1393, %1392 : vector<1x256xi1>, vector<1x256xf32>
    %c96_900 = arith.constant 96 : index
    %c0_901 = arith.constant 0 : index
    %1395 = vector.load %arg8[%c96_900, %c0_901] : memref<240x256xf32, #tpu.memory_space<vmem>>, vector<48x256xf32>
    %cst_902 = arith.constant dense<0.000000e+00> : vector<64x256xf32>
    %1396 = tpu.matmul %1292, %1395, %cst_902 {dimension_numbers = #tpu.dot_dimension_numbers<[1], [0], [0], [1], [0, 0, 1, 1], [], []>} : vector<64x48xf32>, vector<48x256xf32>, vector<64x256xf32> -> vector<64x256xf32>
    %1397 = vector.broadcast %1394 : vector<1x256xf32> to vector<64x256xf32>
    %1398 = arith.mulf %1396, %1397 : vector<64x256xf32>
    %1399 = vector.broadcast %1293 : vector<64x1xf32> to vector<64x256xf32>
    %1400 = vector.broadcast %1390 : vector<1x256xf32> to vector<64x256xf32>
    %1401 = arith.mulf %1399, %1400 : vector<64x256xf32>
    %1402 = arith.addf %1398, %1401 : vector<64x256xf32>
    %cst_903 = arith.constant 0.000000e+00 : f32
    %1403 = vector.broadcast %cst_903 : f32 to vector<64x256xf32>
    %1404 = arith.maximumf %1402, %1403 : vector<64x256xf32>
    %c0_904 = arith.constant 0 : index
    %c0_905 = arith.constant 0 : index
    %1405 = vector.load %arg10[%c0_904, %c0_905] : memref<64x256xf32, #tpu.memory_space<vmem>>, vector<64x256xf32>
    %1406 = arith.maximumf %1405, %1404 : vector<64x256xf32>
    %c0_906 = arith.constant 0 : index
    %c0_907 = arith.constant 0 : index
    %1407 = vector.load %arg10[%c0_906, %c0_907] : memref<64x256xf32, #tpu.memory_space<vmem>>, vector<64x256xf32>
    tpu.vector_store %arg10[%c0_906, %c0_907], %1406 {strides = array<i32>} : memref<64x256xf32, #tpu.memory_space<vmem>>, vector<64x256xf32>,
    %c8_908 = arith.constant 8 : index
    %c0_909 = arith.constant 0 : index
    %1408 = vector.load %arg9[%c8_908, %c0_909] : memref<15x256xf32, #tpu.memory_space<vmem>>, vector<1x256xf32>
    %c9_910 = arith.constant 9 : index
    %c0_911 = arith.constant 0 : index
    %1409 = vector.load %arg9[%c9_910, %c0_911] : memref<15x256xf32, #tpu.memory_space<vmem>>, vector<1x256xf32>
    %c10_912 = arith.constant 10 : index
    %c0_913 = arith.constant 0 : index
    %1410 = vector.load %arg9[%c10_912, %c0_913] : memref<15x256xf32, #tpu.memory_space<vmem>>, vector<1x256xf32>
    %1411 = arith.addf %1408, %1409 : vector<1x256xf32>
    %1412 = arith.addf %1411, %1410 : vector<1x256xf32>
    %cst_914 = arith.constant 1.600000e+01 : f32
    %1413 = vector.broadcast %cst_914 : f32 to vector<1x256xf32>
    %1414 = arith.mulf %1412, %1413 : vector<1x256xf32>
    %cst_915 = arith.constant 0.000000e+00 : f32
    %1415 = vector.broadcast %cst_915 : f32 to vector<1x256xf32>
    %1416 = arith.cmpf oeq, %1414, %1415 : vector<1x256xf32>
    %cst_916 = arith.constant 0.000000e+00 : f32
    %cst_917 = arith.constant 1.000000e+00 : f32
    %1417 = vector.broadcast %cst_916 : f32 to vector<1x256xf32>
    %1418 = vector.broadcast %cst_917 : f32 to vector<1x256xf32>
    %1419 = arith.select %1416, %1417, %1418 : vector<1x256xi1>, vector<1x256xf32>
    %cst_918 = arith.constant 1.000000e+00 : f32
    %1420 = vector.broadcast %cst_918 : f32 to vector<1x256xf32>
    %1421 = arith.divf %1420, %1414 : vector<1x256xf32>
    %cst_919 = arith.constant 0.000000e+00 : f32
    %1422 = vector.broadcast %cst_919 : f32 to vector<1x256xf32>
    %1423 = arith.select %1416, %1422, %1421 : vector<1x256xi1>, vector<1x256xf32>
    %c128_920 = arith.constant 128 : index
    %c0_921 = arith.constant 0 : index
    %1424 = vector.load %arg8[%c128_920, %c0_921] : memref<240x256xf32, #tpu.memory_space<vmem>>, vector<48x256xf32>
    %cst_922 = arith.constant dense<0.000000e+00> : vector<64x256xf32>
    %1425 = tpu.matmul %1292, %1424, %cst_922 {dimension_numbers = #tpu.dot_dimension_numbers<[1], [0], [0], [1], [0, 0, 1, 1], [], []>} : vector<64x48xf32>, vector<48x256xf32>, vector<64x256xf32> -> vector<64x256xf32>
    %1426 = vector.broadcast %1423 : vector<1x256xf32> to vector<64x256xf32>
    %1427 = arith.mulf %1425, %1426 : vector<64x256xf32>
    %1428 = vector.broadcast %1293 : vector<64x1xf32> to vector<64x256xf32>
    %1429 = vector.broadcast %1419 : vector<1x256xf32> to vector<64x256xf32>
    %1430 = arith.mulf %1428, %1429 : vector<64x256xf32>
    %1431 = arith.addf %1427, %1430 : vector<64x256xf32>
    %cst_923 = arith.constant 0.000000e+00 : f32
    %1432 = vector.broadcast %cst_923 : f32 to vector<64x256xf32>
    %1433 = arith.maximumf %1431, %1432 : vector<64x256xf32>
    %c0_924 = arith.constant 0 : index
    %c0_925 = arith.constant 0 : index
    %1434 = vector.load %arg10[%c0_924, %c0_925] : memref<64x256xf32, #tpu.memory_space<vmem>>, vector<64x256xf32>
    %1435 = arith.maximumf %1434, %1433 : vector<64x256xf32>
    %c0_926 = arith.constant 0 : index
    %c0_927 = arith.constant 0 : index
    %1436 = vector.load %arg10[%c0_926, %c0_927] : memref<64x256xf32, #tpu.memory_space<vmem>>, vector<64x256xf32>
    tpu.vector_store %arg10[%c0_926, %c0_927], %1435 {strides = array<i32>} : memref<64x256xf32, #tpu.memory_space<vmem>>, vector<64x256xf32>,
    %c10_928 = arith.constant 10 : index
    %c0_929 = arith.constant 0 : index
    %1437 = vector.load %arg9[%c10_928, %c0_929] : memref<15x256xf32, #tpu.memory_space<vmem>>, vector<1x256xf32>
    %c11_930 = arith.constant 11 : index
    %c0_931 = arith.constant 0 : index
    %1438 = vector.load %arg9[%c11_930, %c0_931] : memref<15x256xf32, #tpu.memory_space<vmem>>, vector<1x256xf32>
    %c12_932 = arith.constant 12 : index
    %c0_933 = arith.constant 0 : index
    %1439 = vector.load %arg9[%c12_932, %c0_933] : memref<15x256xf32, #tpu.memory_space<vmem>>, vector<1x256xf32>
    %1440 = arith.addf %1437, %1438 : vector<1x256xf32>
    %1441 = arith.addf %1440, %1439 : vector<1x256xf32>
    %cst_934 = arith.constant 1.600000e+01 : f32
    %1442 = vector.broadcast %cst_934 : f32 to vector<1x256xf32>
    %1443 = arith.mulf %1441, %1442 : vector<1x256xf32>
    %cst_935 = arith.constant 0.000000e+00 : f32
    %1444 = vector.broadcast %cst_935 : f32 to vector<1x256xf32>
    %1445 = arith.cmpf oeq, %1443, %1444 : vector<1x256xf32>
    %cst_936 = arith.constant 0.000000e+00 : f32
    %cst_937 = arith.constant 1.000000e+00 : f32
    %1446 = vector.broadcast %cst_936 : f32 to vector<1x256xf32>
    %1447 = vector.broadcast %cst_937 : f32 to vector<1x256xf32>
    %1448 = arith.select %1445, %1446, %1447 : vector<1x256xi1>, vector<1x256xf32>
    %cst_938 = arith.constant 1.000000e+00 : f32
    %1449 = vector.broadcast %cst_938 : f32 to vector<1x256xf32>
    %1450 = arith.divf %1449, %1443 : vector<1x256xf32>
    %cst_939 = arith.constant 0.000000e+00 : f32
    %1451 = vector.broadcast %cst_939 : f32 to vector<1x256xf32>
    %1452 = arith.select %1445, %1451, %1450 : vector<1x256xi1>, vector<1x256xf32>
    %c160_940 = arith.constant 160 : index
    %c0_941 = arith.constant 0 : index
    %1453 = vector.load %arg8[%c160_940, %c0_941] : memref<240x256xf32, #tpu.memory_space<vmem>>, vector<48x256xf32>
    %cst_942 = arith.constant dense<0.000000e+00> : vector<64x256xf32>
    %1454 = tpu.matmul %1292, %1453, %cst_942 {dimension_numbers = #tpu.dot_dimension_numbers<[1], [0], [0], [1], [0, 0, 1, 1], [], []>} : vector<64x48xf32>, vector<48x256xf32>, vector<64x256xf32> -> vector<64x256xf32>
    %1455 = vector.broadcast %1452 : vector<1x256xf32> to vector<64x256xf32>
    %1456 = arith.mulf %1454, %1455 : vector<64x256xf32>
    %1457 = vector.broadcast %1293 : vector<64x1xf32> to vector<64x256xf32>
    %1458 = vector.broadcast %1448 : vector<1x256xf32> to vector<64x256xf32>
    %1459 = arith.mulf %1457, %1458 : vector<64x256xf32>
    %1460 = arith.addf %1456, %1459 : vector<64x256xf32>
    %cst_943 = arith.constant 0.000000e+00 : f32
    %1461 = vector.broadcast %cst_943 : f32 to vector<64x256xf32>
    %1462 = arith.maximumf %1460, %1461 : vector<64x256xf32>
    %c0_944 = arith.constant 0 : index
    %c0_945 = arith.constant 0 : index
    %1463 = vector.load %arg10[%c0_944, %c0_945] : memref<64x256xf32, #tpu.memory_space<vmem>>, vector<64x256xf32>
    %1464 = arith.maximumf %1463, %1462 : vector<64x256xf32>
    %c0_946 = arith.constant 0 : index
    %c0_947 = arith.constant 0 : index
    %1465 = vector.load %arg10[%c0_946, %c0_947] : memref<64x256xf32, #tpu.memory_space<vmem>>, vector<64x256xf32>
    tpu.vector_store %arg10[%c0_946, %c0_947], %1464 {strides = array<i32>} : memref<64x256xf32, #tpu.memory_space<vmem>>, vector<64x256xf32>,
    %c12_948 = arith.constant 12 : index
    %c0_949 = arith.constant 0 : index
    %1466 = vector.load %arg9[%c12_948, %c0_949] : memref<15x256xf32, #tpu.memory_space<vmem>>, vector<1x256xf32>
    %c13_950 = arith.constant 13 : index
    %c0_951 = arith.constant 0 : index
    %1467 = vector.load %arg9[%c13_950, %c0_951] : memref<15x256xf32, #tpu.memory_space<vmem>>, vector<1x256xf32>
    %c14_952 = arith.constant 14 : index
    %c0_953 = arith.constant 0 : index
    %1468 = vector.load %arg9[%c14_952, %c0_953] : memref<15x256xf32, #tpu.memory_space<vmem>>, vector<1x256xf32>
    %1469 = arith.addf %1466, %1467 : vector<1x256xf32>
    %1470 = arith.addf %1469, %1468 : vector<1x256xf32>
    %cst_954 = arith.constant 1.600000e+01 : f32
    %1471 = vector.broadcast %cst_954 : f32 to vector<1x256xf32>
    %1472 = arith.mulf %1470, %1471 : vector<1x256xf32>
    %cst_955 = arith.constant 0.000000e+00 : f32
    %1473 = vector.broadcast %cst_955 : f32 to vector<1x256xf32>
    %1474 = arith.cmpf oeq, %1472, %1473 : vector<1x256xf32>
    %cst_956 = arith.constant 0.000000e+00 : f32
    %cst_957 = arith.constant 1.000000e+00 : f32
    %1475 = vector.broadcast %cst_956 : f32 to vector<1x256xf32>
    %1476 = vector.broadcast %cst_957 : f32 to vector<1x256xf32>
    %1477 = arith.select %1474, %1475, %1476 : vector<1x256xi1>, vector<1x256xf32>
    %cst_958 = arith.constant 1.000000e+00 : f32
    %1478 = vector.broadcast %cst_958 : f32 to vector<1x256xf32>
    %1479 = arith.divf %1478, %1472 : vector<1x256xf32>
    %cst_959 = arith.constant 0.000000e+00 : f32
    %1480 = vector.broadcast %cst_959 : f32 to vector<1x256xf32>
    %1481 = arith.select %1474, %1480, %1479 : vector<1x256xi1>, vector<1x256xf32>
    %c192_960 = arith.constant 192 : index
    %c0_961 = arith.constant 0 : index
    %1482 = vector.load %arg8[%c192_960, %c0_961] : memref<240x256xf32, #tpu.memory_space<vmem>>, vector<48x256xf32>
    %cst_962 = arith.constant dense<0.000000e+00> : vector<64x256xf32>
    %1483 = tpu.matmul %1292, %1482, %cst_962 {dimension_numbers = #tpu.dot_dimension_numbers<[1], [0], [0], [1], [0, 0, 1, 1], [], []>} : vector<64x48xf32>, vector<48x256xf32>, vector<64x256xf32> -> vector<64x256xf32>
    %1484 = vector.broadcast %1481 : vector<1x256xf32> to vector<64x256xf32>
    %1485 = arith.mulf %1483, %1484 : vector<64x256xf32>
    %1486 = vector.broadcast %1293 : vector<64x1xf32> to vector<64x256xf32>
    %1487 = vector.broadcast %1477 : vector<1x256xf32> to vector<64x256xf32>
    %1488 = arith.mulf %1486, %1487 : vector<64x256xf32>
    %1489 = arith.addf %1485, %1488 : vector<64x256xf32>
    %cst_963 = arith.constant 0.000000e+00 : f32
    %1490 = vector.broadcast %cst_963 : f32 to vector<64x256xf32>
    %1491 = arith.maximumf %1489, %1490 : vector<64x256xf32>
    %c0_964 = arith.constant 0 : index
    %c0_965 = arith.constant 0 : index
    %1492 = vector.load %arg10[%c0_964, %c0_965] : memref<64x256xf32, #tpu.memory_space<vmem>>, vector<64x256xf32>
    %1493 = arith.maximumf %1492, %1491 : vector<64x256xf32>
    %c0_966 = arith.constant 0 : index
    %c0_967 = arith.constant 0 : index
    %1494 = vector.load %arg10[%c0_966, %c0_967] : memref<64x256xf32, #tpu.memory_space<vmem>>, vector<64x256xf32>
    tpu.vector_store %arg10[%c0_966, %c0_967], %1493 {strides = array<i32>} : memref<64x256xf32, #tpu.memory_space<vmem>>, vector<64x256xf32>,
    %c0_968 = arith.constant 0 : index
    %c0_969 = arith.constant 0 : index
    %1495 = vector.load %arg10[%c0_968, %c0_969] : memref<64x256xf32, #tpu.memory_space<vmem>>, vector<64x256xf32>
    %c96_970 = arith.constant 96 : index
    %c0_971 = arith.constant 0 : index
    %1496 = vector.load %arg3[%c96_970, %c0_971] : memref<152x64xf32, #tpu.memory_space<vmem>>, vector<32x64xf32>
    %cst_972 = arith.constant dense<0.000000e+00> : vector<32x256xf32>
    %1497 = tpu.matmul %1496, %1495, %cst_972 {dimension_numbers = #tpu.dot_dimension_numbers<[1], [0], [0], [1], [0, 0, 1, 1], [], []>} : vector<32x64xf32>, vector<64x256xf32>, vector<32x256xf32> -> vector<32x256xf32>
    %c96_973 = arith.constant 96 : index
    %c0_974 = arith.constant 0 : index
    %1498 = vector.load %arg4[%c96_973, %c0_974] : memref<152x1xf32, #tpu.memory_space<vmem>>, vector<32x1xf32>
    %1499 = vector.broadcast %1498 : vector<32x1xf32> to vector<32x256xf32>
    %1500 = arith.addf %1497, %1499 : vector<32x256xf32>
    %cst_975 = arith.constant 0.000000e+00 : f32
    %1501 = vector.broadcast %cst_975 : f32 to vector<32x256xf32>
    %1502 = arith.maximumf %1500, %1501 : vector<32x256xf32>
    %c128_976 = arith.constant 128 : index
    %c0_977 = arith.constant 0 : index
    %1503 = vector.load %arg3[%c128_976, %c0_977] : memref<152x64xf32, #tpu.memory_space<vmem>>, vector<16x32xf32>
    %cst_978 = arith.constant dense<0.000000e+00> : vector<16x256xf32>
    %1504 = tpu.matmul %1503, %1502, %cst_978 {dimension_numbers = #tpu.dot_dimension_numbers<[1], [0], [0], [1], [0, 0, 1, 1], [], []>} : vector<16x32xf32>, vector<32x256xf32>, vector<16x256xf32> -> vector<16x256xf32>
    %c128_979 = arith.constant 128 : index
    %c0_980 = arith.constant 0 : index
    %1505 = vector.load %arg4[%c128_979, %c0_980] : memref<152x1xf32, #tpu.memory_space<vmem>>, vector<16x1xf32>
    %1506 = vector.broadcast %1505 : vector<16x1xf32> to vector<16x256xf32>
    %1507 = arith.addf %1504, %1506 : vector<16x256xf32>
    %cst_981 = arith.constant 0.000000e+00 : f32
    %1508 = vector.broadcast %cst_981 : f32 to vector<16x256xf32>
    %1509 = arith.maximumf %1507, %1508 : vector<16x256xf32>
    %c144_982 = arith.constant 144 : index
    %c0_983 = arith.constant 0 : index
    %1510 = vector.load %arg3[%c144_982, %c0_983] : memref<152x64xf32, #tpu.memory_space<vmem>>, vector<3x16xf32>
    %cst_984 = arith.constant dense<0.000000e+00> : vector<3x256xf32>
    %1511 = tpu.matmul %1510, %1509, %cst_984 {dimension_numbers = #tpu.dot_dimension_numbers<[1], [0], [0], [1], [0, 0, 1, 1], [], []>} : vector<3x16xf32>, vector<16x256xf32>, vector<3x256xf32> -> vector<3x256xf32>
    %c144_985 = arith.constant 144 : index
    %c0_986 = arith.constant 0 : index
    %1512 = vector.load %arg4[%c144_985, %c0_986] : memref<152x1xf32, #tpu.memory_space<vmem>>, vector<3x1xf32>
    %1513 = vector.broadcast %1512 : vector<3x1xf32> to vector<3x256xf32>
    %1514 = arith.addf %1511, %1513 : vector<3x256xf32>
    %c0_987 = arith.constant 0 : index
    %c0_988 = arith.constant 0 : index
    %1515 = vector.load %arg5[%c0_987, %c0_988] : memref<3x256xf32, #tpu.memory_space<vmem>>, vector<3x256xf32>
    tpu.vector_store %arg5[%c0_987, %c0_988], %1514 {strides = array<i32>} : memref<3x256xf32, #tpu.memory_space<vmem>>, vector<3x256xf32>,
    return
  }
  func.func @transform_0(%arg0: i32) -> (i32, i32) {
    %c0_i32 = arith.constant 0 : i32
    %c0_i32_0 = arith.constant 0 : i32
    return %c0_i32, %arg0 : i32, i32
  }
  func.func @transform_1(%arg0: i32) -> (i32, i32) {
    %c0_i32 = arith.constant 0 : i32
    %c0_i32_0 = arith.constant 0 : i32
    return %c0_i32, %arg0 : i32, i32
  }
  func.func @transform_2(%arg0: i32) -> (i32, i32) {
    %c0_i32 = arith.constant 0 : i32
    %c0_i32_0 = arith.constant 0 : i32
    %c0_i32_1 = arith.constant 0 : i32
    return %c0_i32, %c0_i32_0 : i32, i32
  }
  func.func @transform_3(%arg0: i32) -> (i32, i32) {
    %c0_i32 = arith.constant 0 : i32
    %c0_i32_0 = arith.constant 0 : i32
    %c0_i32_1 = arith.constant 0 : i32
    return %c0_i32, %c0_i32_0 : i32, i32
  }
  func.func @transform_4(%arg0: i32) -> (i32, i32) {
    %c0_i32 = arith.constant 0 : i32
    %c0_i32_0 = arith.constant 0 : i32
    return %c0_i32, %arg0 : i32, i32
  }
}

</mosaic_0001>

<bundles_post_ra>
// kernel: _mlp_last_impl.1
= control target key start
LH: loop header
LB: loop body
LE: loop exit
PB: predicated region body
PF: predicated region fallthrough
CT: control target
= control target key end

     0   :  { %vm42_vm0 = vcmask 1045504   ;;  %vm35_vm1 = vcmask 48128   ;;  %vm204_vm2 = vcmask 1043456   ;;  %v14229_v2 = vmov 0.0   ;;  %s14218_s0 = inlined_call_operand.vmem [shape: f32[128,256], index: 0, kind: input, shape index: {}]   ;;  %s14219_s2 = inlined_call_operand.vmem [shape: f32[152,64], index: 2, kind: input, shape index: {}]   ;;  %s14220_s3 = inlined_call_operand.vmem [shape: f32[152,1], index: 3, kind: input, shape index: {}]   ;;  %s14221_s1 = inlined_call_operand.vmem [shape: f32[64,256], index: 1, kind: input, shape index: {}]   ;;  %s14222_s4 = inlined_call_operand.vmem [shape: f32[3,256], index: 4, kind: output, shape index: {}]  }
   0x1   :  { %v34_v0 = vld [vmem:[%s14218_s0 + $0x8] sm:$0x3f]  ;;  %v33_v1 = vld [vmem:[%s14218_s0] sm:$0x3f]  ;;  %113 = vmatprep.mubr.f32.mxu0 %v14229_v2  ;;  %279 = vmatprep.mubr.f32.mxu1 %v14229_v2  ;;  %v199_v5 = vld [vmem:[%s14218_s0 + $0x18] sm:$0x3] }
   0x2   :  { %v9829_v3 = vld [vmem:[%s14219_s2] sm:$0xff]  ;;  %9077 = vmatprep.subr.msk.mxu0 %vm42_vm0, %v34_v0  ;;  %v197_v4 = vld [vmem:[%s14218_s0 + $0x8] sm:$0xf0]  ;;  %v9792_v7 = vmov 0   ;;  %v209_v9 = vrot.slane %v199_v5, 4  ;;  %v6800_v51 = vld [vmem:[%s14220_s3 + $0x30] sm:$0xff] }
   0x3   :  { %v196_v6 = vld [vmem:[%s14218_s0] sm:$0xf0]  ;;  %9679 = vset.pattern.permute.xlu0 %v9792_v7  ;;  %9078 = vmatpush1.msk.msra.mxu0 %vm42_vm0, %v33_v1  ;;  %v208_v8 = vrot.slane %v197_v4, 4  ;;  %v198_v10 = vld [vmem:[%s14218_s0 + $0x10] sm:$0x3]  ;;  %v9849_v12 = vld [vmem:[%s14219_s2 + $0x8] sm:$0xff] }
   0x4   :  { %v205_v11 = vrot.slane %v196_v6, 4  ;;  %9680 = vset.pattern.permute.xlu1 %v9792_v7  ;;  %9079 = vmatmul.mubr.msk.f32.vlgmr.msra.gmra.mrb[0].mxu0 %vm35_vm1, %v9829_v3  ;;  %v206_v13 = vrot.slane %v198_v10, 4  ;;  %v350_v14 = vld [vmem:[%s14218_s0 + $0x18] sm:$0x3f]  ;;  %v349_v15 = vld [vmem:[%s14218_s0 + $0x10] sm:$0x3f] }
   0x5   :  { %v19_v16 = vld [vmem:[%s14220_s3] sm:$0xff]  ;;  %v210_v17 = vsel %vm204_vm2, %v208_v8, %v209_v9  ;;  %119 = vmatprep.mubr.f32.mxu0 %v14229_v2  ;;  %9091 = vmatprep.subr.msk.mxu0 %vm42_vm0, %v350_v14  ;;  %v492_v18 = vld [vmem:[%s14218_s0 + $0x18] sm:$0xf0]  ;;  %v494_v19 = vld [vmem:[%s14218_s0 + $0x28] sm:$0x3] }
   0x6   :  { %v491_v20 = vld [vmem:[%s14218_s0 + $0x10] sm:$0xf0]  ;;  %9084 = vmatprep.subr.msk.mxu1 %vm42_vm0, %v210_v17  ;;  %v207_v21 = vsel %vm204_vm2, %v205_v11, %v206_v13  ;;  %9092 = vmatpush1.msk.msra.mxu0 %vm42_vm0, %v349_v15  ;;  %v502_v22 = vrot.slane %v492_v18, 4  ;;  %v503_v23 = vrot.slane %v494_v19, 4  ;;  %v493_v24 = vld [vmem:[%s14218_s0 + $0x20] sm:$0x3] }
   0x7   :  { %v499_v25 = vrot.slane %v491_v20, 4  ;;  %9085 = vmatpush1.msk.msra.mxu1 %vm42_vm0, %v207_v21  ;;  %v500_v26 = vrot.slane %v493_v24, 4  ;;  %v644_v27 = vld [vmem:[%s14218_s0 + $0x28] sm:$0x3f]  ;;  %143 = vperm.xlu0 %9679, %v19_v16   ;;  %v788_v31 = vld [vmem:[%s14218_s0 + $0x38] sm:$0x3] }
   0x8   :  { %v20_v28 = vld [vmem:[%s14220_s3 + $0x8] sm:$0xff]  ;;  %9086 = vmatmul.mubr.msk.f32.vlgmr.msra.gmra.mrb[0].mxu1 %vm35_vm1, %v9829_v3  ;;  %9080 = vmatmul.mubr.msk.f32.gmra.mrb[2].mxu0 %vm35_vm1, %v9849_v12  ;;  %v504_v29 = vsel %vm204_vm2, %v502_v22, %v503_v23  ;;  %v785_v32 = vld [vmem:[%s14218_s0 + $0x20] sm:$0xf0]  ;;  %v797_v35 = vrot.slane %v788_v31, 4  ;;  %v787_v36 = vld [vmem:[%s14218_s0 + $0x30] sm:$0x3] }
   0x9   :  { %v786_v30 = vld [vmem:[%s14218_s0 + $0x28] sm:$0xf0]  ;;  %285 = vmatprep.mubr.f32.mxu1 %v14229_v2  ;;  %421 = vmatprep.mubr.f32.mxu0 %v14229_v2  ;;  %v501_v33 = vsel %vm204_vm2, %v499_v25, %v500_v26  ;;  %v643_v37 = vld [vmem:[%s14218_s0 + $0x20] sm:$0x3f]  ;;  %v793_v39 = vrot.slane %v785_v32, 4  ;;  %v794_v40 = vrot.slane %v787_v36, 4 }
   0xa   :  { %v796_v34 = vrot.slane %v786_v30, 4  ;;  %9098 = vmatprep.subr.msk.mxu1 %vm42_vm0, %v504_v29  ;;  %9105 = vmatprep.subr.msk.mxu0 %vm42_vm0, %v644_v27  ;;  %v1080_v41 = vld [vmem:[%s14218_s0 + $0x38] sm:$0xf0]  ;;  %v1082_v42 = vld [vmem:[%s14218_s0 + $0x48] sm:$0x3]  ;;  %v6798_v46 = vld [vmem:[%s14220_s3 + $0x20] sm:$0xff] }
   0xb   :  { %9099 = vmatpush1.msk.msra.mxu1 %vm42_vm0, %v501_v33  ;;  %148 = vperm.xlu0 %9679, %v20_v28   ;;  %v938_v43 = vld [vmem:[%s14218_s0 + $0x38] sm:$0x3f]  ;;  %v1090_v44 = vrot.slane %v1080_v41, 4  ;;  %v1091_v45 = vrot.slane %v1082_v42, 4  ;;  %v795_v47 = vsel %vm204_vm2, %v793_v39, %v794_v40  ;;  %v1079_v49 = vld [vmem:[%s14218_s0 + $0x30] sm:$0xf0] }
   0xc   :  { %v798_v38 = vsel %vm204_vm2, %v796_v34, %v797_v35  ;;  %9087 = vmatmul.mubr.msk.f32.gmra.mrb[2].mxu1 %vm35_vm1, %v9849_v12  ;;  %9093 = vmatmul.mubr.msk.f32.vlgmr.msra.gmra.mrb[4].mxu0 %vm35_vm1, %v9829_v3  ;;  %v1081_v50 = vld [vmem:[%s14218_s0 + $0x40] sm:$0x3]  ;;  %v1374_v52 = vld [vmem:[%s14218_s0 + $0x48] sm:$0xf0]  ;;  %v1376_v53 = vld [vmem:[%s14218_s0 + $0x58] sm:$0x3] }
   0xd   :  { %573 = vmatprep.mubr.f32.mxu1 %v14229_v2  ;;  %427 = vmatprep.mubr.f32.mxu0 %v14229_v2  ;;  %v1092_v48 = vsel %vm204_vm2, %v1090_v44, %v1091_v45  ;;  %v937_v54 = vld [vmem:[%s14218_s0 + $0x30] sm:$0x3f]  ;;  %v1087_v55 = vrot.slane %v1079_v49, 4  ;;  %v1088_v56 = vrot.slane %v1081_v50, 4  ;;  %v1232_v57 = vld [vmem:[%s14218_s0 + $0x48] sm:$0x3f] }
   0xe   :  { %9106 = vmatpush1.msk.msra.mxu0 %vm42_vm0, %v643_v37  ;;  %9112 = vmatprep.subr.msk.mxu1 %vm42_vm0, %v798_v38  ;;  %v1384_v58 = vrot.slane %v1374_v52, 4  ;;  %v1385_v59 = vrot.slane %v1376_v53, 4  ;;  %v6802_v60 = vld [vmem:[%s14220_s3 + $0x40] sm:$0xff]  ;;  %v1375_v0 = vld [vmem:[%s14218_s0 + $0x50] sm:$0x3] }
   0xf   :  { %9119 = vmatprep.subr.msk.mxu0 %vm42_vm0, %v938_v43  ;;  %6995 = vperm.xlu0 %9679, %v6798_v46   ;;  %v1089_v61 = vsel %vm204_vm2, %v1087_v55, %v1088_v56  ;;  %v1373_v63 = vld [vmem:[%s14218_s0 + $0x40] sm:$0xf0]  ;;  %v6804_v1 = vld [vmem:[%s14220_s3 + $0x50] sm:$0xff]  ;;  %v1668_v4 = vld [vmem:[%s14218_s0 + $0x58] sm:$0xf0]  ;;  %v1382_v8 = vrot.slane %v1375_v0, 4 }
  0x10   :  { %9100 = vmatmul.mubr.msk.f32.vlgmr.msra.gmra.mrb[4].mxu1 %vm35_vm1, %v9829_v3  ;;  %9094 = vmatmul.mubr.msk.f32.gmra.mrb[6].mxu0 %vm35_vm1, %v9849_v12  ;;  %v1386_v62 = vsel %vm204_vm2, %v1384_v58, %v1385_v59  ;;  %v1670_v5 = vld [vmem:[%s14218_s0 + $0x68] sm:$0x3]  ;;  %v1231_v6 = vld [vmem:[%s14218_s0 + $0x40] sm:$0x3f]  ;;  %v1381_v7 = vrot.slane %v1373_v63, 4  ;;  %v1678_v11 = vrot.slane %v1668_v4, 4 }
  0x11   :  { %579 = vmatprep.mubr.f32.mxu1 %v14229_v2  ;;  %715 = vmatprep.mubr.f32.mxu0 %v14229_v2  ;;  %v8748_v9 = vld [vmem:[%s14220_s3 + $0x60] sm:$0xff]  ;;  %v1526_v10 = vld [vmem:[%s14218_s0 + $0x58] sm:$0x3f]  ;;  %v1679_v13 = vrot.slane %v1670_v5, 4  ;;  %v10018_v14 = vld [vmem:[%s14218_s0 + $0x50] sm:$0xf0] }
  0x12   :  { %9113 = vmatpush1.msk.msra.mxu1 %vm42_vm0, %v795_v47  ;;  %v2843_v15 = vld [vmem:[%s14218_s0 + $0x90] sm:$0xf0]  ;;  %v1669_v16 = vld [vmem:[%s14218_s0 + $0x60] sm:$0x3]  ;;  %v1383_v20 = vsel %vm204_vm2, %v1381_v7, %v1382_v8  ;;  %v1675_v21 = vrot.slane %v10018_v14, 4 }
  0x13   :  { %9126 = vmatprep.subr.msk.mxu1 %vm42_vm0, %v1092_v48  ;;  %7005 = vperm.xlu0 %9679, %v6800_v51   ;;  %v2845_v17 = vld [vmem:[%s14218_s0 + $0xa0] sm:$0x3]  ;;  %v2851_v18 = vrot.slane %v2843_v15, 4  ;;  %v8750_v19 = vld [vmem:[%s14220_s3 + $0x70] sm:$0xff]  ;;  %v1962_v22 = vld [vmem:[%s14218_s0 + $0x68] sm:$0xf0]  ;;  %v1680_v25 = vsel %vm204_vm2, %v1678_v11, %v1679_v13 }
  0x14   :  { %9101 = vmatmul.mubr.msk.f32.gmra.mrb[6].mxu1 %vm35_vm1, %v9849_v12  ;;  %9107 = vmatmul.mubr.msk.f32.vlgmr.msra.gmra.mrb[8].mxu0 %vm35_vm1, %v9829_v3  ;;  %v1964_v23 = vld [vmem:[%s14218_s0 + $0x78] sm:$0x3]  ;;  %v2852_v24 = vrot.slane %v2845_v17, 4  ;;  %v3138_v26 = vld [vmem:[%s14218_s0 + $0xa8] sm:$0xf0]  ;;  %v1676_v35 = vrot.slane %v1669_v16, 4 }
  0x15   :  { %867 = vmatprep.mubr.f32.mxu1 %v14229_v2  ;;  %721 = vmatprep.mubr.f32.mxu0 %v14229_v2  ;;  %v3140_v27 = vld [vmem:[%s14218_s0 + $0xb8] sm:$0x3]  ;;  %v3137_v28 = vld [vmem:[%s14218_s0 + $0xa0] sm:$0xf0]  ;;  %v1525_v29 = vld [vmem:[%s14218_s0 + $0x50] sm:$0x3f] }
  0x16   :  { %9120 = vmatpush1.msk.msra.mxu0 %vm42_vm0, %v937_v54  ;;  %v10064_v30 = vsel %vm204_vm2, %v2851_v18, %v2852_v24  ;;  %v3148_v31 = vrot.slane %v3138_v26, 4  ;;  %v3149_v32 = vrot.slane %v3140_v27, 4  ;;  %v3139_v33 = vld [vmem:[%s14218_s0 + $0xb0] sm:$0x3]  ;;  %v3145_v34 = vrot.slane %v3137_v28, 4  ;;  %v8884_v46 = vld [vmem:[%s14220_s3 + $0x80] sm:$0xff] }
  0x17   :  { %9133 = vmatprep.subr.msk.mxu0 %vm42_vm0, %v1232_v57  ;;  %7015 = vperm.xlu0 %9679, %v6802_v60   ;;  %v1820_v36 = vld [vmem:[%s14218_s0 + $0x68] sm:$0x3f]  ;;  %v1972_v37 = vrot.slane %v1962_v22, 4  ;;  %v1973_v38 = vrot.slane %v1964_v23, 4  ;;  %v10076_v39 = vld [vmem:[%s14218_s0 + $0x60] sm:$0xf0]  ;;  %v1677_v58 = vsel %vm204_vm2, %v1675_v21, %v1676_v35 }
  0x18   :  { %9114 = vmatmul.mubr.msk.f32.vlgmr.msra.gmra.mrb[8].mxu1 %vm35_vm1, %v9829_v3  ;;  %9108 = vmatmul.mubr.msk.f32.gmra.mrb[10].mxu0 %vm35_vm1, %v9849_v12  ;;  %v3146_v40 = vrot.slane %v3139_v33, 4  ;;  %v10080_v41 = vsel %vm204_vm2, %v3148_v31, %v3149_v32  ;;  %v3432_v42 = vld [vmem:[%s14218_s0 + $0xb8] sm:$0xf0]  ;;  %v3434_v43 = vld [vmem:[%s14218_s0 + $0xc8] sm:$0x3]  ;;  %v1969_v51 = vrot.slane %v10076_v39, 4 }
  0x19   :  { %873 = vmatprep.mubr.f32.mxu1 %v14229_v2  ;;  %1009 = vmatprep.mubr.f32.mxu0 %v14229_v2  ;;  %v3431_v44 = vld [vmem:[%s14218_s0 + $0xb0] sm:$0xf0]  ;;  %v3442_v47 = vrot.slane %v3432_v42, 4  ;;  %v3443_v48 = vrot.slane %v3434_v43, 4  ;;  %v3433_v49 = vld [vmem:[%s14218_s0 + $0xc0] sm:$0x3]  ;;  %v1974_v0 = vsel %vm204_vm2, %v1972_v37, %v1973_v38 }
  0x1a   :  { %9127 = vmatpush1.msk.msra.mxu1 %vm42_vm0, %v1089_v61  ;;  %v10096_v45 = vsel %vm204_vm2, %v3145_v34, %v3146_v40  ;;  %v3439_v50 = vrot.slane %v3431_v44, 4  ;;  %v3440_v52 = vrot.slane %v3433_v49, 4  ;;  %v1963_v53 = vld [vmem:[%s14218_s0 + $0x70] sm:$0x3]  ;;  %v10114_v54 = vld [vmem:[%s14218_s0 + $0x78] sm:$0xf0] }
  0x1b   :  { %9140 = vmatprep.subr.msk.mxu1 %vm42_vm0, %v1386_v62  ;;  %7025 = vperm.xlu0 %9679, %v6804_v1   ;;  %v10117_v55 = vsel %vm204_vm2, %v3442_v47, %v3443_v48  ;;  %v3726_v56 = vld [vmem:[%s14218_s0 + $0xc8] sm:$0xf0]  ;;  %v3728_v57 = vld [vmem:[%s14218_s0 + $0xd8] sm:$0x3]  ;;  %v3725_v62 = vld [vmem:[%s14218_s0 + $0xc0] sm:$0xf0] }
  0x1c   :  { %9115 = vmatmul.mubr.msk.f32.gmra.mrb[10].mxu1 %vm35_vm1, %v9849_v12  ;;  %9121 = vmatmul.mubr.msk.f32.vlgmr.msra.gmra.mrb[12].mxu0 %vm35_vm1, %v9829_v3  ;;  %v10128_v59 = vsel %vm204_vm2, %v3439_v50, %v3440_v52  ;;  %v3736_v60 = vrot.slane %v3726_v56, 4  ;;  %v3737_v61 = vrot.slane %v3728_v57, 4  ;;  %v3727_v63 = vld [vmem:[%s14218_s0 + $0xd0] sm:$0x3]  ;;  %v2258_v1 = vld [vmem:[%s14218_s0 + $0x88] sm:$0x3] }
  0x1d   :  { %1161 = vmatprep.mubr.f32.mxu1 %v14229_v2  ;;  %1015 = vmatprep.mubr.f32.mxu0 %v14229_v2  ;;  %v8985_v4 = vld [vmem:[%s14220_s3 + $0x90] sm:$0x7]  ;;  %v3733_v5 = vrot.slane %v3725_v62, 4  ;;  %v1819_v7 = vld [vmem:[%s14218_s0 + $0x60] sm:$0x3f]  ;;  %v1970_v18 = vrot.slane %v1963_v53, 4 }
  0x1e   :  { %9134 = vmatpush1.msk.msra.mxu0 %vm42_vm0, %v1231_v6  ;;  %v3734_v6 = vrot.slane %v3727_v63, 4  ;;  %v10153_v8 = vsel %vm204_vm2, %v3736_v60, %v3737_v61  ;;  %v4019_v11 = vld [vmem:[%s14218_s0 + $0xd0] sm:$0xf0]  ;;  %v4021_v16 = vld [vmem:[%s14218_s0 + $0xe0] sm:$0x3]  ;;  %v2267_v21 = vrot.slane %v2258_v1, 4 }
  0x1f   :  { %9147 = vmatprep.subr.msk.mxu0 %vm42_vm0, %v1526_v10  ;;  %8754 = vperm.xlu0 %9679, %v8748_v9   ;;  %v4020_v9 = vld [vmem:[%s14218_s0 + $0xd8] sm:$0xf0]  ;;  %v4022_v10 = vld [vmem:[%s14218_s0 + $0xe8] sm:$0x3]  ;;  %v4027_v17 = vrot.slane %v4019_v11, 4  ;;  %v4028_v22 = vrot.slane %v4021_v16, 4  ;;  %v1971_v35 = vsel %vm204_vm2, %v1969_v51, %v1970_v18  ;;  %v14225_v18 = vlaneseq }
  0x20   :  { %9128 = vmatmul.mubr.msk.f32.vlgmr.msra.gmra.mrb[12].mxu1 %vm35_vm1, %v9829_v3  ;;  %9122 = vmatmul.mubr.msk.f32.gmra.mrb[14].mxu0 %vm35_vm1, %v9849_v12  ;;  %v10166_v13 = vsel %vm204_vm2, %v3733_v5, %v3734_v6  ;;  %v4030_v14 = vrot.slane %v4020_v9, 4  ;;  %v4031_v15 = vrot.slane %v4022_v10, 4  ;;  %v4314_v24 = vld [vmem:[%s14218_s0 + $0xe8] sm:$0xf0]  ;;  %v4313_v26 = vld [vmem:[%s14218_s0 + $0xe0] sm:$0xf0] }
  0x21   :  { %1167 = vmatprep.mubr.f32.mxu1 %v14229_v2  ;;  %1303 = vmatprep.mubr.f32.mxu0 %v14229_v2  ;;  %v10195_v27 = vsel %vm204_vm2, %v4027_v17, %v4028_v22  ;;  %v4324_v28 = vrot.slane %v4314_v24, 4  ;;  %v4315_v31 = vld [vmem:[%s14218_s0 + $0xf0] sm:$0x3]  ;;  %v4321_v32 = vrot.slane %v4313_v26, 4  ;;  %v2255_v33 = vld [vmem:[%s14218_s0 + $0x70] sm:$0xf0] }
  0x22   :  { %9141 = vmatpush1.msk.msra.mxu1 %vm42_vm0, %v1383_v20  ;;  %v2266_v20 = vrot.slane %v10114_v54, 4  ;;  %v10181_v23 = vsel %vm204_vm2, %v4030_v14, %v4031_v15  ;;  %v4322_v34 = vrot.slane %v4315_v31, 4  ;;  %v21_v37 = vld [vmem:[%s14221_s1] ss:$8 sm:$0x3]  ;;  %v2263_v52 = vrot.slane %v2255_v33, 4 }
  0x23   :  { %9154 = vmatprep.subr.msk.mxu1 %vm42_vm0, %v1680_v25  ;;  %8764 = vperm.xlu0 %9679, %v8750_v19   ;;  %v2114_v19 = vld [vmem:[%s14218_s0 + $0x78] sm:$0x3f]  ;;  %v9075_v38 = vld [vmem:[%s14221_s1 + $0x1] ss:$8 sm:$0x3]  ;;  %v14231_v61 = vmov 1.0  }
  0x24   :  { %9129 = vmatmul.mubr.msk.f32.gmra.mrb[14].mxu1 %vm35_vm1, %v9849_v12  ;;  %9135 = vmatmul.mubr.msk.f32.vlgmr.msra.gmra.mrb[16].mxu0 %vm35_vm1, %v9829_v3  ;;  %v4316_v25 = vld [vmem:[%s14218_s0 + $0xf8] sm:$0x3]  ;;  %v2268_v39 = vsel %vm204_vm2, %v2266_v20, %v2267_v21  ;;  %v2257_v40 = vld [vmem:[%s14218_s0 + $0x80] sm:$0x3]  ;;  %v10224_v42 = vsel %vm204_vm2, %v4321_v32, %v4322_v34  ;;  %v26_v44 = vadd.f32 %v9075_v38, %v21_v37  ;;  %v10241_v48 = vld [vmem:[%s14218_s0 + $0x80] sm:$0xf0] }
  0x25   :  { %1455 = vmatprep.mubr.f32.mxu1 %v14229_v2  ;;  %1309 = vmatprep.mubr.f32.mxu0 %v14229_v2  ;;  %v9076_v43 = vld [vmem:[%s14221_s1 + $0x2] ss:$8 sm:$0x3]  ;;  %v2552_v47 = vld [vmem:[%s14218_s0 + $0x98] sm:$0x3]  ;;  %v2264_v53 = vrot.slane %v2257_v40, 4 }
  0x26   :  { %9148 = vmatpush1.msk.msra.mxu0 %vm42_vm0, %v1525_v29  ;;  %v4325_v29 = vrot.slane %v4316_v25, 4  ;;  %v10246_v49 = vld [vmem:[%s14218_s0 + $0x90] sm:$0x3]  ;;  %v10248_v50 = vadd.f32 %v9076_v43, %v26_v44  ;;  %v2408_v54 = vld [vmem:[%s14218_s0 + $0x88] sm:$0x3f]  ;;  %v2561_v57 = vrot.slane %v2552_v47, 4 }
  0x27   :  { %9161 = vmatprep.subr.msk.mxu0 %vm42_vm0, %v1820_v36  ;;  %8888 = vperm.xlu0 %9679, %v8884_v46   ;;  %v2550_v46 = vld [vmem:[%s14218_s0 + $0x88] sm:$0xf0]  ;;  %v2113_v51 = vld [vmem:[%s14218_s0 + $0x70] sm:$0x3f]  ;;  %v2558_v60 = vrot.slane %v10246_v49, 4  ;;  %v2265_v5 = vsel %vm204_vm2, %v2263_v52, %v2264_v53  ;;  %vm10337_vm4 = vcmp.lt.s32.totalorder %v14225_v18, 256 }
  0x28   :  { %9142 = vmatmul.mubr.msk.f32.vlgmr.msra.gmra.mrb[16].mxu1 %vm35_vm1, %v9829_v3  ;;  %9136 = vmatmul.mubr.msk.f32.gmra.mrb[18].mxu0 %vm35_vm1, %v9849_v12  ;;  %v10207_v36 = vsel %vm204_vm2, %v4324_v28, %v4325_v29  ;;  %v2560_v56 = vrot.slane %v2550_v46, 4  ;;  %vm28_vm3 = vcmp.eq.f32.partialorder %v10248_v50, 0.0  ;;  %9681 = vrcp.f32 %v10248_v50  ;;  %v9081_v63 = vld [vmem:[%s14221_s1 + $0x2] ss:$8 sm:$0x3] }
  0x29   :  { %1461 = vmatprep.mubr.f32.mxu1 %v14229_v2  ;;  %1597 = vmatprep.mubr.f32.mxu0 %v14229_v2  ;;  %v10270_v62 = vsel %vm28_vm3, 0.0, %v14231_v61  ;;  %v9082_v1 = vld [vmem:[%s14221_s1 + $0x3] ss:$8 sm:$0x3]  ;;  %v2846_v6 = vld [vmem:[%s14218_s0 + $0xa8] sm:$0x3] }
  0x2a   :  { %9155 = vmatpush1.msk.msra.mxu1 %vm42_vm0, %v1677_v58  ;;  %v2557_v58 = vrot.slane %v10241_v48, 4  ;;  %v189_v9 = vadd.f32 %v9082_v1, %v9081_v63  ;;  %v9089_v10 = vld [vmem:[%s14221_s1 + $0x5] ss:$8 sm:$0x3]  ;;  %v2562_v11 = vsel %vm204_vm2, %v2560_v56, %v2561_v57  ;;  %v2702_v22 = vld [vmem:[%s14218_s0 + $0x98] sm:$0x3f] }
  0x2b   :  { %9168 = vmatprep.subr.msk.mxu1 %vm42_vm0, %v1974_v0  ;;  %8988 = vperm.xlu0 %9679, %v8985_v4   ;;  %v10279_v0 = vld [vmem:[%s14218_s0 + $0x98] sm:$0xf0]  ;;  %v9088_v4 = vld [vmem:[%s14221_s1 + $0x4] ss:$8 sm:$0x3]  ;;  %v2855_v34 = vrot.slane %v2846_v6, 4 }
  0x2c   :  { %9143 = vmatmul.mubr.msk.f32.gmra.mrb[18].mxu1 %vm35_vm1, %v9849_v12  ;;  %9149 = vmatmul.mubr.msk.f32.vlgmr.msra.gmra.mrb[20].mxu0 %vm35_vm1, %v9829_v3  ;;  %v9090_v14 = vld [vmem:[%s14221_s1 + $0x6] ss:$8 sm:$0x3]  ;;  %v342_v15 = vadd.f32 %v9089_v10, %v9088_v4  ;;  %v2407_v17 = vld [vmem:[%s14218_s0 + $0x80] sm:$0x3f]  ;;  %v2854_v29 = vrot.slane %v10279_v0, 4  ;;  %v2559_v48 = vsel %vm204_vm2, %v2557_v58, %v2558_v60 }
  0x2d   :  { %1749 = vmatprep.mubr.f32.mxu1 %v14229_v2  ;;  %1603 = vmatprep.mubr.f32.mxu0 %v14229_v2  ;;  %v9095_v16 = vld [vmem:[%s14221_s1 + $0x6] ss:$8 sm:$0x3]  ;;  %v9096_v20 = vld [vmem:[%s14221_s1 + $0x7] ss:$8 sm:$0x3] }
  0x2e   :  { %9162 = vmatpush1.msk.msra.mxu0 %vm42_vm0, %v1819_v7  ;;  %v9083_v7 = vld [vmem:[%s14221_s1 + $0x4] ss:$8 sm:$0x3]  ;;  %v9097_v21 = vld [vmem:[%s14221_s1 + $0x10] ss:$8 sm:$0x3]  ;;  %v10326_v24 = vadd.f32 %v9090_v14, %v342_v15  ;;  %v484_v25 = vadd.f32 %v9096_v20, %v9095_v16  ;;  %v2856_v50 = vsel %vm204_vm2, %v2854_v29, %v2855_v34 }
  0x2f   :  { %9175 = vmatprep.subr.msk.mxu0 %vm42_vm0, %v2114_v19  ;;  %v10314_v19 = vadd.f32 %v9083_v7, %v189_v9  ;;  %v9102_v26 = vld [vmem:[%s14221_s1 + $0x10] ss:$8 sm:$0x3]  ;;  %v9103_v28 = vld [vmem:[%s14221_s1 + $0x11] ss:$8 sm:$0x3] }
  0x30   :  { %9156 = vmatmul.mubr.msk.f32.vlgmr.msra.gmra.mrb[20].mxu1 %vm35_vm1, %v9829_v3  ;;  %9150 = vmatmul.mubr.msk.f32.gmra.mrb[22].mxu0 %vm35_vm1, %v9849_v12  ;;  %v9104_v32 = vld [vmem:[%s14221_s1 + $0x12] ss:$8 sm:$0x3]  ;;  %v636_v33 = vadd.f32 %v9103_v28, %v9102_v26  ;;  %182 = vst.msk [vmem:[#allocation3] ss:$8 sm:$0x3] %vm10337_vm4, %v10270_v62  ;;  %v10358_v37 = vadd.f32 %v9097_v21, %v484_v25 }
  0x31   :  { %1755 = vmatprep.mubr.f32.mxu1 %v14229_v2  ;;  %1891 = vmatprep.mubr.f32.mxu0 %v14229_v2  ;;  %vm191_vm5 = vcmp.eq.f32.partialorder %v10314_v19, 0.0  ;;  %vm344_vm6 = vcmp.eq.f32.partialorder %v10326_v24, 0.0  ;;  %v9109_v38 = vld [vmem:[%s14221_s1 + $0x12] ss:$8 sm:$0x3]  ;;  %9683 = vrcp.f32 %v10314_v19 }
  0x32   :  { %9169 = vmatpush1.msk.msra.mxu1 %vm42_vm0, %v1971_v35  ;;  %v10355_v35 = vsel %vm191_vm5, 0.0, %v14231_v61  ;;  %v10373_v40 = vadd.f32 %v9104_v32, %v636_v33  ;;  %v9110_v43 = vld [vmem:[%s14221_s1 + $0x13] ss:$8 sm:$0x3]  ;;  %v9682_v44 = vpop.eup %9681  ;;  %vm486_vm7 = vcmp.eq.f32.partialorder %v10358_v37, 0.0  ;;  %9685 = vrcp.f32 %v10326_v24 }
  0x33   :  { %9182 = vmatprep.subr.msk.mxu1 %vm42_vm0, %v2268_v39  ;;  %335 = vst.msk [vmem:[#allocation3 + $0x1] ss:$8 sm:$0x3] %vm10337_vm4, %v10355_v35  ;;  %v10371_v39 = vsel %vm344_vm6, 0.0, %v14231_v61  ;;  %v778_v47 = vadd.f32 %v9110_v43, %v9109_v38  ;;  %v10390_v49 = vsel %vm28_vm3, 0.0, %v9682_v44  ;;  %9687 = vrcp.f32 %v10358_v37 }
  0x34   :  { %9157 = vmatmul.mubr.msk.f32.gmra.mrb[22].mxu1 %vm35_vm1, %v9849_v12  ;;  %9163 = vmatmul.mubr.msk.f32.vlgmr.msra.gmra.mrb[24].mxu0 %vm35_vm1, %v9829_v3  ;;  %477 = vst.msk [vmem:[#allocation3 + $0x2] ss:$8 sm:$0x3] %vm10337_vm4, %v10371_v39  ;;  %v9111_v46 = vld [vmem:[%s14221_s1 + $0x14] ss:$8 sm:$0x3]  ;;  %9689 = vrcp.f32 %v10373_v40 }
  0x35   :  { %2043 = vmatprep.mubr.f32.mxu1 %v14229_v2  ;;  %1897 = vmatprep.mubr.f32.mxu0 %v14229_v2  ;;  %vm638_vm8 = vcmp.eq.f32.partialorder %v10373_v40, 0.0  ;;  %v9116_v52 = vld [vmem:[%s14221_s1 + $0x14] ss:$8 sm:$0x3]  ;;  %v2996_v1 = vld [vmem:[%s14218_s0 + $0xa8] sm:$0x3f] }
  0x36   :  { %9176 = vmatpush1.msk.msra.mxu0 %vm42_vm0, %v2113_v51  ;;  %v10395_v51 = vsel %vm486_vm7, 0.0, %v14231_v61  ;;  %v10412_v53 = vsel %vm638_vm8, 0.0, %v14231_v61  ;;  %v9117_v56 = vld [vmem:[%s14221_s1 + $0x15] ss:$8 sm:$0x3] }
  0x37   :  { %9189 = vmatprep.subr.msk.mxu0 %vm42_vm0, %v2408_v54  ;;  %629 = vst.msk [vmem:[#allocation3 + $0x3] ss:$8 sm:$0x3] %vm10337_vm4, %v10395_v51  ;;  %v10414_v54 = vadd.f32 %v9111_v46, %v778_v47  ;;  %771 = vst.msk [vmem:[#allocation3 + $0x4] ss:$8 sm:$0x3] %vm10337_vm4, %v10412_v53  ;;  %v930_v58 = vadd.f32 %v9117_v56, %v9116_v52 }
  0x38   :  { %9170 = vmatmul.mubr.msk.f32.vlgmr.msra.gmra.mrb[24].mxu1 %vm35_vm1, %v9829_v3  ;;  %9164 = vmatmul.mubr.msk.f32.gmra.mrb[26].mxu0 %vm35_vm1, %v9849_v12  ;;  %v9118_v57 = vld [vmem:[%s14221_s1 + $0x16] ss:$8 sm:$0x3]  ;;  %v2701_v63 = vld [vmem:[%s14218_s0 + $0x90] sm:$0x3f] }
  0x39   :  { %2049 = vmatprep.mubr.f32.mxu1 %v14229_v2  ;;  %2185 = vmatprep.mubr.f32.mxu0 %v14229_v2  ;;  %v9123_v60 = vld [vmem:[%s14221_s1 + $0x16] ss:$8 sm:$0x3]  ;;  %vm780_vm9 = vcmp.eq.f32.partialorder %v10414_v54, 0.0  ;;  %v2995_v29 = vld [vmem:[%s14218_s0 + $0xa0] sm:$0x3f]  ;;  %9691 = vrcp.f32 %v10414_v54 }
  0x3a   :  { %9183 = vmatpush1.msk.msra.mxu1 %vm42_vm0, %v2265_v5  ;;  %v9124_v0 = vld [vmem:[%s14221_s1 + $0x17] ss:$8 sm:$0x3]  ;;  %v10445_v4 = vsel %vm780_vm9, 0.0, %v14231_v61  ;;  %v10447_v5 = vadd.f32 %v9118_v57, %v930_v58  ;;  %v4466_v54 = vld [vmem:[%s14218_s0 + $0xf8] sm:$0x3f] }
  0x3b   :  { %9196 = vmatprep.subr.msk.mxu1 %vm42_vm0, %v2562_v11  ;;  %v9125_v6 = vld [vmem:[%s14221_s1 + $0x20] ss:$8 sm:$0x3]  ;;  %v1072_v7 = vadd.f32 %v9124_v0, %v9123_v60  ;;  %923 = vst.msk [vmem:[#allocation3 + $0x5] ss:$8 sm:$0x3] %vm10337_vm4, %v10445_v4 }
  0x3c   :  { %9171 = vmatmul.mubr.msk.f32.gmra.mrb[26].mxu1 %vm35_vm1, %v9849_v12  ;;  %9177 = vmatmul.mubr.msk.f32.vlgmr.msra.gmra.mrb[28].mxu0 %vm35_vm1, %v9829_v3  ;;  %v9130_v9 = vld [vmem:[%s14221_s1 + $0x20] ss:$8 sm:$0x3]  ;;  %v9131_v10 = vld [vmem:[%s14221_s1 + $0x21] ss:$8 sm:$0x3]  ;;  %9693 = vrcp.f32 %v10447_v5 }
  0x3d   :  { %2337 = vmatprep.mubr.f32.mxu1 %v14229_v2  ;;  %2191 = vmatprep.mubr.f32.mxu0 %v14229_v2  ;;  %vm932_vm10 = vcmp.eq.f32.partialorder %v10447_v5, 0.0  ;;  %v10468_v11 = vadd.f32 %v9125_v6, %v1072_v7  ;;  %v9132_v14 = vld [vmem:[%s14221_s1 + $0x22] ss:$8 sm:$0x3]  ;;  %v1224_v15 = vadd.f32 %v9131_v10, %v9130_v9 }
  0x3e   :  { %9190 = vmatpush1.msk.msra.mxu0 %vm42_vm0, %v2407_v17  ;;  %v10477_v16 = vsel %vm932_vm10, 0.0, %v14231_v61  ;;  %v9137_v17 = vld [vmem:[%s14221_s1 + $0x22] ss:$8 sm:$0x3] }
  0x3f   :  { %9203 = vmatprep.subr.msk.mxu0 %vm42_vm0, %v2702_v22  ;;  %1065 = vst.msk [vmem:[#allocation3 + $0x6] ss:$8 sm:$0x3] %vm10337_vm4, %v10477_v16  ;;  %vm1074_vm11 = vcmp.eq.f32.partialorder %v10468_v11, 0.0  ;;  %v10487_v20 = vadd.f32 %v9132_v14, %v1224_v15  ;;  %v3289_v14 = vld [vmem:[%s14218_s0 + $0xb0] sm:$0x3f]  ;;  %9695 = vrcp.f32 %v10468_v11 }
  0x40   :  { %9184 = vmatmul.mubr.msk.f32.vlgmr.msra.gmra.mrb[28].mxu1 %vm35_vm1, %v9829_v3  ;;  %9178 = vmatmul.mubr.msk.f32.gmra.mrb[30].mxu0 %vm35_vm1, %v9849_v12  ;;  %v9138_v21 = vld [vmem:[%s14221_s1 + $0x23] ss:$8 sm:$0x3]  ;;  %v10499_v22 = vsel %vm1074_vm11, 0.0, %v14231_v61 }
  0x41   :  { %2343 = vmatprep.mubr.f32.mxu1 %v14229_v2  ;;  %2479 = vmatprep.mubr.f32.mxu0 %v14229_v2  ;;  %v9139_v25 = vld [vmem:[%s14221_s1 + $0x24] ss:$8 sm:$0x3]  ;;  %v1366_v26 = vadd.f32 %v9138_v21, %v9137_v17  ;;  %1217 = vst.msk [vmem:[#allocation3 + $0x7] ss:$8 sm:$0x3] %vm10337_vm4, %v10499_v22  ;;  %9697 = vrcp.f32 %v10487_v20 }
  0x42   :  { %9197 = vmatpush1.msk.msra.mxu1 %vm42_vm0, %v2559_v48  ;;  %vm1226_vm12 = vcmp.eq.f32.partialorder %v10487_v20, 0.0  ;;  %v9144_v28 = vld [vmem:[%s14221_s1 + $0x24] ss:$8 sm:$0x3] }
  0x43   :  { %9210 = vmatprep.subr.msk.mxu1 %vm42_vm0, %v2856_v50  ;;  %v10521_v32 = vsel %vm1226_vm12, 0.0, %v14231_v61  ;;  %v10523_v33 = vadd.f32 %v9139_v25, %v1366_v26  ;;  %v9145_v34 = vld [vmem:[%s14221_s1 + $0x25] ss:$8 sm:$0x3] }
  0x44   :  { %9185 = vmatmul.mubr.msk.f32.gmra.mrb[30].mxu1 %vm35_vm1, %v9849_v12  ;;  %9191 = vmatmul.mubr.msk.f32.vlgmr.msra.gmra.mrb[32].mxu0 %vm35_vm1, %v9829_v3  ;;  %1359 = vst.msk [vmem:[#allocation3 + $0x10] ss:$8 sm:$0x3] %vm10337_vm4, %v10521_v32  ;;  %v1518_v38 = vadd.f32 %v9145_v34, %v9144_v28  ;;  %v9151_v43 = vld [vmem:[%s14221_s1 + $0x26] ss:$8 sm:$0x3] }
  0x45   :  { %2631 = vmatprep.mubr.f32.mxu1 %v14229_v2  ;;  %2485 = vmatprep.mubr.f32.mxu0 %v14229_v2  ;;  %vm1368_vm13 = vcmp.eq.f32.partialorder %v10523_v33, 0.0  ;;  %v9152_v44 = vld [vmem:[%s14221_s1 + $0x27] ss:$8 sm:$0x3]  ;;  %9699 = vrcp.f32 %v10523_v33 }
  0x46   :  { %9204 = vmatpush1.msk.msra.mxu0 %vm42_vm0, %v2701_v63  ;;  %v10555_v46 = vsel %vm1368_vm13, 0.0, %v14231_v61  ;;  %v9153_v48 = vld [vmem:[%s14221_s1 + $0x30] ss:$8 sm:$0x3]  ;;  %v1660_v52 = vadd.f32 %v9152_v44, %v9151_v43 }
  0x47   :  { %9217 = vmatprep.subr.msk.mxu0 %vm42_vm0, %v2996_v1  ;;  %1511 = vst.msk [vmem:[#allocation3 + $0x11] ss:$8 sm:$0x3] %vm10337_vm4, %v10555_v46  ;;  %v9158_v50 = vld [vmem:[%s14221_s1 + $0x30] ss:$8 sm:$0x3] }
  0x48   :  { %9198 = vmatmul.mubr.msk.f32.vlgmr.msra.gmra.mrb[32].mxu1 %vm35_vm1, %v9829_v3  ;;  %9192 = vmatmul.mubr.msk.f32.gmra.mrb[34].mxu0 %vm35_vm1, %v9849_v12  ;;  %v9159_v56 = vld [vmem:[%s14221_s1 + $0x31] ss:$8 sm:$0x3]  ;;  %v10575_v57 = vadd.f32 %v9153_v48, %v1660_v52  ;;  %v9160_v58 = vld [vmem:[%s14221_s1 + $0x32] ss:$8 sm:$0x3] }
  0x49   :  { %2637 = vmatprep.mubr.f32.mxu1 %v14229_v2  ;;  %2773 = vmatprep.mubr.f32.mxu0 %v14229_v2  ;;  %v1812_v60 = vadd.f32 %v9159_v56, %v9158_v50  ;;  %v9165_v0 = vld [vmem:[%s14221_s1 + $0x32] ss:$8 sm:$0x3]  ;;  %v9166_v6 = vld [vmem:[%s14221_s1 + $0x33] ss:$8 sm:$0x3] }
  0x4a   :  { %9211 = vmatpush1.msk.msra.mxu1 %vm42_vm0, %v10064_v30  ;;  %v9146_v30 = vld [vmem:[%s14221_s1 + $0x26] ss:$8 sm:$0x3]  ;;  %vm1662_vm15 = vcmp.eq.f32.partialorder %v10575_v57, 0.0  ;;  %v1954_v10 = vadd.f32 %v9166_v6, %v9165_v0  ;;  %v3583_v50 = vld [vmem:[%s14218_s0 + $0xc0] sm:$0x3f] }
  0x4b   :  { %9224 = vmatprep.subr.msk.mxu1 %vm42_vm0, %v10080_v41  ;;  %v3290_v41 = vld [vmem:[%s14218_s0 + $0xb8] sm:$0x3f]  ;;  %v10557_v47 = vadd.f32 %v9146_v30, %v1518_v38  ;;  %v10598_v1 = vadd.f32 %v9160_v58, %v1812_v60  ;;  %v10608_v7 = vsel %vm1662_vm15, 0.0, %v14231_v61  ;;  %v9174_v25 = vld [vmem:[%s14221_s1 + $0x36] ss:$8 sm:$0x3] }
  0x4c   :  { %9199 = vmatmul.mubr.msk.f32.gmra.mrb[34].mxu1 %vm35_vm1, %v9849_v12  ;;  %9205 = vmatmul.mubr.msk.f32.vlgmr.msra.gmra.mrb[36].mxu0 %vm35_vm1, %v9829_v3  ;;  %v9167_v9 = vld [vmem:[%s14221_s1 + $0x34] ss:$8 sm:$0x3]  ;;  %1805 = vst.msk [vmem:[#allocation3 + $0x13] ss:$8 sm:$0x3] %vm10337_vm4, %v10608_v7 }
  0x4d   :  { %2925 = vmatprep.mubr.f32.mxu1 %v14229_v2  ;;  %2779 = vmatprep.mubr.f32.mxu0 %v14229_v2  ;;  %vm1520_vm14 = vcmp.eq.f32.partialorder %v10557_v47, 0.0  ;;  %vm1814_vm2 = vcmp.eq.f32.partialorder %v10598_v1, 0.0  ;;  %v10638_v17 = vadd.f32 %v9167_v9, %v1954_v10  ;;  %v9173_v21 = vld [vmem:[%s14221_s1 + $0x35] ss:$8 sm:$0x3]  ;;  %9701 = vrcp.f32 %v10557_v47 }
  0x4e   :  { %9218 = vmatpush1.msk.msra.mxu0 %vm42_vm0, %v2995_v29  ;;  %v10587_v63 = vsel %vm1520_vm14, 0.0, %v14231_v61  ;;  %v10636_v15 = vsel %vm1814_vm2, 0.0, %v14231_v61  ;;  %v9179_v28 = vld [vmem:[%s14221_s1 + $0x36] ss:$8 sm:$0x3]  ;;  %9703 = vrcp.f32 %v10575_v57 }
  0x4f   :  { %9231 = vmatprep.subr.msk.mxu0 %vm42_vm0, %v3290_v41  ;;  %1653 = vst.msk [vmem:[#allocation3 + $0x12] ss:$8 sm:$0x3] %vm10337_vm4, %v10587_v63  ;;  %1947 = vst.msk [vmem:[#allocation3 + $0x14] ss:$8 sm:$0x3] %vm10337_vm4, %v10636_v15  ;;  %v9684_v41 = vpop.eup %9683  ;;  %9705 = vrcp.f32 %v10598_v1 }
  0x50   :  { %9212 = vmatmul.mubr.msk.f32.vlgmr.msra.gmra.mrb[36].mxu1 %vm35_vm1, %v9829_v3  ;;  %9206 = vmatmul.mubr.msk.f32.gmra.mrb[38].mxu0 %vm35_vm1, %v9849_v12  ;;  %vm14223_vm3 = vcmp.eq.f32.partialorder %v10638_v17, 0.0  ;;  %v9180_v30 = vld [vmem:[%s14221_s1 + $0x37] ss:$8 sm:$0x3]  ;;  %v10685_v44 = vsel %vm191_vm5, 0.0, %v9684_v41  ;;  %v9686_v19 = vpop.eup %9685  ;;  %9707 = vrcp.f32 %v10638_v17 }
  0x51   :  { %2931 = vmatprep.mubr.f32.mxu1 %v14229_v2  ;;  %3067 = vmatprep.mubr.f32.mxu0 %v14229_v2  ;;  %v10661_v29 = vsel %vm14223_vm3, 0.0, %v14231_v61  ;;  %v9181_v38 = vld [vmem:[%s14221_s1 + $0x40] ss:$8 sm:$0x3]  ;;  %v2248_v43 = vadd.f32 %v9180_v30, %v9179_v28  ;;  %v9688_v60 = vpop.eup %9687  ;;  %v3877_v0 = vld [vmem:[%s14218_s0 + $0xd0] sm:$0x3f] }
  0x52   :  { %9225 = vmatpush1.msk.msra.mxu1 %vm42_vm0, %v10096_v45  ;;  %v9172_v45 = vld [vmem:[%s14221_s1 + $0x34] ss:$8 sm:$0x3]  ;;  %14381 = vst [vmem:[#allocation7_spill] sm:$0xff] %v10661_v29  ;;  %v10742_v6 = vsel %vm486_vm7, 0.0, %v9688_v60 }
  0x53   :  { %9238 = vmatprep.subr.msk.mxu1 %vm42_vm0, %v10117_v55  ;;  %v3584_v55 = vld [vmem:[%s14218_s0 + $0xc8] sm:$0x3f]  ;;  %v2106_v26 = vadd.f32 %v9173_v21, %v9172_v45  ;;  %2099 = vst.msk [vmem:[#allocation3 + $0x15] ss:$8 sm:$0x3] %vm10337_vm4, %v10661_v29  ;;  %v10692_v52 = vadd.f32 %v9181_v38, %v2248_v43 }
  0x54   :  { %9213 = vmatmul.mubr.msk.f32.gmra.mrb[38].mxu1 %vm35_vm1, %v9849_v12  ;;  %9219 = vmatmul.mubr.msk.f32.vlgmr.msra.gmra.mrb[40].mxu0 %vm35_vm1, %v9829_v3  ;;  %v9186_v56 = vld [vmem:[%s14221_s1 + $0x40] ss:$8 sm:$0x3]  ;;  %v9187_v58 = vld [vmem:[%s14221_s1 + $0x41] ss:$8 sm:$0x3] }
  0x55   :  { %3219 = vmatprep.mubr.f32.mxu1 %v14229_v2  ;;  %3073 = vmatprep.mubr.f32.mxu0 %v14229_v2  ;;  %v10663_v34 = vadd.f32 %v9174_v25, %v2106_v26  ;;  %14383 = vst [vmem:[#allocation9_spill] sm:$0xff] %v10692_v52  ;;  %vm14224_vm5 = vcmp.eq.f32.partialorder %v10692_v52, 0.0  ;;  %v9188_v9 = vld [vmem:[%s14221_s1 + $0x42] ss:$8 sm:$0x3] }
  0x56   :  { %9232 = vmatpush1.msk.msra.mxu0 %vm42_vm0, %v3289_v14  ;;  %v10733_v24 = vsel %vm14224_vm5, 0.0, %v14231_v61  ;;  %v4172_v10 = vld [vmem:[%s14218_s0 + $0xe8] sm:$0x3f]  ;;  %v2400_v14 = vadd.f32 %v9187_v58, %v9186_v56  ;;  %v9208_v25 = vld [vmem:[%s14221_s1 + $0x47] ss:$8 sm:$0x3] }
  0x57   :  { %9245 = vmatprep.subr.msk.mxu0 %vm42_vm0, %v3584_v55  ;;  %vm2108_vm3 = vcmp.eq.f32.partialorder %v10663_v34, 0.0  ;;  %2393 = vst.msk [vmem:[#allocation3 + $0x17] ss:$8 sm:$0x3] %vm10337_vm4, %v10733_v24  ;;  %v10809_v56 = vld [vmem:[%s14219_s2] sm:$0xff]  ;;  %v10816_v58 = vld [vmem:[%s14219_s2 + $0x8] sm:$0xff]  ;;  %9709 = vrcp.f32 %v10663_v34 }
  0x58   :  { %9226 = vmatmul.mubr.msk.f32.vlgmr.msra.gmra.mrb[40].mxu1 %vm35_vm1, %v9829_v3  ;;  %9220 = vmatmul.mubr.msk.f32.gmra.mrb[42].mxu0 %vm35_vm1, %v9849_v12  ;;  %v10690_v48 = vsel %vm2108_vm3, 0.0, %v14231_v61  ;;  %v9193_v37 = vld [vmem:[%s14221_s1 + $0x42] ss:$8 sm:$0x3]  ;;  %v10793_v28 = vadd.f32 %v9188_v9, %v2400_v14 }
  0x59   :  { %3225 = vmatprep.mubr.f32.mxu1 %v14229_v2  ;;  %3361 = vmatprep.mubr.f32.mxu0 %v14229_v2  ;;  %14382 = vst [vmem:[#allocation8_spill] sm:$0xff] %v10690_v48  ;;  %2241 = vst.msk [vmem:[#allocation3 + $0x16] ss:$8 sm:$0x3] %vm10337_vm4, %v10690_v48  ;;  %v4171_v9 = vld [vmem:[%s14218_s0 + $0xe0] sm:$0x3f] }
  0x5a   :  { %9239 = vmatpush1.msk.msra.mxu1 %vm42_vm0, %v10128_v59  ;;  %v3878_v59 = vld [vmem:[%s14218_s0 + $0xd8] sm:$0x3f]  ;;  %v9194_v45 = vld [vmem:[%s14221_s1 + $0x43] ss:$8 sm:$0x3]  ;;  %9711 = vrcp.f32 %v10793_v28 }
  0x5b   :  { %9252 = vmatprep.subr.msk.mxu1 %vm42_vm0, %v10153_v8  ;;  %v10716_v8 = vsel %vm344_vm6, 0.0, %v9686_v19  ;;  %v9200_v55 = vld [vmem:[%s14221_s1 + $0x44] ss:$8 sm:$0x3]  ;;  %v2542_v30 = vadd.f32 %v9194_v45, %v9193_v37  ;;  %vm2402_vm6 = vcmp.eq.f32.partialorder %v10793_v28, 0.0 }
  0x5c   :  { %9227 = vmatmul.mubr.msk.f32.gmra.mrb[42].mxu1 %vm35_vm1, %v9849_v12  ;;  %9233 = vmatmul.mubr.msk.f32.vlgmr.msra.gmra.mrb[44].mxu0 %vm35_vm1, %v9829_v3  ;;  %v9201_v21 = vld [vmem:[%s14221_s1 + $0x45] ss:$8 sm:$0x3]  ;;  %v9214_v26 = vld [vmem:[%s14221_s1 + $0x50] ss:$8 sm:$0x3] }
  0x5d   :  { %3513 = vmatprep.mubr.f32.mxu1 %v14229_v2  ;;  %3367 = vmatprep.mubr.f32.mxu0 %v14229_v2  ;;  %v9202_v38 = vld [vmem:[%s14221_s1 + $0x46] ss:$8 sm:$0x3]  ;;  %v9209_v43 = vld [vmem:[%s14221_s1 + $0x50] ss:$8 sm:$0x3] }
  0x5e   :  { %9246 = vmatpush1.msk.msra.mxu0 %vm42_vm0, %v3583_v50  ;;  %v2694_v50 = vadd.f32 %v9201_v21, %v9200_v55  ;;  %v9216_v60 = vld [vmem:[%s14221_s1 + $0x52] ss:$8 sm:$0x3]  ;;  %v10838_v14 = vsel %vm2402_vm6, 0.0, %v14231_v61 }
  0x5f   :  { %9259 = vmatprep.subr.msk.mxu0 %vm42_vm0, %v3878_v59  ;;  %v9222_v55 = vld [vmem:[%s14221_s1 + $0x53] ss:$8 sm:$0x3]  ;;  %2535 = vst.msk [vmem:[#allocation3 + $0x20] ss:$8 sm:$0x3] %vm10337_vm4, %v10838_v14 }
  0x60   :  { %9240 = vmatmul.mubr.msk.f32.vlgmr.msra.gmra.mrb[44].mxu1 %vm35_vm1, %v9829_v3  ;;  %9234 = vmatmul.mubr.msk.f32.gmra.mrb[46].mxu0 %vm35_vm1, %v9849_v12  ;;  %v10840_v37 = vadd.f32 %v9202_v38, %v2694_v50  ;;  %v9228_v21 = vld [vmem:[%s14221_s1 + $0x54] ss:$8 sm:$0x3]  ;;  %v9237_v50 = vld [vmem:[%s14221_s1 + $0x60] ss:$8 sm:$0x3] }
  0x61   :  { %3519 = vmatprep.mubr.f32.mxu1 %v14229_v2  ;;  %3655 = vmatprep.mubr.f32.mxu0 %v14229_v2  ;;  %v9251_v11 = vld [vmem:[%s14221_s1 + $0x64] ss:$8 sm:$0x3]  ;;  %v9270_v52 = vld [vmem:[%s14221_s1 + $0x70] ss:$8 sm:$0x3] }
  0x62   :  { %9253 = vmatpush1.msk.msra.mxu1 %vm42_vm0, %v10166_v13  ;;  %v9195_v13 = vld [vmem:[%s14221_s1 + $0x44] ss:$8 sm:$0x3]  ;;  %v9271_v20 = vld [vmem:[%s14221_s1 + $0x71] ss:$8 sm:$0x3] }
  0x63   :  { %9266 = vmatprep.subr.msk.mxu1 %vm42_vm0, %v10181_v23  ;;  %v9207_v23 = vld [vmem:[%s14221_s1 + $0x46] ss:$8 sm:$0x3]  ;;  %v10821_v40 = vadd.f32 %v9195_v13, %v2542_v30  ;;  %v9221_v13 = vld [vmem:[%s14221_s1 + $0x52] ss:$8 sm:$0x3] }
  0x64   :  { %9241 = vmatmul.mubr.msk.f32.gmra.mrb[46].mxu1 %vm35_vm1, %v9849_v12  ;;  %9247 = vmatmul.mubr.msk.f32.vlgmr.msra.gmra.mrb[48].mxu0 %vm35_vm1, %v9829_v3  ;;  %v9215_v3 = vld [vmem:[%s14221_s1 + $0x51] ss:$8 sm:$0x3]  ;;  %v9690_v12 = vpop.eup %9689  ;;  %v2836_v59 = vadd.f32 %v9208_v25, %v9207_v23  ;;  %v9229_v23 = vld [vmem:[%s14221_s1 + $0x55] ss:$8 sm:$0x3] }
  0x65   :  { %3807 = vmatprep.mubr.f32.mxu1 %v14229_v2  ;;  %3661 = vmatprep.mubr.f32.mxu0 %v14229_v2  ;;  %v10804_v41 = vsel %vm638_vm8, 0.0, %v9690_v12  ;;  %v9692_v19 = vpop.eup %9691  ;;  %vm2544_vm7 = vcmp.eq.f32.partialorder %v10821_v40, 0.0  ;;  %vm2696_vm8 = vcmp.eq.f32.partialorder %v10840_v37, 0.0  ;;  %v9223_v25 = vld [vmem:[%s14221_s1 + $0x54] ss:$8 sm:$0x3]  ;;  %v3282_v5 = vadd.f32 %v9229_v23, %v9228_v21 }
  0x66   :  { %9260 = vmatpush1.msk.msra.mxu0 %vm42_vm0, %v3877_v0  ;;  %14384 = vst [vmem:[#allocation10_spill] sm:$0xff] %v10804_v41  ;;  %v2988_v0 = vadd.f32 %v9215_v3, %v9214_v26  ;;  %v10842_v45 = vadd.f32 %v9209_v43, %v2836_v59  ;;  %v9235_v26 = vld [vmem:[%s14221_s1 + $0x56] ss:$8 sm:$0x3]  ;;  %v9694_v12 = vpop.eup %9693  ;;  %9713 = vrcp.f32 %v10821_v40 }
  0x67   :  { %9273 = vmatprep.subr.msk.mxu0 %vm42_vm0, %v4172_v10  ;;  %v10833_v10 = vsel %vm780_vm9, 0.0, %v9692_v19  ;;  %v9236_v3 = vld [vmem:[%s14221_s1 + $0x57] ss:$8 sm:$0x3]  ;;  %v10917_v59 = vsel %vm932_vm10, 0.0, %v9694_v12  ;;  %v3130_v19 = vadd.f32 %v9222_v55, %v9221_v13  ;;  %v9696_v13 = vpop.eup %9695  ;;  %9715 = vrcp.f32 %v10840_v37 }
  0x68   :  { %9254 = vmatmul.mubr.msk.f32.vlgmr.msra.gmra.mrb[48].mxu1 %vm35_vm1, %v10809_v56  ;;  %9248 = vmatmul.mubr.msk.f32.gmra.mrb[50].mxu0 %vm35_vm1, %v10816_v58  ;;  %14385 = vst [vmem:[#allocation11_spill] sm:$0xff] %v10833_v10  ;;  %vm2838_vm9 = vcmp.eq.f32.partialorder %v10842_v45, 0.0  ;;  %v10906_v38 = vadd.f32 %v9216_v60, %v2988_v0  ;;  %v9230_v43 = vld [vmem:[%s14221_s1 + $0x56] ss:$8 sm:$0x3]  ;;  %14386 = vst [vmem:[#allocation12_spill] sm:$0xff] %v10917_v59  ;;  %v3424_v12 = vadd.f32 %v9236_v3, %v9235_v26 }
  0x69   :  { %3813 = vmatprep.mubr.f32.mxu1 %v14229_v2  ;;  %3949 = vmatprep.mubr.f32.mxu0 %v14229_v2  ;;  %v10904_v30 = vsel %vm2838_vm9, 0.0, %v14231_v61  ;;  %v9242_v60 = vld [vmem:[%s14221_s1 + $0x60] ss:$8 sm:$0x3]  ;;  %v10952_v23 = vsel %vm1074_vm11, 0.0, %v9696_v13  ;;  %v10963_v26 = vadd.f32 %v9230_v43, %v3282_v5  ;;  %v9698_v5 = vpop.eup %9697  ;;  %v14391_v59 = vmov 1.0  }
  0x6a   :  { %9267 = vmatpush1.msk.msra.mxu1 %vm42_vm0, %v10195_v27  ;;  %v10871_v27 = vsel %vm2544_vm7, 0.0, %v14231_v61  ;;  %2981 = vst.msk [vmem:[#allocation3 + $0x23] ss:$8 sm:$0x3] %vm10337_vm4, %v10904_v30  ;;  %vm2990_vm10 = vcmp.eq.f32.partialorder %v10906_v38, 0.0  ;;  %14387 = vst [vmem:[#allocation13_spill] sm:$0xff] %v10952_v23  ;;  %v10965_v3 = vadd.f32 %v9237_v50, %v3424_v12  ;;  %9717 = vrcp.f32 %v10842_v45 }
  0x6b   :  { %9280 = vmatprep.subr.msk.mxu1 %vm42_vm0, %v10207_v36  ;;  %2687 = vst.msk [vmem:[#allocation3 + $0x21] ss:$8 sm:$0x3] %vm10337_vm4, %v10871_v27  ;;  %v10890_v36 = vsel %vm2696_vm8, 0.0, %v14231_v61  ;;  %v10941_v55 = vsel %vm2990_vm10, 0.0, %v14231_v61  ;;  %vm3284_vm11 = vcmp.eq.f32.partialorder %v10963_v26, 0.0  ;;  %9719 = vrcp.f32 %v10906_v38 }
  0x6c   :  { %9255 = vmatmul.mubr.msk.f32.gmra.mrb[50].mxu1 %vm35_vm1, %v10816_v58  ;;  %9261 = vmatmul.mubr.msk.f32.vlgmr.msra.gmra.mrb[52].mxu0 %vm35_vm1, %v10809_v56  ;;  %2829 = vst.msk [vmem:[#allocation3 + $0x22] ss:$8 sm:$0x3] %vm10337_vm4, %v10890_v36  ;;  %v9243_v0 = vld [vmem:[%s14221_s1 + $0x61] ss:$8 sm:$0x3] }
  0x6d   :  { %4101 = vmatprep.mubr.f32.mxu1 %v14229_v2  ;;  %3955 = vmatprep.mubr.f32.mxu0 %v14229_v2  ;;  %v9250_v21 = vld [vmem:[%s14221_s1 + $0x63] ss:$8 sm:$0x3]  ;;  %3123 = vst.msk [vmem:[#allocation3 + $0x24] ss:$8 sm:$0x3] %vm10337_vm4, %v10941_v55 }
  0x6e   :  { %9274 = vmatpush1.msk.msra.mxu0 %vm42_vm0, %v4171_v9  ;;  %v9249_v9 = vld [vmem:[%s14221_s1 + $0x62] ss:$8 sm:$0x3]  ;;  %v9256_v43 = vld [vmem:[%s14221_s1 + $0x64] ss:$8 sm:$0x3] }
  0x6f   :  { %9287 = vmatprep.subr.msk.mxu0 %vm42_vm0, %v4466_v54  ;;  %v10943_v54 = vadd.f32 %v9223_v25, %v3130_v19  ;;  %v9244_v25 = vld [vmem:[%s14221_s1 + $0x62] ss:$8 sm:$0x3]  ;;  %v4465_v19 = vld [vmem:[%s14218_s0 + $0xf0] sm:$0x3f]  ;;  %v3718_v18 = vadd.f32 %v9250_v21, %v9249_v9  ;;  %v11004_v9 = vsel %vm3284_vm11, 0.0, %v14231_v61 }
  0x70   :  { %9268 = vmatmul.mubr.msk.f32.vlgmr.msra.gmra.mrb[52].mxu1 %vm35_vm1, %v10809_v56  ;;  %9262 = vmatmul.mubr.msk.f32.gmra.mrb[54].mxu0 %vm35_vm1, %v10816_v58  ;;  %v9257_v50 = vld [vmem:[%s14221_s1 + $0x65] ss:$8 sm:$0x3]  ;;  %3417 = vst.msk [vmem:[#allocation3 + $0x26] ss:$8 sm:$0x3] %vm10337_vm4, %v11004_v9 }
  0x71   :  { %4107 = vmatprep.mubr.f32.mxu1 %v14229_v2  ;;  %4243 = vmatprep.mubr.f32.mxu0 %v14229_v2  ;;  %vm14226_vm5 = vcmp.eq.f32.partialorder %v10943_v54, 0.0  ;;  %v11009_v21 = vadd.f32 %v9251_v11, %v3718_v18  ;;  %v9258_v18 = vld [vmem:[%s14221_s1 + $0x66] ss:$8 sm:$0x3]  ;;  %v14390_v23 = vmov 0.0   ;;  %9721 = vrcp.f32 %v10943_v54 }
  0x72   :  { %9281 = vmatpush1.msk.msra.mxu1 %vm42_vm0, %v10224_v42  ;;  %v10976_v13 = vsel %vm14226_vm5, 0.0, %v14231_v61  ;;  %v3576_v42 = vadd.f32 %v9243_v0, %v9242_v60  ;;  %v9263_v60 = vld [vmem:[%s14221_s1 + $0x66] ss:$8 sm:$0x3]  ;;  %vm3426_vm5 = vcmp.eq.f32.partialorder %v10965_v3, 0.0  ;;  %9723 = vrcp.f32 %v10963_v26 }
  0x73   :  { %3275 = vst.msk [vmem:[#allocation3 + $0x25] ss:$8 sm:$0x3] %vm10337_vm4, %v10976_v13  ;;  %v9264_v0 = vld [vmem:[%s14221_s1 + $0x67] ss:$8 sm:$0x3]  ;;  %9725 = vrcp.f32 %v10965_v3 }
  0x74   :  { %9269 = vmatmul.mubr.msk.f32.gmra.mrb[54].mxu1 %vm35_vm1, %v10816_v58  ;;  %9275 = vmatmul.mubr.msk.f32.vlgmr.msra.gmra.mrb[56].mxu0 %vm35_vm1, %v10809_v56  ;;  %v11007_v12 = vadd.f32 %v9244_v25, %v3576_v42  ;;  %14388 = vst [vmem:[#allocation14_spill] sm:$0xff] %v11009_v21  ;;  %v11025_v25 = vsel %vm3426_vm5, 0.0, %v14231_v61  ;;  %v9265_v11 = vld [vmem:[%s14221_s1 + $0x70] ss:$8 sm:$0x3] }
  0x75   :  { %4395 = vmatprep.mubr.f32.mxu1 %v14229_v2  ;;  %4249 = vmatprep.mubr.f32.mxu0 %v14229_v2  ;;  %v11017_v2 = vsel %vm1226_vm12, 0.0, %v9698_v5  ;;  %3569 = vst.msk [vmem:[#allocation3 + $0x27] ss:$8 sm:$0x3] %vm10337_vm4, %v11025_v25  ;;  %vm14242_vm12 = vcmp.eq.f32.partialorder %v11009_v21, 0.0  ;;  %v3870_v5 = vadd.f32 %v9257_v50, %v9256_v43  ;;  %v4012_v43 = vadd.f32 %v9264_v0, %v9263_v60 }
  0x76   :  { %9288 = vmatpush1.msk.msra.mxu0 %vm42_vm0, %v4465_v19  ;;  %14389 = vst [vmem:[#allocation15_spill] sm:$0xff] %v11017_v2  ;;  %v9272_v19 = vld [vmem:[%s14221_s1 + $0x72] ss:$8 sm:$0x3]  ;;  %vm14243_vm0 = vcmp.eq.f32.partialorder %v11007_v12, 0.0  ;;  %v9700_v2 = vpop.eup %9699  ;;  %v11065_v41 = vsel %vm14242_vm12, 0.0, %v14391_v59  ;;  %v4164_v50 = vadd.f32 %v9271_v20, %v9270_v52  ;;  %9727 = vrcp.f32 %v11007_v12 }
  0x77   :  { %v9277_v42 = vld [vmem:[%s14221_s1 + $0x72] ss:$8 sm:$0x3]  ;;  %v9278_v61 = vld [vmem:[%s14221_s1 + $0x73] ss:$8 sm:$0x3]  ;;  %v11083_v60 = vadd.f32 %v9258_v18, %v3870_v5  ;;  %v11085_v0 = vadd.f32 %v9265_v11, %v4012_v43  ;;  %v9702_v11 = vpop.eup %9701 }
  0x78   :  { %9282 = vmatmul.mubr.msk.f32.vlgmr.msra.gmra.mrb[56].mxu1 %vm35_vm1, %v10809_v56  ;;  %9276 = vmatmul.mubr.msk.f32.gmra.mrb[58].mxu0 %vm35_vm1, %v10816_v58  ;;  %v11060_v10 = vsel %vm14243_vm0, 0.0, %v14391_v59  ;;  %v9284_v48 = vld [vmem:[%s14221_s1 + $0x74] ss:$8 sm:$0x3]  ;;  %v11072_v29 = vsel %vm1368_vm13, 0.0, %v9700_v2  ;;  %v11094_v33 = vadd.f32 %v9272_v19, %v4164_v50  ;;  %v4306_v20 = vadd.f32 %v9278_v61, %v9277_v42  ;;  %v9704_v42 = vpop.eup %9703 }
  0x79   :  { %4401 = vmatprep.mubr.f32.mxu1 %v14390_v23  ;;  %4537 = vmatprep.mubr.f32.mxu0 %v14390_v23  ;;  %3711 = vst.msk [vmem:[#allocation3 + $0x30] ss:$8 sm:$0x3] %vm10337_vm4, %v11060_v10  ;;  %3863 = vst.msk [vmem:[#allocation3 + $0x31] ss:$8 sm:$0x3] %vm10337_vm4, %v11065_v41 }
  0x7a   :  { %v9285_v52 = vld [vmem:[%s14221_s1 + $0x75] ss:$8 sm:$0x3]  ;;  %14392 = vst [vmem:[#allocation16_spill] sm:$0xff] %v11083_v60  ;;  %14393 = vst [vmem:[#allocation17_spill] sm:$0xff] %v11085_v0  ;;  %vm3872_vm13 = vcmp.eq.f32.partialorder %v11083_v60, 0.0 }
  0x7b   :  { %v9279_v2 = vld [vmem:[%s14221_s1 + $0x74] ss:$8 sm:$0x3]  ;;  %14394 = vst [vmem:[#allocation18_spill] sm:$0xff] %v11094_v33  ;;  %vm4014_vm12 = vcmp.eq.f32.partialorder %v11085_v0, 0.0  ;;  %v4458_v18 = vadd.f32 %v9285_v52, %v9284_v48  ;;  %v11103_v5 = vsel %vm3872_vm13, 0.0, %v14391_v59  ;;  %v14397_v52 = vlaneseq }
  0x7c   :  { %9283 = vmatmul.mubr.msk.f32.gmra.mrb[58].mxu1 %vm35_vm1, %v10816_v58  ;;  %9289 = vmatmul.mubr.msk.f32.vlgmr.msra.gmra.mrb[60].mxu0 %vm35_vm1, %v10809_v56  ;;  %v11108_v56 = vsel %vm4014_vm12, 0.0, %v14391_v59  ;;  %vm4166_vm0 = vcmp.eq.f32.partialorder %v11094_v33, 0.0  ;;  %v11111_v61 = vadd.f32 %v9279_v2, %v4306_v20  ;;  %v11115_v19 = vsel %vm1520_vm14, 0.0, %v9702_v11  ;;  %4005 = vst.msk [vmem:[#allocation3 + $0x32] ss:$8 sm:$0x3] %vm10337_vm4, %v11103_v5 }
  0x7d   :  { %4543 = vmatprep.mubr.f32.mxu0 %v14390_v23  ;;  %4693 = vmatprep.mubr.f32.mxu1 %v14390_v23  ;;  %4157 = vst.msk [vmem:[#allocation3 + $0x33] ss:$8 sm:$0x3] %vm10337_vm4, %v11108_v56  ;;  %v9286_v48 = vld [vmem:[%s14221_s1 + $0x76] ss:$8 sm:$0x3] }
  0x7e   :  { %14395 = vst [vmem:[#allocation19_spill] sm:$0xff] %v11111_v61  ;;  %v11131_v47 = vsel %vm4166_vm0, 0.0, %v14391_v59  ;;  %vm4308_vm14 = vcmp.eq.f32.partialorder %v11111_v61, 0.0  ;;  %v11140_v43 = vsel %vm1662_vm15, 0.0, %v9704_v42  ;;  %v11147_v50 = vadd.f32 %v9286_v48, %v4458_v18  ;;  %v9706_v61 = vpop.eup %9705 }
  0x7f   :  { %4299 = vst.msk [vmem:[#allocation3 + $0x34] ss:$8 sm:$0x3] %vm10337_vm4, %v11131_v47  ;;  %v128_v2 = vshrl.u32 %v14397_v52, 7  ;;  %v9708_v60 = vpop.eup %9707  ;;  %vm14416_vm15 = vcmp.eq.f32.partialorder %v10638_v17, 0.0 }
  0x80   :  { %9290 = vmatmul.mubr.msk.f32.gmra.mrb[62].mxu0 %vm35_vm1, %v10816_v58  ;;  %v11145_v58 = vsel %vm4308_vm14, 0.0, %v14391_v59  ;;  %14396 = vst [vmem:[#allocation20_spill] sm:$0xff] %v11147_v50  ;;  %vm4460_vm1 = vcmp.eq.f32.partialorder %v11147_v50, 0.0  ;;  %v5632_v3 = vld [vmem:[#allocation3 + $0x20] ss:$8 sm:$0x3] }
  0x81   :  { %4847 = vmatprep.mubr.f32.mxu0 %v14390_v23  ;;  %4451 = vst.msk [vmem:[#allocation3 + $0x35] ss:$8 sm:$0x3] %vm10337_vm4, %v11145_v58  ;;  %v11158_v57 = vsel %vm4460_vm1, 0.0, %v14391_v59  ;;  %v11164_v20 = vsub.s32 0, %v128_v2  ;;  %v11167_v18 = vsub.s32 1, %v128_v2 }
  0x82   :  { %4593 = vst.msk [vmem:[#allocation3 + $0x36] ss:$8 sm:$0x3] %vm10337_vm4, %v11158_v57 }
  0x83   :  { %v11171_v11 = vrot.slane %v10390_v49, %v11164_v20  ;;  %v11175_v48 = vrot.slane %v10270_v62, %v11164_v20  ;;  %v11179_v42 = vrot.slane %v10390_v49, %v11167_v18  ;;  %v11183_v52 = vrot.slane %v10270_v62, %v11167_v18 }
  0x84   :  { %v11187_v2 = vrot.slane %v10685_v44, %v11164_v20  ;;  %v11191_v50 = vrot.slane %v10355_v35, %v11164_v20  ;;  %v11195_v33 = vrot.slane %v10685_v44, %v11167_v18  ;;  %v11199_v49 = vrot.slane %v10355_v35, %v11167_v18 }
  0x85   :  { %14398 = vst [vmem:[#allocation21_spill] sm:$0xff] %v11171_v11  ;;  %14399 = vst [vmem:[#allocation22_spill] sm:$0xff] %v11179_v42  ;;  %v11203_v62 = vrot.slane %v10371_v39, %v11164_v20  ;;  %v11207_v0 = vrot.slane %v10371_v39, %v11167_v18  ;;  %v11211_v21 = vrot.slane %v10395_v51, %v11164_v20 }
  0x86   :  { %14400 = vst [vmem:[#allocation23_spill] sm:$0xff] %v11187_v2  ;;  %14401 = vst [vmem:[#allocation24_spill] sm:$0xff] %v11195_v33  ;;  %v11215_v44 = vrot.slane %v10395_v51, %v11167_v18  ;;  %v11219_v35 = vrot.slane %v10412_v53, %v11164_v20  ;;  %v11223_v23 = vrot.slane %v10412_v53, %v11167_v18 }
  0x87   :  { %14402 = vst [vmem:[#allocation25_spill] sm:$0xff] %v11199_v49  ;;  %14403 = vst [vmem:[#allocation26_spill] sm:$0xff] %v11203_v62  ;;  %v11227_v39 = vrot.slane %v10716_v8, %v11164_v20  ;;  %v11231_v33 = vrot.slane %v10445_v4, %v11164_v20  ;;  %v11235_v51 = vrot.slane %v10445_v4, %v11167_v18  ;;  %v9710_v4 = vpop.eup %9709 }
  0x88   :  { %14404 = vst [vmem:[#allocation27_spill] sm:$0xff] %v11207_v0  ;;  %14405 = vst [vmem:[#allocation28_spill] sm:$0xff] %v11211_v21  ;;  %v11239_v2 = vrot.slane %v10477_v16, %v11164_v20  ;;  %v11243_v53 = vrot.slane %v10733_v24, %v11164_v20  ;;  %v11247_v42 = vrot.slane %v10733_v24, %v11167_v18 }
  0x89   :  { %14406 = vst [vmem:[#allocation29_spill] sm:$0xff] %v11215_v44  ;;  %14407 = vst [vmem:[#allocation30_spill] sm:$0xff] %v11219_v35  ;;  %v2515_v11 = vrot.slane %v10838_v14, %v11167_v18  ;;  %v2663_v24 = vrot.slane %v10871_v27, %v11164_v20  ;;  %v2809_v35 = vrot.slane %v10890_v36, %v11167_v18  ;;  %v11285_v44 = vsel %vm2108_vm3, 0.0, %v9710_v4 }
  0x8a   :  { %14408 = vst [vmem:[#allocation31_spill] sm:$0xff] %v11223_v23  ;;  %14409 = vst [vmem:[#allocation32_spill] sm:$0xff] %v11227_v39  ;;  %v2511_v39 = vrot.slane %v10838_v14, %v11164_v20  ;;  %v2667_v23 = vrot.slane %v10871_v27, %v11167_v18  ;;  %v2805_v14 = vrot.slane %v10890_v36, %v11164_v20  ;;  %v4600_v36 = vld [vmem:[#allocation3 + $0x1] ss:$8 sm:$0x3] }
  0x8b   :  { %14410 = vst [vmem:[#allocation33_spill] sm:$0xff] %v11231_v33  ;;  %14411 = vst [vmem:[#allocation34_spill] sm:$0xff] %v11235_v51  ;;  %v11253_v51 = vpop.permute.xlu0 %143  ;;  %v11261_v33 = vsel %vm14416_vm15, 0.0, %v9708_v60  ;;  %v2957_v1 = vrot.slane %v10904_v30, %v11164_v20  ;;  %v2961_v17 = vrot.slane %v10904_v30, %v11167_v18  ;;  %v3099_v60 = vrot.slane %v10941_v55, %v11164_v20 }
  0x8c   :  { %14412 = vst [vmem:[#allocation35_spill] sm:$0xff] %v11239_v2  ;;  %14413 = vst [vmem:[#allocation36_spill] sm:$0xff] %v11243_v53  ;;  %v11257_v2 = vsel %vm1814_vm2, 0.0, %v9706_v61  ;;  %v3103_v61 = vrot.slane %v10941_v55, %v11167_v18  ;;  %v3251_v27 = vrot.slane %v10976_v13, %v11164_v20  ;;  %v3393_v30 = vrot.slane %v11004_v9, %v11164_v20 }
  0x8d   :  { %14414 = vst [vmem:[#allocation37_spill] sm:$0xff] %v11247_v42  ;;  %14415 = vst [vmem:[#allocation38_spill] sm:$0xff] %v11257_v2  ;;  %v4599_v2 = vld [vmem:[#allocation3] ss:$8 sm:$0x3]  ;;  %v3397_v21 = vrot.slane %v11004_v9, %v11167_v18  ;;  %v3545_v55 = vrot.slane %v11025_v25, %v11164_v20  ;;  %v3549_v0 = vrot.slane %v11025_v25, %v11167_v18  ;;  %vm14465_vm2 = vcmp.eq.f32.partialorder %v10943_v54, 0.0 }
  0x8e   :  { %14417 = vst [vmem:[#allocation39_spill] sm:$0xff] %v11261_v33  ;;  %v3255_v33 = vrot.slane %v10976_v13, %v11167_v18  ;;  %14418 = vst [vmem:[#allocation40_spill] sm:$0xff] %v11285_v44  ;;  %v11297_v13 = vrot.slane %v11060_v10, %v11164_v20  ;;  %v11301_v34 = vrot.slane %v11060_v10, %v11167_v18 }
  0x8f   :  { %v11305_v4 = vrot.slane %v11065_v41, %v11164_v20  ;;  %v11309_v9 = vmul.f32 %v11243_v53, %v11253_v51  ;;  %v11313_v44 = vmul.f32 %v11247_v42, %v11253_v51  ;;  %v11317_v25 = vrot.slane %v11065_v41, %v11167_v18  ;;  %v11319_v49 = vpop.permute.xlu0 %148 }
  0x90   :  { %v4602_v62 = vadd.f32 %v4600_v36, %v4599_v2  ;;  %v11323_v10 = vmul.f32 %v2511_v39, %v11253_v51  ;;  %v11327_v53 = vrot.slane %v11103_v5, %v11164_v20  ;;  %v11338_v41 = vmul.f32 %v2663_v24, %v11253_v51 }
  0x91   :  { %14419 = vst [vmem:[#allocation41_spill] sm:$0xff] %v11309_v9  ;;  %14420 = vst [vmem:[#allocation42_spill] sm:$0xff] %v11313_v44  ;;  %v11331_v9 = vrot.slane %v11103_v5, %v11167_v18  ;;  %v11334_v44 = vmul.f32 %v2515_v11, %v11253_v51  ;;  %v11341_v2 = vmul.f32 %v2511_v39, %v11319_v49 }
  0x92   :  { %14421 = vst [vmem:[#allocation43_spill] sm:$0xff] %v11323_v10  ;;  %14423 = vst [vmem:[#allocation45_spill] sm:$0xff] %v11338_v41  ;;  %v11344_v36 = vmul.f32 %v2667_v23, %v11253_v51  ;;  %v11347_v10 = vmul.f32 %v2515_v11, %v11319_v49  ;;  %v11350_v5 = vmul.f32 %v2663_v24, %v11319_v49 }
  0x93   :  { %14422 = vst [vmem:[#allocation44_spill] sm:$0xff] %v11334_v44  ;;  %14424 = vst [vmem:[#allocation46_spill] sm:$0xff] %v11341_v2  ;;  %v11353_v42 = vmul.f32 %v2667_v23, %v11319_v49  ;;  %v11357_v44 = vmul.f32 %v2805_v14, %v11253_v51  ;;  %v11360_v39 = vmul.f32 %v2809_v35, %v11253_v51 }
  0x94   :  { %14425 = vst [vmem:[#allocation47_spill] sm:$0xff] %v11344_v36  ;;  %14426 = vst [vmem:[#allocation48_spill] sm:$0xff] %v11347_v10  ;;  %v11363_v2 = vmul.f32 %v2957_v1, %v11253_v51  ;;  %v11367_v11 = vmul.f32 %v2805_v14, %v11319_v49  ;;  %v11370_v24 = vmul.f32 %v2961_v17, %v11253_v51  ;;  %v14540_v36 = vld [vmem:[#allocation28_spill] sm:$0xff] }
  0x95   :  { %14427 = vst [vmem:[#allocation49_spill] sm:$0xff] %v11350_v5  ;;  %14428 = vst [vmem:[#allocation50_spill] sm:$0xff] %v11353_v42  ;;  %v11373_v23 = vmul.f32 %v2809_v35, %v11319_v49  ;;  %v11376_v42 = vmul.f32 %v2957_v1, %v11319_v49  ;;  %v11386_v14 = vmul.f32 %v3103_v61, %v11253_v51 }
  0x96   :  { %14429 = vst [vmem:[#allocation51_spill] sm:$0xff] %v11357_v44  ;;  %14430 = vst [vmem:[#allocation52_spill] sm:$0xff] %v11360_v39  ;;  %v11379_v44 = vmul.f32 %v2961_v17, %v11319_v49  ;;  %v11393_v35 = vmul.f32 %v3099_v60, %v11319_v49  ;;  %v11396_v1 = vmul.f32 %v3255_v33, %v11253_v51  ;;  %v6646_v39 = vld [vmem:[#allocation3 + $0x35] ss:$8 sm:$0x3] }
  0x97   :  { %14431 = vst [vmem:[#allocation53_spill] sm:$0xff] %v11363_v2  ;;  %14432 = vst [vmem:[#allocation54_spill] sm:$0xff] %v11367_v11  ;;  %v11383_v2 = vmul.f32 %v3099_v60, %v11253_v51  ;;  %v11399_v17 = vmul.f32 %v3103_v61, %v11319_v49  ;;  %v11414_v60 = vmul.f32 %v3545_v55, %v11253_v51 }
  0x98   :  { %14433 = vst [vmem:[#allocation55_spill] sm:$0xff] %v11370_v24  ;;  %14434 = vst [vmem:[#allocation56_spill] sm:$0xff] %v11373_v23  ;;  %v11390_v24 = vmul.f32 %v3251_v27, %v11253_v51  ;;  %v11420_v61 = vmul.f32 %v3549_v0, %v11253_v51  ;;  %v11458_v28 = vmul.f32 %v11297_v13, %v11319_v49  ;;  %v6645_v23 = vld [vmem:[#allocation3 + $0x34] ss:$8 sm:$0x3] }
  0x99   :  { %14435 = vst [vmem:[#allocation57_spill] sm:$0xff] %v11376_v42  ;;  %14436 = vst [vmem:[#allocation58_spill] sm:$0xff] %v11379_v44  ;;  %v11402_v44 = vmul.f32 %v3251_v27, %v11319_v49  ;;  %v11408_v42 = vmul.f32 %v3393_v30, %v11253_v51  ;;  %v11423_v27 = vmul.f32 %v3397_v21, %v11319_v49 }
  0x9a   :  { %14437 = vst [vmem:[#allocation59_spill] sm:$0xff] %v11383_v2  ;;  %14438 = vst [vmem:[#allocation60_spill] sm:$0xff] %v11386_v14  ;;  %v11405_v2 = vmul.f32 %v3255_v33, %v11319_v49  ;;  %v4601_v14 = vld [vmem:[#allocation3 + $0x2] ss:$8 sm:$0x3]  ;;  %v11426_v33 = vmul.f32 %v3545_v55, %v11319_v49  ;;  %v4279_v40 = vrot.slane %v11131_v47, %v11167_v18 }
  0x9b   :  { %14439 = vst [vmem:[#allocation61_spill] sm:$0xff] %v11390_v24  ;;  %14440 = vst [vmem:[#allocation62_spill] sm:$0xff] %v11393_v35  ;;  %v11411_v24 = vmul.f32 %v3397_v21, %v11253_v51  ;;  %v4137_v21 = vrot.slane %v11108_v56, %v11167_v18  ;;  %v11493_v37 = vmul.f32 %v11327_v53, %v11253_v51  ;;  %v5631_v35 = vld [vmem:[#allocation3 + $0x17] ss:$8 sm:$0x3] }
  0x9c   :  { %14441 = vst [vmem:[#allocation63_spill] sm:$0xff] %v11396_v1  ;;  %14442 = vst [vmem:[#allocation64_spill] sm:$0xff] %v11399_v17  ;;  %v11417_v1 = vmul.f32 %v3393_v30, %v11319_v49  ;;  %v11435_v30 = vmul.f32 %v11297_v13, %v11253_v51  ;;  %v4427_v13 = vrot.slane %v11145_v58, %v11164_v20 }
  0x9d   :  { %14443 = vst [vmem:[#allocation65_spill] sm:$0xff] %v11402_v44  ;;  %14444 = vst [vmem:[#allocation66_spill] sm:$0xff] %v11405_v2  ;;  %v4133_v2 = vrot.slane %v11108_v56, %v11164_v20  ;;  %v9712_v44 = vpop.eup %9711  ;;  %v11518_v38 = vmul.f32 %v11327_v53, %v11319_v49  ;;  %v4573_v54 = vrot.slane %v11158_v57, %v11167_v18  ;;  %v4907_v53 = vld [vmem:[#allocation3 + $0x6] ss:$8 sm:$0x3] }
  0x9e   :  { %14445 = vst [vmem:[#allocation67_spill] sm:$0xff] %v11408_v42  ;;  %14446 = vst [vmem:[#allocation68_spill] sm:$0xff] %v11411_v24  ;;  %v4760_v42 = vld [vmem:[#allocation3 + $0x2] ss:$8 sm:$0x3]  ;;  %v11441_v55 = vsel %vm2402_vm6, 0.0, %v9712_v44  ;;  %v11706_v11 = vrot.slane %v10587_v63, %v11167_v18  ;;  %v11723_v5 = vrot.slane %v10608_v7, %v11164_v20  ;;  %v6648_v10 = vadd.f32 %v6646_v39, %v6645_v23 }
  0x9f   :  { %14447 = vst [vmem:[#allocation69_spill] sm:$0xff] %v11414_v60  ;;  %14448 = vst [vmem:[#allocation70_spill] sm:$0xff] %v11417_v1  ;;  %v4761_v24 = vld [vmem:[#allocation3 + $0x3] ss:$8 sm:$0x3]  ;;  %v11431_v60 = vmul.f32 %v3549_v0, %v11319_v49  ;;  %v11450_v0 = vmul.f32 %v11305_v4, %v11253_v51  ;;  %v11752_v39 = vrot.slane %v10636_v15, %v11167_v18 }
  0xa0   :  { %14449 = vst [vmem:[#allocation71_spill] sm:$0xff] %v11420_v61  ;;  %14450 = vst [vmem:[#allocation72_spill] sm:$0xff] %v11423_v27  ;;  %v4603_v27 = vadd.f32 %v4602_v62, %v4601_v14  ;;  %v9714_v61 = vpop.eup %9713  ;;  %v4275_v62 = vrot.slane %v11131_v47, %v11164_v20  ;;  %v4763_v44 = vadd.f32 %v4761_v24, %v4760_v42  ;;  %v4905_v14 = vld [vmem:[#allocation3 + $0x4] ss:$8 sm:$0x3] }
  0xa1   :  { %14451 = vst [vmem:[#allocation73_spill] sm:$0xff] %v11426_v33  ;;  %14452 = vst [vmem:[#allocation74_spill] sm:$0xff] %v11431_v60  ;;  %v11446_v33 = vmul.f32 %v11301_v34, %v11253_v51  ;;  %v4762_v60 = vld [vmem:[#allocation3 + $0x4] ss:$8 sm:$0x3]  ;;  %v11454_v56 = vsel %vm2544_vm7, 0.0, %v9714_v61  ;;  %v11481_v24 = vmul.f32 %v11305_v4, %v11319_v49  ;;  %v11922_v31 = vmul.f32 %v11191_v50, %v11253_v51 }
  0xa2   :  { %14453 = vst [vmem:[#allocation75_spill] sm:$0xff] %v11435_v30  ;;  %14455 = vst [vmem:[#allocation77_spill] sm:$0xff] %v11450_v0  ;;  %v9716_v30 = vpop.eup %9715  ;;  %v11468_v0 = vmul.f32 %v11301_v34, %v11319_v49  ;;  %v4906_v61 = vld [vmem:[#allocation3 + $0x5] ss:$8 sm:$0x3]  ;;  %v11485_v34 = vmul.f32 %v11317_v25, %v11319_v49  ;;  %v11497_v17 = vmul.f32 16.0, %v4603_v27  ;;  %v4764_v45 = vadd.f32 %v4763_v44, %v4762_v60 }
  0xa3   :  { %14454 = vst [vmem:[#allocation76_spill] sm:$0xff] %v11446_v33  ;;  %14456 = vst [vmem:[#allocation78_spill] sm:$0xff] %v11458_v28  ;;  %v11464_v33 = vmul.f32 %v11317_v25, %v11253_v51  ;;  %v5050_v28 = vld [vmem:[#allocation3 + $0x6] ss:$8 sm:$0x3]  ;;  %v9718_v1 = vpop.eup %9717  ;;  %v11476_v42 = vsel %vm2696_vm8, 0.0, %v9716_v30  ;;  %v4431_v30 = vrot.slane %v11145_v58, %v11167_v18  ;;  %v4569_v58 = vrot.slane %v11158_v57, %v11164_v20 }
  0xa4   :  { %14458 = vst [vmem:[#allocation80_spill] sm:$0xff] %v11468_v0  ;;  %14459 = vst [vmem:[#allocation81_spill] sm:$0xff] %v11481_v24  ;;  %v5051_v47 = vld [vmem:[#allocation3 + $0x7] ss:$8 sm:$0x3]  ;;  %v9720_v0 = vpop.eup %9719  ;;  %v11525_v60 = vmul.f32 %v11331_v9, %v11319_v49  ;;  %v11531_v44 = vmul.f32 %v4133_v2, %v11319_v49  ;;  %vm4605_vm3 = vcmp.eq.f32.partialorder %v11497_v17, 0.0  ;;  %v11544_v57 = vmul.f32 %v4427_v13, %v11253_v51 }
  0xa5   :  { %14457 = vst [vmem:[#allocation79_spill] sm:$0xff] %v11464_v33  ;;  %14460 = vst [vmem:[#allocation82_spill] sm:$0xff] %v11485_v34  ;;  %v11489_v33 = vsel %vm2838_vm9, 0.0, %v9718_v1  ;;  %v9722_v4 = vpop.eup %9721  ;;  %v11501_v25 = vsel %vm2990_vm10, 0.0, %v9720_v0  ;;  %v11505_v34 = vmul.f32 %v11331_v9, %v11253_v51  ;;  %v4908_v1 = vadd.f32 %v4906_v61, %v4905_v14 }
  0xa6   :  { %14461 = vst [vmem:[#allocation83_spill] sm:$0xff] %v11493_v37  ;;  %14462 = vst [vmem:[#allocation84_spill] sm:$0xff] %v11497_v17  ;;  %v11509_v24 = vsel %vm14465_vm2, 0.0, %v9722_v4  ;;  %v11512_v37 = vmul.f32 %v4133_v2, %v11253_v51  ;;  %v5053_v27 = vadd.f32 %v5051_v47, %v5050_v28  ;;  %v11521_v0 = vmul.f32 %v4137_v21, %v11253_v51  ;;  %v5052_v14 = vld [vmem:[#allocation3 + $0x10] ss:$8 sm:$0x3] }
  0xa7   :  { %14463 = vst [vmem:[#allocation85_spill] sm:$0xff] %v11501_v25  ;;  %14464 = vst [vmem:[#allocation86_spill] sm:$0xff] %v11505_v34  ;;  %v11534_v28 = vmul.f32 %v4137_v21, %v11319_v49  ;;  %v11538_v61 = vmul.f32 %v4275_v62, %v11253_v51  ;;  %v11541_v9 = vmul.f32 %v4279_v40, %v11253_v51  ;;  %v5195_v2 = vld [vmem:[#allocation3 + $0x10] ss:$8 sm:$0x3]  ;;  %vm14495_vm8 = vcmp.eq.f32.partialorder %v11007_v12, 0.0 }
  0xa8   :  { %14466 = vst [vmem:[#allocation87_spill] sm:$0xff] %v11509_v24  ;;  %14467 = vst [vmem:[#allocation88_spill] sm:$0xff] %v11512_v37  ;;  %v11547_v47 = vmul.f32 %v4275_v62, %v11319_v49  ;;  %v5196_v4 = vld [vmem:[#allocation3 + $0x11] ss:$8 sm:$0x3]  ;;  %v11563_v62 = vrot.slane %v10477_v16, %v11167_v18  ;;  %v11580_v16 = vrot.slane %v10499_v22, %v11164_v20 }
  0xa9   :  { %14468 = vst [vmem:[#allocation89_spill] sm:$0xff] %v11518_v38  ;;  %14469 = vst [vmem:[#allocation90_spill] sm:$0xff] %v11521_v0  ;;  %v5340_v21 = vld [vmem:[#allocation3 + $0x12] ss:$8 sm:$0x3]  ;;  %v11583_v26 = vmul.f32 %v4569_v58, %v11319_v49  ;;  %v11595_v38 = vrot.slane %v10716_v8, %v11167_v18  ;;  %v11608_v8 = vrot.slane %v10499_v22, %v11167_v18 }
  0xaa   :  { %14470 = vst [vmem:[#allocation91_spill] sm:$0xff] %v11525_v60  ;;  %14471 = vst [vmem:[#allocation92_spill] sm:$0xff] %v11531_v44  ;;  %v11550_v44 = vmul.f32 %v4431_v30, %v11253_v51  ;;  %v11553_v60 = vmul.f32 %v4279_v40, %v11319_v49  ;;  %v5485_v0 = vld [vmem:[#allocation3 + $0x14] ss:$8 sm:$0x3]  ;;  %v11671_v12 = vrot.slane %v10555_v46, %v11167_v18 }
  0xab   :  { %14472 = vst [vmem:[#allocation93_spill] sm:$0xff] %v11534_v28  ;;  %14473 = vst [vmem:[#allocation94_spill] sm:$0xff] %v11538_v61  ;;  %v9724_v28 = vpop.eup %9723  ;;  %v11556_v61 = vmul.f32 %v4427_v13, %v11319_v49  ;;  %v4597_v40 = vld [vmem:[%s14220_s3 + $0x10] sm:$0xff]  ;;  %v11573_v13 = vmul.f32 %v4569_v58, %v11253_v51  ;;  %v11600_v58 = vmul.f32 16.0, %v4764_v45  ;;  %v4598_v45 = vld [vmem:[%s14220_s3 + $0x18] sm:$0xff]  ;;  %v11941_v41 = vmul.f32 %v14540_v36, %v11253_v51 }
  0xac   :  { %14474 = vst [vmem:[#allocation95_spill] sm:$0xff] %v11541_v9  ;;  %14475 = vst [vmem:[#allocation96_spill] sm:$0xff] %v11544_v57  ;;  %v11559_v9 = vmul.f32 %v4431_v30, %v11319_v49  ;;  %v5341_v57 = vld [vmem:[#allocation3 + $0x13] ss:$8 sm:$0x3]  ;;  %v11576_v30 = vmul.f32 %v4573_v54, %v11253_v51  ;;  %4723 = vperm.xlu1 %9680, %v4597_v40   ;;  %v5054_v40 = vadd.f32 %v5053_v27, %v5052_v14 }
  0xad   :  { %14476 = vst [vmem:[#allocation97_spill] sm:$0xff] %v11547_v47  ;;  %14477 = vst [vmem:[#allocation98_spill] sm:$0xff] %v11550_v44  ;;  %v11567_v47 = vsel %vm3284_vm11, 0.0, %v9724_v28  ;;  %v11586_v28 = vmul.f32 %v4573_v54, %v11319_v49  ;;  %v9726_v44 = vpop.eup %9725  ;;  %v4909_v54 = vadd.f32 %v4908_v1, %v4907_v53  ;;  %v5343_v37 = vadd.f32 %v5341_v57, %v5340_v21  ;;  %v5775_v14 = vld [vmem:[#allocation3 + $0x20] ss:$8 sm:$0x3] }
  0xae   :  { %14478 = vst [vmem:[#allocation99_spill] sm:$0xff] %v11553_v60  ;;  %14479 = vst [vmem:[#allocation100_spill] sm:$0xff] %v11556_v61  ;;  %v5486_v61 = vld [vmem:[#allocation3 + $0x15] ss:$8 sm:$0x3]  ;;  %v11604_v17 = vsel %vm3426_vm5, 0.0, %v9726_v44  ;;  %v11620_v44 = vrot.slane %v10521_v32, %v11164_v20 }
  0xaf   :  { %14480 = vst [vmem:[#allocation101_spill] sm:$0xff] %v11559_v9  ;;  %14481 = vst [vmem:[#allocation102_spill] sm:$0xff] %v11567_v47  ;;  %v5197_v9 = vld [vmem:[#allocation3 + $0x12] ss:$8 sm:$0x3]  ;;  %v5488_v34 = vadd.f32 %v5486_v61, %v5485_v0  ;;  %vm4766_vm6 = vcmp.eq.f32.partialorder %v11600_v58, 0.0  ;;  %v11624_v0 = vrot.slane %v10521_v32, %v11167_v18 }
  0xb0   :  { %14482 = vst [vmem:[#allocation103_spill] sm:$0xff] %v11573_v13  ;;  %14483 = vst [vmem:[#allocation104_spill] sm:$0xff] %v11576_v30  ;;  %v11591_v13 = vsel %vm4605_vm3, 0.0, %v14391_v59  ;;  %v5342_v60 = vld [vmem:[#allocation3 + $0x14] ss:$8 sm:$0x3]  ;;  %4728 = vperm.xlu1 %9680, %v4598_v45  }
  0xb1   :  { %14484 = vst [vmem:[#allocation105_spill] sm:$0xff] %v11583_v26  ;;  %14485 = vst [vmem:[#allocation106_spill] sm:$0xff] %v11586_v28  ;;  %v5487_v30 = vld [vmem:[#allocation3 + $0x16] ss:$8 sm:$0x3]  ;;  %v5198_v26 = vadd.f32 %v5196_v4, %v5195_v2  ;;  %v11614_v1 = vmul.f32 16.0, %v4909_v54  ;;  %v5344_v61 = vadd.f32 %v5343_v37, %v5342_v60  ;;  %v9728_v2 = vpop.eup %9727  ;;  %v11650_v60 = vrot.slane %v10555_v46, %v11164_v20 }
  0xb2   :  { %14486 = vst [vmem:[#allocation107_spill] sm:$0xff] %v11591_v13  ;;  %4758 = vst.msk [vmem:[#allocation5] ss:$8 sm:$0x3] %vm10337_vm4, %v11591_v13  ;;  %v11616_v27 = vmul.f32 16.0, %v5054_v40  ;;  %v11629_v22 = vsel %vm4766_vm6, 0.0, %v14391_v59  ;;  %v5489_v57 = vadd.f32 %v5488_v34, %v5487_v30 }
  0xb3   :  { %14487 = vst [vmem:[#allocation108_spill] sm:$0xff] %v11600_v58  ;;  %v5630_v28 = vld [vmem:[#allocation3 + $0x16] ss:$8 sm:$0x3]  ;;  %14488 = vst [vmem:[#allocation109_spill] sm:$0xff] %v11604_v17  ;;  %v5199_v53 = vadd.f32 %v5198_v26, %v5197_v9  ;;  %vm4911_vm5 = vcmp.eq.f32.partialorder %v11614_v1, 0.0 }
  0xb4   :  { %14489 = vst [vmem:[#allocation110_spill] sm:$0xff] %v11614_v1  ;;  %14490 = vst [vmem:[#allocation111_spill] sm:$0xff] %v11616_v27  ;;  %vm5056_vm7 = vcmp.eq.f32.partialorder %v11616_v27, 0.0  ;;  %v5776_v32 = vld [vmem:[#allocation3 + $0x21] ss:$8 sm:$0x3]  ;;  %v5633_v26 = vadd.f32 %v5631_v35, %v5630_v28 }
  0xb5   :  { %14491 = vst [vmem:[#allocation112_spill] sm:$0xff] %v11629_v22  ;;  %4903 = vst.msk [vmem:[#allocation5 + $0x1] ss:$8 sm:$0x3] %vm10337_vm4, %v11629_v22  ;;  %v11639_v4 = vsel %vm4911_vm5, 0.0, %v14391_v59  ;;  %v11644_v9 = vsel %vm5056_vm7, 0.0, %v14391_v59  ;;  %v5778_v27 = vadd.f32 %v5776_v32, %v5775_v14  ;;  %v11687_v32 = vrot.slane %v10587_v63, %v11164_v20 }
  0xb6   :  { %14492 = vst [vmem:[#allocation113_spill] sm:$0xff] %v11639_v4  ;;  %14493 = vst [vmem:[#allocation114_spill] sm:$0xff] %v11644_v9  ;;  %v11646_v21 = vmul.f32 16.0, %v5199_v53  ;;  %v5777_v54 = vld [vmem:[#allocation3 + $0x22] ss:$8 sm:$0x3]  ;;  %v11719_v63 = vrot.slane %v10742_v6, %v11167_v18 }
  0xb7   :  { %v5920_v40 = vld [vmem:[#allocation3 + $0x22] ss:$8 sm:$0x3]  ;;  %v5921_v45 = vld [vmem:[#allocation3 + $0x23] ss:$8 sm:$0x3] }
  0xb8   :  { %14494 = vst [vmem:[#allocation115_spill] sm:$0xff] %v11646_v21  ;;  %v6065_v37 = vld [vmem:[#allocation3 + $0x24] ss:$8 sm:$0x3]  ;;  %v11654_v30 = vsel %vm14495_vm8, 0.0, %v9728_v2  ;;  %v11665_v35 = vmul.f32 16.0, %v5344_v61  ;;  %v5634_v2 = vadd.f32 %v5633_v26, %v5632_v3 }
  0xb9   :  { %v6066_v34 = vld [vmem:[#allocation3 + $0x25] ss:$8 sm:$0x3]  ;;  %14496 = vst [vmem:[#allocation116_spill] sm:$0xff] %v11654_v30  ;;  %v11667_v28 = vmul.f32 16.0, %v5489_v57  ;;  %vm5201_vm9 = vcmp.eq.f32.partialorder %v11646_v21, 0.0 }
  0xba   :  { %v6799_v22 = vld [vmem:[%s14220_s3 + $0x28] sm:$0xff]  ;;  %5048 = vst.msk [vmem:[#allocation5 + $0x2] ss:$8 sm:$0x3] %vm10337_vm4, %v11639_v4  ;;  %14497 = vst [vmem:[#allocation117_spill] sm:$0xff] %v11665_v35  ;;  %v11681_v61 = vsel %vm5201_vm9, 0.0, %v14391_v59 }
  0xbb   :  { %5193 = vst.msk [vmem:[#allocation5 + $0x3] ss:$8 sm:$0x3] %vm10337_vm4, %v11644_v9  ;;  %14498 = vst [vmem:[#allocation118_spill] sm:$0xff] %v11667_v28  ;;  %7000 = vperm.xlu1 %9680, %v6799_v22   ;;  %v11676_v9 = vrot.slane %v10742_v6, %v11164_v20  ;;  %vm5346_vm10 = vcmp.eq.f32.partialorder %v11665_v35, 0.0  ;;  %vm5491_vm11 = vcmp.eq.f32.partialorder %v11667_v28, 0.0  ;;  %v5779_v28 = vadd.f32 %v5778_v27, %v5777_v54 }
  0xbc   :  { %v6210_v53 = vld [vmem:[#allocation3 + $0x26] ss:$8 sm:$0x3]  ;;  %v5922_v1 = vld [vmem:[#allocation3 + $0x24] ss:$8 sm:$0x3]  ;;  %v6068_v35 = vadd.f32 %v6066_v34, %v6065_v37 }
  0xbd   :  { %v6067_v4 = vld [vmem:[#allocation3 + $0x26] ss:$8 sm:$0x3]  ;;  %v6211_v13 = vld [vmem:[#allocation3 + $0x27] ss:$8 sm:$0x3] }
  0xbe   :  { %14499 = vst [vmem:[#allocation119_spill] sm:$0xff] %v11681_v61  ;;  %v6212_v46 = vld [vmem:[#allocation3 + $0x30] ss:$8 sm:$0x3]  ;;  %v11695_v26 = vsel %vm5346_vm10, 0.0, %v14391_v59  ;;  %v11700_v21 = vsel %vm5491_vm11, 0.0, %v14391_v59 }
  0xbf   :  { %v6355_v22 = vld [vmem:[#allocation3 + $0x30] ss:$8 sm:$0x3]  ;;  %v6356_v3 = vld [vmem:[#allocation3 + $0x31] ss:$8 sm:$0x3] }
  0xc0   :  { %v6500_v14 = vld [vmem:[#allocation3 + $0x32] ss:$8 sm:$0x3]  ;;  %v6501_v57 = vld [vmem:[#allocation3 + $0x33] ss:$8 sm:$0x3]  ;;  %v6358_v37 = vadd.f32 %v6356_v3, %v6355_v22 }
  0xc1   :  { %5338 = vst.msk [vmem:[#allocation5 + $0x4] ss:$8 sm:$0x3] %vm10337_vm4, %v11681_v61  ;;  %14500 = vst [vmem:[#allocation120_spill] sm:$0xff] %v11695_v26  ;;  %v11702_v58 = vmul.f32 16.0, %v5634_v2  ;;  %v6801_v61 = vld [vmem:[%s14220_s3 + $0x38] sm:$0xff]  ;;  %v5923_v2 = vadd.f32 %v5921_v45, %v5920_v40  ;;  %v6069_v40 = vadd.f32 %v6068_v35, %v6067_v4 }
  0xc2   :  { %14501 = vst [vmem:[#allocation121_spill] sm:$0xff] %v11700_v21  ;;  %5483 = vst.msk [vmem:[#allocation5 + $0x5] ss:$8 sm:$0x3] %vm10337_vm4, %v11695_v26  ;;  %7010 = vperm.xlu1 %9680, %v6801_v61   ;;  %v6213_v26 = vadd.f32 %v6211_v13, %v6210_v53  ;;  %v11731_v27 = vmul.f32 16.0, %v5779_v28  ;;  %v6503_v61 = vadd.f32 %v6501_v57, %v6500_v14  ;;  %v14541_v30 = vld [vmem:[#allocation29_spill] sm:$0xff] }
  0xc3   :  { %14502 = vst [vmem:[#allocation122_spill] sm:$0xff] %v11702_v58  ;;  %5628 = vst.msk [vmem:[#allocation5 + $0x6] ss:$8 sm:$0x3] %vm10337_vm4, %v11700_v21  ;;  %vm5636_vm15 = vcmp.eq.f32.partialorder %v11702_v58, 0.0  ;;  %v5924_v54 = vadd.f32 %v5923_v2, %v5922_v1  ;;  %v11738_v13 = vrot.slane %v10608_v7, %v11167_v18  ;;  %v11742_v28 = vrot.slane %v10636_v15, %v11164_v20  ;;  %v6803_v1 = vld [vmem:[%s14220_s3 + $0x48] sm:$0xff] }
  0xc4   :  { %v11729_v21 = vsel %vm5636_vm15, 0.0, %v14391_v59  ;;  %14504 = vst [vmem:[#allocation124_spill] sm:$0xff] %v11731_v27  ;;  %v6214_v6 = vadd.f32 %v6213_v26, %v6212_v46  ;;  %v6357_v45 = vld [vmem:[#allocation3 + $0x32] ss:$8 sm:$0x3]  ;;  %vm14305_vm2 = vcmp.eq.f32.partialorder %v11731_v27, 0.0  ;;  %v11945_v17 = vmul.f32 %v14541_v30, %v11253_v51 }
  0xc5   :  { %14503 = vst [vmem:[#allocation123_spill] sm:$0xff] %v11729_v21  ;;  %5773 = vst.msk [vmem:[#allocation5 + $0x7] ss:$8 sm:$0x3] %vm10337_vm4, %v11729_v21  ;;  %v11748_v4 = vmul.f32 16.0, %v5924_v54  ;;  %v11757_v7 = vsel %vm14305_vm2, 0.0, %v14391_v59  ;;  %v6359_v15 = vadd.f32 %v6358_v37, %v6357_v45 }
  0xc6   :  { %v6502_v34 = vld [vmem:[#allocation3 + $0x34] ss:$8 sm:$0x3]  ;;  %v6647_v35 = vld [vmem:[#allocation3 + $0x36] ss:$8 sm:$0x3]  ;;  %7020 = vperm.xlu1 %9680, %v6803_v1  }
  0xc7   :  { %14505 = vst [vmem:[#allocation125_spill] sm:$0xff] %v11748_v4  ;;  %14506 = vst [vmem:[#allocation126_spill] sm:$0xff] %v11757_v7  ;;  %v11759_v23 = vmul.f32 16.0, %v6069_v40  ;;  %v11761_v53 = vmul.f32 16.0, %v6214_v6  ;;  %v14509_v46 = vld [vmem:[#allocation7_spill] sm:$0xff]  ;;  %vm14306_vm8 = vcmp.eq.f32.partialorder %v11748_v4, 0.0  ;;  %v6504_v3 = vadd.f32 %v6503_v61, %v6502_v34 }
  0xc8   :  { %v11765_v22 = vrot.slane %v14509_v46, %v11164_v20  ;;  %5918 = vst.msk [vmem:[#allocation5 + $0x10] ss:$8 sm:$0x3] %vm10337_vm4, %v11757_v7  ;;  %v11773_v14 = vrot.slane %v14509_v46, %v11167_v18  ;;  %v11778_v57 = vsel %vm14306_vm8, 0.0, %v14391_v59  ;;  %v6649_v26 = vadd.f32 %v6648_v10, %v6647_v35  ;;  %v14511_v2 = vld [vmem:[#allocation8_spill] sm:$0xff]  ;;  %v6805_v40 = vld [vmem:[%s14220_s3 + $0x58] sm:$0xff] }
  0xc9   :  { %14507 = vst [vmem:[#allocation127_spill] sm:$0xff] %v11759_v23  ;;  %14508 = vst [vmem:[#allocation128_spill] sm:$0xff] %v11761_v53  ;;  %vm14307_vm2 = vcmp.eq.f32.partialorder %v11759_v23, 0.0  ;;  %v11783_v54 = vrot.slane %v14511_v2, %v11164_v20  ;;  %vm14310_vm8 = vcmp.eq.f32.partialorder %v11761_v53, 0.0  ;;  %v11797_v10 = vmul.f32 16.0, %v6359_v15  ;;  %v14514_v45 = vld [vmem:[#allocation10_spill] sm:$0xff] }
  0xca   :  { %14510 = vst [vmem:[#allocation7_spill] sm:$0xff] %v11778_v57  ;;  %6063 = vst.msk [vmem:[#allocation5 + $0x11] ss:$8 sm:$0x3] %vm10337_vm4, %v11778_v57  ;;  %v11794_v6 = vsel %vm14307_vm2, 0.0, %v14391_v59  ;;  %v11801_v37 = vrot.slane %v14514_v45, %v11164_v20  ;;  %v11805_v34 = vrot.slane %v14511_v2, %v11167_v18  ;;  %7030 = vperm.xlu1 %9680, %v6805_v40   ;;  %v11813_v61 = vsel %vm14310_vm8, 0.0, %v14391_v59 }
  0xcb   :  { %14512 = vst [vmem:[#allocation8_spill] sm:$0xff] %v11794_v6  ;;  %14513 = vst [vmem:[#allocation129_spill] sm:$0xff] %v11797_v10  ;;  %v11815_v1 = vmul.f32 16.0, %v6504_v3  ;;  %v11819_v35 = vrot.slane %v14514_v45, %v11167_v18  ;;  %v14517_v46 = vld [vmem:[#allocation11_spill] sm:$0xff]  ;;  %vm14317_vm2 = vcmp.eq.f32.partialorder %v11797_v10, 0.0  ;;  %v11829_v2 = vmul.f32 16.0, %v6649_v26 }
  0xcc   :  { %6208 = vst.msk [vmem:[#allocation5 + $0x12] ss:$8 sm:$0x3] %vm10337_vm4, %v11794_v6  ;;  %14515 = vst [vmem:[#allocation10_spill] sm:$0xff] %v11813_v61  ;;  %v11823_v15 = vrot.slane %v14517_v46, %v11164_v20  ;;  %v11833_v3 = vrot.slane %v14517_v46, %v11167_v18  ;;  %v14519_v40 = vld [vmem:[#allocation12_spill] sm:$0xff]  ;;  %v11842_v6 = vsel %vm14317_vm2, 0.0, %v14391_v59 }
  0xcd   :  { %14516 = vst [vmem:[#allocation130_spill] sm:$0xff] %v11815_v1  ;;  %6353 = vst.msk [vmem:[#allocation5 + $0x13] ss:$8 sm:$0x3] %vm10337_vm4, %v11813_v61  ;;  %v11837_v45 = vrot.slane %v14519_v40, %v11164_v20  ;;  %vm6506_vm8 = vcmp.eq.f32.partialorder %v11815_v1, 0.0  ;;  %v11847_v61 = vrot.slane %v14519_v40, %v11167_v18  ;;  %v14523_v26 = vld [vmem:[#allocation13_spill] sm:$0xff]  ;;  %v11891_v1 = vrot.slane %v11072_v29, %v11167_v18 }
  0xce   :  { %14518 = vst [vmem:[#allocation11_spill] sm:$0xff] %v11829_v2  ;;  %14521 = vst [vmem:[#allocation131_spill] sm:$0xff] %v11842_v6  ;;  %v11851_v53 = vrot.slane %v14523_v26, %v11164_v20  ;;  %v8749_v46 = vld [vmem:[%s14220_s3 + $0x68] sm:$0xff]  ;;  %v11862_v10 = vsel %vm6506_vm8, 0.0, %v14391_v59  ;;  %vm14366_vm2 = vcmp.eq.f32.partialorder %v11829_v2, 0.0  ;;  %v11867_v40 = vrot.slane %v14523_v26, %v11167_v18  ;;  %v14527_v57 = vld [vmem:[#allocation15_spill] sm:$0xff] }
  0xcf   :  { %14520 = vst [vmem:[#allocation12_spill] sm:$0xff] %v11837_v45  ;;  %14522 = vst [vmem:[#allocation132_spill] sm:$0xff] %v11847_v61  ;;  %v11871_v23 = vrot.slane %v14527_v57, %v11164_v20  ;;  %v11875_v7 = vrot.slane %v14527_v57, %v11167_v18  ;;  %8759 = vperm.xlu1 %9680, %v8749_v46   ;;  %v11887_v26 = vrot.slane %v11072_v29, %v11164_v20  ;;  %v14538_v21 = vld [vmem:[#allocation26_spill] sm:$0xff]  ;;  %v14539_v27 = vld [vmem:[#allocation27_spill] sm:$0xff] }
  0xd0   :  { %14524 = vst [vmem:[#allocation13_spill] sm:$0xff] %v11851_v53  ;;  %6498 = vst.msk [vmem:[#allocation5 + $0x14] ss:$8 sm:$0x3] %vm10337_vm4, %v11842_v6  ;;  %v11883_v6 = vsel %vm14366_vm2, 0.0, %v14391_v59  ;;  %v11895_v57 = vrot.slane %v11115_v19, %v11164_v20  ;;  %v11899_v46 = vrot.slane %v11115_v19, %v11167_v18  ;;  %v11906_v59 = vmul.f32 %v11175_v48, %v11253_v51  ;;  %v14544_v47 = vld [vmem:[#allocation33_spill] sm:$0xff] }
  0xd1   :  { %14525 = vst [vmem:[#allocation133_spill] sm:$0xff] %v11862_v10  ;;  %14526 = vst [vmem:[#allocation134_spill] sm:$0xff] %v11867_v40  ;;  %v11910_v29 = vmul.f32 %v11183_v52, %v11253_v51  ;;  %v11918_v19 = vrot.slane %v11140_v43, %v11167_v18  ;;  %v11930_v4 = vmul.f32 %v14538_v21, %v11253_v51  ;;  %v14551_v45 = vld [vmem:[#allocation9_spill] sm:$0xff] }
  0xd2   :  { %14528 = vst [vmem:[#allocation15_spill] sm:$0xff] %v11871_v23  ;;  %14529 = vst [vmem:[#allocation135_spill] sm:$0xff] %v11875_v7  ;;  %v11934_v58 = vmul.f32 %v14539_v27, %v11253_v51  ;;  %v14546_v23 = vld [vmem:[#allocation35_spill] sm:$0xff]  ;;  %v11969_v40 = vmul.f32 %v11563_v62, %v11253_v51  ;;  %v11973_v53 = vmul.f32 %v11175_v48, %v11319_v49  ;;  %9729 = vrcp.f32 %v14551_v45 }
  0xd3   :  { %6643 = vst.msk [vmem:[#allocation5 + $0x15] ss:$8 sm:$0x3] %vm10337_vm4, %v11862_v10  ;;  %14530 = vst [vmem:[#allocation136_spill] sm:$0xff] %v11883_v6  ;;  %v11914_v10 = vrot.slane %v11140_v43, %v11164_v20  ;;  %v8751_v43 = vld [vmem:[%s14220_s3 + $0x78] sm:$0xff]  ;;  %v11965_v24 = vmul.f32 %v14546_v23, %v11253_v51  ;;  %v11981_v61 = vmul.f32 %v11608_v8, %v11253_v51 }
  0xd4   :  { %14531 = vst [vmem:[#allocation137_spill] sm:$0xff] %v11887_v26  ;;  %14532 = vst [vmem:[#allocation138_spill] sm:$0xff] %v11891_v1  ;;  %8769 = vperm.xlu1 %9680, %v8751_v43   ;;  %v11957_v1 = vmul.f32 %v14544_v47, %v11253_v51  ;;  %v14545_v26 = vld [vmem:[#allocation34_spill] sm:$0xff]  ;;  %v11977_v43 = vmul.f32 %v11580_v16, %v11253_v51 }
  0xd5   :  { %14533 = vst [vmem:[#allocation139_spill] sm:$0xff] %v11895_v57  ;;  %14534 = vst [vmem:[#allocation140_spill] sm:$0xff] %v11899_v46  ;;  %v14543_v46 = vld [vmem:[#allocation31_spill] sm:$0xff]  ;;  %v11961_v7 = vmul.f32 %v14545_v26, %v11253_v51 }
  0xd6   :  { %6788 = vst.msk [vmem:[#allocation5 + $0x16] ss:$8 sm:$0x3] %vm10337_vm4, %v11883_v6  ;;  %14535 = vst [vmem:[#allocation141_spill] sm:$0xff] %v11914_v10  ;;  %v14537_v6 = vld [vmem:[#allocation25_spill] sm:$0xff]  ;;  %v11953_v57 = vmul.f32 %v14543_v46, %v11253_v51  ;;  %v12021_v25 = vmul.f32 %v14543_v46, %v11319_v49  ;;  %v12069_v46 = vmul.f32 %v11624_v0, %v11319_v49  ;;  %vm14586_vm4 = vcmp.eq.f32.partialorder %v14551_v45, 0.0 }
  0xd7   :  { %14536 = vst [vmem:[#allocation142_spill] sm:$0xff] %v11918_v19  ;;  %v11926_v2 = vmul.f32 %v14537_v6, %v11253_v51  ;;  %v14542_v19 = vld [vmem:[#allocation30_spill] sm:$0xff]  ;;  %14547 = vst [vmem:[#allocation25_spill] sm:$0xff] %v11965_v24  ;;  %v11986_v24 = vmul.f32 %v11183_v52, %v11319_v49  ;;  %v11994_v48 = vmul.f32 %v14537_v6, %v11319_v49  ;;  %v14591_v45 = vld [vmem:[#allocation36_spill] sm:$0xff] }
  0xd8   :  { %v11949_v10 = vmul.f32 %v14542_v19, %v11253_v51  ;;  %14548 = vst [vmem:[#allocation26_spill] sm:$0xff] %v11969_v40  ;;  %14549 = vst [vmem:[#allocation27_spill] sm:$0xff] %v11977_v43  ;;  %v11990_v40 = vmul.f32 %v11191_v50, %v11319_v49  ;;  %v11998_v43 = vmul.f32 %v14538_v21, %v11319_v49 }
  0xd9   :  { %14550 = vst [vmem:[#allocation28_spill] sm:$0xff] %v11981_v61  ;;  %v8885_v61 = vld [vmem:[%s14220_s3 + $0x88] sm:$0xff]  ;;  %v12005_v52 = vmul.f32 %v14539_v27, %v11319_v49  ;;  %v12009_v50 = vmul.f32 %v14540_v36, %v11319_v49  ;;  %v12013_v6 = vmul.f32 %v14541_v30, %v11319_v49  ;;  %v12017_v21 = vmul.f32 %v14542_v19, %v11319_v49 }
  0xda   :  { %8893 = vperm.xlu1 %9680, %v8885_v61   ;;  %v12025_v27 = vmul.f32 %v14544_v47, %v11319_v49  ;;  %v12029_v36 = vmul.f32 %v14545_v26, %v11319_v49  ;;  %v12033_v30 = vmul.f32 %v14546_v23, %v11319_v49  ;;  %v12037_v19 = vmul.f32 %v11563_v62, %v11319_v49 }
  0xdb   :  { %v12041_v61 = vmul.f32 %v11580_v16, %v11319_v49  ;;  %v12045_v47 = vmul.f32 %v11608_v8, %v11319_v49  ;;  %v12049_v26 = vmul.f32 %v11620_v44, %v11253_v51  ;;  %v12053_v23 = vmul.f32 %v11624_v0, %v11253_v51  ;;  %14555 = vst [vmem:[#allocation33_spill] sm:$0xff] %v12069_v46 }
  0xdc   :  { %v12057_v62 = vmul.f32 %v11650_v60, %v11253_v51  ;;  %v12061_v16 = vmul.f32 %v11620_v44, %v11319_v49  ;;  %v12065_v8 = vmul.f32 %v11671_v12, %v11253_v51  ;;  %v12081_v44 = vmul.f32 %v11687_v32, %v11253_v51 }
  0xdd   :  { %14552 = vst [vmem:[#allocation29_spill] sm:$0xff] %v12045_v47  ;;  %14553 = vst [vmem:[#allocation30_spill] sm:$0xff] %v12053_v23  ;;  %v12073_v47 = vmul.f32 %v11650_v60, %v11319_v49  ;;  %v12077_v23 = vmul.f32 %v11671_v12, %v11319_v49  ;;  %v12089_v0 = vmul.f32 %v11723_v5, %v11253_v51 }
  0xde   :  { %14554 = vst [vmem:[#allocation31_spill] sm:$0xff] %v12061_v16  ;;  %14558 = vst [vmem:[#allocation9_spill] sm:$0xff] %v12081_v44  ;;  %v12085_v16 = vmul.f32 %v11706_v11, %v11253_v51  ;;  %v12093_v60 = vmul.f32 %v11687_v32, %v11319_v49  ;;  %v12097_v12 = vmul.f32 %v11738_v13, %v11253_v51 }
  0xdf   :  { %14556 = vst [vmem:[#allocation34_spill] sm:$0xff] %v12073_v47  ;;  %14557 = vst [vmem:[#allocation35_spill] sm:$0xff] %v12077_v23  ;;  %v12101_v23 = vmul.f32 %v11706_v11, %v11319_v49  ;;  %v12105_v44 = vmul.f32 %v11723_v5, %v11319_v49  ;;  %v12113_v32 = vmul.f32 %v11742_v28, %v11253_v51 }
  0xe0   :  { %14559 = vst [vmem:[#allocation143_spill] sm:$0xff] %v12085_v16  ;;  %14560 = vst [vmem:[#allocation144_spill] sm:$0xff] %v12089_v0  ;;  %v12109_v16 = vmul.f32 %v11738_v13, %v11319_v49  ;;  %v14567_v0 = vld [vmem:[#allocation38_spill] sm:$0xff]  ;;  %v12125_v5 = vmul.f32 %v11752_v39, %v11253_v51  ;;  %v14571_v13 = vld [vmem:[#allocation39_spill] sm:$0xff]  ;;  %v12134_v46 = vmul.f32 %v11765_v22, %v11253_v51 }
  0xe1   :  { %14561 = vst [vmem:[#allocation145_spill] sm:$0xff] %v12093_v60  ;;  %14562 = vst [vmem:[#allocation146_spill] sm:$0xff] %v12097_v12  ;;  %v115_v60 = vpop.f32.mrb[0].mxu0  ;;  %v12117_v12 = vrot.slane %v14567_v0, %v11164_v20  ;;  %v12121_v11 = vrot.slane %v14567_v0, %v11167_v18  ;;  %v12138_v0 = vmul.f32 %v11742_v28, %v11319_v49 }
  0xe2   :  { %14563 = vst [vmem:[#allocation147_spill] sm:$0xff] %v12101_v23  ;;  %14564 = vst [vmem:[#allocation148_spill] sm:$0xff] %v12105_v44  ;;  %v9730_v44 = vpop.eup %9729  ;;  %v14573_v23 = vld [vmem:[#allocation21_spill] sm:$0xff]  ;;  %v117_v47 = vpop.f32.mrb[1].mxu0 }
  0xe3   :  { %14565 = vst [vmem:[#allocation149_spill] sm:$0xff] %v12109_v16  ;;  %14566 = vst [vmem:[#allocation150_spill] sm:$0xff] %v12113_v32  ;;  %v12129_v16 = vrot.slane %v14571_v13, %v11164_v20  ;;  %v137_v32 = vmul.f32 %v14573_v23, %v115_v60  ;;  %v12151_v60 = vmul.f32 %v11752_v39, %v11319_v49 }
  0xe4   :  { %14568 = vst [vmem:[#allocation38_spill] sm:$0xff] %v12117_v12  ;;  %14569 = vst [vmem:[#allocation151_spill] sm:$0xff] %v12121_v11  ;;  %v12142_v11 = vrot.slane %v14571_v13, %v11167_v18  ;;  %v12160_v13 = vmul.f32 %v11773_v14, %v11319_v49 }
  0xe5   :  { %14570 = vst [vmem:[#allocation152_spill] sm:$0xff] %v12125_v5  ;;  %14572 = vst [vmem:[#allocation39_spill] sm:$0xff] %v12129_v16  ;;  %v14577_v5 = vld [vmem:[#allocation22_spill] sm:$0xff]  ;;  %v12147_v16 = vmul.f32 %v11773_v14, %v11253_v51  ;;  %v166_v28 = vadd.f32 %v11906_v59, %v137_v32  ;;  %v12177_v59 = vmul.f32 %v11805_v34, %v11253_v51  ;;  %v2254_v14 = vsel %vm14586_vm4, 0.0, %v9730_v44  ;;  %v14587_v32 = vld [vmem:[#allocation23_spill] sm:$0xff] }
  0xe6   :  { %14574 = vst [vmem:[#allocation21_spill] sm:$0xff] %v12134_v46  ;;  %14575 = vst [vmem:[#allocation153_spill] sm:$0xff] %v12138_v0  ;;  %v138_v12 = vmul.f32 %v14577_v5, %v117_v47  ;;  %v12155_v46 = vmul.f32 %v11765_v22, %v11319_v49  ;;  %v14582_v47 = vld [vmem:[#allocation40_spill] sm:$0xff]  ;;  %v12195_v44 = vmul.f32 %v14591_v45, %v11319_v49  ;;  %vm4622_vm4 = vcmask 392192  }
  0xe7   :  { %14576 = vst [vmem:[#allocation154_spill] sm:$0xff] %v12142_v11  ;;  %14578 = vst [vmem:[#allocation22_spill] sm:$0xff] %v12147_v16  ;;  %v12164_v0 = vrot.slane %v14582_v47, %v11164_v20  ;;  %v12168_v16 = vmul.f32 %v11783_v54, %v11253_v51  ;;  %v121_v11 = vpop.f32.mrb[2].mxu0  ;;  %v12173_v22 = vrot.slane %v14582_v47, %v11167_v18  ;;  %v14590_v47 = vld [vmem:[#allocation24_spill] sm:$0xff] }
  0xe8   :  { %14579 = vst [vmem:[#allocation155_spill] sm:$0xff] %v12151_v60  ;;  %14580 = vst [vmem:[#allocation156_spill] sm:$0xff] %v12155_v46  ;;  %v167_v39 = vadd.f32 %v11910_v29, %v138_v12  ;;  %v281_v60 = vpop.f32.mrb[0].mxu1  ;;  %v139_v46 = vmul.f32 %v14573_v23, %v121_v11  ;;  %v12185_v29 = vmul.f32 %v11783_v54, %v11319_v49  ;;  %v14593_v23 = vld [vmem:[#allocation37_spill] sm:$0xff] }
  0xe9   :  { %14581 = vst [vmem:[#allocation157_spill] sm:$0xff] %v12160_v13  ;;  %14583 = vst [vmem:[#allocation40_spill] sm:$0xff] %v12164_v0  ;;  %v303_v13 = vmul.f32 %v14587_v32, %v281_v60  ;;  %v123_v0 = vpop.f32.mrb[3].mxu0  ;;  %v12189_v12 = vmul.f32 %v11805_v34, %v11319_v49  ;;  %v12199_v11 = vmul.f32 %v14593_v23, %v11319_v49  ;;  %v14596_v23 = vld [vmem:[#allocation32_spill] sm:$0xff] }
  0xea   :  { %14584 = vst [vmem:[#allocation158_spill] sm:$0xff] %v12168_v16  ;;  %14585 = vst [vmem:[#allocation159_spill] sm:$0xff] %v12177_v59  ;;  %v283_v16 = vpop.f32.mrb[1].mxu1  ;;  %v140_v59 = vmul.f32 %v14577_v5, %v123_v0  ;;  %v168_v54 = vadd.f32 %v11973_v53, %v139_v46  ;;  %v12207_v34 = vrot.slane %v2254_v14, %v11167_v18  ;;  %v423_v45 = vpop.f32.mrb[4].mxu0  ;;  %v170_v53 = vmax.f32 %v166_v28, 0.0 }
  0xeb   :  { %14588 = vst [vmem:[#allocation23_spill] sm:$0xff] %v12185_v29  ;;  %14589 = vst [vmem:[#allocation160_spill] sm:$0xff] %v12189_v12  ;;  %v304_v51 = vmul.f32 %v14590_v47, %v283_v16  ;;  %v322_v60 = vadd.f32 %v11922_v31, %v303_v13  ;;  %v12204_v29 = vrot.slane %v2254_v14, %v11164_v20  ;;  %v287_v0 = vpop.f32.mrb[2].mxu1 }
  0xec   :  { %14592 = vst [vmem:[#allocation24_spill] sm:$0xff] %v12195_v44  ;;  %14594 = vst [vmem:[#allocation36_spill] sm:$0xff] %v12199_v11  ;;  %v169_v5 = vadd.f32 %v11986_v24, %v140_v59  ;;  %v12213_v49 = vrot.slane %v11441_v55, %v11164_v20  ;;  %v12217_v31 = vrot.slane %v11441_v55, %v11167_v18  ;;  %v172_v46 = vmax.f32 %v168_v54, 0.0  ;;  %v289_v14 = vpop.f32.mrb[3].mxu1 }
  0xed   :  { %v323_v16 = vadd.f32 %v11926_v2, %v304_v51  ;;  %v305_v13 = vmul.f32 %v14587_v32, %v287_v0  ;;  %v445_v11 = vmul.f32 %v14596_v23, %v423_v45  ;;  %v425_v2 = vpop.f32.mrb[5].mxu0  ;;  %v171_v51 = vmax.f32 %v167_v39, 0.0  ;;  %v575_v0 = vpop.f32.mrb[4].mxu1 }
  0xee   :  { %14595 = vst [vmem:[#allocation37_spill] sm:$0xff] %v12213_v49  ;;  %v173_v24 = vmax.f32 %v169_v5, 0.0  ;;  %v306_v59 = vmul.f32 %v14590_v47, %v289_v14  ;;  %v446_v44 = vmul.f32 %v11595_v38, %v425_v2  ;;  %v9386_v12 = vpack.c.bf16 %v172_v46, %v170_v53  ;;  %v429_v39 = vpop.f32.mrb[6].mxu0 }
  0xef   :  { %v324_v49 = vadd.f32 %v11990_v40, %v305_v13  ;;  %v464_v55 = vadd.f32 %v11930_v4, %v445_v11  ;;  %v12227_v28 = vrot.slane %v11454_v56, %v11164_v20  ;;  %v12233_v47 = vrot.slane %v11454_v56, %v11167_v18  ;;  %v577_v11 = vpop.f32.mrb[5].mxu1  ;;  %v431_v46 = vpop.f32.mrb[7].mxu0 }
  0xf0   :  { %v325_v32 = vadd.f32 %v11994_v48, %v306_v59  ;;  %v465_v54 = vadd.f32 %v11934_v58, %v446_v44  ;;  %v9384_v5 = vpack.c.bf16 %v173_v24, %v171_v51  ;;  %v326_v45 = vmax.f32 %v322_v60, 0.0  ;;  %v717_v51 = vpop.f32.mrb[8].mxu0 }
  0xf1   :  { %v328_v53 = vmax.f32 %v324_v49, 0.0  ;;  %v597_v40 = vmul.f32 %v11676_v9, %v575_v0  ;;  %v447_v4 = vmul.f32 %v14596_v23, %v429_v39  ;;  %v327_v13 = vmax.f32 %v323_v16, 0.0  ;;  %v581_v23 = vpop.f32.mrb[6].mxu1  ;;  %v719_v0 = vpop.f32.mrb[9].mxu0 }
  0xf2   :  { %v329_v14 = vmax.f32 %v325_v32, 0.0  ;;  %v598_v48 = vmul.f32 %v11719_v63, %v577_v11  ;;  %v448_v58 = vmul.f32 %v11595_v38, %v431_v46  ;;  %9385 = vmatprep.subr.bf16.mxu1 %v9384_v5  ;;  %v12243_v60 = vrot.slane %v11476_v42, %v11164_v20 }
  0xf3   :  { %v9390_v44 = vpack.c.bf16 %v328_v53, %v326_v45  ;;  %v616_v2 = vadd.f32 %v11941_v41, %v597_v40  ;;  %v466_v56 = vadd.f32 %v11998_v43, %v447_v4  ;;  %9387 = vmatpush1.bf16.msra.mxu1 %v9386_v12  ;;  %v12249_v38 = vrot.slane %v11476_v42, %v11167_v18  ;;  %v583_v12 = vpop.f32.mrb[7].mxu1  ;;  %v723_v4 = vpop.f32.mrb[10].mxu0 }
  0xf4   :  { %v617_v49 = vadd.f32 %v11945_v17, %v598_v48  ;;  %v467_v16 = vadd.f32 %v12005_v52, %v448_v58  ;;  %v9388_v24 = vpack.c.bf16 %v329_v14, %v327_v13  ;;  %v468_v59 = vmax.f32 %v464_v55, 0.0  ;;  %v869_v40 = vpop.f32.mrb[8].mxu1  ;;  %v725_v48 = vpop.f32.mrb[11].mxu0 }
  0xf5   :  { %v470_v41 = vmax.f32 %v466_v56, 0.0  ;;  %v599_v43 = vmul.f32 %v11676_v9, %v581_v23  ;;  %v739_v32 = vmul.f32 %v11801_v37, %v717_v51  ;;  %v469_v39 = vmax.f32 %v465_v54, 0.0  ;;  %v871_v14 = vpop.f32.mrb[9].mxu1  ;;  %v1011_v23 = vpop.f32.mrb[12].mxu0 }
  0xf6   :  { %v471_v5 = vmax.f32 %v467_v16, 0.0  ;;  %v600_v17 = vmul.f32 %v11719_v63, %v583_v12  ;;  %v740_v52 = vmul.f32 %v11819_v35, %v719_v0  ;;  %9389 = vmatprep.subr.bf16.mxu1 %v9388_v24  ;;  %v12259_v9 = vrot.slane %v11489_v33, %v11164_v20  ;;  %v14597_v24 = vld [vmem:[#allocation85_spill] sm:$0xff]  ;;  %v14598_v12 = vld [vmem:[#allocation12_spill] sm:$0xff]  ;;  %v1013_v0 = vpop.f32.mrb[13].mxu0 }
  0xf7   :  { %v9394_v45 = vpack.c.bf16 %v470_v41, %v468_v59  ;;  %v618_v53 = vadd.f32 %v12009_v50, %v599_v43  ;;  %v758_v42 = vadd.f32 %v11949_v10, %v739_v32  ;;  %9391 = vmatpush1.bf16.msra.mxu1 %v9390_v44  ;;  %v12265_v11 = vrot.slane %v11489_v33, %v11167_v18 }
  0xf8   :  { %v619_v55 = vadd.f32 %v12013_v6, %v600_v17  ;;  %v759_v54 = vadd.f32 %v11953_v57, %v740_v52  ;;  %v9392_v63 = vpack.c.bf16 %v471_v5, %v469_v39  ;;  %v620_v46 = vmax.f32 %v616_v2, 0.0 }
  0xf9   :  { %v622_v50 = vmax.f32 %v618_v53, 0.0  ;;  %v891_v10 = vmul.f32 %v11823_v15, %v869_v40  ;;  %v741_v13 = vmul.f32 %v11801_v37, %v723_v4  ;;  %v621_v58 = vmax.f32 %v617_v49, 0.0  ;;  %v12276_v37 = vld [vmem:[%s14219_s2 + $0x10] sm:$0xff] }
  0xfa   :  { %v623_v44 = vmax.f32 %v619_v55, 0.0  ;;  %v892_v6 = vmul.f32 %v11833_v3, %v871_v14  ;;  %v742_v57 = vmul.f32 %v11819_v35, %v725_v48  ;;  %9393 = vmatprep.subr.bf16.mxu1 %v9392_v63  ;;  %9397 = vmatprep.subr.bf16.mxu0 %v9392_v63  ;;  %v875_v35 = vpop.f32.mrb[10].mxu1  ;;  %v1033_v32 = vmul.f32 %v14598_v12, %v1011_v23  ;;  %v14600_v53 = vld [vmem:[#allocation25_spill] sm:$0xff] }
  0xfb   :  { %v9402_v56 = vpack.c.bf16 %v622_v50, %v620_v46  ;;  %v910_v33 = vadd.f32 %v11957_v1, %v891_v10  ;;  %v760_v2 = vadd.f32 %v12017_v21, %v741_v13  ;;  %9395 = vmatpush1.bf16.msra.mxu1 %v9394_v45  ;;  %9399 = vmatpush1.bf16.msra.mxu0 %v9394_v45  ;;  %v762_v21 = vmax.f32 %v758_v42, 0.0  ;;  %v877_v43 = vpop.f32.mrb[11].mxu1  ;;  %v14603_v13 = vld [vmem:[#allocation13_spill] sm:$0xff] }
  0xfc   :  { %v911_v49 = vadd.f32 %v11961_v7, %v892_v6  ;;  %v761_v16 = vadd.f32 %v12021_v25, %v742_v57  ;;  %v9400_v51 = vpack.c.bf16 %v623_v44, %v621_v58  ;;  %v12282_v1 = vrot.slane %v14597_v24, %v11164_v20  ;;  %v14599_v25 = vld [vmem:[#allocation132_spill] sm:$0xff]  ;;  %v1163_v4 = vpop.f32.mrb[12].mxu1  ;;  %v14604_v57 = vld [vmem:[#allocation134_spill] sm:$0xff] }
  0xfd   :  { %v764_v59 = vmax.f32 %v760_v2, 0.0  ;;  %v893_v41 = vmul.f32 %v11823_v15, %v875_v35  ;;  %v763_v39 = vmax.f32 %v759_v54, 0.0  ;;  %v894_v7 = vmul.f32 %v11833_v3, %v877_v43  ;;  %v14602_v54 = vld [vmem:[#allocation26_spill] sm:$0xff]  ;;  %v1017_v3 = vpop.f32.mrb[14].mxu0  ;;  %v1165_v48 = vpop.f32.mrb[13].mxu1  ;;  %v14607_v43 = vld [vmem:[#allocation87_spill] sm:$0xff] }
  0xfe   :  { %v765_v5 = vmax.f32 %v761_v16, 0.0  ;;  %v1034_v17 = vmul.f32 %v14599_v25, %v1013_v0  ;;  %9401 = vmatprep.subr.bf16.mxu0 %v9400_v51  ;;  %9291 = vmatmul.mubr.msk.f32.vlgmr.msra.gmra.mrb[60].mxu1 %vm4622_vm4, %v12276_v37  ;;  %v1052_v42 = vadd.f32 %v14600_v53, %v1033_v32  ;;  %v14601_v15 = vmov 0.0   ;;  %v1019_v58 = vpop.f32.mrb[15].mxu0  ;;  %v14605_v16 = vld [vmem:[#allocation27_spill] sm:$0xff]  ;;  %v14606_v51 = vld [vmem:[#allocation28_spill] sm:$0xff] }
  0xff   :  { %v9406_v52 = vpack.c.bf16 %v764_v59, %v762_v21  ;;  %v912_v45 = vadd.f32 %v12025_v27, %v893_v41  ;;  %9403 = vmatpush1.bf16.msra.mxu0 %v9402_v56  ;;  %4699 = vmatprep.mubr.f32.mxu1 %v14601_v15  ;;  %v913_v55 = vadd.f32 %v12029_v36, %v894_v7  ;;  %v914_v50 = vmax.f32 %v910_v33, 0.0  ;;  %v12304_v36 = vld [vmem:[%s14219_s2 + $0x18] sm:$0xff]  ;;  %v1169_v59 = vpop.f32.mrb[14].mxu1 }
 0x100   :  { %v1053_v40 = vadd.f32 %v14602_v54, %v1034_v17  ;;  %v9404_v63 = vpack.c.bf16 %v765_v5, %v763_v39  ;;  %v12297_v46 = vrot.slane %v14597_v24, %v11167_v18  ;;  %v1185_v27 = vmul.f32 %v14603_v13, %v1163_v4  ;;  %v1171_v39 = vpop.f32.mrb[15].mxu1  ;;  %v14608_v5 = vld [vmem:[#allocation15_spill] sm:$0xff]  ;;  %v14610_v4 = vld [vmem:[#allocation29_spill] sm:$0xff] }
 0x101   :  { %v916_v10 = vmax.f32 %v912_v45, 0.0  ;;  %v1035_v14 = vmul.f32 %v14598_v12, %v1017_v3  ;;  %v915_v44 = vmax.f32 %v911_v49, 0.0  ;;  %v917_v6 = vmax.f32 %v913_v55, 0.0  ;;  %v1305_v49 = vpop.f32.mrb[16].mxu0  ;;  %v14609_v45 = vld [vmem:[#allocation135_spill] sm:$0xff] }
 0x102   :  { %v1186_v56 = vmul.f32 %v14604_v57, %v1165_v48  ;;  %v1036_v2 = vmul.f32 %v14599_v25, %v1019_v58  ;;  %9405 = vmatprep.subr.bf16.mxu0 %v9404_v63  ;;  %9409 = vmatprep.subr.bf16.mxu1 %v9404_v63  ;;  %v1204_v35 = vadd.f32 %v14605_v16, %v1185_v27  ;;  %v1056_v32 = vmax.f32 %v1052_v42, 0.0  ;;  %v1307_v25 = vpop.f32.mrb[17].mxu0  ;;  %v14612_v58 = vld [vmem:[#allocation137_spill] sm:$0xff] }
 0x103   :  { %v9414_v33 = vpack.c.bf16 %v916_v10, %v914_v50  ;;  %v1054_v23 = vadd.f32 %v12033_v30, %v1035_v14  ;;  %9407 = vmatpush1.bf16.msra.mxu0 %v9406_v52  ;;  %9411 = vmatpush1.bf16.msra.mxu1 %v9406_v52  ;;  %v9412_v41 = vpack.c.bf16 %v917_v6, %v915_v44  ;;  %v1457_v50 = vpop.f32.mrb[16].mxu1  ;;  %v1311_v10 = vpop.f32.mrb[18].mxu0 }
 0x104   :  { %v1205_v24 = vadd.f32 %v14606_v51, %v1186_v56  ;;  %v1055_v21 = vadd.f32 %v12037_v19, %v1036_v2  ;;  %9292 = vmatmul.mubr.msk.f32.gmra.mrb[62].mxu1 %vm4622_vm4, %v12304_v36  ;;  %v12316_v12 = vrot.slane %v14607_v43, %v11164_v20  ;;  %v1187_v30 = vmul.f32 %v14603_v13, %v1169_v59  ;;  %v1459_v44 = vpop.f32.mrb[17].mxu1  ;;  %v1313_v6 = vpop.f32.mrb[19].mxu0  ;;  %v14613_v2 = vld [vmem:[#allocation138_spill] sm:$0xff] }
 0x105   :  { %v1058_v0 = vmax.f32 %v1054_v23, 0.0  ;;  %v1327_v7 = vmul.f32 %v14608_v5, %v1305_v49  ;;  %4992 = vmatprep.mubr.f32.mxu1 %v14601_v15  ;;  %v1057_v19 = vmax.f32 %v1053_v40, 0.0  ;;  %v1188_v52 = vmul.f32 %v14604_v57, %v1171_v39  ;;  %9413 = vmatprep.subr.bf16.mxu1 %v9412_v41  ;;  %v14611_v40 = vld [vmem:[#allocation30_spill] sm:$0xff]  ;;  %v14615_v49 = vld [vmem:[#allocation33_spill] sm:$0xff] }
 0x106   :  { %v1059_v17 = vmax.f32 %v1055_v21, 0.0  ;;  %v1328_v53 = vmul.f32 %v14609_v45, %v1307_v25  ;;  %9293 = vmatmul.mubr.msk.f32.vlgmr.msra.gmra.mrb[64].mxu0 %vm4622_vm4, %v12276_v37  ;;  %v1206_v55 = vadd.f32 %v12041_v61, %v1187_v30  ;;  %v12332_v27 = vrot.slane %v14607_v43, %v11167_v18  ;;  %v14614_v21 = vld [vmem:[#allocation31_spill] sm:$0xff]  ;;  %v1463_v43 = vpop.f32.mrb[18].mxu1 }
 0x107   :  { %v9418_v42 = vpack.c.bf16 %v1058_v0, %v1056_v32  ;;  %v1346_v54 = vadd.f32 %v12049_v26, %v1327_v7  ;;  %9415 = vmatpush1.bf16.msra.mxu1 %v9414_v33  ;;  %4853 = vmatprep.mubr.f32.mxu0 %v14601_v15  ;;  %v1207_v3 = vadd.f32 %v14610_v4, %v1188_v52  ;;  %v1208_v14 = vmax.f32 %v1204_v35, 0.0  ;;  %v14616_v0 = vld [vmem:[#allocation102_spill] sm:$0xff]  ;;  %v1465_v7 = vpop.f32.mrb[19].mxu1  ;;  %v14617_v25 = vld [vmem:[#allocation139_spill] sm:$0xff] }
 0x108   :  { %v1347_v63 = vadd.f32 %v14611_v40, %v1328_v53  ;;  %v9416_v13 = vpack.c.bf16 %v1059_v17, %v1057_v19  ;;  %v1210_v48 = vmax.f32 %v1206_v55, 0.0  ;;  %v1479_v61 = vmul.f32 %v14612_v58, %v1457_v50  ;;  %v14618_v53 = vld [vmem:[#allocation140_spill] sm:$0xff]  ;;  %v14621_v50 = vld [vmem:[#allocation35_spill] sm:$0xff] }
 0x109   :  { %v1329_v26 = vmul.f32 %v14608_v5, %v1311_v10  ;;  %v1209_v57 = vmax.f32 %v1205_v24, 0.0  ;;  %v1211_v56 = vmax.f32 %v1207_v3, 0.0  ;;  %v1480_v33 = vmul.f32 %v14613_v2, %v1459_v44  ;;  %v1599_v24 = vpop.f32.mrb[20].mxu0  ;;  %v14620_v3 = vld [vmem:[#allocation9_spill] sm:$0xff] }
 0x10a   :  { %v1330_v16 = vmul.f32 %v14609_v45, %v1313_v6  ;;  %9417 = vmatprep.subr.bf16.mxu1 %v9416_v13  ;;  %9421 = vmatprep.subr.bf16.mxu0 %v9416_v13  ;;  %v9426_v23 = vpack.c.bf16 %v1210_v48, %v1208_v14  ;;  %v1498_v51 = vadd.f32 %v12057_v62, %v1479_v61  ;;  %v1350_v39 = vmax.f32 %v1346_v54, 0.0  ;;  %v14619_v54 = vld [vmem:[#allocation34_spill] sm:$0xff]  ;;  %v1751_v14 = vpop.f32.mrb[20].mxu1  ;;  %v14623_v6 = vld [vmem:[#allocation141_spill] sm:$0xff] }
 0x10b   :  { %v1348_v35 = vadd.f32 %v14614_v21, %v1329_v26  ;;  %9419 = vmatpush1.bf16.msra.mxu1 %v9418_v42  ;;  %9423 = vmatpush1.bf16.msra.mxu0 %v9418_v42  ;;  %v1499_v59 = vadd.f32 %v12065_v8, %v1480_v33  ;;  %v9424_v32 = vpack.c.bf16 %v1211_v56, %v1209_v57  ;;  %v1601_v8 = vpop.f32.mrb[21].mxu0  ;;  %v1351_v17 = vmax.f32 %v1347_v63, 0.0  ;;  %v14622_v63 = vld [vmem:[#allocation143_spill] sm:$0xff]  ;;  %v14624_v21 = vld [vmem:[#allocation142_spill] sm:$0xff] }
 0x10c   :  { %v1349_v41 = vadd.f32 %v14615_v49, %v1330_v16  ;;  %9294 = vmatmul.mubr.msk.f32.gmra.mrb[66].mxu0 %vm4622_vm4, %v12304_v36  ;;  %v12346_v30 = vrot.slane %v14616_v0, %v11164_v20  ;;  %v1481_v5 = vmul.f32 %v14612_v58, %v1463_v43  ;;  %v1621_v19 = vmul.f32 %v14617_v25, %v1599_v24  ;;  %v1605_v48 = vpop.f32.mrb[22].mxu0  ;;  %v14625_v43 = vld [vmem:[#allocation144_spill] sm:$0xff]  ;;  %v14626_v24 = vld [vmem:[#allocation145_spill] sm:$0xff] }
 0x10d   :  { %v1352_v62 = vmax.f32 %v1348_v35, 0.0  ;;  %5137 = vmatprep.mubr.f32.mxu0 %v14601_v15  ;;  %v1482_v45 = vmul.f32 %v14613_v2, %v1465_v7  ;;  %v1622_v42 = vmul.f32 %v14618_v53, %v1601_v8  ;;  %9425 = vmatprep.subr.bf16.mxu0 %v9424_v32  ;;  %v12362_v61 = vrot.slane %v14616_v0, %v11167_v18  ;;  %v1753_v2 = vpop.f32.mrb[21].mxu1  ;;  %v1607_v33 = vpop.f32.mrb[23].mxu0  ;;  %v14627_v0 = vld [vmem:[#allocation146_spill] sm:$0xff] }
 0x10e   :  { %v1353_v52 = vmax.f32 %v1349_v41, 0.0  ;;  %9295 = vmatmul.mubr.msk.f32.vlgmr.msra.gmra.mrb[64].mxu1 %vm4622_vm4, %v12276_v37  ;;  %v1500_v4 = vadd.f32 %v14619_v54, %v1481_v5  ;;  %v1640_v40 = vadd.f32 %v14620_v3, %v1621_v19  ;;  %v1502_v26 = vmax.f32 %v1498_v51, 0.0  ;;  %v1757_v5 = vpop.f32.mrb[22].mxu1  ;;  %v1893_v7 = vpop.f32.mrb[24].mxu0  ;;  %v14629_v19 = vld [vmem:[#allocation14_spill] sm:$0xff] }
 0x10f   :  { %v9430_v55 = vpack.c.bf16 %v1352_v62, %v1350_v39  ;;  %9427 = vmatpush1.bf16.msra.mxu0 %v9426_v23  ;;  %4998 = vmatprep.mubr.f32.mxu1 %v14601_v15  ;;  %v1501_v10 = vadd.f32 %v14621_v50, %v1482_v45  ;;  %v1641_v13 = vadd.f32 %v14622_v63, %v1622_v42  ;;  %v1503_v16 = vmax.f32 %v1499_v59, 0.0  ;;  %v14628_v62 = vld [vmem:[#allocation147_spill] sm:$0xff]  ;;  %v1759_v45 = vpop.f32.mrb[23].mxu1  ;;  %v1895_v54 = vpop.f32.mrb[25].mxu0 }
 0x110   :  { %v9428_v58 = vpack.c.bf16 %v1353_v52, %v1351_v17  ;;  %v1504_v44 = vmax.f32 %v1500_v4, 0.0  ;;  %v1773_v57 = vmul.f32 %v14623_v6, %v1751_v14  ;;  %v1623_v56 = vmul.f32 %v14617_v25, %v1605_v48  ;;  %v14632_v14 = vld [vmem:[#allocation148_spill] sm:$0xff]  ;;  %v14633_v48 = vld [vmem:[#allocation150_spill] sm:$0xff] }
 0x111   :  { %v1505_v23 = vmax.f32 %v1501_v10, 0.0  ;;  %v1774_v35 = vmul.f32 %v14624_v21, %v1753_v2  ;;  %v1624_v49 = vmul.f32 %v14618_v53, %v1607_v33  ;;  %9731 = vrcp.f32 %v14629_v19  ;;  %v14630_v53 = vld [vmem:[#allocation38_spill] sm:$0xff]  ;;  %v14631_v10 = vld [vmem:[#allocation151_spill] sm:$0xff]  ;;  %v2045_v2 = vpop.f32.mrb[24].mxu1  ;;  %v1899_v33 = vpop.f32.mrb[26].mxu0 }
 0x112   :  { %9296 = vmatmul.mubr.msk.f32.gmra.mrb[66].mxu1 %vm4622_vm4, %v12304_v36  ;;  %9429 = vmatprep.subr.bf16.mxu0 %v9428_v58  ;;  %v9438_v41 = vpack.c.bf16 %v1504_v44, %v1502_v26  ;;  %v1792_v51 = vadd.f32 %v14625_v43, %v1773_v57  ;;  %v1642_v32 = vadd.f32 %v14626_v24, %v1623_v56  ;;  %v1644_v8 = vmax.f32 %v1640_v40, 0.0  ;;  %v14634_v26 = vld [vmem:[#allocation109_spill] sm:$0xff]  ;;  %v14636_v57 = vld [vmem:[#allocation152_spill] sm:$0xff] }
 0x113   :  { %9433 = vmatprep.subr.bf16.mxu1 %v9428_v58  ;;  %9431 = vmatpush1.bf16.msra.mxu0 %v9430_v55  ;;  %v1793_v39 = vadd.f32 %v14627_v0, %v1774_v35  ;;  %v1643_v59 = vadd.f32 %v14628_v62, %v1624_v49  ;;  %v9436_v25 = vpack.c.bf16 %v1505_v23, %v1503_v16  ;;  %v1645_v4 = vmax.f32 %v1641_v13, 0.0  ;;  %v14635_v13 = vld [vmem:[#allocation149_spill] sm:$0xff]  ;;  %v14637_v49 = vld [vmem:[#allocation39_spill] sm:$0xff]  ;;  %v1901_v0 = vpop.f32.mrb[27].mxu0 }
 0x114   :  { %9435 = vmatpush1.bf16.msra.mxu1 %v9430_v55  ;;  %5282 = vmatprep.mubr.f32.mxu1 %v14601_v15  ;;  %v1646_v17 = vmax.f32 %v1642_v32, 0.0  ;;  %v1775_v52 = vmul.f32 %v14623_v6, %v1757_v5  ;;  %v1915_v42 = vmul.f32 %v14630_v53, %v1893_v7  ;;  %v1776_v50 = vmul.f32 %v14624_v21, %v1759_v45  ;;  %v2047_v32 = vpop.f32.mrb[25].mxu1  ;;  %v14638_v5 = vld [vmem:[#allocation154_spill] sm:$0xff] }
 0x115   :  { %v1647_v3 = vmax.f32 %v1643_v59, 0.0  ;;  %v1916_v55 = vmul.f32 %v14631_v10, %v1895_v54  ;;  %9437 = vmatprep.subr.bf16.mxu1 %v9436_v25  ;;  %v12387_v44 = vrot.slane %v14634_v26, %v11164_v20  ;;  %v12393_v23 = vrot.slane %v14634_v26, %v11167_v18  ;;  %v14641_v45 = vld [vmem:[#allocation22_spill] sm:$0xff]  ;;  %v2051_v54 = vpop.f32.mrb[26].mxu1 }
 0x116   :  { %9297 = vmatmul.mubr.msk.f32.vlgmr.msra.gmra.mrb[68].mxu0 %vm4622_vm4, %v12276_v37  ;;  %v9442_v63 = vpack.c.bf16 %v1646_v17, %v1644_v8  ;;  %v1794_v40 = vadd.f32 %v14632_v14, %v1775_v52  ;;  %v1934_v58 = vadd.f32 %v14633_v48, %v1915_v42  ;;  %v1795_v6 = vadd.f32 %v14635_v13, %v1776_v50  ;;  %v14639_v8 = vld [vmem:[#allocation21_spill] sm:$0xff]  ;;  %v14643_v50 = vld [vmem:[#allocation16_spill] sm:$0xff] }
 0x117   :  { %5143 = vmatprep.mubr.f32.mxu0 %v14601_v15  ;;  %v1935_v56 = vadd.f32 %v14636_v57, %v1916_v55  ;;  %v9440_v16 = vpack.c.bf16 %v1647_v3, %v1645_v4  ;;  %v1796_v21 = vmax.f32 %v1792_v51, 0.0  ;;  %v2067_v43 = vmul.f32 %v14637_v49, %v2045_v2  ;;  %v14640_v17 = vld [vmem:[#allocation153_spill] sm:$0xff]  ;;  %v2187_v4 = vpop.f32.mrb[28].mxu0  ;;  %v14644_v48 = vld [vmem:[#allocation40_spill] sm:$0xff] }
 0x118   :  { %9439 = vmatpush1.bf16.msra.mxu1 %v9438_v41  ;;  %v1798_v35 = vmax.f32 %v1794_v40, 0.0  ;;  %v1917_v24 = vmul.f32 %v14630_v53, %v1899_v33  ;;  %v1797_v62 = vmax.f32 %v1793_v39, 0.0  ;;  %v1799_v59 = vmax.f32 %v1795_v6, 0.0  ;;  %v14642_v39 = vld [vmem:[#allocation155_spill] sm:$0xff]  ;;  %v2053_v40 = vpop.f32.mrb[27].mxu1  ;;  %v2189_v13 = vpop.f32.mrb[29].mxu0 }
 0x119   :  { %v2068_v7 = vmul.f32 %v14638_v5, %v2047_v32  ;;  %v1918_v41 = vmul.f32 %v14631_v10, %v1901_v0  ;;  %9441 = vmatprep.subr.bf16.mxu1 %v9440_v16  ;;  %v2086_v51 = vadd.f32 %v14639_v8, %v2067_v43  ;;  %9445 = vmatprep.subr.bf16.mxu0 %v9440_v16  ;;  %9733 = vrcp.f32 %v14643_v50  ;;  %v14646_v43 = vld [vmem:[#allocation158_spill] sm:$0xff]  ;;  %v14648_v32 = vld [vmem:[#allocation157_spill] sm:$0xff]  ;;  %v14649_v0 = vld [vmem:[#allocation159_spill] sm:$0xff] }
 0x11a   :  { %9298 = vmatmul.mubr.msk.f32.gmra.mrb[70].mxu0 %vm4622_vm4, %v12304_v36  ;;  %v9450_v25 = vpack.c.bf16 %v1798_v35, %v1796_v21  ;;  %v1936_v52 = vadd.f32 %v14640_v17, %v1917_v24  ;;  %v9448_v3 = vpack.c.bf16 %v1799_v59, %v1797_v62  ;;  %v1938_v10 = vmax.f32 %v1934_v58, 0.0  ;;  %v14645_v21 = vld [vmem:[#allocation156_spill] sm:$0xff]  ;;  %v2339_v59 = vpop.f32.mrb[28].mxu1  ;;  %v14665_v50 = vld [vmem:[#allocation49_spill] sm:$0xff] }
 0x11b   :  { %5427 = vmatprep.mubr.f32.mxu0 %v14601_v15  ;;  %v2087_v53 = vadd.f32 %v14641_v45, %v2068_v7  ;;  %v1937_v42 = vadd.f32 %v14642_v39, %v1918_v41  ;;  %9447 = vmatpush1.bf16.msra.mxu0 %v9442_v63  ;;  %v2069_v14 = vmul.f32 %v14637_v49, %v2051_v54  ;;  %v9732_v6 = vpop.eup %9731  ;;  %v1939_v57 = vmax.f32 %v1935_v56, 0.0  ;;  %v14647_v49 = vld [vmem:[#allocation116_spill] sm:$0xff]  ;;  %v14650_v41 = vld [vmem:[#allocation17_spill] sm:$0xff]  ;;  %v2341_v39 = vpop.f32.mrb[29].mxu1 }
 0x11c   :  { %9443 = vmatpush1.bf16.msra.mxu1 %v9442_v63  ;;  %v1940_v55 = vmax.f32 %v1936_v52, 0.0  ;;  %v2209_v26 = vmul.f32 %v14644_v48, %v2187_v4  ;;  %v2070_v33 = vmul.f32 %v14638_v5, %v2053_v40  ;;  %v2210_v16 = vmul.f32 %v12173_v22, %v2189_v13  ;;  %9449 = vmatprep.subr.bf16.mxu0 %v9448_v3  ;;  %v2193_v5 = vpop.f32.mrb[30].mxu0  ;;  %v14652_v40 = vld [vmem:[#allocation23_spill] sm:$0xff]  ;;  %v14654_v13 = vld [vmem:[#allocation160_spill] sm:$0xff] }
 0x11d   :  { %v1941_v2 = vmax.f32 %v1937_v42, 0.0  ;;  %v2088_v35 = vadd.f32 %v14645_v21, %v2069_v14  ;;  %v12417_v24 = vrot.slane %v14647_v49, %v11164_v20  ;;  %9735 = vrcp.f32 %v14650_v41  ;;  %v2195_v42 = vpop.f32.mrb[31].mxu0  ;;  %v14674_v41 = vld [vmem:[#allocation57_spill] sm:$0xff] }
 0x11e   :  { %v9454_v63 = vpack.c.bf16 %v1940_v55, %v1938_v10  ;;  %v2228_v58 = vadd.f32 %v14646_v43, %v2209_v26  ;;  %v2089_v56 = vadd.f32 %v14648_v32, %v2070_v33  ;;  %v2229_v62 = vadd.f32 %v14649_v0, %v2210_v16  ;;  %v14651_v55 = vld [vmem:[#allocation41_spill] sm:$0xff] }
 0x11f   :  { %9299 = vmatmul.mubr.msk.f32.vlgmr.msra.gmra.mrb[68].mxu1 %vm4622_vm4, %v12276_v37  ;;  %9451 = vmatpush1.bf16.msra.mxu0 %v9450_v25  ;;  %v9452_v7 = vpack.c.bf16 %v1941_v2, %v1939_v57  ;;  %v2090_v8 = vmax.f32 %v2086_v51, 0.0  ;;  %v2092_v17 = vmax.f32 %v2088_v35, 0.0  ;;  %v2361_v52 = vmul.f32 %v12204_v29, %v2339_v59  ;;  %v2345_v2 = vpop.f32.mrb[30].mxu1 }
 0x120   :  { %5288 = vmatprep.mubr.f32.mxu1 %v14601_v15  ;;  %v2211_v45 = vmul.f32 %v14644_v48, %v2193_v5  ;;  %v2091_v54 = vmax.f32 %v2087_v53, 0.0  ;;  %v2093_v4 = vmax.f32 %v2089_v56, 0.0  ;;  %v2362_v3 = vmul.f32 %v12207_v34, %v2341_v39  ;;  %v14653_v53 = vld [vmem:[#allocation42_spill] sm:$0xff]  ;;  %v2347_v32 = vpop.f32.mrb[31].mxu1  ;;  %v14656_v56 = vld [vmem:[#allocation37_spill] sm:$0xff] }
 0x121   :  { %v2212_v25 = vmul.f32 %v12173_v22, %v2195_v42  ;;  %9453 = vmatprep.subr.bf16.mxu0 %v9452_v7  ;;  %9457 = vmatprep.subr.bf16.mxu1 %v9452_v7  ;;  %v9462_v10 = vpack.c.bf16 %v2092_v17, %v2090_v8  ;;  %v2380_v14 = vadd.f32 %v14651_v55, %v2361_v52  ;;  %v2481_v22 = vpop.f32.mrb[32].mxu0  ;;  %vm14655_vm2 = vcmp.eq.f32.partialorder %v14629_v19, 0.0  ;;  %v14658_v17 = vld [vmem:[#allocation43_spill] sm:$0xff] }
 0x122   :  { %v2230_v51 = vadd.f32 %v14652_v40, %v2211_v45  ;;  %v12433_v48 = vrot.slane %v14647_v49, %v11167_v18  ;;  %v2381_v26 = vadd.f32 %v14653_v53, %v2362_v3  ;;  %9459 = vmatpush1.bf16.msra.mxu1 %v9454_v63  ;;  %v9460_v33 = vpack.c.bf16 %v2093_v4, %v2091_v54  ;;  %v2483_v0 = vpop.f32.mrb[33].mxu0  ;;  %v14659_v45 = vld [vmem:[#allocation36_spill] sm:$0xff]  ;;  %v2633_v54 = vpop.f32.mrb[32].mxu1 }
 0x123   :  { %9300 = vmatmul.mubr.msk.f32.gmra.mrb[70].mxu1 %vm4622_vm4, %v12304_v36  ;;  %v2231_v57 = vadd.f32 %v14654_v13, %v2212_v25  ;;  %9455 = vmatpush1.bf16.msra.mxu0 %v9454_v63  ;;  %v3724_v16 = vsel %vm14655_vm2, 0.0, %v9732_v6  ;;  %v2232_v21 = vmax.f32 %v2228_v58, 0.0  ;;  %v2363_v43 = vmul.f32 %v12204_v29, %v2345_v2  ;;  %v9734_v59 = vpop.eup %9733  ;;  %v14657_v6 = vld [vmem:[#allocation24_spill] sm:$0xff] }
 0x124   :  { %v2234_v35 = vmax.f32 %v2230_v51, 0.0  ;;  %v2503_v49 = vmul.f32 %v14656_v56, %v2481_v22  ;;  %5572 = vmatprep.mubr.f32.mxu1 %v14601_v15  ;;  %v2233_v5 = vmax.f32 %v2229_v62, 0.0  ;;  %v2364_v63 = vmul.f32 %v12207_v34, %v2347_v32  ;;  %9461 = vmatprep.subr.bf16.mxu1 %v9460_v33  ;;  %v14660_v62 = vld [vmem:[#allocation44_spill] sm:$0xff]  ;;  %v2487_v34 = vpop.f32.mrb[34].mxu0  ;;  %v2635_v51 = vpop.f32.mrb[33].mxu1 }
 0x125   :  { %v2235_v7 = vmax.f32 %v2231_v57, 0.0  ;;  %v2504_v8 = vmul.f32 %v12217_v31, %v2483_v0  ;;  %v2382_v58 = vadd.f32 %v14657_v6, %v2363_v43  ;;  %v12449_v29 = vrot.slane %v3724_v16, %v11164_v20  ;;  %v2489_v53 = vpop.f32.mrb[35].mxu0 }
 0x126   :  { %v9466_v19 = vpack.c.bf16 %v2234_v35, %v2232_v21  ;;  %v2522_v52 = vadd.f32 %v14658_v17, %v2503_v49  ;;  %9301 = vmatmul.mubr.msk.f32.vlgmr.msra.gmra.mrb[72].mxu0 %vm4622_vm4, %v12276_v37  ;;  %v2383_v39 = vadd.f32 %v14659_v45, %v2364_v63  ;;  %9463 = vmatpush1.bf16.msra.mxu1 %v9462_v10  ;;  %v2384_v3 = vmax.f32 %v2380_v14, 0.0  ;;  %v14661_v21 = vld [vmem:[#allocation45_spill] sm:$0xff]  ;;  %v14662_v35 = vld [vmem:[#allocation46_spill] sm:$0xff]  ;;  %v14664_v49 = vld [vmem:[#allocation48_spill] sm:$0xff] }
 0x127   :  { %v2523_v42 = vadd.f32 %v14660_v62, %v2504_v8  ;;  %5433 = vmatprep.mubr.f32.mxu0 %v14601_v15  ;;  %v9464_v4 = vpack.c.bf16 %v2235_v7, %v2233_v5  ;;  %v2386_v25 = vmax.f32 %v2382_v58, 0.0  ;;  %v2655_v55 = vmul.f32 %v12227_v28, %v2633_v54  ;;  %v12456_v13 = vpop.eup %9735  ;;  %v2639_v5 = vpop.f32.mrb[34].mxu1 }
 0x128   :  { %v2505_v40 = vmul.f32 %v14656_v56, %v2487_v34  ;;  %v2385_v57 = vmax.f32 %v2381_v26, 0.0  ;;  %v2387_v2 = vmax.f32 %v2383_v39, 0.0  ;;  %v2656_v22 = vmul.f32 %v12233_v47, %v2635_v51  ;;  %v14663_v56 = vld [vmem:[#allocation47_spill] sm:$0xff]  ;;  %v2641_v17 = vpop.f32.mrb[35].mxu1 }
 0x129   :  { %v2506_v10 = vmul.f32 %v12217_v31, %v2489_v53  ;;  %9465 = vmatprep.subr.bf16.mxu1 %v9464_v4  ;;  %9469 = vmatprep.subr.bf16.mxu0 %v9464_v4  ;;  %v9474_v33 = vpack.c.bf16 %v2386_v25, %v2384_v3  ;;  %v2674_v14 = vadd.f32 %v14661_v21, %v2655_v55  ;;  %v2775_v31 = vpop.f32.mrb[36].mxu0  ;;  %v3876_v63 = vsel %vm3872_vm13, 0.0, %v9734_v59  ;;  %v14667_v3 = vld [vmem:[#allocation50_spill] sm:$0xff] }
 0x12a   :  { %v2524_v43 = vadd.f32 %v14662_v35, %v2505_v40  ;;  %9302 = vmatmul.mubr.msk.f32.gmra.mrb[74].mxu0 %vm4622_vm4, %v12304_v36  ;;  %v12465_v32 = vrot.slane %v3724_v16, %v11167_v18  ;;  %v2675_v26 = vadd.f32 %v14663_v56, %v2656_v22  ;;  %9467 = vmatpush1.bf16.msra.mxu1 %v9466_v19  ;;  %v2526_v8 = vmax.f32 %v2522_v52, 0.0  ;;  %v2777_v45 = vpop.f32.mrb[37].mxu0  ;;  %v14666_v52 = vld [vmem:[#allocation51_spill] sm:$0xff]  ;;  %v2927_v40 = vpop.f32.mrb[36].mxu1  ;;  %v14669_v53 = vld [vmem:[#allocation18_spill] sm:$0xff] }
 0x12b   :  { %v2525_v0 = vadd.f32 %v14664_v49, %v2506_v10  ;;  %9471 = vmatpush1.bf16.msra.mxu0 %v9466_v19  ;;  %v9472_v7 = vpack.c.bf16 %v2387_v2, %v2385_v57  ;;  %v2657_v58 = vmul.f32 %v12227_v28, %v2639_v5  ;;  %v2797_v16 = vmul.f32 %v12243_v60, %v2775_v31  ;;  %v2929_v21 = vpop.f32.mrb[37].mxu1  ;;  %v14670_v5 = vld [vmem:[#allocation53_spill] sm:$0xff] }
 0x12c   :  { %v2528_v6 = vmax.f32 %v2524_v43, 0.0  ;;  %5717 = vmatprep.mubr.f32.mxu0 %v14601_v15  ;;  %v2527_v39 = vmax.f32 %v2523_v42, 0.0  ;;  %v2658_v54 = vmul.f32 %v12233_v47, %v2641_v17  ;;  %v2798_v19 = vmul.f32 %v12249_v38, %v2777_v45  ;;  %v14668_v42 = vld [vmem:[#allocation52_spill] sm:$0xff]  ;;  %v2781_v47 = vpop.f32.mrb[38].mxu0  ;;  %v2933_v17 = vpop.f32.mrb[38].mxu1 }
 0x12d   :  { %v2529_v62 = vmax.f32 %v2525_v0, 0.0  ;;  %9473 = vmatprep.subr.bf16.mxu0 %v9472_v7  ;;  %v2676_v59 = vadd.f32 %v14665_v50, %v2657_v58  ;;  %v2816_v4 = vadd.f32 %v14666_v52, %v2797_v16  ;;  %9303 = vmatmul.mubr.msk.f32.vlgmr.msra.gmra.mrb[72].mxu1 %vm4622_vm4, %v12276_v37  ;;  %v12481_v28 = vrot.slane %v3876_v63, %v11164_v20  ;;  %v2783_v35 = vpop.f32.mrb[39].mxu0  ;;  %v14671_v7 = vld [vmem:[#allocation54_spill] sm:$0xff] }
 0x12e   :  { %v9478_v34 = vpack.c.bf16 %v2528_v6, %v2526_v8  ;;  %v2677_v25 = vadd.f32 %v14667_v3, %v2658_v54  ;;  %v2817_v55 = vadd.f32 %v14668_v42, %v2798_v19  ;;  %5578 = vmatprep.mubr.f32.mxu1 %v14601_v15  ;;  %9737 = vrcp.f32 %v14669_v53  ;;  %v14672_v8 = vld [vmem:[#allocation55_spill] sm:$0xff]  ;;  %v14673_v6 = vld [vmem:[#allocation56_spill] sm:$0xff]  ;;  %v2935_v19 = vpop.f32.mrb[39].mxu1  ;;  %v14688_v53 = vld [vmem:[#allocation69_spill] sm:$0xff] }
 0x12f   :  { %9475 = vmatpush1.bf16.msra.mxu0 %v9474_v33  ;;  %v9476_v51 = vpack.c.bf16 %v2529_v62, %v2527_v39  ;;  %v2678_v57 = vmax.f32 %v2674_v14, 0.0  ;;  %v2680_v2 = vmax.f32 %v2676_v59, 0.0  ;;  %v2949_v22 = vmul.f32 %v12259_v9, %v2927_v40  ;;  %v14676_v40 = vld [vmem:[#allocation58_spill] sm:$0xff] }
 0x130   :  { %v2799_v10 = vmul.f32 %v12243_v60, %v2781_v47  ;;  %v2679_v43 = vmax.f32 %v2675_v26, 0.0  ;;  %v2681_v56 = vmax.f32 %v2677_v25, 0.0  ;;  %v2950_v49 = vmul.f32 %v12265_v11, %v2929_v21 }
 0x131   :  { %v2800_v33 = vmul.f32 %v12249_v38, %v2783_v35  ;;  %9477 = vmatprep.subr.bf16.mxu0 %v9476_v51  ;;  %9481 = vmatprep.subr.bf16.mxu1 %v9476_v51  ;;  %v9486_v0 = vpack.c.bf16 %v2680_v2, %v2678_v57  ;;  %v2968_v31 = vadd.f32 %v14670_v5, %v2949_v22  ;;  %v3069_v38 = vpop.f32.mrb[40].mxu0  ;;  %v4018_v45 = vsel %vm4014_vm12, 0.0, %v12456_v13  ;;  %v3221_v57 = vpop.f32.mrb[40].mxu1  ;;  %v14678_v22 = vld [vmem:[#allocation19_spill] sm:$0xff] }
 0x132   :  { %v2818_v14 = vadd.f32 %v14671_v7, %v2799_v10  ;;  %9304 = vmatmul.mubr.msk.f32.gmra.mrb[74].mxu1 %vm4622_vm4, %v12304_v36  ;;  %v12496_v60 = vrot.slane %v3876_v63, %v11167_v18  ;;  %v2969_v26 = vadd.f32 %v14672_v8, %v2950_v49  ;;  %v9484_v16 = vpack.c.bf16 %v2681_v56, %v2679_v43  ;;  %v3071_v50 = vpop.f32.mrb[41].mxu0  ;;  %v3223_v56 = vpop.f32.mrb[41].mxu1 }
 0x133   :  { %v2819_v58 = vadd.f32 %v14673_v6, %v2800_v33  ;;  %9479 = vmatpush1.bf16.msra.mxu0 %v9478_v34  ;;  %9483 = vmatpush1.bf16.msra.mxu1 %v9478_v34  ;;  %v2820_v39 = vmax.f32 %v2816_v4, 0.0  ;;  %v2951_v54 = vmul.f32 %v12259_v9, %v2933_v17  ;;  %v3091_v63 = vmul.f32 %v12282_v1, %v3069_v38  ;;  %v14675_v4 = vld [vmem:[#allocation59_spill] sm:$0xff]  ;;  %v14679_v6 = vld [vmem:[#allocation61_spill] sm:$0xff] }
 0x134   :  { %v2822_v62 = vmax.f32 %v2818_v14, 0.0  ;;  %5862 = vmatprep.mubr.f32.mxu1 %v14601_v15  ;;  %v2821_v59 = vmax.f32 %v2817_v55, 0.0  ;;  %v2952_v34 = vmul.f32 %v12265_v11, %v2935_v19  ;;  %v3092_v3 = vmul.f32 %v12297_v46, %v3071_v50  ;;  %9485 = vmatprep.subr.bf16.mxu1 %v9484_v16  ;;  %v14677_v55 = vld [vmem:[#allocation60_spill] sm:$0xff]  ;;  %v3075_v11 = vpop.f32.mrb[42].mxu0  ;;  %v14681_v38 = vld [vmem:[#allocation63_spill] sm:$0xff] }
 0x135   :  { %v2823_v52 = vmax.f32 %v2819_v58, 0.0  ;;  %v2970_v13 = vadd.f32 %v14674_v41, %v2951_v54  ;;  %v3110_v42 = vadd.f32 %v14675_v4, %v3091_v63  ;;  %v12513_v9 = vrot.slane %v4018_v45, %v11164_v20  ;;  %v3077_v49 = vpop.f32.mrb[43].mxu0  ;;  %v14682_v16 = vld [vmem:[#allocation64_spill] sm:$0xff]  ;;  %v14683_v4 = vld [vmem:[#allocation65_spill] sm:$0xff] }
 0x136   :  { %v9490_v25 = vpack.c.bf16 %v2822_v62, %v2820_v39  ;;  %9305 = vmatmul.mubr.msk.f32.vlgmr.msra.gmra.mrb[76].mxu0 %vm4622_vm4, %v12276_v37  ;;  %v2971_v47 = vadd.f32 %v14676_v40, %v2952_v34  ;;  %v3111_v51 = vadd.f32 %v14677_v55, %v3092_v3  ;;  %9739 = vrcp.f32 %v14678_v22  ;;  %v3227_v62 = vpop.f32.mrb[42].mxu1  ;;  %v14686_v55 = vld [vmem:[#allocation66_spill] sm:$0xff]  ;;  %v14696_v22 = vld [vmem:[#allocation77_spill] sm:$0xff] }
 0x137   :  { %9487 = vmatpush1.bf16.msra.mxu1 %v9486_v0  ;;  %5723 = vmatprep.mubr.f32.mxu0 %v14601_v15  ;;  %v9488_v2 = vpack.c.bf16 %v2823_v52, %v2821_v59  ;;  %v2972_v10 = vmax.f32 %v2968_v31, 0.0  ;;  %v2974_v21 = vmax.f32 %v2970_v13, 0.0  ;;  %v3243_v35 = vmul.f32 %v12316_v12, %v3221_v57  ;;  %v14680_v31 = vld [vmem:[#allocation62_spill] sm:$0xff]  ;;  %v3229_v59 = vpop.f32.mrb[43].mxu1 }
 0x138   :  { %v3093_v43 = vmul.f32 %v12282_v1, %v3075_v11  ;;  %v9738_v33 = vpop.eup %9737  ;;  %v2973_v5 = vmax.f32 %v2969_v26, 0.0  ;;  %v2975_v7 = vmax.f32 %v2971_v47, 0.0  ;;  %v3244_v14 = vmul.f32 %v12332_v27, %v3223_v56  ;;  %v14687_v11 = vld [vmem:[#allocation68_spill] sm:$0xff] }
 0x139   :  { %v3094_v0 = vmul.f32 %v12297_v46, %v3077_v49  ;;  %9489 = vmatprep.subr.bf16.mxu1 %v9488_v2  ;;  %9493 = vmatprep.subr.bf16.mxu0 %v9488_v2  ;;  %v9498_v8 = vpack.c.bf16 %v2974_v21, %v2972_v10  ;;  %v3262_v58 = vadd.f32 %v14679_v6, %v3243_v35  ;;  %v3363_v46 = vpop.f32.mrb[44].mxu0  ;;  %v3114_v19 = vmax.f32 %v3110_v42, 0.0  ;;  %v14684_v42 = vld [vmem:[#allocation67_spill] sm:$0xff]  ;;  %v3515_v2 = vpop.f32.mrb[44].mxu1 }
 0x13a   :  { %v3112_v17 = vadd.f32 %v14680_v31, %v3093_v43  ;;  %9306 = vmatmul.mubr.msk.f32.gmra.mrb[78].mxu0 %vm4622_vm4, %v12304_v36  ;;  %v12528_v1 = vrot.slane %v4018_v45, %v11167_v18  ;;  %v3263_v26 = vadd.f32 %v14681_v38, %v3244_v14  ;;  %v9496_v54 = vpack.c.bf16 %v2975_v7, %v2973_v5  ;;  %v3365_v34 = vpop.f32.mrb[45].mxu0  ;;  %v3517_v5 = vpop.f32.mrb[45].mxu1 }
 0x13b   :  { %v3113_v39 = vadd.f32 %v14682_v16, %v3094_v0  ;;  %9491 = vmatpush1.bf16.msra.mxu1 %v9490_v25  ;;  %9495 = vmatpush1.bf16.msra.mxu0 %v9490_v25  ;;  %v3245_v50 = vmul.f32 %v12316_v12, %v3227_v62  ;;  %v3385_v52 = vmul.f32 %v12346_v30, %v3363_v46  ;;  %v3115_v45 = vmax.f32 %v3111_v51, 0.0  ;;  %v14685_v12 = vld [vmem:[#allocation20_spill] sm:$0xff]  ;;  %v14690_v16 = vld [vmem:[#allocation71_spill] sm:$0xff]  ;;  %v3521_v46 = vpop.f32.mrb[46].mxu1 }
 0x13c   :  { %v3116_v63 = vmax.f32 %v3112_v17, 0.0  ;;  %6007 = vmatprep.mubr.f32.mxu0 %v14601_v15  ;;  %v3246_v41 = vmul.f32 %v12332_v27, %v3229_v59  ;;  %v3386_v13 = vmul.f32 %v12362_v61, %v3365_v34  ;;  %9497 = vmatprep.subr.bf16.mxu0 %v9496_v54  ;;  %9741 = vrcp.f32 %v14685_v12  ;;  %v3369_v27 = vpop.f32.mrb[46].mxu0  ;;  %v3523_v59 = vpop.f32.mrb[47].mxu1 }
 0x13d   :  { %v3117_v3 = vmax.f32 %v3113_v39, 0.0  ;;  %v3264_v40 = vadd.f32 %v14683_v4, %v3245_v50  ;;  %v3404_v47 = vadd.f32 %v14684_v42, %v3385_v52  ;;  %v4170_v21 = vsel %vm4166_vm0, 0.0, %v9738_v33  ;;  %v3371_v7 = vpop.f32.mrb[47].mxu0  ;;  %v14691_v39 = vld [vmem:[#allocation72_spill] sm:$0xff]  ;;  %v14692_v4 = vld [vmem:[#allocation73_spill] sm:$0xff]  ;;  %v14693_v42 = vld [vmem:[#allocation75_spill] sm:$0xff] }
 0x13e   :  { %v9502_v25 = vpack.c.bf16 %v3116_v63, %v3114_v19  ;;  %9307 = vmatmul.mubr.msk.f32.vlgmr.msra.gmra.mrb[76].mxu1 %vm4622_vm4, %v12276_v37  ;;  %v3265_v57 = vadd.f32 %v14686_v55, %v3246_v41  ;;  %v3405_v51 = vadd.f32 %v14687_v11, %v3386_v13  ;;  %v3266_v35 = vmax.f32 %v3262_v58, 0.0  ;;  %v14689_v58 = vld [vmem:[#allocation70_spill] sm:$0xff]  ;;  %v14695_v11 = vld [vmem:[#allocation76_spill] sm:$0xff] }
 0x13f   :  { %9499 = vmatpush1.bf16.msra.mxu0 %v9498_v8  ;;  %5868 = vmatprep.mubr.f32.mxu1 %v14601_v15  ;;  %v9500_v10 = vpack.c.bf16 %v3117_v3, %v3115_v45  ;;  %v3268_v43 = vmax.f32 %v3264_v40, 0.0  ;;  %v3537_v56 = vmul.f32 %v12387_v44, %v3515_v2  ;;  %v3387_v49 = vmul.f32 %v12346_v30, %v3369_v27  ;;  %v14694_v55 = vld [vmem:[#allocation74_spill] sm:$0xff]  ;;  %v3809_v2 = vpop.f32.mrb[48].mxu1 }
 0x140   :  { %v9740_v14 = vpop.eup %9739  ;;  %v3267_v0 = vmax.f32 %v3263_v26, 0.0  ;;  %v3269_v6 = vmax.f32 %v3265_v57, 0.0  ;;  %v3538_v8 = vmul.f32 %v12393_v23, %v3517_v5  ;;  %v3388_v31 = vmul.f32 %v12362_v61, %v3371_v7  ;;  %v3657_v61 = vpop.f32.mrb[48].mxu0 }
 0x141   :  { %9501 = vmatprep.subr.bf16.mxu0 %v9500_v10  ;;  %9505 = vmatprep.subr.bf16.mxu1 %v9500_v10  ;;  %v9510_v17 = vpack.c.bf16 %v3268_v43, %v3266_v35  ;;  %v3556_v33 = vadd.f32 %v14688_v53, %v3537_v56  ;;  %v3406_v38 = vadd.f32 %v14689_v58, %v3387_v49  ;;  %v3408_v19 = vmax.f32 %v3404_v47, 0.0  ;;  %v3659_v34 = vpop.f32.mrb[49].mxu0  ;;  %v3811_v49 = vpop.f32.mrb[49].mxu1 }
 0x142   :  { %9308 = vmatmul.mubr.msk.f32.gmra.mrb[78].mxu1 %vm4622_vm4, %v12304_v36  ;;  %v12556_v30 = vrot.slane %v4170_v21, %v11164_v20  ;;  %v3557_v26 = vadd.f32 %v14690_v16, %v3538_v8  ;;  %v3407_v62 = vadd.f32 %v14691_v39, %v3388_v31  ;;  %v9508_v54 = vpack.c.bf16 %v3269_v6, %v3267_v0 }
 0x143   :  { %9503 = vmatpush1.bf16.msra.mxu0 %v9502_v25  ;;  %9507 = vmatpush1.bf16.msra.mxu1 %v9502_v25  ;;  %v3410_v63 = vmax.f32 %v3406_v38, 0.0  ;;  %v3539_v50 = vmul.f32 %v12387_v44, %v3521_v46  ;;  %v3679_v52 = vmul.f32 %v12417_v24, %v3657_v61  ;;  %v3409_v45 = vmax.f32 %v3405_v51, 0.0  ;;  %v14699_v38 = vld [vmem:[#allocation80_spill] sm:$0xff] }
 0x144   :  { %6152 = vmatprep.mubr.f32.mxu1 %v14601_v15  ;;  %v3411_v3 = vmax.f32 %v3407_v62, 0.0  ;;  %v3540_v41 = vmul.f32 %v12393_v23, %v3523_v59  ;;  %v3680_v13 = vmul.f32 %v12433_v48, %v3659_v34  ;;  %9509 = vmatprep.subr.bf16.mxu1 %v9508_v54  ;;  %v12570_v44 = vrot.slane %v4170_v21, %v11167_v18  ;;  %v3663_v23 = vpop.f32.mrb[50].mxu0 }
 0x145   :  { %v9514_v25 = vpack.c.bf16 %v3410_v63, %v3408_v19  ;;  %v3558_v40 = vadd.f32 %v14692_v4, %v3539_v50  ;;  %v3698_v47 = vadd.f32 %v14693_v42, %v3679_v52  ;;  %v4312_v10 = vsel %vm4308_vm14, 0.0, %v9740_v14  ;;  %v3665_v5 = vpop.f32.mrb[51].mxu0  ;;  %v14703_v42 = vld [vmem:[#allocation86_spill] sm:$0xff] }
 0x146   :  { %9309 = vmatmul.mubr.msk.f32.vlgmr.msra.gmra.mrb[80].mxu0 %vm4622_vm4, %v12276_v37  ;;  %v3559_v57 = vadd.f32 %v14694_v55, %v3540_v41  ;;  %v3699_v51 = vadd.f32 %v14695_v11, %v3680_v13  ;;  %v9512_v27 = vpack.c.bf16 %v3411_v3, %v3409_v45  ;;  %v9742_v35 = vpop.eup %9741  ;;  %v3560_v43 = vmax.f32 %v3556_v33, 0.0  ;;  %v14698_v33 = vld [vmem:[#allocation79_spill] sm:$0xff]  ;;  %v14700_v3 = vld [vmem:[#allocation81_spill] sm:$0xff] }
 0x147   :  { %9511 = vmatpush1.bf16.msra.mxu1 %v9510_v17  ;;  %6013 = vmatprep.mubr.f32.mxu0 %v14601_v15  ;;  %v3562_v56 = vmax.f32 %v3558_v40, 0.0  ;;  %v3831_v37 = vmul.f32 %v12449_v29, %v3809_v2  ;;  %v3681_v21 = vmul.f32 %v12417_v24, %v3663_v23  ;;  %v3561_v7 = vmax.f32 %v3557_v26, 0.0  ;;  %v14697_v17 = vld [vmem:[#allocation78_spill] sm:$0xff]  ;;  %v3815_v26 = vpop.f32.mrb[50].mxu1  ;;  %v14701_v13 = vld [vmem:[#allocation83_spill] sm:$0xff] }
 0x148   :  { %v3563_v0 = vmax.f32 %v3559_v57, 0.0  ;;  %v3832_v6 = vmul.f32 %v12465_v32, %v3811_v49  ;;  %v3682_v8 = vmul.f32 %v12433_v48, %v3665_v5  ;;  %9513 = vmatprep.subr.bf16.mxu1 %v9512_v27  ;;  %9517 = vmatprep.subr.bf16.mxu0 %v9512_v27  ;;  %v12586_v24 = vrot.slane %v4312_v10, %v11164_v20  ;;  %v3951_v48 = vpop.f32.mrb[52].mxu0  ;;  %v3817_v54 = vpop.f32.mrb[51].mxu1 }
 0x149   :  { %v9522_v31 = vpack.c.bf16 %v3562_v56, %v3560_v43  ;;  %v3850_v14 = vadd.f32 %v14696_v22, %v3831_v37  ;;  %v3700_v53 = vadd.f32 %v14697_v17, %v3681_v21  ;;  %9519 = vmatpush1.bf16.msra.mxu0 %v9514_v25  ;;  %v3702_v62 = vmax.f32 %v3698_v47, 0.0  ;;  %v3953_v63 = vpop.f32.mrb[53].mxu0  ;;  %v4103_v55 = vpop.f32.mrb[52].mxu1  ;;  %v14707_v22 = vld [vmem:[#allocation91_spill] sm:$0xff] }
 0x14a   :  { %9310 = vmatmul.mubr.msk.f32.gmra.mrb[82].mxu0 %vm4622_vm4, %v12304_v36  ;;  %v3851_v58 = vadd.f32 %v14698_v33, %v3832_v6  ;;  %v3701_v16 = vadd.f32 %v14699_v38, %v3682_v8  ;;  %v9520_v39 = vpack.c.bf16 %v3563_v0, %v3561_v7  ;;  %v3833_v61 = vmul.f32 %v12449_v29, %v3815_v26  ;;  %v12600_v29 = vld [vmem:[%s14219_s2 + $0x10] sm:$0xff]  ;;  %v3957_v57 = vpop.f32.mrb[54].mxu0  ;;  %v4105_v43 = vpop.f32.mrb[53].mxu1  ;;  %v14704_v0 = vld [vmem:[#allocation88_spill] sm:$0xff]  ;;  %v14706_v8 = vld [vmem:[#allocation90_spill] sm:$0xff] }
 0x14b   :  { %9515 = vmatpush1.bf16.msra.mxu1 %v9514_v25  ;;  %v3704_v46 = vmax.f32 %v3700_v53, 0.0  ;;  %v3973_v19 = vmul.f32 %v12481_v28, %v3951_v48  ;;  %6297 = vmatprep.mubr.f32.mxu0 %v14601_v15  ;;  %v3703_v50 = vmax.f32 %v3699_v51, 0.0  ;;  %v3834_v52 = vmul.f32 %v12465_v32, %v3817_v54  ;;  %v14702_v32 = vld [vmem:[#allocation82_spill] sm:$0xff]  ;;  %v3959_v56 = vpop.f32.mrb[55].mxu0  ;;  %v4109_v17 = vpop.f32.mrb[54].mxu1  ;;  %v14708_v54 = vld [vmem:[#allocation92_spill] sm:$0xff] }
 0x14c   :  { %v3705_v59 = vmax.f32 %v3701_v16, 0.0  ;;  %v3974_v34 = vmul.f32 %v12496_v60, %v3953_v63  ;;  %9521 = vmatprep.subr.bf16.mxu0 %v9520_v39  ;;  %v3852_v41 = vadd.f32 %v14700_v3, %v3833_v61  ;;  %v12605_v4 = vrot.slane %v4312_v10, %v11167_v18  ;;  %v4111_v16 = vpop.f32.mrb[55].mxu1  ;;  %v14709_v63 = vld [vmem:[#allocation94_spill] sm:$0xff] }
 0x14d   :  { %v9526_v45 = vpack.c.bf16 %v3704_v46, %v3702_v62  ;;  %v3992_v25 = vadd.f32 %v14701_v13, %v3973_v19  ;;  %v3853_v40 = vadd.f32 %v14702_v32, %v3834_v52  ;;  %9523 = vmatpush1.bf16.msra.mxu0 %v9522_v31  ;;  %v4464_v51 = vsel %vm4460_vm1, 0.0, %v9742_v35  ;;  %v14705_v35 = vld [vmem:[#allocation89_spill] sm:$0xff]  ;;  %v4397_v3 = vpop.f32.mrb[56].mxu1 }
 0x14e   :  { %9311 = vmatmul.mubr.msk.f32.vlgmr.msra.gmra.mrb[80].mxu1 %vm4622_vm4, %v12600_v29  ;;  %v3993_v47 = vadd.f32 %v14703_v42, %v3974_v34  ;;  %v9524_v11 = vpack.c.bf16 %v3705_v59, %v3703_v50  ;;  %v3854_v2 = vmax.f32 %v3850_v14, 0.0  ;;  %v3856_v23 = vmax.f32 %v3852_v41, 0.0  ;;  %v14710_v59 = vld [vmem:[#allocation93_spill] sm:$0xff]  ;;  %v14711_v34 = vld [vmem:[#allocation95_spill] sm:$0xff]  ;;  %v4399_v42 = vpop.f32.mrb[57].mxu1 }
 0x14f   :  { %6158 = vmatprep.mubr.f32.mxu1 %v14601_v15  ;;  %v4125_v27 = vmul.f32 %v12513_v9, %v4103_v55  ;;  %v3975_v10 = vmul.f32 %v12481_v28, %v3957_v57  ;;  %v3855_v37 = vmax.f32 %v3851_v58, 0.0  ;;  %v3857_v21 = vmax.f32 %v3853_v40, 0.0 }
 0x150   :  { %v4126_v49 = vmul.f32 %v12528_v1, %v4105_v43  ;;  %v3976_v5 = vmul.f32 %v12496_v60, %v3959_v56  ;;  %9525 = vmatprep.subr.bf16.mxu0 %v9524_v11  ;;  %9529 = vmatprep.subr.bf16.mxu1 %v9524_v11  ;;  %v9534_v7 = vpack.c.bf16 %v3856_v23, %v3854_v2  ;;  %v4245_v60 = vpop.f32.mrb[56].mxu0  ;;  %v3996_v33 = vmax.f32 %v3992_v25, 0.0  ;;  %v14712_v23 = vld [vmem:[#allocation96_spill] sm:$0xff]  ;;  %v12647_v56 = vld [vmem:[%s14219_s2 + $0x18] sm:$0xff] }
 0x151   :  { %v4144_v12 = vadd.f32 %v14704_v0, %v4125_v27  ;;  %v3994_v6 = vadd.f32 %v14705_v35, %v3975_v10  ;;  %v12621_v28 = vrot.slane %v4464_v51, %v11164_v20  ;;  %9527 = vmatpush1.bf16.msra.mxu0 %v9526_v45  ;;  %9531 = vmatpush1.bf16.msra.mxu1 %v9526_v45  ;;  %v3997_v48 = vmax.f32 %v3993_v47, 0.0  ;;  %v14713_v10 = vld [vmem:[#allocation97_spill] sm:$0xff] }
 0x152   :  { %9312 = vmatmul.mubr.msk.f32.gmra.mrb[82].mxu1 %vm4622_vm4, %v12304_v36  ;;  %v4145_v31 = vadd.f32 %v14706_v8, %v4126_v49  ;;  %v3995_v14 = vadd.f32 %v14707_v22, %v3976_v5  ;;  %v9532_v53 = vpack.c.bf16 %v3857_v21, %v3855_v37  ;;  %v4127_v38 = vmul.f32 %v12513_v9, %v4109_v17  ;;  %v4247_v36 = vpop.f32.mrb[57].mxu0  ;;  %v14715_v21 = vld [vmem:[#allocation99_spill] sm:$0xff] }
 0x153   :  { %v3998_v58 = vmax.f32 %v3994_v6, 0.0  ;;  %v4267_v26 = vmul.f32 %v12556_v30, %v4245_v60  ;;  %6442 = vmatprep.mubr.f32.mxu1 %v14601_v15  ;;  %v4128_v62 = vmul.f32 %v12528_v1, %v4111_v16  ;;  %v4268_v46 = vmul.f32 %v12570_v44, %v4247_v36  ;;  %v4251_v1 = vpop.f32.mrb[58].mxu0  ;;  %v14719_v36 = vld [vmem:[#allocation104_spill] sm:$0xff] }
 0x154   :  { %v3999_v39 = vmax.f32 %v3995_v14, 0.0  ;;  %9533 = vmatprep.subr.bf16.mxu1 %v9532_v53  ;;  %v4146_v19 = vadd.f32 %v14708_v54, %v4127_v38  ;;  %9313 = vmatmul.mubr.msk.f32.vlgmr.msra.gmra.mrb[84].mxu0 %vm4622_vm4, %v12600_v29  ;;  %v4558_v9 = vrot.slane %v4464_v51, %v11167_v18  ;;  %v4148_v13 = vmax.f32 %v4144_v12, 0.0  ;;  %v4253_v47 = vpop.f32.mrb[59].mxu0  ;;  %v14717_v38 = vld [vmem:[#allocation103_spill] sm:$0xff] }
 0x155   :  { %v9538_v61 = vpack.c.bf16 %v3998_v58, %v3996_v33  ;;  %v4286_v50 = vadd.f32 %v14709_v63, %v4267_v26  ;;  %v4147_v52 = vadd.f32 %v14710_v59, %v4128_v62  ;;  %v4287_v45 = vadd.f32 %v14711_v34, %v4268_v46  ;;  %9535 = vmatpush1.bf16.msra.mxu1 %v9534_v7  ;;  %v4539_v5 = vpop.f32.mrb[60].mxu0  ;;  %v14716_v33 = vld [vmem:[#allocation100_spill] sm:$0xff] }
 0x156   :  { %6303 = vmatprep.mubr.f32.mxu0 %v14601_v15  ;;  %v9536_v41 = vpack.c.bf16 %v3999_v39, %v3997_v48  ;;  %v4150_v25 = vmax.f32 %v4146_v19, 0.0  ;;  %v4419_v32 = vmul.f32 %v12586_v24, %v4397_v3  ;;  %v4269_v40 = vmul.f32 %v12556_v30, %v4251_v1  ;;  %v14714_v30 = vld [vmem:[#allocation98_spill] sm:$0xff] }
 0x157   :  { %v4149_v55 = vmax.f32 %v4145_v31, 0.0  ;;  %v4151_v57 = vmax.f32 %v4147_v52, 0.0  ;;  %v4420_v11 = vmul.f32 %v12605_v4, %v4399_v42  ;;  %v4270_v51 = vmul.f32 %v12570_v44, %v4253_v47  ;;  %v4403_v44 = vpop.f32.mrb[58].mxu1  ;;  %v4541_v31 = vpop.f32.mrb[61].mxu0  ;;  %v14720_v52 = vld [vmem:[#allocation105_spill] sm:$0xff]  ;;  %v14723_v47 = vld [vmem:[#allocation108_spill] sm:$0xff] }
 0x158   :  { %9537 = vmatprep.subr.bf16.mxu1 %v9536_v41  ;;  %9541 = vmatprep.subr.bf16.mxu0 %v9536_v41  ;;  %v9546_v2 = vpack.c.bf16 %v4150_v25, %v4148_v13  ;;  %v4438_v27 = vadd.f32 %v14712_v23, %v4419_v32  ;;  %v4288_v43 = vadd.f32 %v14713_v10, %v4269_v40  ;;  %v4290_v0 = vmax.f32 %v4286_v50, 0.0  ;;  %v4405_v6 = vpop.f32.mrb[59].mxu1  ;;  %v4545_v39 = vpop.f32.mrb[62].mxu0  ;;  %v14722_v40 = vld [vmem:[#allocation84_spill] sm:$0xff] }
 0x159   :  { %9314 = vmatmul.mubr.msk.f32.gmra.mrb[86].mxu0 %vm4622_vm4, %v12647_v56  ;;  %v4439_v37 = vadd.f32 %v14714_v30, %v4420_v11  ;;  %v4289_v49 = vadd.f32 %v14715_v21, %v4270_v51  ;;  %9539 = vmatpush1.bf16.msra.mxu1 %v9538_v61  ;;  %v9544_v7 = vpack.c.bf16 %v4151_v57, %v4149_v55  ;;  %v4291_v22 = vmax.f32 %v4287_v45, 0.0  ;;  %v4547_v54 = vpop.f32.mrb[63].mxu0  ;;  %v14721_v45 = vld [vmem:[#allocation106_spill] sm:$0xff]  ;;  %v14724_v11 = vld [vmem:[#allocation107_spill] sm:$0xff] }
 0x15a   :  { %9543 = vmatpush1.bf16.msra.mxu0 %v9538_v61  ;;  %v4292_v12 = vmax.f32 %v4288_v43, 0.0  ;;  %v4421_v35 = vmul.f32 %v12586_v24, %v4403_v44  ;;  %v4561_v8 = vmul.f32 %v12621_v28, %v4539_v5  ;;  %6587 = vmatprep.mubr.f32.mxu0 %v14601_v15  ;;  %v4422_v17 = vmul.f32 %v12605_v4, %v4405_v6  ;;  %v14718_v24 = vld [vmem:[#allocation101_spill] sm:$0xff]  ;;  %v14725_v51 = vld [vmem:[#allocation110_spill] sm:$0xff] }
 0x15b   :  { %v4293_v14 = vmax.f32 %v4289_v49, 0.0  ;;  %v4562_v60 = vmul.f32 %v4558_v9, %v4541_v31  ;;  %9545 = vmatprep.subr.bf16.mxu0 %v9544_v7  ;;  %v4442_v4 = vmax.f32 %v4438_v27, 0.0  ;;  %v4563_v61 = vmul.f32 %v12621_v28, %v4545_v39  ;;  %v14726_v7 = vld [vmem:[#allocation111_spill] sm:$0xff] }
 0x15c   :  { %v9550_v53 = vpack.c.bf16 %v4292_v12, %v4290_v0  ;;  %v4440_v58 = vadd.f32 %v14716_v33, %v4421_v35  ;;  %v4580_v16 = vadd.f32 %v14717_v38, %v4561_v8  ;;  %9315 = vmatmul.mubr.msk.f32.vlgmr.msra.gmra.mrb[84].mxu1 %vm4622_vm4, %v12600_v29  ;;  %v4441_v26 = vadd.f32 %v14718_v24, %v4422_v17 }
 0x15d   :  { %v4581_v48 = vadd.f32 %v14719_v36, %v4562_v60  ;;  %6448 = vmatprep.mubr.f32.mxu1 %v14601_v15  ;;  %v9548_v62 = vpack.c.bf16 %v4293_v14, %v4291_v22  ;;  %v4443_v19 = vmax.f32 %v4439_v37, 0.0  ;;  %v4564_v50 = vmul.f32 %v4558_v9, %v4547_v54  ;;  %v14727_v60 = vld [vmem:[#allocation112_spill] sm:$0xff] }
 0x15e   :  { %9547 = vmatpush1.bf16.msra.mxu0 %v9546_v2  ;;  %v4444_v46 = vmax.f32 %v4440_v58, 0.0  ;;  %v4445_v63 = vmax.f32 %v4441_v26, 0.0  ;;  %v4582_v34 = vadd.f32 %v14720_v52, %v4563_v61  ;;  %v4584_v41 = vmax.f32 %v4580_v16, 0.0  ;;  %v12690_v2 = vpop.permute.xlu1 %4723 }
 0x15f   :  { %9549 = vmatprep.subr.bf16.mxu0 %v9548_v62  ;;  %9553 = vmatprep.subr.bf16.mxu1 %v9548_v62  ;;  %v4583_v3 = vadd.f32 %v14721_v45, %v4564_v50  ;;  %v4585_v28 = vmax.f32 %v4581_v48, 0.0  ;;  %9743 = vrcp.f32 %v14722_v40  ;;  %v4739_v27 = vrot.slane %v14724_v11, %v11167_v18  ;;  %v14728_v45 = vld [vmem:[#allocation113_spill] sm:$0xff] }
 0x160   :  { %v9558_v59 = vpack.c.bf16 %v4444_v46, %v4442_v4  ;;  %9316 = vmatmul.mubr.msk.f32.gmra.mrb[86].mxu1 %vm4622_vm4, %v12647_v56  ;;  %v9556_v1 = vpack.c.bf16 %v4445_v63, %v4443_v19  ;;  %v4586_v13 = vmax.f32 %v4582_v34, 0.0  ;;  %9745 = vrcp.f32 %v14723_v47 }
 0x161   :  { %9555 = vmatpush1.bf16.msra.mxu1 %v9550_v53  ;;  %6732 = vmatprep.mubr.f32.mxu1 %v14601_v15  ;;  %v4587_v25 = vmax.f32 %v4583_v3, 0.0  ;;  %9747 = vrcp.f32 %v14725_v51  ;;  %v4743_v49 = vmul.f32 %v4739_v27, %v12690_v2  ;;  %v4883_v16 = vrot.slane %v14727_v60, %v11167_v18 }
 0x162   :  { %9551 = vmatpush1.bf16.msra.mxu0 %v9550_v53  ;;  %9557 = vmatprep.subr.bf16.mxu1 %v9556_v1  ;;  %v9562_v9 = vpack.c.bf16 %v4586_v13, %v4584_v41  ;;  %v12697_v44 = vpop.permute.xlu1 %4728  ;;  %9749 = vrcp.f32 %v14726_v7  ;;  %v4879_v53 = vrot.slane %v14727_v60, %v11164_v20  ;;  %v5024_v3 = vrot.slane %v14728_v45, %v11164_v20  ;;  %v14729_v13 = vld [vmem:[#allocation115_spill] sm:$0xff] }
 0x163   :  { %v9560_v32 = vpack.c.bf16 %v4587_v25, %v4585_v28  ;;  %v4745_v8 = vmul.f32 %v4739_v27, %v12697_v44  ;;  %v4887_v63 = vmul.f32 %v4883_v16, %v12690_v2  ;;  %9751 = vrcp.f32 %v14729_v13 }
 0x164   :  { %v4886_v61 = vmul.f32 %v4879_v53, %v12690_v2  ;;  %v5028_v40 = vrot.slane %v14728_v45, %v11167_v18  ;;  %vm8772_vm2 = vcmask 523264  }
 0x165   :  { %9317 = vmatmul.mubr.msk.f32.vlgmr.msra.gmra.mrb[88].mxu0 %vm4622_vm4, %v12600_v29  ;;  %9559 = vmatpush1.bf16.msra.mxu1 %v9558_v59 }
 0x166   :  { %6593 = vmatprep.mubr.f32.mxu0 %v14601_v15  ;;  %9561 = vmatprep.subr.bf16.mxu1 %v9560_v32 }
 0x169   :  { %9318 = vmatmul.mubr.msk.f32.gmra.mrb[90].mxu0 %vm4622_vm4, %v12647_v56  ;;  %9563 = vmatpush1.bf16.msra.mxu1 %v9562_v9  ;;  %v9744_v42 = vpop.eup %9743  ;;  %v4888_v9 = vmul.f32 %v4879_v53, %v12697_v44  ;;  %v14730_v53 = vld [vmem:[#allocation117_spill] sm:$0xff] }
 0x16a   :  { %6917 = vmatprep.mubr.f32.mxu0 %v14601_v15  ;;  %v4609_v55 = vsel %vm4605_vm3, 0.0, %v9744_v42  ;;  %v9746_v43 = vpop.eup %9745  ;;  %9753 = vrcp.f32 %v14730_v53  ;;  %v14734_v53 = vld [vmem:[#allocation122_spill] sm:$0xff] }
 0x16b   :  { %v4710_v57 = vrot.slane %v4609_v55, %v11164_v20  ;;  %v4714_v23 = vrot.slane %v4609_v55, %v11167_v18  ;;  %v4770_v5 = vsel %vm4766_vm6, 0.0, %v9746_v43  ;;  %v9748_v31 = vpop.eup %9747  ;;  %v4889_v55 = vmul.f32 %v4883_v16, %v12697_v44 }
 0x16c   :  { %9319 = vmatmul.mubr.msk.f32.vlgmr.msra.gmra.mrb[88].mxu1 %vm4622_vm4, %v12600_v29  ;;  %v4735_v29 = vrot.slane %v14724_v11, %v11164_v20  ;;  %v4864_v17 = vrot.slane %v4770_v5, %v11164_v20  ;;  %v4868_v38 = vrot.slane %v4770_v5, %v11167_v18  ;;  %v4915_v62 = vsel %vm4911_vm5, 0.0, %v9748_v31  ;;  %v9750_v52 = vpop.eup %9749 }
 0x16d   :  { %6738 = vmatprep.mubr.f32.mxu1 %v14601_v15  ;;  %v5009_v59 = vrot.slane %v4915_v62, %v11164_v20  ;;  %v5013_v1 = vrot.slane %v4915_v62, %v11167_v18  ;;  %v9752_v16 = vpop.eup %9751 }
 0x16e   :  { %v4742_v30 = vmul.f32 %v4735_v29, %v12690_v2  ;;  %v4744_v12 = vmul.f32 %v4735_v29, %v12697_v44 }
 0x170   :  { %9320 = vmatmul.mubr.msk.f32.gmra.mrb[90].mxu1 %vm4622_vm4, %v12647_v56 }
 0x171   :  { %7195 = vmatprep.mubr.f32.mxu1 %v14601_v15 }
 0x1d1   :  { %v4695_v10 = vpop.f32.mrb[60].mxu1 }
 0x1d2   :  { %v4717_v56 = vmul.f32 %v4710_v57, %v4695_v10  ;;  %v4697_v37 = vpop.f32.mrb[61].mxu1  ;;  %v5031_v10 = vmul.f32 %v5024_v3, %v12690_v2 }
 0x1d3   :  { %v4718_v21 = vmul.f32 %v4714_v23, %v4697_v37  ;;  %v5032_v37 = vmul.f32 %v5028_v40, %v12690_v2 }
 0x1d4   :  { %v4746_v0 = vadd.f32 %v4742_v30, %v4717_v56 }
 0x1d5   :  { %v4747_v35 = vadd.f32 %v4743_v49, %v4718_v21  ;;  %v5033_v21 = vmul.f32 %v5024_v3, %v12697_v44 }
 0x1d6   :  { %v4750_v24 = vmax.f32 %v4746_v0, 0.0 }
 0x1d7   :  { %v4701_v6 = vpop.f32.mrb[62].mxu1  ;;  %v4751_v48 = vmax.f32 %v4747_v35, 0.0 }
 0x1d8   :  { %v4719_v22 = vmul.f32 %v4710_v57, %v4701_v6  ;;  %v4703_v14 = vpop.f32.mrb[63].mxu1 }
 0x1d9   :  { %v4720_v33 = vmul.f32 %v4714_v23, %v4703_v14  ;;  %v4849_v58 = vpop.f32.mrb[64].mxu0  ;;  %v5060_v23 = vsel %vm5056_vm7, 0.0, %v9750_v52 }
 0x1da   :  { %v4748_v26 = vadd.f32 %v4744_v12, %v4719_v22  ;;  %v4851_v36 = vpop.f32.mrb[65].mxu0  ;;  %v4871_v46 = vmul.f32 %v4864_v17, %v4849_v58  ;;  %v5034_v12 = vmul.f32 %v5028_v40, %v12697_v44  ;;  %v5154_v35 = vrot.slane %v5060_v23, %v11164_v20  ;;  %v14731_v58 = vld [vmem:[#allocation114_spill] sm:$0xff] }
 0x1db   :  { %v4749_v39 = vadd.f32 %v4745_v8, %v4720_v33  ;;  %v4872_v19 = vmul.f32 %v4868_v38, %v4851_v36  ;;  %v5158_v22 = vrot.slane %v5060_v23, %v11167_v18  ;;  %v5173_v36 = vrot.slane %v14731_v58, %v11167_v18  ;;  %v14732_v40 = vld [vmem:[#allocation118_spill] sm:$0xff] }
 0x1dc   :  { %v4752_v4 = vmax.f32 %v4748_v26, 0.0  ;;  %v4890_v28 = vadd.f32 %v4886_v61, %v4871_v46  ;;  %9755 = vrcp.f32 %v14732_v40 }
 0x1dd   :  { %v4753_v54 = vmax.f32 %v4749_v39, 0.0  ;;  %v4891_v42 = vadd.f32 %v4887_v63, %v4872_v19  ;;  %9757 = vrcp.f32 %v14734_v53 }
 0x1de   :  { %v9566_v50 = vpack.c.bf16 %v4752_v4, %v4750_v24  ;;  %v4894_v56 = vmax.f32 %v4890_v28, 0.0  ;;  %v5179_v28 = vmul.f32 %v5173_v36, %v12697_v44 }
 0x1df   :  { %v4855_v34 = vpop.f32.mrb[66].mxu0  ;;  %v9564_v41 = vpack.c.bf16 %v4753_v54, %v4751_v48  ;;  %v4895_v49 = vmax.f32 %v4891_v42, 0.0 }
 0x1e0   :  { %v4873_v25 = vmul.f32 %v4864_v17, %v4855_v34  ;;  %v4857_v32 = vpop.f32.mrb[67].mxu0 }
 0x1e1   :  { %v4874_v47 = vmul.f32 %v4868_v38, %v4857_v32  ;;  %v4994_v57 = vpop.f32.mrb[64].mxu1  ;;  %9565 = vmatprep.subr.bf16.mxu0 %v9564_v41  ;;  %v5169_v38 = vrot.slane %v14731_v58, %v11164_v20 }
 0x1e2   :  { %v4892_v11 = vadd.f32 %v4888_v9, %v4873_v25  ;;  %v5016_v29 = vmul.f32 %v5009_v59, %v4994_v57  ;;  %v4996_v51 = vpop.f32.mrb[65].mxu1  ;;  %9567 = vmatpush1.bf16.msra.mxu0 %v9566_v50  ;;  %v5205_v50 = vsel %vm5201_vm9, 0.0, %v9752_v16  ;;  %v12777_v16 = vld [vmem:[%s14219_s2 + $0x30] sm:$0xff] }
 0x1e3   :  { %v4893_v27 = vadd.f32 %v4889_v55, %v4874_v47  ;;  %v5017_v43 = vmul.f32 %v5013_v1, %v4996_v51  ;;  %v5176_v63 = vmul.f32 %v5169_v38, %v12690_v2  ;;  %v5299_v32 = vrot.slane %v5205_v50, %v11164_v20  ;;  %v12748_v47 = vld [vmem:[%s14219_s2 + $0x20] sm:$0xff]  ;;  %v9754_v55 = vpop.eup %9753 }
 0x1e4   :  { %v4896_v30 = vmax.f32 %v4892_v11, 0.0  ;;  %v5035_v7 = vadd.f32 %v5031_v10, %v5016_v29  ;;  %v5303_v42 = vrot.slane %v5205_v50, %v11167_v18  ;;  %v14733_v11 = vld [vmem:[#allocation119_spill] sm:$0xff] }
 0x1e5   :  { %v4897_v5 = vmax.f32 %v4893_v27, 0.0  ;;  %v5000_v0 = vpop.f32.mrb[66].mxu1  ;;  %v5036_v14 = vadd.f32 %v5032_v37, %v5017_v43  ;;  %v5314_v29 = vrot.slane %v14733_v11, %v11164_v20  ;;  %v5318_v10 = vrot.slane %v14733_v11, %v11167_v18 }
 0x1e6   :  { %v9570_v6 = vpack.c.bf16 %v4896_v30, %v4894_v56  ;;  %v5018_v8 = vmul.f32 %v5009_v59, %v5000_v0  ;;  %v5002_v31 = vpop.f32.mrb[67].mxu1  ;;  %v5039_v48 = vmax.f32 %v5035_v7, 0.0  ;;  %v5177_v59 = vmul.f32 %v5173_v36, %v12690_v2  ;;  %v14735_v36 = vld [vmem:[#allocation120_spill] sm:$0xff] }
 0x1e7   :  { %v5019_v17 = vmul.f32 %v5013_v1, %v5002_v31  ;;  %v9568_v60 = vpack.c.bf16 %v4897_v5, %v4895_v49  ;;  %v5040_v46 = vmax.f32 %v5036_v14, 0.0  ;;  %v5178_v1 = vmul.f32 %v5169_v38, %v12697_v44  ;;  %v12760_v5 = vld [vmem:[%s14219_s2 + $0x28] sm:$0xff] }
 0x1e8   :  { %v5037_v33 = vadd.f32 %v5033_v21, %v5018_v8  ;;  %v5350_v0 = vsel %vm5346_vm10, 0.0, %v9754_v55  ;;  %v5323_v8 = vmul.f32 %v5314_v29, %v12697_v44  ;;  %v5324_v31 = vmul.f32 %v5318_v10, %v12697_v44  ;;  %v14736_v55 = vld [vmem:[#allocation124_spill] sm:$0xff] }
 0x1e9   :  { %v5038_v24 = vadd.f32 %v5034_v12, %v5019_v17  ;;  %v5139_v26 = vpop.f32.mrb[68].mxu0  ;;  %9569 = vmatprep.subr.bf16.mxu0 %v9568_v60  ;;  %v5321_v12 = vmul.f32 %v5314_v29, %v12690_v2  ;;  %v5444_v60 = vrot.slane %v5350_v0, %v11164_v20  ;;  %v5448_v38 = vrot.slane %v5350_v0, %v11167_v18 }
 0x1ea   :  { %v5041_v39 = vmax.f32 %v5037_v33, 0.0  ;;  %v5161_v62 = vmul.f32 %v5154_v35, %v5139_v26  ;;  %v5141_v4 = vpop.f32.mrb[69].mxu0  ;;  %9571 = vmatpush1.bf16.msra.mxu0 %v9570_v6  ;;  %v5322_v6 = vmul.f32 %v5318_v10, %v12690_v2  ;;  %9759 = vrcp.f32 %v14736_v55  ;;  %v14737_v10 = vld [vmem:[#allocation121_spill] sm:$0xff] }
 0x1eb   :  { %v5042_v61 = vmax.f32 %v5038_v24, 0.0  ;;  %v5162_v54 = vmul.f32 %v5158_v22, %v5141_v4  ;;  %v9756_v24 = vpop.eup %9755  ;;  %v5463_v4 = vrot.slane %v14735_v36, %v11167_v18  ;;  %vm14740_vm0 = vcmp.eq.f32.partialorder %v14736_v55, 0.0 }
 0x1ec   :  { %v9574_v19 = vpack.c.bf16 %v5041_v39, %v5039_v48  ;;  %v5180_v45 = vadd.f32 %v5176_v63, %v5161_v62  ;;  %v5459_v48 = vrot.slane %v14735_v36, %v11164_v20 }
 0x1ed   :  { %v5145_v52 = vpop.f32.mrb[70].mxu0  ;;  %v9572_v34 = vpack.c.bf16 %v5042_v61, %v5040_v46  ;;  %v5181_v25 = vadd.f32 %v5177_v59, %v5162_v54 }
 0x1ee   :  { %v5163_v3 = vmul.f32 %v5154_v35, %v5145_v52  ;;  %v5147_v41 = vpop.f32.mrb[71].mxu0  ;;  %v5184_v51 = vmax.f32 %v5180_v45, 0.0  ;;  %v12789_v52 = vld [vmem:[%s14219_s2 + $0x38] sm:$0xff] }
 0x1ef   :  { %v5164_v9 = vmul.f32 %v5158_v22, %v5147_v41  ;;  %9573 = vmatprep.subr.bf16.mxu0 %v9572_v34  ;;  %9577 = vmatprep.subr.bf16.mxu1 %v9572_v34  ;;  %v5185_v43 = vmax.f32 %v5181_v25, 0.0  ;;  %v5495_v34 = vsel %vm5491_vm11, 0.0, %v9756_v24  ;;  %v5469_v25 = vmul.f32 %v5463_v4, %v12697_v44 }
 0x1f0   :  { %v5182_v13 = vadd.f32 %v5178_v1, %v5163_v3  ;;  %9575 = vmatpush1.bf16.msra.mxu0 %v9574_v19  ;;  %9579 = vmatpush1.bf16.msra.mxu1 %v9574_v19  ;;  %v5466_v3 = vmul.f32 %v5459_v48, %v12690_v2  ;;  %v5467_v1 = vmul.f32 %v5463_v4, %v12690_v2 }
 0x1f1   :  { %v5183_v57 = vadd.f32 %v5179_v28, %v5164_v9  ;;  %v5468_v28 = vmul.f32 %v5459_v48, %v12697_v44  ;;  %v5589_v40 = vrot.slane %v5495_v34, %v11164_v20  ;;  %v5593_v29 = vrot.slane %v5495_v34, %v11167_v18  ;;  %v14738_v48 = vld [vmem:[#allocation125_spill] sm:$0xff] }
 0x1f2   :  { %v5186_v23 = vmax.f32 %v5182_v13, 0.0  ;;  %v5284_v27 = vpop.f32.mrb[68].mxu1  ;;  %9761 = vrcp.f32 %v14738_v48  ;;  %vm14743_vm12 = vcmp.eq.f32.partialorder %v14738_v48, 0.0 }
 0x1f3   :  { %v5187_v56 = vmax.f32 %v5183_v57, 0.0  ;;  %v5306_v30 = vmul.f32 %v5299_v32, %v5284_v27  ;;  %v5286_v37 = vpop.f32.mrb[69].mxu1  ;;  %9321 = vmatmul.mubr.msk.f32.vlgmr.msra.gmra.mrb[92].mxu0 %vm4622_vm4, %v12748_v47 }
 0x1f4   :  { %v9582_v21 = vpack.c.bf16 %v5186_v23, %v5184_v51  ;;  %v5307_v49 = vmul.f32 %v5303_v42, %v5286_v37  ;;  %6923 = vmatprep.mubr.f32.mxu0 %v14601_v15  ;;  %v12805_v51 = vld [vmem:[%s14219_s2 + $0x40] sm:$0xff]  ;;  %v9758_v23 = vpop.eup %9757  ;;  %v5608_v37 = vrot.slane %v14737_v10, %v11167_v18 }
 0x1f5   :  { %v9580_v35 = vpack.c.bf16 %v5187_v56, %v5185_v43  ;;  %v5325_v22 = vadd.f32 %v5321_v12, %v5306_v30  ;;  %v5604_v43 = vrot.slane %v14737_v10, %v11164_v20 }
 0x1f6   :  { %v5290_v7 = vpop.f32.mrb[70].mxu1  ;;  %v5326_v33 = vadd.f32 %v5322_v6, %v5307_v49 }
 0x1f7   :  { %v5308_v14 = vmul.f32 %v5299_v32, %v5290_v7  ;;  %v5292_v17 = vpop.f32.mrb[71].mxu1  ;;  %9322 = vmatmul.mubr.msk.f32.gmra.mrb[94].mxu0 %vm4622_vm4, %v12760_v5  ;;  %9581 = vmatprep.subr.bf16.mxu1 %v9580_v35  ;;  %v5329_v46 = vmax.f32 %v5325_v22, 0.0 }
 0x1f8   :  { %v5309_v58 = vmul.f32 %v5303_v42, %v5292_v17  ;;  %9583 = vmatpush1.bf16.msra.mxu1 %v9582_v21  ;;  %6929 = vmatprep.mubr.f32.mxu0 %v14601_v15  ;;  %v5330_v63 = vmax.f32 %v5326_v33, 0.0  ;;  %v5612_v17 = vmul.f32 %v5608_v37, %v12690_v2  ;;  %v5613_v33 = vmul.f32 %v5604_v43, %v12697_v44 }
 0x1f9   :  { %v5327_v26 = vadd.f32 %v5323_v8, %v5308_v14  ;;  %v5429_v62 = vpop.f32.mrb[72].mxu0  ;;  %v12820_v8 = vld [vmem:[%s14219_s2 + $0x48] sm:$0xff]  ;;  %v5611_v14 = vmul.f32 %v5604_v43, %v12690_v2 }
 0x1fa   :  { %v5328_v39 = vadd.f32 %v5324_v31, %v5309_v58  ;;  %v5451_v54 = vmul.f32 %v5444_v60, %v5429_v62  ;;  %v5431_v19 = vpop.f32.mrb[73].mxu0  ;;  %v5640_v31 = vsel %vm5636_vm15, 0.0, %v9758_v23  ;;  %v5614_v58 = vmul.f32 %v5608_v37, %v12697_v44 }
 0x1fb   :  { %v5331_v61 = vmax.f32 %v5327_v26, 0.0  ;;  %9323 = vmatmul.mubr.msk.f32.gmra.mrb[96].mxu0 %vm4622_vm4, %v12777_v16  ;;  %v5452_v59 = vmul.f32 %v5448_v38, %v5431_v19  ;;  %v5734_v53 = vrot.slane %v5640_v31, %v11164_v20  ;;  %v5738_v4 = vrot.slane %v5640_v31, %v11167_v18  ;;  %v14739_v19 = vld [vmem:[#allocation123_spill] sm:$0xff] }
 0x1fc   :  { %v5332_v50 = vmax.f32 %v5328_v39, 0.0  ;;  %6935 = vmatprep.mubr.f32.mxu0 %v14601_v15  ;;  %v5470_v32 = vadd.f32 %v5466_v3, %v5451_v54  ;;  %v5753_v34 = vrot.slane %v14739_v19, %v11167_v18 }
 0x1fd   :  { %v9586_v45 = vpack.c.bf16 %v5331_v61, %v5329_v46  ;;  %v5435_v41 = vpop.f32.mrb[74].mxu0  ;;  %v5471_v57 = vadd.f32 %v5467_v1, %v5452_v59  ;;  %v12839_v46 = vld [vmem:[%s14219_s2 + $0x50] sm:$0xff]  ;;  %v9760_v61 = vpop.eup %9759 }
 0x1fe   :  { %v9584_v9 = vpack.c.bf16 %v5332_v50, %v5330_v63  ;;  %v5453_v13 = vmul.f32 %v5444_v60, %v5435_v41  ;;  %v5437_v42 = vpop.f32.mrb[75].mxu0  ;;  %v5474_v21 = vmax.f32 %v5470_v32, 0.0  ;;  %v5749_v63 = vrot.slane %v14739_v19, %v11164_v20  ;;  %v12855_v32 = vld [vmem:[%s14219_s2 + $0x58] sm:$0xff] }
 0x1ff   :  { %9324 = vmatmul.mubr.msk.f32.gmra.mrb[98].mxu0 %vm4622_vm4, %v12789_v52  ;;  %v5454_v11 = vmul.f32 %v5448_v38, %v5437_v42  ;;  %v5475_v35 = vmax.f32 %v5471_v57, 0.0  ;;  %v14741_v57 = vld [vmem:[#allocation126_spill] sm:$0xff]  ;;  %v5757_v23 = vmul.f32 %v5753_v34, %v12690_v2  ;;  %v5759_v43 = vmul.f32 %v5753_v34, %v12697_v44 }
 0x200   :  { %9585 = vmatprep.subr.bf16.mxu1 %v9584_v9  ;;  %9589 = vmatprep.subr.bf16.mxu0 %v9584_v9  ;;  %v5472_v27 = vadd.f32 %v5468_v28, %v5453_v13  ;;  %v5574_v30 = vpop.f32.mrb[72].mxu1  ;;  %v5785_v13 = vsel %vm14740_vm0, 0.0, %v9760_v61  ;;  %v5758_v10 = vmul.f32 %v5749_v63, %v12697_v44 }
 0x201   :  { %9587 = vmatpush1.bf16.msra.mxu1 %v9586_v45  ;;  %9591 = vmatpush1.bf16.msra.mxu0 %v9586_v45  ;;  %v5473_v56 = vadd.f32 %v5469_v25, %v5454_v11  ;;  %v5596_v0 = vmul.f32 %v5589_v40, %v5574_v30  ;;  %v5576_v12 = vpop.f32.mrb[73].mxu1  ;;  %v5894_v11 = vrot.slane %v14741_v57, %v11164_v20 }
 0x202   :  { %6941 = vmatprep.mubr.f32.mxu0 %v14601_v15  ;;  %v5476_v49 = vmax.f32 %v5472_v27, 0.0  ;;  %v5597_v7 = vmul.f32 %v5593_v29, %v5576_v12 }
 0x203   :  { %9325 = vmatmul.mubr.msk.f32.gmra.mrb[100].mxu0 %vm4622_vm4, %v12805_v51  ;;  %v5477_v6 = vmax.f32 %v5473_v56, 0.0  ;;  %v5615_v24 = vadd.f32 %v5611_v14, %v5596_v0  ;;  %v5901_v14 = vmul.f32 %v5894_v11, %v12690_v2 }
 0x204   :  { %9329 = vmatmul.mubr.msk.f32.vlgmr.msra.gmra.mrb[92].mxu1 %vm4622_vm4, %v12748_v47  ;;  %6947 = vmatprep.mubr.f32.mxu0 %v14601_v15  ;;  %v9594_v22 = vpack.c.bf16 %v5476_v49, %v5474_v21  ;;  %v5616_v39 = vadd.f32 %v5612_v17, %v5597_v7  ;;  %v5879_v21 = vrot.slane %v5785_v13, %v11164_v20  ;;  %v14742_v49 = vld [vmem:[#allocation127_spill] sm:$0xff] }
 0x205   :  { %7201 = vmatprep.mubr.f32.mxu1 %v14601_v15  ;;  %v5580_v60 = vpop.f32.mrb[74].mxu1  ;;  %v9592_v38 = vpack.c.bf16 %v5477_v6, %v5475_v35  ;;  %v5619_v45 = vmax.f32 %v5615_v24, 0.0  ;;  %9763 = vrcp.f32 %v14742_v49  ;;  %v5883_v35 = vrot.slane %v5785_v13, %v11167_v18  ;;  %v9762_v6 = vpop.eup %9761 }
 0x206   :  { %v5598_v26 = vmul.f32 %v5589_v40, %v5580_v60  ;;  %v5582_v36 = vpop.f32.mrb[75].mxu1  ;;  %v5620_v28 = vmax.f32 %v5616_v39, 0.0  ;;  %v5756_v40 = vmul.f32 %v5749_v63, %v12690_v2  ;;  %v14744_v63 = vld [vmem:[#allocation7_spill] sm:$0xff]  ;;  %vm14746_vm13 = vcmp.eq.f32.partialorder %v14742_v49, 0.0 }
 0x207   :  { %9326 = vmatmul.mubr.msk.f32.gmra.mrb[102].mxu0 %vm4622_vm4, %v12820_v8  ;;  %v5599_v62 = vmul.f32 %v5593_v29, %v5582_v36  ;;  %9593 = vmatprep.subr.bf16.mxu0 %v9592_v38  ;;  %v5898_v29 = vrot.slane %v14741_v57, %v11167_v18  ;;  %v6043_v48 = vrot.slane %v14744_v63, %v11167_v18 }
 0x208   :  { %9330 = vmatmul.mubr.msk.f32.gmra.mrb[94].mxu1 %vm4622_vm4, %v12760_v5  ;;  %v5617_v54 = vadd.f32 %v5613_v33, %v5598_v26  ;;  %9595 = vmatpush1.bf16.msra.mxu0 %v9594_v22 }
 0x209   :  { %6953 = vmatprep.mubr.f32.mxu0 %v14601_v15  ;;  %v5618_v50 = vadd.f32 %v5614_v58, %v5599_v62  ;;  %v5719_v59 = vpop.f32.mrb[76].mxu0  ;;  %7207 = vmatprep.mubr.f32.mxu1 %v14601_v15  ;;  %v5902_v38 = vmul.f32 %v5898_v29, %v12690_v2 }
 0x20a   :  { %v5621_v3 = vmax.f32 %v5617_v54, 0.0  ;;  %v5741_v1 = vmul.f32 %v5734_v53, %v5719_v59  ;;  %v5721_v41 = vpop.f32.mrb[77].mxu0  ;;  %v5903_v54 = vmul.f32 %v5894_v11, %v12697_v44 }
 0x20b   :  { %9327 = vmatmul.mubr.msk.f32.gmra.mrb[104].mxu0 %vm4622_vm4, %v12839_v46  ;;  %v5622_v25 = vmax.f32 %v5618_v50, 0.0  ;;  %v5742_v9 = vmul.f32 %v5738_v4, %v5721_v41  ;;  %v6039_v50 = vrot.slane %v14744_v63, %v11164_v20  ;;  %v5904_v41 = vmul.f32 %v5898_v29, %v12697_v44 }
 0x20c   :  { %9331 = vmatmul.mubr.msk.f32.gmra.mrb[96].mxu1 %vm4622_vm4, %v12777_v16  ;;  %6959 = vmatprep.mubr.f32.mxu0 %v14601_v15  ;;  %v9598_v42 = vpack.c.bf16 %v5621_v3, %v5619_v45  ;;  %v5760_v56 = vadd.f32 %v5756_v40, %v5741_v1  ;;  %v14745_v3 = vld [vmem:[#allocation128_spill] sm:$0xff] }
 0x20d   :  { %7213 = vmatprep.mubr.f32.mxu1 %v14601_v15  ;;  %v5725_v27 = vpop.f32.mrb[78].mxu0  ;;  %v9596_v55 = vpack.c.bf16 %v5622_v25, %v5620_v28  ;;  %v5761_v0 = vadd.f32 %v5757_v23, %v5742_v9  ;;  %9765 = vrcp.f32 %v14745_v3  ;;  %v6046_v40 = vmul.f32 %v6039_v50, %v12690_v2 }
 0x20e   :  { %v5743_v30 = vmul.f32 %v5734_v53, %v5725_v27  ;;  %v5727_v37 = vpop.f32.mrb[79].mxu0  ;;  %v5764_v17 = vmax.f32 %v5760_v56, 0.0  ;;  %v5930_v53 = vsel %vm14743_vm12, 0.0, %v9762_v6  ;;  %v6047_v27 = vmul.f32 %v6043_v48, %v12690_v2 }
 0x20f   :  { %9328 = vmatmul.mubr.msk.f32.gmra.mrb[106].mxu0 %vm4622_vm4, %v12855_v32  ;;  %v5744_v12 = vmul.f32 %v5738_v4, %v5727_v37  ;;  %9597 = vmatprep.subr.bf16.mxu0 %v9596_v55  ;;  %v5765_v24 = vmax.f32 %v5761_v0, 0.0  ;;  %v6024_v45 = vrot.slane %v5930_v53, %v11164_v20  ;;  %v6028_v28 = vrot.slane %v5930_v53, %v11167_v18  ;;  %v9764_v25 = vpop.eup %9763 }
 0x210   :  { %9332 = vmatmul.mubr.msk.f32.gmra.mrb[98].mxu1 %vm4622_vm4, %v12789_v52  ;;  %v5762_v7 = vadd.f32 %v5758_v10, %v5743_v30  ;;  %9601 = vmatprep.subr.bf16.mxu1 %v9596_v55  ;;  %v6075_v56 = vsel %vm14746_vm13, 0.0, %v9764_v25  ;;  %vm14749_vm14 = vcmp.eq.f32.partialorder %v14745_v3, 0.0 }
 0x211   :  { %9599 = vmatpush1.bf16.msra.mxu0 %v9598_v42  ;;  %v5763_v31 = vadd.f32 %v5759_v43, %v5744_v12  ;;  %9603 = vmatpush1.bf16.msra.mxu1 %v9598_v42  ;;  %v5864_v22 = vpop.f32.mrb[76].mxu1 }
 0x212   :  { %7219 = vmatprep.mubr.f32.mxu1 %v14601_v15  ;;  %v5766_v60 = vmax.f32 %v5762_v7, 0.0  ;;  %v5886_v33 = vmul.f32 %v5879_v21, %v5864_v22  ;;  %v5866_v58 = vpop.f32.mrb[77].mxu1  ;;  %7465 = vmatprep.mubr.f32.mxu0 %v14601_v15  ;;  %v6048_v22 = vmul.f32 %v6039_v50, %v12697_v44 }
 0x213   :  { %v5767_v26 = vmax.f32 %v5763_v31, 0.0  ;;  %v5887_v36 = vmul.f32 %v5883_v35, %v5866_v58  ;;  %v6173_v58 = vrot.slane %v6075_v56, %v11167_v18 }
 0x214   :  { %9333 = vmatmul.mubr.msk.f32.gmra.mrb[100].mxu1 %vm4622_vm4, %v12805_v51  ;;  %9337 = vmatmul.mubr.msk.f32.vlgmr.msra.gmra.mrb[108].mxu0 %vm4622_vm4, %v12748_v47  ;;  %v9606_v39 = vpack.c.bf16 %v5766_v60, %v5764_v17  ;;  %v5905_v62 = vadd.f32 %v5901_v14, %v5886_v33  ;;  %v6169_v14 = vrot.slane %v6075_v56, %v11164_v20  ;;  %v14748_v17 = vld [vmem:[#allocation129_spill] sm:$0xff] }
 0x215   :  { %7225 = vmatprep.mubr.f32.mxu1 %v14601_v15  ;;  %7471 = vmatprep.mubr.f32.mxu0 %v14601_v15  ;;  %v5906_v4 = vadd.f32 %v5902_v38, %v5887_v36  ;;  %v5870_v61 = vpop.f32.mrb[78].mxu1  ;;  %v9604_v19 = vpack.c.bf16 %v5767_v26, %v5765_v24  ;;  %9767 = vrcp.f32 %v14748_v17  ;;  %v6049_v33 = vmul.f32 %v6043_v48, %v12697_v44 }
 0x216   :  { %v5888_v59 = vmul.f32 %v5879_v21, %v5870_v61  ;;  %v5872_v34 = vpop.f32.mrb[79].mxu1  ;;  %v5909_v57 = vmax.f32 %v5905_v62, 0.0  ;;  %vm14752_vm1 = vcmp.eq.f32.partialorder %v14748_v17, 0.0 }
 0x217   :  { %v5889_v1 = vmul.f32 %v5883_v35, %v5872_v34  ;;  %9605 = vmatprep.subr.bf16.mxu1 %v9604_v19  ;;  %v5910_v10 = vmax.f32 %v5906_v4, 0.0  ;;  %v14747_v35 = vld [vmem:[#allocation8_spill] sm:$0xff]  ;;  %v9766_v38 = vpop.eup %9765 }
 0x218   :  { %9334 = vmatmul.mubr.msk.f32.gmra.mrb[102].mxu1 %vm4622_vm4, %v12820_v8  ;;  %9338 = vmatmul.mubr.msk.f32.gmra.mrb[110].mxu0 %vm4622_vm4, %v12760_v5  ;;  %v5907_v9 = vadd.f32 %v5903_v54, %v5888_v59  ;;  %v6184_v6 = vrot.slane %v14747_v35, %v11164_v20  ;;  %v6188_v7 = vrot.slane %v14747_v35, %v11167_v18  ;;  %v6220_v59 = vsel %vm14749_vm14, 0.0, %v9766_v38  ;;  %v14753_v38 = vld [vmem:[#allocation131_spill] sm:$0xff] }
 0x219   :  { %7231 = vmatprep.mubr.f32.mxu1 %v14601_v15  ;;  %v5908_v13 = vadd.f32 %v5904_v41, %v5889_v1  ;;  %9607 = vmatpush1.bf16.msra.mxu1 %v9606_v39  ;;  %v6009_v42 = vpop.f32.mrb[80].mxu0 }
 0x21a   :  { %7477 = vmatprep.mubr.f32.mxu0 %v14601_v15  ;;  %v5911_v11 = vmax.f32 %v5907_v9, 0.0  ;;  %v6031_v29 = vmul.f32 %v6024_v45, %v6009_v42  ;;  %v6011_v23 = vpop.f32.mrb[81].mxu0  ;;  %v6191_v53 = vmul.f32 %v6184_v6, %v12690_v2  ;;  %v6192_v54 = vmul.f32 %v6188_v7, %v12690_v2 }
 0x21b   :  { %v5912_v43 = vmax.f32 %v5908_v13, 0.0  ;;  %v6032_v55 = vmul.f32 %v6028_v28, %v6011_v23  ;;  %v6193_v13 = vmul.f32 %v6184_v6, %v12697_v44  ;;  %v6318_v23 = vrot.slane %v6220_v59, %v11167_v18 }
 0x21c   :  { %9335 = vmatmul.mubr.msk.f32.gmra.mrb[104].mxu1 %vm4622_vm4, %v12839_v46  ;;  %9339 = vmatmul.mubr.msk.f32.gmra.mrb[112].mxu0 %vm4622_vm4, %v12777_v16  ;;  %v9610_v30 = vpack.c.bf16 %v5911_v11, %v5909_v57  ;;  %v6050_v37 = vadd.f32 %v6046_v40, %v6031_v29  ;;  %v6314_v40 = vrot.slane %v6220_v59, %v11164_v20  ;;  %v14751_v57 = vld [vmem:[#allocation130_spill] sm:$0xff] }
 0x21d   :  { %7237 = vmatprep.mubr.f32.mxu1 %v14601_v15  ;;  %7483 = vmatprep.mubr.f32.mxu0 %v14601_v15  ;;  %v6051_v21 = vadd.f32 %v6047_v27, %v6032_v55  ;;  %v6015_v0 = vpop.f32.mrb[82].mxu0  ;;  %v9608_v12 = vpack.c.bf16 %v5912_v43, %v5910_v10  ;;  %9769 = vrcp.f32 %v14751_v57  ;;  %v6194_v29 = vmul.f32 %v6188_v7, %v12697_v44 }
 0x21e   :  { %v6033_v31 = vmul.f32 %v6024_v45, %v6015_v0  ;;  %v6017_v49 = vpop.f32.mrb[83].mxu0  ;;  %v6054_v39 = vmax.f32 %v6050_v37, 0.0 }
 0x21f   :  { %v6034_v60 = vmul.f32 %v6028_v28, %v6017_v49  ;;  %9609 = vmatprep.subr.bf16.mxu1 %v9608_v12  ;;  %9613 = vmatprep.subr.bf16.mxu0 %v9608_v12  ;;  %v6055_v19 = vmax.f32 %v6051_v21, 0.0  ;;  %v14750_v28 = vld [vmem:[#allocation10_spill] sm:$0xff]  ;;  %v9768_v27 = vpop.eup %9767 }
 0x220   :  { %9336 = vmatmul.mubr.msk.f32.gmra.mrb[106].mxu1 %vm4622_vm4, %v12855_v32  ;;  %9340 = vmatmul.mubr.msk.f32.gmra.mrb[114].mxu0 %vm4622_vm4, %v12789_v52  ;;  %v6052_v24 = vadd.f32 %v6048_v22, %v6033_v31  ;;  %v6329_v25 = vrot.slane %v14750_v28, %v11164_v20  ;;  %v6333_v9 = vrot.slane %v14750_v28, %v11167_v18  ;;  %v6365_v31 = vsel %vm14752_vm1, 0.0, %v9768_v27 }
 0x221   :  { %v6053_v26 = vadd.f32 %v6049_v33, %v6034_v60  ;;  %9611 = vmatpush1.bf16.msra.mxu1 %v9610_v30  ;;  %9615 = vmatpush1.bf16.msra.mxu0 %v9610_v30  ;;  %v6154_v36 = vpop.f32.mrb[80].mxu1 }
 0x222   :  { %v6056_v62 = vmax.f32 %v6052_v24, 0.0  ;;  %v6176_v4 = vmul.f32 %v6169_v14, %v6154_v36  ;;  %v6156_v61 = vpop.f32.mrb[81].mxu1  ;;  %7489 = vmatprep.mubr.f32.mxu0 %v14601_v15  ;;  %7735 = vmatprep.mubr.f32.mxu1 %v14601_v15  ;;  %v6336_v56 = vmul.f32 %v6329_v25, %v12690_v2  ;;  %v6337_v12 = vmul.f32 %v6333_v9, %v12690_v2 }
 0x223   :  { %v6057_v63 = vmax.f32 %v6053_v26, 0.0  ;;  %v6177_v50 = vmul.f32 %v6173_v58, %v6156_v61  ;;  %v6338_v33 = vmul.f32 %v6329_v25, %v12697_v44  ;;  %v6474_v24 = vrot.slane %v14753_v38, %v11164_v20 }
 0x224   :  { %9341 = vmatmul.mubr.msk.f32.gmra.mrb[116].mxu0 %vm4622_vm4, %v12805_v51  ;;  %v9618_v34 = vpack.c.bf16 %v6056_v62, %v6054_v39  ;;  %v6195_v45 = vadd.f32 %v6191_v53, %v6176_v4  ;;  %9345 = vmatmul.mubr.msk.f32.vlgmr.msra.gmra.mrb[108].mxu1 %vm4622_vm4, %v12748_v47  ;;  %v6459_v36 = vrot.slane %v6365_v31, %v11164_v20  ;;  %v14754_v39 = vld [vmem:[#allocation11_spill] sm:$0xff] }
 0x225   :  { %7495 = vmatprep.mubr.f32.mxu0 %v14601_v15  ;;  %v6196_v48 = vadd.f32 %v6192_v54, %v6177_v50  ;;  %v6160_v1 = vpop.f32.mrb[82].mxu1  ;;  %7741 = vmatprep.mubr.f32.mxu1 %v14601_v15  ;;  %v9616_v41 = vpack.c.bf16 %v6057_v63, %v6055_v19  ;;  %v6478_v53 = vrot.slane %v14753_v38, %v11167_v18  ;;  %9771 = vrcp.f32 %v14754_v39 }
 0x226   :  { %v6178_v3 = vmul.f32 %v6169_v14, %v6160_v1  ;;  %v6162_v42 = vpop.f32.mrb[83].mxu1  ;;  %v6199_v30 = vmax.f32 %v6195_v45, 0.0  ;;  %v6339_v4 = vmul.f32 %v6333_v9, %v12697_v44  ;;  %v6463_v61 = vrot.slane %v6365_v31, %v11167_v18 }
 0x227   :  { %v6179_v11 = vmul.f32 %v6173_v58, %v6162_v42  ;;  %9617 = vmatprep.subr.bf16.mxu0 %v9616_v41  ;;  %v6299_v55 = vpop.f32.mrb[84].mxu0  ;;  %v6200_v35 = vmax.f32 %v6196_v48, 0.0  ;;  %v9770_v54 = vpop.eup %9769  ;;  %v6481_v59 = vmul.f32 %v6474_v24, %v12690_v2  ;;  %v6482_v41 = vmul.f32 %v6478_v53, %v12690_v2 }
 0x228   :  { %9342 = vmatmul.mubr.msk.f32.gmra.mrb[118].mxu0 %vm4622_vm4, %v12820_v8  ;;  %v6197_v10 = vadd.f32 %v6193_v13, %v6178_v3  ;;  %9346 = vmatmul.mubr.msk.f32.gmra.mrb[110].mxu1 %vm4622_vm4, %v12760_v5  ;;  %v6321_v21 = vmul.f32 %v6314_v40, %v6299_v55  ;;  %v6301_v0 = vpop.f32.mrb[85].mxu0  ;;  %v6510_v3 = vsel %vm6506_vm8, 0.0, %v9770_v54  ;;  %vm14756_vm3 = vcmp.eq.f32.partialorder %v14754_v39, 0.0 }
 0x229   :  { %9619 = vmatpush1.bf16.msra.mxu0 %v9618_v34  ;;  %v6198_v43 = vadd.f32 %v6194_v29, %v6179_v11  ;;  %7501 = vmatprep.mubr.f32.mxu0 %v14601_v15  ;;  %v6322_v7 = vmul.f32 %v6318_v23, %v6301_v0  ;;  %v6604_v55 = vrot.slane %v6510_v3, %v11164_v20  ;;  %vm8896_vm8 = vcmask 261120  }
 0x22a   :  { %7747 = vmatprep.mubr.f32.mxu1 %v14601_v15  ;;  %v6201_v37 = vmax.f32 %v6197_v10, 0.0  ;;  %v6340_v49 = vadd.f32 %v6336_v56, %v6321_v21  ;;  %v6483_v10 = vmul.f32 %v6474_v24, %v12697_v44  ;;  %v6608_v21 = vrot.slane %v6510_v3, %v11167_v18 }
 0x22b   :  { %v6202_v6 = vmax.f32 %v6198_v43, 0.0  ;;  %v6341_v14 = vadd.f32 %v6337_v12, %v6322_v7 }
 0x22c   :  { %9343 = vmatmul.mubr.msk.f32.gmra.mrb[120].mxu0 %vm4622_vm4, %v12839_v46  ;;  %v9622_v22 = vpack.c.bf16 %v6201_v37, %v6199_v30  ;;  %9347 = vmatmul.mubr.msk.f32.gmra.mrb[112].mxu1 %vm4622_vm4, %v12777_v16  ;;  %v6305_v60 = vpop.f32.mrb[86].mxu0  ;;  %v6344_v34 = vmax.f32 %v6340_v49, 0.0  ;;  %v6484_v37 = vmul.f32 %v6478_v53, %v12697_v44 }
 0x22d   :  { %7507 = vmatprep.mubr.f32.mxu0 %v14601_v15  ;;  %7753 = vmatprep.mubr.f32.mxu1 %v14601_v15  ;;  %v9620_v58 = vpack.c.bf16 %v6202_v6, %v6200_v35  ;;  %v6323_v26 = vmul.f32 %v6314_v40, %v6305_v60  ;;  %v6307_v17 = vpop.f32.mrb[87].mxu0  ;;  %v6345_v28 = vmax.f32 %v6341_v14, 0.0 }
 0x22e   :  { %v6324_v62 = vmul.f32 %v6318_v23, %v6307_v17  ;;  %v14755_v23 = vld [vmem:[#allocation133_spill] sm:$0xff] }
 0x22f   :  { %9621 = vmatprep.subr.bf16.mxu0 %v9620_v58  ;;  %v6342_v19 = vadd.f32 %v6338_v33, %v6323_v26  ;;  %9625 = vmatprep.subr.bf16.mxu1 %v9620_v58  ;;  %v6444_v50 = vpop.f32.mrb[84].mxu1  ;;  %v6619_v27 = vrot.slane %v14755_v23, %v11164_v20  ;;  %v6623_v56 = vrot.slane %v14755_v23, %v11167_v18  ;;  %v9772_v0 = vpop.eup %9771 }
 0x230   :  { %9344 = vmatmul.mubr.msk.f32.gmra.mrb[122].mxu0 %vm4622_vm4, %v12855_v32  ;;  %9348 = vmatmul.mubr.msk.f32.gmra.mrb[114].mxu1 %vm4622_vm4, %v12789_v52  ;;  %v6343_v63 = vadd.f32 %v6339_v4, %v6324_v62  ;;  %v6466_v48 = vmul.f32 %v6459_v36, %v6444_v50  ;;  %v6446_v1 = vpop.f32.mrb[85].mxu1  ;;  %v6655_v24 = vsel %vm14756_vm3, 0.0, %v9772_v0  ;;  %v14757_v4 = vld [vmem:[#allocation136_spill] sm:$0xff] }
 0x231   :  { %9623 = vmatpush1.bf16.msra.mxu0 %v9622_v22  ;;  %9627 = vmatpush1.bf16.msra.mxu1 %v9622_v22  ;;  %v6346_v45 = vmax.f32 %v6342_v19, 0.0  ;;  %v6467_v9 = vmul.f32 %v6463_v61, %v6446_v1  ;;  %v6626_v7 = vmul.f32 %v6619_v27, %v12690_v2  ;;  %v6627_v60 = vmul.f32 %v6623_v56, %v12690_v2 }
 0x232   :  { %7759 = vmatprep.mubr.f32.mxu1 %v14601_v15  ;;  %8005 = vmatprep.mubr.f32.mxu0 %v14601_v15  ;;  %v6347_v25 = vmax.f32 %v6343_v63, 0.0  ;;  %v6485_v42 = vadd.f32 %v6481_v59, %v6466_v48  ;;  %v6628_v54 = vmul.f32 %v6619_v27, %v12697_v44  ;;  %v6629_v63 = vmul.f32 %v6623_v56, %v12697_v44 }
 0x233   :  { %v9630_v13 = vpack.c.bf16 %v6346_v45, %v6344_v34  ;;  %v6486_v40 = vadd.f32 %v6482_v41, %v6467_v9  ;;  %v6450_v11 = vpop.f32.mrb[86].mxu1  ;;  %v6749_v50 = vrot.slane %v6655_v24, %v11164_v20  ;;  %v6753_v34 = vrot.slane %v6655_v24, %v11167_v18  ;;  %v13088_v24 = vpop.permute.xlu0 %6995 }
 0x234   :  { %9349 = vmatmul.mubr.msk.f32.gmra.mrb[116].mxu1 %vm4622_vm4, %v12805_v51  ;;  %9353 = vmatmul.mubr.msk.f32.vlgmr.msra.gmra.mrb[124].mxu0 %vm4622_vm4, %v12748_v47  ;;  %v9628_v29 = vpack.c.bf16 %v6347_v25, %v6345_v28  ;;  %v6468_v57 = vmul.f32 %v6459_v36, %v6450_v11  ;;  %v6452_v43 = vpop.f32.mrb[87].mxu1  ;;  %v6489_v31 = vmax.f32 %v6485_v42, 0.0  ;;  %v6768_v45 = vrot.slane %v14757_v4, %v11167_v18 }
 0x235   :  { %7765 = vmatprep.mubr.f32.mxu1 %v14601_v15  ;;  %8011 = vmatprep.mubr.f32.mxu0 %v14601_v15  ;;  %v6469_v30 = vmul.f32 %v6463_v61, %v6452_v43  ;;  %v6490_v33 = vmax.f32 %v6486_v40, 0.0  ;;  %v6764_v61 = vrot.slane %v14757_v4, %v11164_v20  ;;  %v7918_v4 = vld [vmem:[#allocation5 + $0x10] ss:$8 sm:$0x3] }
 0x236   :  { %9629 = vmatprep.subr.bf16.mxu1 %v9628_v29  ;;  %v6487_v12 = vadd.f32 %v6483_v10, %v6468_v57  ;;  %v6772_v29 = vmul.f32 %v6768_v45, %v12690_v2 }
 0x237   :  { %v6488_v35 = vadd.f32 %v6484_v37, %v6469_v30  ;;  %9631 = vmatpush1.bf16.msra.mxu1 %v9630_v13  ;;  %v6771_v3 = vmul.f32 %v6764_v61, %v12690_v2  ;;  %v6773_v56 = vmul.f32 %v6764_v61, %v12697_v44  ;;  %v6774_v37 = vmul.f32 %v6768_v45, %v12697_v44  ;;  %v8458_v45 = vld [vmem:[#allocation5 + $0x14] ss:$8 sm:$0x3] }
 0x238   :  { %9350 = vmatmul.mubr.msk.f32.gmra.mrb[118].mxu1 %vm4622_vm4, %v12820_v8  ;;  %9354 = vmatmul.mubr.msk.f32.gmra.mrb[126].mxu0 %vm4622_vm4, %v12760_v5  ;;  %v6589_v6 = vpop.f32.mrb[88].mxu0  ;;  %v6491_v22 = vmax.f32 %v6487_v12, 0.0 }
 0x239   :  { %7771 = vmatprep.mubr.f32.mxu1 %v14601_v15  ;;  %v6611_v49 = vmul.f32 %v6604_v55, %v6589_v6  ;;  %v6591_v14 = vpop.f32.mrb[89].mxu0  ;;  %8017 = vmatprep.mubr.f32.mxu0 %v14601_v15  ;;  %v6492_v58 = vmax.f32 %v6488_v35, 0.0 }
 0x23a   :  { %v6612_v38 = vmul.f32 %v6608_v21, %v6591_v14  ;;  %v9634_v26 = vpack.c.bf16 %v6491_v22, %v6489_v31  ;;  %v7378_v14 = vld [vmem:[#allocation5 + $0x4] ss:$8 sm:$0x3] }
 0x23b   :  { %v6630_v17 = vadd.f32 %v6626_v7, %v6611_v49  ;;  %v9632_v62 = vpack.c.bf16 %v6492_v58, %v6490_v33  ;;  %v7379_v49 = vld [vmem:[#allocation5 + $0x5] ss:$8 sm:$0x3] }
 0x23c   :  { %9351 = vmatmul.mubr.msk.f32.gmra.mrb[120].mxu1 %vm4622_vm4, %v12839_v46  ;;  %9355 = vmatmul.mubr.msk.f32.gmra.mrb[128].mxu0 %vm4622_vm4, %v12777_v16  ;;  %v6631_v36 = vadd.f32 %v6627_v60, %v6612_v38  ;;  %v6595_v53 = vpop.f32.mrb[90].mxu0  ;;  %v7381_v58 = vadd.f32 %v7379_v49, %v7378_v14  ;;  %v7380_v38 = vld [vmem:[#allocation5 + $0x6] ss:$8 sm:$0x3] }
 0x23d   :  { %7777 = vmatprep.mubr.f32.mxu1 %v14601_v15  ;;  %8023 = vmatprep.mubr.f32.mxu0 %v14601_v15  ;;  %v6613_v39 = vmul.f32 %v6604_v55, %v6595_v53  ;;  %v6597_v19 = vpop.f32.mrb[91].mxu0  ;;  %v6634_v28 = vmax.f32 %v6630_v17, 0.0  ;;  %v7648_v17 = vld [vmem:[#allocation5 + $0x6] ss:$8 sm:$0x3] }
 0x23e   :  { %v6614_v59 = vmul.f32 %v6608_v21, %v6597_v19  ;;  %9633 = vmatprep.subr.bf16.mxu1 %v9632_v62  ;;  %9637 = vmatprep.subr.bf16.mxu0 %v9632_v62  ;;  %v6635_v42 = vmax.f32 %v6631_v36, 0.0  ;;  %v7919_v53 = vld [vmem:[#allocation5 + $0x11] ss:$8 sm:$0x3] }
 0x23f   :  { %v6632_v48 = vadd.f32 %v6628_v54, %v6613_v39  ;;  %9635 = vmatpush1.bf16.msra.mxu1 %v9634_v26  ;;  %9639 = vmatpush1.bf16.msra.mxu0 %v9634_v26  ;;  %v6734_v41 = vpop.f32.mrb[88].mxu1  ;;  %v7650_v39 = vld [vmem:[#allocation5 + $0x10] ss:$8 sm:$0x3] }
 0x240   :  { %9352 = vmatmul.mubr.msk.f32.gmra.mrb[122].mxu1 %vm4622_vm4, %v12855_v32  ;;  %9356 = vmatmul.mubr.msk.f32.gmra.mrb[130].mxu0 %vm4622_vm4, %v12789_v52  ;;  %v6633_v1 = vadd.f32 %v6629_v63, %v6614_v59  ;;  %v6756_v9 = vmul.f32 %v6749_v50, %v6734_v41  ;;  %v6736_v13 = vpop.f32.mrb[89].mxu1  ;;  %v8189_v54 = vld [vmem:[#allocation5 + $0x13] ss:$8 sm:$0x3]  ;;  %v13094_v63 = vpop.permute.xlu0 %7005 }
 0x241   :  { %v6636_v25 = vmax.f32 %v6632_v48, 0.0  ;;  %8029 = vmatprep.mubr.f32.mxu0 %v14601_v15  ;;  %8275 = vmatprep.mubr.f32.mxu1 %v14601_v15  ;;  %v6757_v11 = vmul.f32 %v6753_v34, %v6736_v13  ;;  %v8188_v19 = vld [vmem:[#allocation5 + $0x12] ss:$8 sm:$0x3] }
 0x242   :  { %v6637_v40 = vmax.f32 %v6633_v1, 0.0  ;;  %v6775_v27 = vadd.f32 %v6771_v3, %v6756_v9  ;;  %v7920_v59 = vld [vmem:[#allocation5 + $0x12] ss:$8 sm:$0x3]  ;;  %v8191_v41 = vadd.f32 %v8189_v54, %v8188_v19 }
 0x243   :  { %v9642_v23 = vpack.c.bf16 %v6636_v25, %v6634_v28  ;;  %v6776_v57 = vadd.f32 %v6772_v29, %v6757_v11  ;;  %v6740_v10 = vpop.f32.mrb[90].mxu1  ;;  %v8459_v48 = vld [vmem:[#allocation5 + $0x15] ss:$8 sm:$0x3]  ;;  %v14758_v28 = vmov 1.0  }
 0x244   :  { %9357 = vmatmul.mubr.msk.f32.gmra.mrb[132].mxu0 %vm4622_vm4, %v12805_v51  ;;  %9361 = vmatmul.mubr.msk.f32.vlgmr.msra.gmra.mrb[124].mxu1 %vm4622_vm4, %v12748_v47  ;;  %v9640_v43 = vpack.c.bf16 %v6637_v40, %v6635_v42  ;;  %v6758_v55 = vmul.f32 %v6749_v50, %v6740_v10  ;;  %v6742_v30 = vpop.f32.mrb[91].mxu1  ;;  %v6779_v12 = vmax.f32 %v6775_v27, 0.0  ;;  %v8190_v9 = vld [vmem:[#allocation5 + $0x14] ss:$8 sm:$0x3]  ;;  %v8461_v13 = vadd.f32 %v8459_v48, %v8458_v45  ;;  %v13109_v29 = vpop.permute.xlu0 %7015 }
 0x245   :  { %8035 = vmatprep.mubr.f32.mxu0 %v14601_v15  ;;  %8281 = vmatprep.mubr.f32.mxu1 %v14601_v15  ;;  %v6759_v2 = vmul.f32 %v6753_v34, %v6742_v30  ;;  %v6780_v6 = vmax.f32 %v6776_v57, 0.0  ;;  %v7921_v34 = vadd.f32 %v7919_v53, %v7918_v4  ;;  %v8460_v11 = vld [vmem:[#allocation5 + $0x16] ss:$8 sm:$0x3]  ;;  %14759 = vst [vmem:[#allocation32_spill] sm:$0xff] %v13109_v29 }
 0x246   :  { %9641 = vmatprep.subr.bf16.mxu0 %v9640_v43  ;;  %v6777_v21 = vadd.f32 %v6773_v56, %v6758_v55  ;;  %v8192_v27 = vadd.f32 %v8191_v41, %v8190_v9  ;;  %v8462_v56 = vadd.f32 %v8461_v13, %v8460_v11 }
 0x247   :  { %v6778_v0 = vadd.f32 %v6774_v37, %v6759_v2  ;;  %9643 = vmatpush1.bf16.msra.mxu0 %v9642_v23  ;;  %v7922_v3 = vadd.f32 %v7921_v34, %v7920_v59  ;;  %v13129_v2 = vpop.permute.xlu1 %7000 }
 0x248   :  { %9358 = vmatmul.mubr.msk.f32.gmra.mrb[134].mxu0 %vm4622_vm4, %v12820_v8  ;;  %9362 = vmatmul.mubr.msk.f32.gmra.mrb[126].mxu1 %vm4622_vm4, %v12760_v5  ;;  %v6781_v35 = vmax.f32 %v6777_v21, 0.0 }
 0x249   :  { %8041 = vmatprep.mubr.f32.mxu0 %v14601_v15  ;;  %8287 = vmatprep.mubr.f32.mxu1 %v14601_v15  ;;  %v6782_v7 = vmax.f32 %v6778_v0, 0.0  ;;  %v13123_v55 = vmul.f32 16.0, %v7922_v3 }
 0x24a   :  { %v9646_v31 = vpack.c.bf16 %v6781_v35, %v6779_v12  ;;  %v13141_v12 = vmul.f32 16.0, %v8192_v27 }
 0x24b   :  { %v9644_v44 = vpack.c.bf16 %v6782_v7, %v6780_v6  ;;  %vm7924_vm10 = vcmp.eq.f32.partialorder %v13123_v55, 0.0 }
 0x24c   :  { %9359 = vmatmul.mubr.msk.f32.gmra.mrb[136].mxu0 %vm4622_vm4, %v12839_v46  ;;  %9363 = vmatmul.mubr.msk.f32.gmra.mrb[128].mxu1 %vm4622_vm4, %v12777_v16  ;;  %vm8194_vm11 = vcmp.eq.f32.partialorder %v13141_v12, 0.0 }
 0x24d   :  { %8047 = vmatprep.mubr.f32.mxu0 %v14601_v15  ;;  %8293 = vmatprep.mubr.f32.mxu1 %v14601_v15  ;;  %v8195_v54 = vsel %vm8194_vm11, 0.0, %v14758_v28 }
 0x24e   :  { %9645 = vmatprep.subr.bf16.mxu0 %v9644_v44  ;;  %v13159_v44 = vpop.permute.xlu0 %7025 }
 0x24f   :  { %9647 = vmatpush1.bf16.msra.mxu0 %v9646_v31  ;;  %14760 = vst [vmem:[#allocation85_spill] sm:$0xff] %v13159_v44 }
 0x250   :  { %9360 = vmatmul.mubr.msk.f32.gmra.mrb[138].mxu0 %vm4622_vm4, %v12855_v32  ;;  %9364 = vmatmul.mubr.msk.f32.gmra.mrb[130].mxu1 %vm4622_vm4, %v12789_v52 }
 0x251   :  { %8299 = vmatprep.mubr.f32.mxu1 %v14601_v15  ;;  %8545 = vmatprep.mubr.f32.mxu0 %v14601_v15 }
 0x254   :  { %9365 = vmatmul.mubr.msk.f32.gmra.mrb[132].mxu1 %vm4622_vm4, %v12805_v51  ;;  %9369 = vmatmul.mubr.msk.f32.vlgmr.msra.gmra.mrb[140].mxu0 %vm4622_vm4, %v12748_v47  ;;  %v6806_v47 = vld [vmem:[#allocation5] ss:$8 sm:$0x3] }
 0x255   :  { %8305 = vmatprep.mubr.f32.mxu1 %v14601_v15  ;;  %8551 = vmatprep.mubr.f32.mxu0 %v14601_v15 }
 0x258   :  { %9366 = vmatmul.mubr.msk.f32.gmra.mrb[134].mxu1 %vm4622_vm4, %v12820_v8  ;;  %9370 = vmatmul.mubr.msk.f32.gmra.mrb[142].mxu0 %vm4622_vm4, %v12760_v5  ;;  %v6807_v5 = vld [vmem:[#allocation5 + $0x1] ss:$8 sm:$0x3] }
 0x259   :  { %8311 = vmatprep.mubr.f32.mxu1 %v14601_v15  ;;  %8557 = vmatprep.mubr.f32.mxu0 %v14601_v15  ;;  %v6809_v22 = vadd.f32 %v6807_v5, %v6806_v47 }
 0x25c   :  { %9367 = vmatmul.mubr.msk.f32.gmra.mrb[136].mxu1 %vm4622_vm4, %v12839_v46  ;;  %9371 = vmatmul.mubr.msk.f32.gmra.mrb[144].mxu0 %vm4622_vm4, %v12777_v16  ;;  %v7109_v16 = vld [vmem:[#allocation5 + $0x3] ss:$8 sm:$0x3] }
 0x25d   :  { %8317 = vmatprep.mubr.f32.mxu1 %v14601_v15  ;;  %8563 = vmatprep.mubr.f32.mxu0 %v14601_v15 }
 0x260   :  { %9368 = vmatmul.mubr.msk.f32.gmra.mrb[138].mxu1 %vm4622_vm4, %v12855_v32  ;;  %9372 = vmatmul.mubr.msk.f32.gmra.mrb[146].mxu0 %vm4622_vm4, %v12789_v52  ;;  %v7108_v52 = vld [vmem:[#allocation5 + $0x2] ss:$8 sm:$0x3] }
 0x261   :  { %8569 = vmatprep.mubr.f32.mxu0 %v14601_v15  ;;  %8849 = vmatprep.mubr.f32.mxu1 %v14601_v15  ;;  %v7111_v60 = vadd.f32 %v7109_v16, %v7108_v52  ;;  %v13169_v16 = vmul.f32 16.0, %v8462_v56 }
 0x263   :  { %vm8464_vm15 = vcmp.eq.f32.partialorder %v13169_v16, 0.0 }
 0x264   :  { %9373 = vmatmul.mubr.msk.f32.gmra.mrb[148].mxu0 %vm4622_vm4, %v12805_v51  ;;  %v6808_v51 = vld [vmem:[#allocation5 + $0x2] ss:$8 sm:$0x3] }
 0x265   :  { %8575 = vmatprep.mubr.f32.mxu0 %v14601_v15  ;;  %v6810_v33 = vadd.f32 %v6809_v22, %v6808_v51 }
 0x267   :  { %v13090_v36 = vmul.f32 16.0, %v6810_v33 }
 0x268   :  { %9374 = vmatmul.mubr.msk.f32.gmra.mrb[150].mxu0 %vm4622_vm4, %v12820_v8  ;;  %v7110_v8 = vld [vmem:[#allocation5 + $0x4] ss:$8 sm:$0x3] }
 0x269   :  { %8581 = vmatprep.mubr.f32.mxu0 %v14601_v15  ;;  %v7112_v26 = vadd.f32 %v7111_v60, %v7110_v8  ;;  %vm6812_vm6 = vcmp.eq.f32.partialorder %v13090_v36, 0.0  ;;  %9773 = vrcp.f32 %v13090_v36 }
 0x26a   :  { %v6813_v25 = vsel %vm6812_vm6, 0.0, %v14758_v28 }
 0x26b   :  { %v13092_v61 = vmul.f32 16.0, %v7112_v26  ;;  %v13112_v23 = vrot.slane %v6813_v25, %v11164_v20  ;;  %v13115_v57 = vrot.slane %v6813_v25, %v11167_v18  ;;  %v13214_v26 = vpop.permute.xlu1 %7010  ;;  %v8465_v25 = vsel %vm8464_vm15, 0.0, %v14758_v28 }
 0x26c   :  { %9375 = vmatmul.mubr.msk.f32.gmra.mrb[152].mxu0 %vm4622_vm4, %v12839_v46  ;;  %v7649_v46 = vld [vmem:[#allocation5 + $0x7] ss:$8 sm:$0x3] }
 0x26d   :  { %8587 = vmatprep.mubr.f32.mxu0 %v14601_v15  ;;  %v7651_v62 = vadd.f32 %v7649_v46, %v7648_v17  ;;  %vm7114_vm5 = vcmp.eq.f32.partialorder %v13092_v61, 0.0  ;;  %v13133_v37 = vmul.f32 %v13112_v23, %v13088_v24  ;;  %v13145_v35 = vmul.f32 %v13115_v57, %v13088_v24 }
 0x26e   :  { %v7115_v42 = vsel %vm7114_vm5, 0.0, %v14758_v28  ;;  %v13149_v6 = vmul.f32 %v13112_v23, %v13094_v63  ;;  %v13153_v7 = vmul.f32 %v13115_v57, %v13094_v63  ;;  %v13157_v31 = vmul.f32 %v13112_v23, %v13109_v29 }
 0x26f   :  { %v7652_v1 = vadd.f32 %v7651_v62, %v7650_v39  ;;  %v13121_v43 = vrot.slane %v7115_v42, %v11164_v20  ;;  %v13126_v30 = vrot.slane %v7115_v42, %v11167_v18  ;;  %v13173_v52 = vmul.f32 %v13115_v57, %v13109_v29  ;;  %v13302_v56 = vpop.permute.xlu1 %7020 }
 0x270   :  { %9376 = vmatmul.mubr.msk.f32.gmra.mrb[154].mxu0 %vm4622_vm4, %v12855_v32  ;;  %v7382_v32 = vadd.f32 %v7381_v58, %v7380_v38  ;;  %v13181_v22 = vmul.f32 %v13112_v23, %v13159_v44  ;;  %v13189_v14 = vmul.f32 %v13115_v57, %v13159_v44  ;;  %v7925_v46 = vsel %vm7924_vm10, 0.0, %v14758_v28  ;;  %14776 = vst [vmem:[#allocation31_spill] sm:$0xff] %v13302_v56 }
 0x271   :  { %v13107_v40 = vmul.f32 16.0, %v7652_v1  ;;  %v13163_v47 = vmul.f32 %v13121_v43, %v13088_v24  ;;  %v13177_v51 = vmul.f32 %v13126_v30, %v13088_v24  ;;  %v13185_v49 = vmul.f32 %v13121_v43, %v13094_v63 }
 0x272   :  { %v13097_v50 = vmul.f32 16.0, %v7382_v32  ;;  %v13193_v60 = vmul.f32 %v13126_v30, %v13094_v63  ;;  %v13197_v8 = vmul.f32 %v13121_v43, %v13109_v29  ;;  %v13206_v58 = vmul.f32 %v13126_v30, %v13109_v29 }
 0x273   :  { %vm7654_vm9 = vcmp.eq.f32.partialorder %v13107_v40, 0.0  ;;  %v13222_v32 = vmul.f32 %v13121_v43, %v13159_v44  ;;  %v13234_v4 = vmul.f32 %v13126_v30, %v13159_v44  ;;  %v13252_v34 = vrot.slane %v7925_v46, %v11164_v20 }
 0x274   :  { %vm7384_vm7 = vcmp.eq.f32.partialorder %v13097_v50, 0.0  ;;  %v7655_v5 = vsel %vm7654_vm9, 0.0, %v14758_v28  ;;  %v13255_v45 = vrot.slane %v7925_v46, %v11167_v18  ;;  %v13285_v42 = vrot.slane %v8195_v54, %v11164_v20 }
 0x275   :  { %v7385_v10 = vsel %vm7384_vm7, 0.0, %v14758_v28  ;;  %v13209_v38 = vrot.slane %v7655_v5, %v11164_v20  ;;  %14761 = vst [vmem:[#allocation12_spill] sm:$0xff] %v13222_v32  ;;  %v13225_v53 = vrot.slane %v7655_v5, %v11167_v18  ;;  %14763 = vst [vmem:[#allocation25_spill] sm:$0xff] %v13234_v4  ;;  %v13306_v5 = vmul.f32 %v13252_v34, %v13088_v24 }
 0x276   :  { %v13136_v21 = vrot.slane %v7385_v10, %v11164_v20  ;;  %v13139_v0 = vrot.slane %v7385_v10, %v11167_v18  ;;  %v13300_v10 = vrot.slane %v8195_v54, %v11167_v18  ;;  %v13310_v46 = vmul.f32 %v13255_v45, %v13088_v24 }
 0x277   :  { %v13259_v48 = vmul.f32 %v13209_v38, %v13088_v24  ;;  %v13274_v9 = vmul.f32 %v13225_v53, %v13088_v24  ;;  %v13278_v3 = vmul.f32 %v13209_v38, %v13094_v63  ;;  %v13282_v13 = vmul.f32 %v13225_v53, %v13094_v63  ;;  %14777 = vst [vmem:[#allocation33_spill] sm:$0xff] %v13306_v5 }
 0x278   :  { %v13202_v33 = vmul.f32 %v13136_v21, %v13088_v24  ;;  %v13218_v17 = vmul.f32 %v13139_v0, %v13088_v24  ;;  %v13230_v62 = vmul.f32 %v13136_v21, %v13094_v63  ;;  %v13238_v39 = vmul.f32 %v13139_v0, %v13094_v63  ;;  %14778 = vst [vmem:[#allocation102_spill] sm:$0xff] %v13310_v46 }
 0x279   :  { %v13245_v19 = vmul.f32 %v13136_v21, %v13109_v29  ;;  %v13249_v59 = vmul.f32 %v13139_v0, %v13109_v29  ;;  %14767 = vst [vmem:[#allocation27_spill] sm:$0xff] %v13259_v48  ;;  %v13263_v1 = vmul.f32 %v13136_v21, %v13159_v44  ;;  %v13267_v41 = vmul.f32 %v13139_v0, %v13159_v44 }
 0x27a   :  { %14762 = vst [vmem:[#allocation132_spill] sm:$0xff] %v13230_v62  ;;  %14764 = vst [vmem:[#allocation26_spill] sm:$0xff] %v13238_v39  ;;  %v13289_v11 = vmul.f32 %v13209_v38, %v13109_v29  ;;  %v13293_v28 = vmul.f32 %v13225_v53, %v13109_v29  ;;  %v13297_v27 = vmul.f32 %v13209_v38, %v13159_v44  ;;  %9775 = vrcp.f32 %v13092_v61 }
 0x27b   :  { %14765 = vst [vmem:[#allocation13_spill] sm:$0xff] %v13245_v19  ;;  %14766 = vst [vmem:[#allocation134_spill] sm:$0xff] %v13249_v59  ;;  %v13313_v15 = vrot.slane %v8465_v25, %v11164_v20  ;;  %v13321_v54 = vmul.f32 %v13252_v34, %v13094_v63  ;;  %v13329_v5 = vmul.f32 %v13255_v45, %v13094_v63  ;;  %9777 = vrcp.f32 %v13097_v50 }
 0x27c   :  { %14768 = vst [vmem:[#allocation28_spill] sm:$0xff] %v13263_v1  ;;  %14769 = vst [vmem:[#allocation87_spill] sm:$0xff] %v13267_v41  ;;  %v13333_v46 = vmul.f32 %v13252_v34, %v13109_v29  ;;  %v13420_v41 = vmul.f32 %v13126_v30, %v13129_v2  ;;  %v13428_v1 = vmul.f32 %v13121_v43, %v13214_v26  ;;  %9779 = vrcp.f32 %v13107_v40 }
 0x27d   :  { %14770 = vst [vmem:[#allocation15_spill] sm:$0xff] %v13274_v9  ;;  %14771 = vst [vmem:[#allocation135_spill] sm:$0xff] %v13278_v3  ;;  %v13436_v59 = vmul.f32 %v13126_v30, %v13214_v26  ;;  %v13441_v19 = vmul.f32 %v13121_v43, %v13302_v56  ;;  %v13449_v39 = vmul.f32 %v13126_v30, %v13302_v56  ;;  %9781 = vrcp.f32 %v13123_v55 }
 0x27e   :  { %14772 = vst [vmem:[#allocation29_spill] sm:$0xff] %v13282_v13  ;;  %14773 = vst [vmem:[#allocation30_spill] sm:$0xff] %v13289_v11  ;;  %v13341_v11 = vmul.f32 %v13255_v45, %v13109_v29  ;;  %v13407_v13 = vmul.f32 %v13112_v23, %v13302_v56  ;;  %v13454_v4 = vmul.f32 %v13139_v0, %v13129_v2  ;;  %9783 = vrcp.f32 %v13141_v12 }
 0x27f   :  { %14774 = vst [vmem:[#allocation137_spill] sm:$0xff] %v13293_v28  ;;  %14775 = vst [vmem:[#allocation138_spill] sm:$0xff] %v13297_v27  ;;  %v13316_v28 = vrot.slane %v8465_v25, %v11167_v18  ;;  %v13325_v27 = vmul.f32 %v13225_v53, %v13159_v44  ;;  %v13337_v25 = vmul.f32 %v13285_v42, %v13088_v24  ;;  %9785 = vrcp.f32 %v13169_v16 }
 0x280   :  { %14779 = vst [vmem:[#allocation139_spill] sm:$0xff] %v13313_v15  ;;  %14781 = vst [vmem:[#allocation34_spill] sm:$0xff] %v13321_v54  ;;  %v13345_v54 = vmul.f32 %v13252_v34, %v13159_v44  ;;  %v13462_v32 = vmul.f32 %v13136_v21, %v13214_v26  ;;  %v13530_v36 = vmul.f32 %v13252_v34, %v13214_v26  ;;  %vm8991_vm4 = vcmask 130048  }
 0x281   :  { %14780 = vst [vmem:[#allocation140_spill] sm:$0xff] %v13316_v28  ;;  %14782 = vst [vmem:[#allocation9_spill] sm:$0xff] %v13325_v27  ;;  %v13349_v27 = vmul.f32 %v13300_v10, %v13088_v24 }
 0x282   :  { %14783 = vst [vmem:[#allocation35_spill] sm:$0xff] %v13329_v5  ;;  %14784 = vst [vmem:[#allocation143_spill] sm:$0xff] %v13333_v46  ;;  %v13353_v5 = vmul.f32 %v13285_v42, %v13094_v63  ;;  %v13357_v46 = vmul.f32 %v13255_v45, %v13159_v44 }
 0x283   :  { %14785 = vst [vmem:[#allocation141_spill] sm:$0xff] %v13337_v25  ;;  %14786 = vst [vmem:[#allocation142_spill] sm:$0xff] %v13341_v11  ;;  %v13361_v25 = vmul.f32 %v13300_v10, %v13094_v63  ;;  %v13365_v11 = vmul.f32 %v13285_v42, %v13109_v29 }
 0x284   :  { %14787 = vst [vmem:[#allocation144_spill] sm:$0xff] %v13345_v54  ;;  %14788 = vst [vmem:[#allocation145_spill] sm:$0xff] %v13349_v27  ;;  %v13369_v54 = vmul.f32 %v13313_v15, %v13088_v24  ;;  %v13373_v27 = vmul.f32 %v13300_v10, %v13109_v29 }
 0x285   :  { %14789 = vst [vmem:[#allocation146_spill] sm:$0xff] %v13353_v5  ;;  %14790 = vst [vmem:[#allocation147_spill] sm:$0xff] %v13357_v46  ;;  %v13377_v5 = vmul.f32 %v13316_v28, %v13088_v24  ;;  %v13381_v46 = vmul.f32 %v13112_v23, %v13129_v2  ;;  %v13399_v24 = vmul.f32 %v13112_v23, %v13214_v26 }
 0x286   :  { %14791 = vst [vmem:[#allocation14_spill] sm:$0xff] %v13361_v25  ;;  %14792 = vst [vmem:[#allocation38_spill] sm:$0xff] %v13365_v11  ;;  %v13385_v25 = vmul.f32 %v13115_v57, %v13129_v2  ;;  %v13389_v11 = vmul.f32 %v13285_v42, %v13159_v44 }
 0x287   :  { %14793 = vst [vmem:[#allocation151_spill] sm:$0xff] %v13369_v54  ;;  %14794 = vst [vmem:[#allocation148_spill] sm:$0xff] %v13373_v27  ;;  %v13393_v54 = vmul.f32 %v13313_v15, %v13094_v63  ;;  %v13395_v27 = vpop.permute.xlu1 %7030 }
 0x288   :  { %14795 = vst [vmem:[#allocation150_spill] sm:$0xff] %v13377_v5  ;;  %14796 = vst [vmem:[#allocation109_spill] sm:$0xff] %v13389_v11  ;;  %v13403_v5 = vmul.f32 %v13115_v57, %v13214_v26  ;;  %v13411_v11 = vmul.f32 %v13121_v43, %v13129_v2  ;;  %v13424_v3 = vmul.f32 %v13112_v23, %v13395_v27 }
 0x289   :  { %14797 = vst [vmem:[#allocation149_spill] sm:$0xff] %v13393_v54  ;;  %14798 = vst [vmem:[#allocation152_spill] sm:$0xff] %v13395_v27  ;;  %v13416_v54 = vmul.f32 %v13115_v57, %v13302_v56  ;;  %v13432_v9 = vmul.f32 %v13115_v57, %v13395_v27  ;;  %v13445_v23 = vmul.f32 %v13136_v21, %v13129_v2 }
 0x28a   :  { %14799 = vst [vmem:[#allocation39_spill] sm:$0xff] %v13441_v19  ;;  %14801 = vst [vmem:[#allocation21_spill] sm:$0xff] %v13449_v39  ;;  %v13458_v62 = vmul.f32 %v13121_v43, %v13395_v27  ;;  %v13467_v39 = vmul.f32 %v13126_v30, %v13395_v27  ;;  %v13471_v19 = vmul.f32 %v13139_v0, %v13214_v26 }
 0x28b   :  { %14800 = vst [vmem:[#allocation154_spill] sm:$0xff] %v13445_v23  ;;  %14802 = vst [vmem:[#allocation153_spill] sm:$0xff] %v13454_v4  ;;  %v9774_v23 = vpop.eup %9773  ;;  %v13475_v4 = vmul.f32 %v13136_v21, %v13302_v56  ;;  %v13480_v43 = vmul.f32 %v13209_v38, %v13129_v2  ;;  %v13488_v30 = vmul.f32 %v13225_v53, %v13129_v2 }
 0x28c   :  { %14803 = vst [vmem:[#allocation22_spill] sm:$0xff] %v13458_v62  ;;  %14804 = vst [vmem:[#allocation155_spill] sm:$0xff] %v13462_v32  ;;  %v13484_v32 = vmul.f32 %v13139_v0, %v13302_v56  ;;  %v13514_v62 = vmul.f32 %v13252_v34, %v13129_v2 }
 0x28d   :  { %14805 = vst [vmem:[#allocation16_spill] sm:$0xff] %v13467_v39  ;;  %14806 = vst [vmem:[#allocation40_spill] sm:$0xff] %v13471_v19  ;;  %v13492_v19 = vmul.f32 %v13136_v21, %v13395_v27  ;;  %v6816_v21 = vsel %vm6812_vm6, 0.0, %v9774_v23  ;;  %v13534_v23 = vmul.f32 %v13225_v53, %v13395_v27 }
 0x28e   :  { %14807 = vst [vmem:[#allocation156_spill] sm:$0xff] %v13475_v4  ;;  %14808 = vst [vmem:[#allocation158_spill] sm:$0xff] %v13480_v43  ;;  %v13496_v4 = vmul.f32 %v13209_v38, %v13214_v26  ;;  %v13500_v43 = vmul.f32 %v13139_v0, %v13395_v27  ;;  %v13518_v0 = vmul.f32 %v13225_v53, %v13302_v56 }
 0x28f   :  { %14809 = vst [vmem:[#allocation116_spill] sm:$0xff] %v13484_v32  ;;  %14810 = vst [vmem:[#allocation157_spill] sm:$0xff] %v13488_v30  ;;  %v13504_v32 = vmul.f32 %v13225_v53, %v13214_v26  ;;  %v13508_v30 = vmul.f32 %v13209_v38, %v13302_v56  ;;  %v13554_v53 = vmul.f32 %v13313_v15, %v13109_v29 }
 0x290   :  { %14811 = vst [vmem:[#allocation159_spill] sm:$0xff] %v13492_v19  ;;  %14812 = vst [vmem:[#allocation17_spill] sm:$0xff] %v13500_v43  ;;  %v13522_v43 = vmul.f32 %v13255_v45, %v13129_v2  ;;  %v13576_v29 = vmul.f32 %v13252_v34, %v13395_v27 }
 0x291   :  { %14813 = vst [vmem:[#allocation41_spill] sm:$0xff] %v13504_v32  ;;  %14814 = vst [vmem:[#allocation23_spill] sm:$0xff] %v13508_v30  ;;  %v13526_v32 = vmul.f32 %v13209_v38, %v13395_v27  ;;  %v13546_v38 = vmul.f32 %v13300_v10, %v13159_v44  ;;  %v13564_v44 = vmul.f32 %v13285_v42, %v13129_v2 }
 0x292   :  { %14815 = vst [vmem:[#allocation42_spill] sm:$0xff] %v13514_v62  ;;  %14816 = vst [vmem:[#allocation160_spill] sm:$0xff] %v13518_v0  ;;  %v13538_v62 = vmul.f32 %v13255_v45, %v13214_v26  ;;  %v13542_v0 = vmul.f32 %v13252_v34, %v13302_v56  ;;  %v13596_v34 = vmul.f32 %v13313_v15, %v13129_v2 }
 0x293   :  { %14817 = vst [vmem:[#allocation37_spill] sm:$0xff] %v13522_v43  ;;  %14818 = vst [vmem:[#allocation24_spill] sm:$0xff] %v13526_v32  ;;  %v13550_v32 = vmul.f32 %v13316_v28, %v13094_v63  ;;  %v13568_v63 = vmul.f32 %v13255_v45, %v13302_v56 }
 0x294   :  { %14819 = vst [vmem:[#allocation43_spill] sm:$0xff] %v13530_v36  ;;  %14820 = vst [vmem:[#allocation36_spill] sm:$0xff] %v13534_v23  ;;  %v9776_v23 = vpop.eup %9775  ;;  %v13557_v36 = vrot.slane %v6816_v21, %v11164_v20 }
 0x295   :  { %14821 = vst [vmem:[#allocation44_spill] sm:$0xff] %v13538_v62  ;;  %14822 = vst [vmem:[#allocation45_spill] sm:$0xff] %v13542_v0  ;;  %v13560_v62 = vrot.slane %v6816_v21, %v11167_v18  ;;  %v13580_v21 = vmul.f32 %v13285_v42, %v13214_v26 }
 0x296   :  { %14823 = vst [vmem:[#allocation46_spill] sm:$0xff] %v13546_v38  ;;  %14824 = vst [vmem:[#allocation47_spill] sm:$0xff] %v13550_v32  ;;  %v9778_v32 = vpop.eup %9777 }
 0x297   :  { %14825 = vst [vmem:[#allocation48_spill] sm:$0xff] %v13554_v53  ;;  %14826 = vst [vmem:[#allocation49_spill] sm:$0xff] %v13564_v44  ;;  %v13572_v53 = vmul.f32 %v13300_v10, %v13129_v2  ;;  %v13584_v44 = vmul.f32 %v13255_v45, %v13395_v27  ;;  %v9780_v43 = vpop.eup %9779  ;;  %v7118_v45 = vsel %vm7114_vm5, 0.0, %v9776_v23  ;;  %v7388_v61 = vsel %vm7384_vm7, 0.0, %v9778_v32 }
 0x298   :  { %14827 = vst [vmem:[#allocation51_spill] sm:$0xff] %v13568_v63  ;;  %14829 = vst [vmem:[#allocation52_spill] sm:$0xff] %v13576_v29  ;;  %v13588_v63 = vmul.f32 %v13300_v10, %v13214_v26  ;;  %v9782_v29 = vpop.eup %9781  ;;  %v13634_v50 = vrot.slane %v7118_v45, %v11164_v20  ;;  %v13637_v32 = vrot.slane %v7118_v45, %v11167_v18 }
 0x299   :  { %14828 = vst [vmem:[#allocation50_spill] sm:$0xff] %v13572_v53  ;;  %14830 = vst [vmem:[#allocation18_spill] sm:$0xff] %v13580_v21  ;;  %v13592_v53 = vmul.f32 %v13285_v42, %v13302_v56  ;;  %v13600_v21 = vmul.f32 %v13300_v10, %v13302_v56  ;;  %v13643_v40 = vrot.slane %v7388_v61, %v11164_v20 }
 0x29a   :  { %14831 = vst [vmem:[#allocation53_spill] sm:$0xff] %v13584_v44  ;;  %14832 = vst [vmem:[#allocation54_spill] sm:$0xff] %v13588_v63  ;;  %v13606_v44 = vmul.f32 %v13316_v28, %v13129_v2  ;;  %v13610_v63 = vmul.f32 %v13285_v42, %v13395_v27  ;;  %v13622_v2 = vmul.f32 %v13300_v10, %v13395_v27 }
 0x29b   :  { %14833 = vst [vmem:[#allocation55_spill] sm:$0xff] %v13592_v53  ;;  %14834 = vst [vmem:[#allocation56_spill] sm:$0xff] %v13596_v34  ;;  %v13614_v53 = vmul.f32 %v13313_v15, %v13214_v26  ;;  %v9784_v34 = vpop.eup %9783  ;;  %v7658_v15 = vsel %vm7654_vm9, 0.0, %v9780_v43  ;;  %v13646_v10 = vrot.slane %v7388_v61, %v11167_v18 }
 0x29c   :  { %14835 = vst [vmem:[#allocation57_spill] sm:$0xff] %v13600_v21  ;;  %14836 = vst [vmem:[#allocation59_spill] sm:$0xff] %v13610_v63  ;;  %v13653_v27 = vrot.slane %v7658_v15, %v11164_v20 }
 0x29d   :  { %14837 = vst [vmem:[#allocation58_spill] sm:$0xff] %v13614_v53  ;;  %14838 = vst [vmem:[#allocation60_spill] sm:$0xff] %v13622_v2 }
 0x2c6   :  { %v6919_v48 = vpop.f32.mrb[92].mxu0 }
 0x2c7   :  { %v6921_v57 = vpop.f32.mrb[93].mxu0  ;;  %v6977_v56 = vmul.f32 %v13557_v36, %v6919_v48  ;;  %v13630_v48 = vmul.f32 %v13316_v28, %v13214_v26  ;;  %v8198_v26 = vsel %vm8194_vm11, 0.0, %v9784_v34 }
 0x2c8   :  { %v6978_v21 = vmul.f32 %v13560_v62, %v6921_v57 }
 0x2c9   :  { %14839 = vst [vmem:[#allocation19_spill] sm:$0xff] %v13630_v48  ;;  %v7060_v43 = vadd.f32 %v13133_v37, %v6977_v56 }
 0x2ca   :  { %v6925_v39 = vpop.f32.mrb[94].mxu0 }
 0x2cb   :  { %v6927_v19 = vpop.f32.mrb[95].mxu0  ;;  %v6979_v42 = vmul.f32 %v13557_v36, %v6925_v39  ;;  %v7928_v39 = vsel %vm7924_vm10, 0.0, %v9782_v29  ;;  %v13656_v29 = vrot.slane %v7658_v15, %v11167_v18 }
 0x2cc   :  { %v6980_v23 = vmul.f32 %v13560_v62, %v6927_v19  ;;  %v13662_v34 = vrot.slane %v7928_v39, %v11164_v20  ;;  %v13669_v15 = vrot.slane %v7928_v39, %v11167_v18 }
 0x2cd   :  { %v7062_v55 = vadd.f32 %v13381_v46, %v6979_v42  ;;  %v13672_v46 = vrot.slane %v8198_v26, %v11164_v20 }
 0x2ce   :  { %v6931_v0 = vpop.f32.mrb[96].mxu0 }
 0x2cf   :  { %v6933_v38 = vpop.f32.mrb[97].mxu0  ;;  %v6981_v57 = vmul.f32 %v13557_v36, %v6931_v0  ;;  %v7061_v0 = vadd.f32 %v13145_v35, %v6978_v21  ;;  %v13679_v21 = vrot.slane %v8198_v26, %v11167_v18  ;;  %v7078_v39 = vmax.f32 %v7062_v55, 0.0 }
 0x2d0   :  { %v6982_v19 = vmul.f32 %v13560_v62, %v6933_v38  ;;  %v7063_v38 = vadd.f32 %v13385_v25, %v6980_v23 }
 0x2d1   :  { %v13665_v37 = vadd.f32 %v13149_v6, %v6981_v57  ;;  %v7076_v6 = vmax.f32 %v7060_v43, 0.0  ;;  %v7077_v42 = vmax.f32 %v7061_v0, 0.0 }
 0x2d2   :  { %v6937_v30 = vpop.f32.mrb[98].mxu0  ;;  %v13675_v25 = vadd.f32 %v13153_v7, %v6982_v19  ;;  %v7079_v48 = vmax.f32 %v7063_v38, 0.0 }
 0x2d3   :  { %v6939_v63 = vpop.f32.mrb[99].mxu0  ;;  %v6983_v61 = vmul.f32 %v13557_v36, %v6937_v30  ;;  %v7080_v26 = vmax.f32 %v13665_v37, 0.0 }
 0x2d5   :  { %v13685_v2 = vadd.f32 %v13399_v24, %v6983_v61 }
 0x2d6   :  { %v6943_v45 = vpop.f32.mrb[100].mxu0 }
 0x2d7   :  { %v7197_v28 = vpop.f32.mrb[92].mxu1  ;;  %v6945_v12 = vpop.f32.mrb[101].mxu0  ;;  %v6985_v53 = vmul.f32 %v13557_v36, %v6943_v45 }
 0x2d8   :  { %v7255_v35 = vmul.f32 %v13634_v50, %v7197_v28  ;;  %v7199_v56 = vpop.f32.mrb[93].mxu1  ;;  %v6984_v28 = vmul.f32 %v13560_v62, %v6939_v63  ;;  %v6986_v55 = vmul.f32 %v13560_v62, %v6945_v12 }
 0x2d9   :  { %v7256_v30 = vmul.f32 %v13637_v32, %v7199_v56 }
 0x2da   :  { %v7298_v23 = vadd.f32 %v13163_v47, %v7255_v35  ;;  %v6949_v57 = vpop.f32.mrb[102].mxu0  ;;  %v7081_v47 = vmax.f32 %v13675_v25, 0.0  ;;  %v13695_v61 = vadd.f32 %v13403_v5, %v6984_v28  ;;  %v13707_v5 = vadd.f32 %v13157_v31, %v6985_v53 }
 0x2db   :  { %v7299_v7 = vadd.f32 %v13177_v51, %v7256_v30  ;;  %v7203_v19 = vpop.f32.mrb[94].mxu1  ;;  %v6951_v56 = vpop.f32.mrb[103].mxu0  ;;  %v6987_v37 = vmul.f32 %v13557_v36, %v6949_v57  ;;  %v7082_v30 = vmax.f32 %v13685_v2, 0.0 }
 0x2dc   :  { %v7314_v43 = vmax.f32 %v7298_v23, 0.0  ;;  %v7257_v0 = vmul.f32 %v13634_v50, %v7203_v19  ;;  %v7205_v63 = vpop.f32.mrb[95].mxu1  ;;  %v6988_v25 = vmul.f32 %v13560_v62, %v6951_v56 }
 0x2dd   :  { %v7315_v38 = vmax.f32 %v7299_v7, 0.0  ;;  %v7258_v24 = vmul.f32 %v13637_v32, %v7205_v63 }
 0x2de   :  { %v13697_v51 = vmax.f32 %v7076_v6, %v7314_v43  ;;  %v7300_v45 = vadd.f32 %v13411_v11, %v7257_v0  ;;  %v6955_v35 = vpop.f32.mrb[104].mxu0  ;;  %v13712_v43 = vadd.f32 %v13173_v52, %v6986_v55  ;;  %v13718_v0 = vadd.f32 %v13407_v13, %v6987_v37 }
 0x2df   :  { %v13702_v23 = vmax.f32 %v7077_v42, %v7315_v38  ;;  %v7301_v12 = vadd.f32 %v13420_v41, %v7258_v24  ;;  %v7209_v7 = vpop.f32.mrb[96].mxu1  ;;  %v6957_v19 = vpop.f32.mrb[105].mxu0  ;;  %v6989_v28 = vmul.f32 %v13557_v36, %v6955_v35  ;;  %v7083_v41 = vmax.f32 %v13695_v61, 0.0 }
 0x2e0   :  { %v7316_v6 = vmax.f32 %v7300_v45, 0.0  ;;  %v7259_v57 = vmul.f32 %v13634_v50, %v7209_v7  ;;  %v7211_v11 = vpop.f32.mrb[97].mxu1  ;;  %v6990_v42 = vmul.f32 %v13560_v62, %v6957_v19  ;;  %v13723_v38 = vpop.eup %9785  ;;  %v13726_v52 = vadd.f32 %v13416_v54, %v6988_v25 }
 0x2e1   :  { %v7317_v2 = vmax.f32 %v7301_v12, 0.0  ;;  %v7260_v56 = vmul.f32 %v13637_v32, %v7211_v11  ;;  %v7084_v13 = vmax.f32 %v13707_v5, 0.0  ;;  %v7085_v54 = vmax.f32 %v13712_v43, 0.0 }
 0x2e2   :  { %v13720_v31 = vmax.f32 %v7078_v39, %v7316_v6  ;;  %v7302_v53 = vadd.f32 %v13185_v49, %v7259_v57  ;;  %v6961_v63 = vpop.f32.mrb[106].mxu0  ;;  %v13734_v39 = vadd.f32 %v13181_v22, %v6989_v28  ;;  %v7087_v5 = vmax.f32 %v13726_v52, 0.0 }
 0x2e3   :  { %v13728_v55 = vmax.f32 %v7079_v48, %v7317_v2  ;;  %v7303_v24 = vadd.f32 %v13193_v60, %v7260_v56  ;;  %v6991_v45 = vmul.f32 %v13557_v36, %v6961_v63  ;;  %v7215_v61 = vpop.f32.mrb[98].mxu1  ;;  %v6963_v35 = vpop.f32.mrb[107].mxu0  ;;  %v13739_v48 = vadd.f32 %v13189_v14, %v6990_v42 }
 0x2e4   :  { %v7318_v49 = vmax.f32 %v7302_v53, 0.0  ;;  %v7261_v37 = vmul.f32 %v13634_v50, %v7215_v61  ;;  %v7217_v12 = vpop.f32.mrb[99].mxu1  ;;  %v7086_v36 = vmax.f32 %v13718_v0, 0.0  ;;  %v6992_v22 = vmul.f32 %v13560_v62, %v6963_v35 }
 0x2e5   :  { %v7319_v25 = vmax.f32 %v7303_v24, 0.0  ;;  %v7262_v60 = vmul.f32 %v13637_v32, %v7217_v12  ;;  %v13751_v28 = vadd.f32 %v13424_v3, %v6991_v45  ;;  %v7088_v43 = vmax.f32 %v13734_v39, 0.0 }
 0x2e6   :  { %v13743_v7 = vmax.f32 %v7080_v26, %v7318_v49  ;;  %v7304_v19 = vadd.f32 %v13428_v1, %v7261_v37  ;;  %v7089_v56 = vmax.f32 %v13739_v48, 0.0 }
 0x2e7   :  { %v13748_v6 = vmax.f32 %v7081_v47, %v7319_v25  ;;  %v7305_v14 = vadd.f32 %v13436_v59, %v7262_v60  ;;  %v7221_v57 = vpop.f32.mrb[100].mxu1  ;;  %v7467_v11 = vpop.f32.mrb[108].mxu0  ;;  %v13763_v59 = vadd.f32 %v13432_v9, %v6992_v22  ;;  %v7090_v24 = vmax.f32 %v13751_v28, 0.0 }
 0x2e8   :  { %v7320_v2 = vmax.f32 %v7304_v19, 0.0  ;;  %v7263_v26 = vmul.f32 %v13634_v50, %v7221_v57  ;;  %v7525_v1 = vmul.f32 %v13643_v40, %v7467_v11  ;;  %v7223_v42 = vpop.f32.mrb[101].mxu1  ;;  %v7469_v62 = vpop.f32.mrb[109].mxu0  ;;  %v14841_v11 = vld [vmem:[#allocation154_spill] sm:$0xff] }
 0x2e9   :  { %v7321_v47 = vmax.f32 %v7305_v14, 0.0  ;;  %v7264_v0 = vmul.f32 %v13637_v32, %v7223_v42  ;;  %v7526_v3 = vmul.f32 %v13646_v10, %v7469_v62  ;;  %v14842_v42 = vld [vmem:[#allocation21_spill] sm:$0xff] }
 0x2ea   :  { %v13760_v53 = vmax.f32 %v7082_v30, %v7320_v2  ;;  %v7306_v63 = vadd.f32 %v13197_v8, %v7263_v26  ;;  %v7568_v52 = vadd.f32 %v13202_v33, %v7525_v1 }
 0x2eb   :  { %v13768_v45 = vmax.f32 %v7083_v41, %v7321_v47  ;;  %v7307_v61 = vadd.f32 %v13206_v58, %v7264_v0  ;;  %v7569_v35 = vadd.f32 %v13218_v17, %v7526_v3  ;;  %v7227_v49 = vpop.f32.mrb[102].mxu1  ;;  %v7473_v37 = vpop.f32.mrb[110].mxu0  ;;  %v14840_v17 = vld [vmem:[#allocation39_spill] sm:$0xff]  ;;  %v14843_v47 = vld [vmem:[#allocation153_spill] sm:$0xff] }
 0x2ec   :  { %v7322_v12 = vmax.f32 %v7306_v63, 0.0  ;;  %v7584_v30 = vmax.f32 %v7568_v52, 0.0  ;;  %v7265_v25 = vmul.f32 %v13634_v50, %v7227_v49  ;;  %v7527_v9 = vmul.f32 %v13643_v40, %v7473_v37  ;;  %v7229_v60 = vpop.f32.mrb[103].mxu1  ;;  %v7475_v8 = vpop.f32.mrb[111].mxu0 }
 0x2ed   :  { %v7323_v19 = vmax.f32 %v7307_v61, 0.0  ;;  %v7585_v33 = vmax.f32 %v7569_v35, 0.0  ;;  %v7266_v22 = vmul.f32 %v13637_v32, %v7229_v60  ;;  %v7528_v41 = vmul.f32 %v13646_v10, %v7475_v8  ;;  %v14845_v8 = vld [vmem:[#allocation132_spill] sm:$0xff] }
 0x2ee   :  { %v13776_v14 = vmax.f32 %v7084_v13, %v7322_v12  ;;  %v13779_v58 = vmax.f32 %v13697_v51, %v7584_v30  ;;  %v7308_v57 = vadd.f32 %v14840_v17, %v7265_v25  ;;  %v7570_v2 = vadd.f32 %v14841_v11, %v7527_v9  ;;  %v14844_v9 = vld [vmem:[#allocation12_spill] sm:$0xff] }
 0x2ef   :  { %v13783_v26 = vmax.f32 %v7085_v54, %v7323_v19  ;;  %v13786_v1 = vmax.f32 %v13702_v23, %v7585_v33  ;;  %v7309_v62 = vadd.f32 %v14842_v42, %v7266_v22  ;;  %v7571_v0 = vadd.f32 %v14843_v47, %v7528_v41  ;;  %v7233_v3 = vpop.f32.mrb[104].mxu1  ;;  %v7479_v63 = vpop.f32.mrb[112].mxu0  ;;  %v14846_v41 = vld [vmem:[#allocation25_spill] sm:$0xff] }
 0x2f0   :  { %v7324_v13 = vmax.f32 %v7308_v57, 0.0  ;;  %v7586_v52 = vmax.f32 %v7570_v2, 0.0  ;;  %v7267_v51 = vmul.f32 %v13634_v50, %v7233_v3  ;;  %v7529_v61 = vmul.f32 %v13643_v40, %v7479_v63  ;;  %v7235_v35 = vpop.f32.mrb[105].mxu1  ;;  %v7481_v49 = vpop.f32.mrb[113].mxu0  ;;  %v14847_v57 = vld [vmem:[#allocation26_spill] sm:$0xff] }
 0x2f1   :  { %v7325_v37 = vmax.f32 %v7309_v62, 0.0  ;;  %v7587_v54 = vmax.f32 %v7571_v0, 0.0  ;;  %v7268_v12 = vmul.f32 %v13637_v32, %v7235_v35  ;;  %v7530_v23 = vmul.f32 %v13646_v10, %v7481_v49 }
 0x2f2   :  { %v13794_v30 = vmax.f32 %v7086_v36, %v7324_v13  ;;  %v13797_v25 = vmax.f32 %v13720_v31, %v7586_v52  ;;  %v7310_v60 = vadd.f32 %v14844_v9, %v7267_v51  ;;  %v7572_v19 = vadd.f32 %v14845_v8, %v7529_v61  ;;  %v14848_v61 = vld [vmem:[#allocation22_spill] sm:$0xff] }
 0x2f3   :  { %v13801_v33 = vmax.f32 %v7087_v5, %v7325_v37  ;;  %v13804_v22 = vmax.f32 %v13728_v55, %v7587_v54  ;;  %v7311_v17 = vadd.f32 %v14846_v41, %v7268_v12  ;;  %v7573_v11 = vadd.f32 %v14847_v57, %v7530_v23  ;;  %v7239_v2 = vpop.f32.mrb[106].mxu1  ;;  %v7485_v42 = vpop.f32.mrb[114].mxu0  ;;  %v14851_v23 = vld [vmem:[#allocation40_spill] sm:$0xff] }
 0x2f4   :  { %v7326_v36 = vmax.f32 %v7310_v60, 0.0  ;;  %v7588_v62 = vmax.f32 %v7572_v19, 0.0  ;;  %v7269_v31 = vmul.f32 %v13634_v50, %v7239_v2  ;;  %v7531_v47 = vmul.f32 %v13643_v40, %v7485_v42  ;;  %v7241_v0 = vpop.f32.mrb[107].mxu1  ;;  %v7487_v3 = vpop.f32.mrb[115].mxu0  ;;  %v14849_v50 = vld [vmem:[#allocation155_spill] sm:$0xff] }
 0x2f5   :  { %v7327_v63 = vmax.f32 %v7311_v17, 0.0  ;;  %v7589_v5 = vmax.f32 %v7573_v11, 0.0  ;;  %v7270_v13 = vmul.f32 %v13637_v32, %v7241_v0  ;;  %v7532_v55 = vmul.f32 %v13646_v10, %v7487_v3  ;;  %v14850_v32 = vld [vmem:[#allocation16_spill] sm:$0xff]  ;;  %v14854_v3 = vld [vmem:[#allocation134_spill] sm:$0xff] }
 0x2f6   :  { %v13814_v52 = vmax.f32 %v7088_v43, %v7326_v36  ;;  %v13817_v51 = vmax.f32 %v13743_v7, %v7588_v62  ;;  %v7312_v35 = vadd.f32 %v14848_v61, %v7269_v31  ;;  %v7574_v49 = vadd.f32 %v14849_v50, %v7531_v47  ;;  %v14853_v47 = vld [vmem:[#allocation27_spill] sm:$0xff] }
 0x2f7   :  { %v13823_v37 = vmax.f32 %v7089_v56, %v7327_v63  ;;  %v13826_v54 = vmax.f32 %v13748_v6, %v7589_v5  ;;  %v7313_v12 = vadd.f32 %v14850_v32, %v7270_v13  ;;  %v7575_v39 = vadd.f32 %v14851_v23, %v7532_v55  ;;  %v7491_v43 = vpop.f32.mrb[116].mxu0  ;;  %v7737_v19 = vpop.f32.mrb[108].mxu1 }
 0x2f8   :  { %v7091_v9 = vmax.f32 %v13763_v59, 0.0  ;;  %v7328_v7 = vmax.f32 %v7312_v35, 0.0  ;;  %v7590_v60 = vmax.f32 %v7574_v49, 0.0  ;;  %v7533_v8 = vmul.f32 %v13643_v40, %v7491_v43  ;;  %v7493_v41 = vpop.f32.mrb[117].mxu0  ;;  %v7739_v57 = vpop.f32.mrb[109].mxu1  ;;  %v14852_v59 = vld [vmem:[#allocation13_spill] sm:$0xff] }
 0x2f9   :  { %v7329_v17 = vmax.f32 %v7313_v12, 0.0  ;;  %v7591_v48 = vmax.f32 %v7575_v39, 0.0  ;;  %v7795_v56 = vmul.f32 %v13653_v27, %v7737_v19  ;;  %v7534_v6 = vmul.f32 %v13646_v10, %v7493_v41  ;;  %v14856_v43 = vld [vmem:[#allocation156_spill] sm:$0xff] }
 0x2fa   :  { %v13836_v11 = vmax.f32 %v7090_v24, %v7328_v7  ;;  %v13839_v2 = vmax.f32 %v13760_v53, %v7590_v60  ;;  %v7576_v42 = vadd.f32 %v14852_v59, %v7533_v8  ;;  %v7796_v36 = vmul.f32 %v13656_v29, %v7739_v57  ;;  %v14855_v24 = vld [vmem:[#allocation15_spill] sm:$0xff]  ;;  %v14858_v19 = vld [vmem:[#allocation116_spill] sm:$0xff] }
 0x2fb   :  { %v13843_v62 = vmax.f32 %v7091_v9, %v7329_v17  ;;  %v13846_v31 = vmax.f32 %v13768_v45, %v7591_v48  ;;  %v7838_v0 = vadd.f32 %v14853_v47, %v7795_v56  ;;  %v7577_v63 = vadd.f32 %v14854_v3, %v7534_v6  ;;  %v7497_v5 = vpop.f32.mrb[118].mxu0  ;;  %v7743_v55 = vpop.f32.mrb[110].mxu1  ;;  %v14859_v56 = vld [vmem:[#allocation157_spill] sm:$0xff] }
 0x2fc   :  { %v7592_v28 = vmax.f32 %v7576_v42, 0.0  ;;  %v7839_v13 = vadd.f32 %v14855_v24, %v7796_v36  ;;  %v7535_v53 = vmul.f32 %v13643_v40, %v7497_v5  ;;  %v7499_v61 = vpop.f32.mrb[119].mxu0  ;;  %v13855_v35 = vsel %vm8464_vm15, 0.0, %v13723_v38  ;;  %v7745_v12 = vpop.f32.mrb[111].mxu1  ;;  %v14857_v38 = vld [vmem:[#allocation158_spill] sm:$0xff] }
 0x2fd   :  { %v7854_v50 = vmax.f32 %v7838_v0, 0.0  ;;  %v7593_v45 = vmax.f32 %v7577_v63, 0.0  ;;  %v7797_v49 = vmul.f32 %v13653_v27, %v7743_v55  ;;  %v7536_v32 = vmul.f32 %v13646_v10, %v7499_v61  ;;  %v14862_v61 = vld [vmem:[#allocation87_spill] sm:$0xff] }
 0x2fe   :  { %v13860_v23 = vmax.f32 %v13776_v14, %v7592_v28  ;;  %v7855_v39 = vmax.f32 %v7839_v13, 0.0  ;;  %v7578_v9 = vadd.f32 %v14856_v43, %v7535_v53  ;;  %v7798_v7 = vmul.f32 %v13656_v29, %v7745_v12  ;;  %v14861_v53 = vld [vmem:[#allocation135_spill] sm:$0xff] }
 0x2ff   :  { %v13865_v60 = vmax.f32 %v13779_v58, %v7854_v50  ;;  %v13868_v16 = vmax.f32 %v13783_v26, %v7593_v45  ;;  %v7840_v8 = vadd.f32 %v14857_v38, %v7797_v49  ;;  %v7579_v41 = vadd.f32 %v14858_v19, %v7536_v32  ;;  %v7503_v17 = vpop.f32.mrb[120].mxu0  ;;  %v7749_v59 = vpop.f32.mrb[112].mxu1  ;;  %v14863_v32 = vld [vmem:[#allocation29_spill] sm:$0xff] }
 0x300   :  { %v13873_v48 = vmax.f32 %v13786_v1, %v7855_v39  ;;  %v7594_v14 = vmax.f32 %v7578_v9, 0.0  ;;  %v7841_v6 = vadd.f32 %v14859_v56, %v7798_v7  ;;  %v7537_v57 = vmul.f32 %v13643_v40, %v7503_v17  ;;  %v7505_v42 = vpop.f32.mrb[121].mxu0  ;;  %v7751_v0 = vpop.f32.mrb[113].mxu1  ;;  %v14860_v1 = vld [vmem:[#allocation28_spill] sm:$0xff] }
 0x301   :  { %v7856_v58 = vmax.f32 %v7840_v8, 0.0  ;;  %v7595_v36 = vmax.f32 %v7579_v41, 0.0  ;;  %v7799_v26 = vmul.f32 %v13653_v27, %v7749_v59  ;;  %v7538_v47 = vmul.f32 %v13646_v10, %v7505_v42  ;;  %v14866_v42 = vld [vmem:[#allocation41_spill] sm:$0xff] }
 0x302   :  { %v13880_v3 = vmax.f32 %v13794_v30, %v7594_v14  ;;  %v7857_v63 = vmax.f32 %v7841_v6, 0.0  ;;  %v7580_v5 = vadd.f32 %v14860_v1, %v7537_v57  ;;  %v7800_v28 = vmul.f32 %v13656_v29, %v7751_v0  ;;  %v14865_v57 = vld [vmem:[#allocation17_spill] sm:$0xff] }
 0x303   :  { %v13885_v24 = vmax.f32 %v13797_v25, %v7856_v58  ;;  %v13888_v13 = vmax.f32 %v13801_v33, %v7595_v36  ;;  %v7842_v55 = vadd.f32 %v14861_v53, %v7799_v26  ;;  %v7581_v50 = vadd.f32 %v14862_v61, %v7538_v47  ;;  %v7509_v45 = vpop.f32.mrb[122].mxu0  ;;  %v7755_v43 = vpop.f32.mrb[114].mxu1  ;;  %v14867_v61 = vld [vmem:[#allocation30_spill] sm:$0xff] }
 0x304   :  { %v13893_v49 = vmax.f32 %v13804_v22, %v7857_v63  ;;  %v7596_v30 = vmax.f32 %v7580_v5, 0.0  ;;  %v7843_v12 = vadd.f32 %v14863_v32, %v7800_v28  ;;  %v7539_v39 = vmul.f32 %v13643_v40, %v7509_v45  ;;  %v7511_v9 = vpop.f32.mrb[123].mxu0  ;;  %v7757_v8 = vpop.f32.mrb[115].mxu1  ;;  %v14864_v22 = vld [vmem:[#allocation159_spill] sm:$0xff]  ;;  %v14868_v45 = vld [vmem:[#allocation33_spill] sm:$0xff] }
 0x305   :  { %v7858_v25 = vmax.f32 %v7842_v55, 0.0  ;;  %v7597_v7 = vmax.f32 %v7581_v50, 0.0  ;;  %v7801_v33 = vmul.f32 %v13653_v27, %v7755_v43  ;;  %v7540_v38 = vmul.f32 %v13646_v10, %v7511_v9 }
 0x306   :  { %v13900_v19 = vmax.f32 %v13814_v52, %v7596_v30  ;;  %v7859_v41 = vmax.f32 %v7843_v12, 0.0  ;;  %v7582_v17 = vadd.f32 %v14864_v22, %v7539_v39  ;;  %v7802_v14 = vmul.f32 %v13656_v29, %v7757_v8  ;;  %v14870_v39 = vld [vmem:[#allocation102_spill] sm:$0xff] }
 0x307   :  { %v13905_v56 = vmax.f32 %v13817_v51, %v7858_v25  ;;  %v13908_v40 = vmax.f32 %v13823_v37, %v7597_v7  ;;  %v7844_v6 = vadd.f32 %v13496_v4, %v7801_v33  ;;  %v7583_v59 = vadd.f32 %v14865_v57, %v7540_v38  ;;  %v7761_v36 = vpop.f32.mrb[116].mxu1  ;;  %v8007_v26 = vpop.f32.mrb[124].mxu0 }
 0x308   :  { %v13913_v10 = vmax.f32 %v13826_v54, %v7859_v41  ;;  %v7598_v52 = vmax.f32 %v7582_v17, 0.0  ;;  %v7845_v58 = vadd.f32 %v14866_v42, %v7802_v14  ;;  %v13918_v47 = vrot.slane %v13855_v35, %v11164_v20  ;;  %v7763_v63 = vpop.f32.mrb[117].mxu1  ;;  %v8009_v1 = vpop.f32.mrb[125].mxu0 }
 0x309   :  { %v7860_v51 = vmax.f32 %v7844_v6, 0.0  ;;  %v7599_v0 = vmax.f32 %v7583_v59, 0.0  ;;  %v7803_v37 = vmul.f32 %v13653_v27, %v7761_v36  ;;  %v8065_v4 = vmul.f32 %v13662_v34, %v8007_v26  ;;  %v14872_v59 = vld [vmem:[#allocation42_spill] sm:$0xff]  ;;  %v14873_v36 = vld [vmem:[#allocation160_spill] sm:$0xff] }
 0x30a   :  { %v13923_v54 = vmax.f32 %v13836_v11, %v7598_v52  ;;  %v7861_v5 = vmax.f32 %v7845_v58, 0.0  ;;  %v7804_v28 = vmul.f32 %v13656_v29, %v7763_v63  ;;  %v8066_v53 = vmul.f32 %v13669_v15, %v8009_v1  ;;  %v14869_v11 = vld [vmem:[#allocation137_spill] sm:$0xff] }
 0x30b   :  { %v13928_v55 = vmax.f32 %v13839_v2, %v7860_v51  ;;  %v13931_v20 = vmax.f32 %v13843_v62, %v7599_v0  ;;  %v7846_v50 = vadd.f32 %v14867_v61, %v7803_v37  ;;  %v8108_v30 = vadd.f32 %v14868_v45, %v8065_v4  ;;  %v7767_v9 = vpop.f32.mrb[118].mxu1  ;;  %v8013_v25 = vpop.f32.mrb[126].mxu0  ;;  %v14874_v51 = vld [vmem:[#allocation37_spill] sm:$0xff] }
 0x30c   :  { %v13936_v32 = vmax.f32 %v13846_v31, %v7861_v5  ;;  %v7847_v12 = vadd.f32 %v14869_v11, %v7804_v28  ;;  %v8109_v43 = vadd.f32 %v14870_v39, %v8066_v53  ;;  %v13942_v2 = vrot.slane %v13855_v35, %v11167_v18  ;;  %v7769_v8 = vpop.f32.mrb[119].mxu1  ;;  %v8015_v41 = vpop.f32.mrb[127].mxu0  ;;  %v14871_v35 = vld [vmem:[#allocation23_spill] sm:$0xff] }
 0x30d   :  { %v7862_v7 = vmax.f32 %v7846_v50, 0.0  ;;  %v8124_v62 = vmax.f32 %v8108_v30, 0.0  ;;  %v7805_v33 = vmul.f32 %v13653_v27, %v7767_v9  ;;  %v8067_v38 = vmul.f32 %v13662_v34, %v8013_v25  ;;  %v14875_v30 = vld [vmem:[#allocation138_spill] sm:$0xff]  ;;  %v14877_v25 = vld [vmem:[#allocation9_spill] sm:$0xff] }
 0x30e   :  { %v7863_v31 = vmax.f32 %v7847_v12, 0.0  ;;  %v8125_v22 = vmax.f32 %v8109_v43, 0.0  ;;  %v7806_v17 = vmul.f32 %v13656_v29, %v7769_v8  ;;  %v8068_v14 = vmul.f32 %v13669_v15, %v8015_v41  ;;  %v14876_v12 = vld [vmem:[#allocation34_spill] sm:$0xff] }
 0x30f   :  { %v13949_v6 = vmax.f32 %v13860_v23, %v7862_v7  ;;  %v13952_v18 = vmax.f32 %v13865_v60, %v8124_v62  ;;  %v7848_v57 = vadd.f32 %v14871_v35, %v7805_v33  ;;  %v8110_v52 = vadd.f32 %v14872_v59, %v8067_v38  ;;  %v7773_v37 = vpop.f32.mrb[120].mxu1  ;;  %v8019_v23 = vpop.f32.mrb[128].mxu0  ;;  %v14878_v62 = vld [vmem:[#allocation35_spill] sm:$0xff] }
 0x310   :  { %v13957_v42 = vmax.f32 %v13868_v16, %v7863_v31  ;;  %v13960_v58 = vmax.f32 %v13873_v48, %v8125_v22  ;;  %v7849_v26 = vadd.f32 %v14873_v36, %v7806_v17  ;;  %v8111_v0 = vadd.f32 %v14874_v51, %v8068_v14  ;;  %v7775_v5 = vpop.f32.mrb[121].mxu1  ;;  %v8021_v28 = vpop.f32.mrb[129].mxu0 }
 0x311   :  { %v7864_v4 = vmax.f32 %v7848_v57, 0.0  ;;  %v8126_v63 = vmax.f32 %v8110_v52, 0.0  ;;  %v7807_v60 = vmul.f32 %v13653_v27, %v7773_v37  ;;  %v8069_v1 = vmul.f32 %v13662_v34, %v8019_v23  ;;  %v14879_v52 = vld [vmem:[#allocation24_spill] sm:$0xff] }
 0x312   :  { %v7865_v53 = vmax.f32 %v7849_v26, 0.0  ;;  %v8127_v16 = vmax.f32 %v8111_v0, 0.0  ;;  %v7808_v61 = vmul.f32 %v13656_v29, %v7775_v5  ;;  %v8070_v48 = vmul.f32 %v13669_v15, %v8021_v28  ;;  %v14880_v26 = vld [vmem:[#allocation43_spill] sm:$0xff]  ;;  %v14881_v37 = vld [vmem:[#allocation36_spill] sm:$0xff] }
 0x313   :  { %v13969_v50 = vmax.f32 %v13880_v3, %v7864_v4  ;;  %v13972_v45 = vmax.f32 %v13885_v24, %v8126_v63  ;;  %v7850_v11 = vadd.f32 %v14875_v30, %v7807_v60  ;;  %v8112_v39 = vadd.f32 %v14876_v12, %v8069_v1  ;;  %v7779_v38 = vpop.f32.mrb[122].mxu1  ;;  %v8025_v3 = vpop.f32.mrb[130].mxu0  ;;  %v14882_v23 = vld [vmem:[#allocation44_spill] sm:$0xff] }
 0x314   :  { %v13977_v43 = vmax.f32 %v13888_v13, %v7865_v53  ;;  %v13980_v9 = vmax.f32 %v13893_v49, %v8127_v16  ;;  %v7851_v7 = vadd.f32 %v14877_v25, %v7808_v61  ;;  %v8113_v33 = vadd.f32 %v14878_v62, %v8070_v48  ;;  %v7781_v22 = vpop.f32.mrb[123].mxu1  ;;  %v8027_v17 = vpop.f32.mrb[131].mxu0 }
 0x315   :  { %v7866_v8 = vmax.f32 %v7850_v11, 0.0  ;;  %v8128_v41 = vmax.f32 %v8112_v39, 0.0  ;;  %v7809_v24 = vmul.f32 %v13653_v27, %v7779_v38  ;;  %v8071_v31 = vmul.f32 %v13662_v34, %v8025_v3  ;;  %v14883_v11 = vld [vmem:[#allocation143_spill] sm:$0xff]  ;;  %v14884_v39 = vld [vmem:[#allocation141_spill] sm:$0xff] }
 0x316   :  { %v7867_v14 = vmax.f32 %v7851_v7, 0.0  ;;  %v8129_v13 = vmax.f32 %v8113_v33, 0.0  ;;  %v7810_v35 = vmul.f32 %v13656_v29, %v7781_v22  ;;  %v8072_v49 = vmul.f32 %v13669_v15, %v8027_v17  ;;  %v14885_v33 = vld [vmem:[#allocation142_spill] sm:$0xff]  ;;  %v14886_v3 = vld [vmem:[#allocation145_spill] sm:$0xff] }
 0x317   :  { %v13989_v57 = vmax.f32 %v13900_v19, %v7866_v8  ;;  %v13992_v59 = vmax.f32 %v13905_v56, %v8128_v41  ;;  %v7852_v36 = vadd.f32 %v14879_v52, %v7809_v24  ;;  %v8114_v27 = vadd.f32 %v14880_v26, %v8071_v31  ;;  %v8031_v63 = vpop.f32.mrb[132].mxu0  ;;  %v8277_v19 = vpop.f32.mrb[124].mxu1 }
 0x318   :  { %v13997_v51 = vmax.f32 %v13908_v40, %v7867_v14  ;;  %v14000_v0 = vmax.f32 %v13913_v10, %v8129_v13  ;;  %v7853_v29 = vadd.f32 %v14881_v37, %v7810_v35  ;;  %v8115_v4 = vadd.f32 %v14882_v23, %v8072_v49  ;;  %v8033_v28 = vpop.f32.mrb[133].mxu0  ;;  %v8279_v53 = vpop.f32.mrb[125].mxu1 }
 0x319   :  { %v7868_v60 = vmax.f32 %v7852_v36, 0.0  ;;  %v8130_v1 = vmax.f32 %v8114_v27, 0.0  ;;  %v8073_v56 = vmul.f32 %v13662_v34, %v8031_v63  ;;  %v8335_v5 = vmul.f32 %v13672_v46, %v8277_v19  ;;  %v14887_v36 = vld [vmem:[#allocation45_spill] sm:$0xff]  ;;  %v14890_v19 = vld [vmem:[#allocation50_spill] sm:$0xff] }
 0x31a   :  { %v7869_v16 = vmax.f32 %v7853_v29, 0.0  ;;  %v8131_v40 = vmax.f32 %v8115_v4, 0.0  ;;  %v8074_v61 = vmul.f32 %v13669_v15, %v8033_v28  ;;  %v8336_v10 = vmul.f32 %v13679_v21, %v8279_v53  ;;  %v14888_v27 = vld [vmem:[#allocation49_spill] sm:$0xff]  ;;  %v14889_v4 = vld [vmem:[#allocation51_spill] sm:$0xff] }
 0x31b   :  { %v14009_v48 = vmax.f32 %v13923_v54, %v7868_v60  ;;  %v14012_v30 = vmax.f32 %v13928_v55, %v8130_v1  ;;  %v8116_v12 = vadd.f32 %v14883_v11, %v8073_v56  ;;  %v8378_v25 = vadd.f32 %v14884_v39, %v8335_v5  ;;  %v8037_v41 = vpop.f32.mrb[134].mxu0  ;;  %v8283_v54 = vpop.f32.mrb[126].mxu1 }
 0x31c   :  { %v14017_v7 = vmax.f32 %v13931_v20, %v7869_v16  ;;  %v14020_v62 = vmax.f32 %v13936_v32, %v8131_v40  ;;  %v8117_v38 = vadd.f32 %v14885_v33, %v8074_v61  ;;  %v8379_v8 = vadd.f32 %v14886_v3, %v8336_v10  ;;  %v8039_v17 = vpop.f32.mrb[135].mxu0  ;;  %v8285_v14 = vpop.f32.mrb[127].mxu1 }
 0x31d   :  { %v8132_v24 = vmax.f32 %v8116_v12, 0.0  ;;  %v8394_v31 = vmax.f32 %v8378_v25, 0.0  ;;  %v8075_v55 = vmul.f32 %v13662_v34, %v8037_v41  ;;  %v8337_v22 = vmul.f32 %v13672_v46, %v8283_v54  ;;  %v14891_v12 = vld [vmem:[#allocation144_spill] sm:$0xff]  ;;  %v14892_v25 = vld [vmem:[#allocation146_spill] sm:$0xff] }
 0x31e   :  { %v8133_v13 = vmax.f32 %v8117_v38, 0.0  ;;  %v8395_v20 = vmax.f32 %v8379_v8, 0.0  ;;  %v8076_v35 = vmul.f32 %v13669_v15, %v8039_v17  ;;  %v8338_v32 = vmul.f32 %v13679_v21, %v8285_v14  ;;  %v14893_v8 = vld [vmem:[#allocation147_spill] sm:$0xff]  ;;  %v14894_v54 = vld [vmem:[#allocation14_spill] sm:$0xff] }
 0x31f   :  { %v14029_v49 = vmax.f32 %v13949_v6, %v8132_v24  ;;  %v14032_v52 = vmax.f32 %v13952_v18, %v8394_v31  ;;  %v8118_v26 = vadd.f32 %v14887_v36, %v8075_v55  ;;  %v8380_v37 = vadd.f32 %v14888_v27, %v8337_v22  ;;  %v8043_v1 = vpop.f32.mrb[136].mxu0  ;;  %v8289_v6 = vpop.f32.mrb[128].mxu1 }
 0x320   :  { %v14037_v29 = vmax.f32 %v13957_v42, %v8133_v13  ;;  %v14040_v23 = vmax.f32 %v13960_v58, %v8395_v20  ;;  %v8119_v63 = vadd.f32 %v14889_v4, %v8076_v35  ;;  %v8381_v60 = vadd.f32 %v14890_v19, %v8338_v32  ;;  %v8045_v53 = vpop.f32.mrb[137].mxu0  ;;  %v8291_v16 = vpop.f32.mrb[129].mxu1  ;;  %v14897_v19 = vld [vmem:[#allocation53_spill] sm:$0xff] }
 0x321   :  { %v8134_v56 = vmax.f32 %v8118_v26, 0.0  ;;  %v8396_v5 = vmax.f32 %v8380_v37, 0.0  ;;  %v8077_v18 = vmul.f32 %v13662_v34, %v8043_v1  ;;  %v8339_v28 = vmul.f32 %v13672_v46, %v8289_v6  ;;  %v14895_v26 = vld [vmem:[#allocation52_spill] sm:$0xff]  ;;  %v14896_v37 = vld [vmem:[#allocation18_spill] sm:$0xff] }
 0x322   :  { %v8135_v40 = vmax.f32 %v8119_v63, 0.0  ;;  %v8397_v42 = vmax.f32 %v8381_v60, 0.0  ;;  %v8078_v61 = vmul.f32 %v13669_v15, %v8045_v53  ;;  %v8340_v58 = vmul.f32 %v13679_v21, %v8291_v16  ;;  %v14898_v60 = vld [vmem:[#allocation54_spill] sm:$0xff] }
 0x323   :  { %v14049_v10 = vmax.f32 %v13969_v50, %v8134_v56  ;;  %v14052_v11 = vmax.f32 %v13972_v45, %v8396_v5  ;;  %v8120_v39 = vadd.f32 %v14891_v12, %v8077_v18  ;;  %v8382_v33 = vadd.f32 %v14892_v25, %v8339_v28  ;;  %v8049_v31 = vpop.f32.mrb[138].mxu0  ;;  %v8295_v50 = vpop.f32.mrb[130].mxu1 }
 0x324   :  { %v14057_v38 = vmax.f32 %v13977_v43, %v8135_v40  ;;  %v14060_v3 = vmax.f32 %v13980_v9, %v8397_v42  ;;  %v8121_v41 = vadd.f32 %v14893_v8, %v8078_v61  ;;  %v8383_v24 = vadd.f32 %v14894_v54, %v8340_v58  ;;  %v8051_v14 = vpop.f32.mrb[139].mxu0  ;;  %v8297_v13 = vpop.f32.mrb[131].mxu1  ;;  %v14899_v58 = vld [vmem:[#allocation38_spill] sm:$0xff] }
 0x325   :  { %v8136_v55 = vmax.f32 %v8120_v39, 0.0  ;;  %v8398_v22 = vmax.f32 %v8382_v33, 0.0  ;;  %v8079_v45 = vmul.f32 %v13662_v34, %v8049_v31  ;;  %v8341_v17 = vmul.f32 %v13672_v46, %v8295_v50  ;;  %v14900_v39 = vld [vmem:[#allocation151_spill] sm:$0xff] }
 0x326   :  { %v8137_v20 = vmax.f32 %v8121_v41, 0.0  ;;  %v8399_v43 = vmax.f32 %v8383_v24, 0.0  ;;  %v8080_v35 = vmul.f32 %v13669_v15, %v8051_v14  ;;  %v8342_v9 = vmul.f32 %v13679_v21, %v8297_v13  ;;  %v14901_v41 = vld [vmem:[#allocation148_spill] sm:$0xff]  ;;  %v14902_v24 = vld [vmem:[#allocation150_spill] sm:$0xff] }
 0x327   :  { %v14069_v32 = vmax.f32 %v13989_v57, %v8136_v55  ;;  %v14072_v36 = vmax.f32 %v13992_v59, %v8398_v22  ;;  %v8122_v27 = vadd.f32 %v14895_v26, %v8079_v45  ;;  %v8384_v34 = vadd.f32 %v14896_v37, %v8341_v17  ;;  %v8301_v6 = vpop.f32.mrb[132].mxu1  ;;  %v8547_v57 = vpop.f32.mrb[140].mxu0 }
 0x328   :  { %v14077_v4 = vmax.f32 %v13997_v51, %v8137_v20  ;;  %v14080_v63 = vmax.f32 %v14000_v0, %v8399_v43  ;;  %v8123_v15 = vadd.f32 %v14897_v19, %v8080_v35  ;;  %v8385_v1 = vadd.f32 %v14898_v60, %v8342_v9  ;;  %v8303_v28 = vpop.f32.mrb[133].mxu1  ;;  %v8549_v53 = vpop.f32.mrb[141].mxu0  ;;  %v14903_v9 = vld [vmem:[#allocation55_spill] sm:$0xff] }
 0x329   :  { %v8138_v56 = vmax.f32 %v8122_v27, 0.0  ;;  %v8400_v5 = vmax.f32 %v8384_v34, 0.0  ;;  %v8343_v59 = vmul.f32 %v13672_v46, %v8301_v6  ;;  %v8605_v18 = vmul.f32 %v13918_v47, %v8547_v57  ;;  %v14904_v27 = vld [vmem:[#allocation56_spill] sm:$0xff] }
 0x32a   :  { %v8139_v16 = vmax.f32 %v8123_v15, 0.0  ;;  %v8401_v51 = vmax.f32 %v8385_v1, 0.0  ;;  %v8344_v40 = vmul.f32 %v13679_v21, %v8303_v28  ;;  %v8606_v0 = vmul.f32 %v13942_v2, %v8549_v53  ;;  %v14905_v15 = vld [vmem:[#allocation57_spill] sm:$0xff] }
 0x32b   :  { %v14089_v42 = vmax.f32 %v14009_v48, %v8138_v56  ;;  %v14092_v61 = vmax.f32 %v14012_v30, %v8400_v5  ;;  %v8386_v12 = vadd.f32 %v14899_v58, %v8343_v59  ;;  %v8648_v25 = vadd.f32 %v14900_v39, %v8605_v18  ;;  %v8307_v50 = vpop.f32.mrb[134].mxu1  ;;  %v8553_v48 = vpop.f32.mrb[142].mxu0 }
 0x32c   :  { %v14097_v33 = vmax.f32 %v14017_v7, %v8139_v16  ;;  %v14100_v8 = vmax.f32 %v14020_v62, %v8401_v51  ;;  %v8387_v54 = vadd.f32 %v14901_v41, %v8344_v40  ;;  %v8649_v31 = vadd.f32 %v14902_v24, %v8606_v0  ;;  %v8309_v17 = vpop.f32.mrb[135].mxu1  ;;  %v8555_v14 = vpop.f32.mrb[143].mxu0  ;;  %v14906_v51 = vld [vmem:[#allocation109_spill] sm:$0xff] }
 0x32d   :  { %v8402_v55 = vmax.f32 %v8386_v12, 0.0  ;;  %v8664_v22 = vmax.f32 %v8648_v25, 0.0  ;;  %v8345_v30 = vmul.f32 %v13672_v46, %v8307_v50  ;;  %v8607_v45 = vmul.f32 %v13918_v47, %v8553_v48  ;;  %v14907_v0 = vld [vmem:[#allocation149_spill] sm:$0xff]  ;;  %v14908_v25 = vld [vmem:[#allocation46_spill] sm:$0xff] }
 0x32e   :  { %v8403_v13 = vmax.f32 %v8387_v54, 0.0  ;;  %v8665_v7 = vmax.f32 %v8649_v31, 0.0  ;;  %v8346_v20 = vmul.f32 %v13679_v21, %v8309_v17  ;;  %v8608_v62 = vmul.f32 %v13942_v2, %v8555_v14  ;;  %v14909_v54 = vld [vmem:[#allocation47_spill] sm:$0xff] }
 0x32f   :  { %v14109_v43 = vmax.f32 %v14029_v49, %v8402_v55  ;;  %v14112_v35 = vmax.f32 %v14032_v52, %v8664_v22  ;;  %v8388_v26 = vadd.f32 %v14903_v9, %v8345_v30  ;;  %v8650_v37 = vadd.f32 %v14904_v27, %v8607_v45  ;;  %v8313_v6 = vpop.f32.mrb[136].mxu1  ;;  %v8559_v57 = vpop.f32.mrb[144].mxu0  ;;  %v14911_v9 = vld [vmem:[#allocation58_spill] sm:$0xff]  ;;  %v14912_v27 = vld [vmem:[#allocation60_spill] sm:$0xff] }
 0x330   :  { %v14117_v34 = vmax.f32 %v14037_v29, %v8403_v13  ;;  %v8697_v19 = vmax.f32 %v14040_v23, %v8665_v7  ;;  %v8389_v60 = vadd.f32 %v14905_v15, %v8346_v20  ;;  %v8651_v1 = vadd.f32 %v13606_v44, %v8608_v62  ;;  %v8315_v59 = vpop.f32.mrb[137].mxu1  ;;  %v8561_v18 = vpop.f32.mrb[145].mxu0  ;;  %v14910_v7 = vld [vmem:[#allocation59_spill] sm:$0xff] }
 0x331   :  { %v8404_v49 = vmax.f32 %v8388_v26, 0.0  ;;  %v8666_v56 = vmax.f32 %v8650_v37, 0.0  ;;  %v8347_v52 = vmul.f32 %v13672_v46, %v8313_v6  ;;  %v8609_v5 = vmul.f32 %v13918_v47, %v8559_v57 }
 0x332   :  { %v8405_v28 = vmax.f32 %v8389_v60, 0.0  ;;  %v8667_v53 = vmax.f32 %v8651_v1, 0.0  ;;  %v8348_v29 = vmul.f32 %v13679_v21, %v8315_v59  ;;  %v8610_v23 = vmul.f32 %v13942_v2, %v8561_v18  ;;  %v14913_v60 = vld [vmem:[#allocation19_spill] sm:$0xff]  ;;  %v14916_v18 = vld [vmem:[#allocation48_spill] sm:$0xff] }
 0x333   :  { %v14127_v16 = vmax.f32 %v14049_v10, %v8404_v49  ;;  %v8698_v44 = vmax.f32 %v14052_v11, %v8666_v56  ;;  %v8390_v40 = vadd.f32 %v14906_v51, %v8347_v52  ;;  %v8652_v58 = vadd.f32 %v14907_v0, %v8609_v5  ;;  %v8319_v31 = vpop.f32.mrb[138].mxu1  ;;  %v8565_v50 = vpop.f32.mrb[146].mxu0  ;;  %v14915_v52 = vld [vmem:[#allocation140_spill] sm:$0xff]  ;;  %v14917_v0 = vld [vmem:[#allocation31_spill] sm:$0xff] }
 0x334   :  { %v14133_v12 = vmax.f32 %v14057_v38, %v8405_v28  ;;  %v8699_v39 = vmax.f32 %v14060_v3, %v8667_v53  ;;  %v8391_v41 = vadd.f32 %v14908_v25, %v8348_v29  ;;  %v8653_v24 = vadd.f32 %v14909_v54, %v8610_v23  ;;  %v8321_v22 = vpop.f32.mrb[139].mxu1  ;;  %v8567_v30 = vpop.f32.mrb[147].mxu0 }
 0x335   :  { %v9650_v10 = vpack.c.bf16 %v8698_v44, %v14112_v35  ;;  %v8406_v48 = vmax.f32 %v8390_v40, 0.0  ;;  %v8668_v55 = vmax.f32 %v8652_v58, 0.0  ;;  %v8349_v11 = vmul.f32 %v13672_v46, %v8319_v31  ;;  %v14918_v58 = vld [vmem:[#allocation139_spill] sm:$0xff] }
 0x336   :  { %v8407_v45 = vmax.f32 %v8391_v41, 0.0  ;;  %v8669_v17 = vmax.f32 %v8653_v24, 0.0  ;;  %v8611_v38 = vmul.f32 %v13918_v47, %v8565_v50  ;;  %v8350_v3 = vmul.f32 %v13679_v21, %v8321_v22 }
 0x337   :  { %v14143_v14 = vmax.f32 %v14069_v32, %v8406_v48  ;;  %v8700_v13 = vmax.f32 %v14072_v36, %v8668_v55  ;;  %v8392_v20 = vadd.f32 %v14910_v7, %v8349_v11  ;;  %v8612_v62 = vmul.f32 %v13942_v2, %v8567_v30  ;;  %v8571_v15 = vpop.f32.mrb[148].mxu0  ;;  %v14919_v11 = vld [vmem:[#allocation85_spill] sm:$0xff] }
 0x338   :  { %v14149_v35 = vmax.f32 %v14077_v4, %v8407_v45  ;;  %v8701_v46 = vmax.f32 %v14080_v63, %v8669_v17  ;;  %v8654_v26 = vadd.f32 %v14911_v9, %v8611_v38  ;;  %v8393_v37 = vadd.f32 %v14912_v27, %v8350_v3  ;;  %v8573_v6 = vpop.f32.mrb[149].mxu0  ;;  %v14914_v4 = vld [vmem:[#allocation32_spill] sm:$0xff] }
 0x339   :  { %v8408_v21 = vmax.f32 %v8392_v20, 0.0  ;;  %v8655_v32 = vadd.f32 %v14913_v60, %v8612_v62  ;;  %v8613_v1 = vmul.f32 %v13918_v47, %v8571_v15  ;;  %v9648_v36 = vpack.c.bf16 %v8699_v39, %v8697_v19  ;;  %v14920_v9 = vld [vmem:[#allocation152_spill] sm:$0xff] }
 0x33a   :  { %v8670_v57 = vmax.f32 %v8654_v26, 0.0  ;;  %v8409_v49 = vmax.f32 %v8393_v37, 0.0  ;;  %v8614_v56 = vmul.f32 %v13942_v2, %v8573_v6  ;;  %v8641_v5 = vmul.f32 %v14915_v52, %v14914_v4  ;;  %v8746_v4 = vld [vmem:[%s14219_s2 + $0x70] sm:$0xff] }
 0x33b   :  { %v8440_v63 = vmax.f32 %v14089_v42, %v8408_v21  ;;  %v8671_v59 = vmax.f32 %v8655_v32, 0.0  ;;  %v8656_v28 = vadd.f32 %v14916_v18, %v8613_v1  ;;  %9649 = vmatprep.subr.bf16.mxu1 %v9648_v36  ;;  %v8577_v19 = vpop.f32.mrb[150].mxu0  ;;  %v8642_v39 = vmul.f32 %v14918_v58, %v14917_v0 }
 0x33c   :  { %v8702_v53 = vmax.f32 %v14092_v61, %v8670_v57  ;;  %v8441_v29 = vmax.f32 %v14097_v33, %v8409_v49  ;;  %v8657_v23 = vadd.f32 %v8641_v5, %v8614_v56  ;;  %9651 = vmatpush1.bf16.msra.mxu1 %v9650_v10  ;;  %v8615_v40 = vmul.f32 %v13918_v47, %v8577_v19  ;;  %v8579_v42 = vpop.f32.mrb[151].mxu0 }
 0x33d   :  { %v8703_v44 = vmax.f32 %v14100_v8, %v8671_v59  ;;  %v8672_v51 = vmax.f32 %v8656_v28, 0.0  ;;  %v8616_v54 = vmul.f32 %v13942_v2, %v8579_v42  ;;  %v8643_v61 = vmul.f32 %v14915_v52, %v14917_v0  ;;  %v8755_v59 = vpop.permute.xlu0 %8754  ;;  %v8760_v28 = vpop.permute.xlu1 %8759 }
 0x33e   :  { %v9654_v25 = vpack.c.bf16 %v8702_v53, %v8700_v13  ;;  %v8673_v41 = vmax.f32 %v8657_v23, 0.0  ;;  %v8658_v24 = vadd.f32 %v8642_v39, %v8615_v40  ;;  %v8644_v22 = vmul.f32 %v14918_v58, %v14919_v11 }
 0x33f   :  { %v8704_v33 = vmax.f32 %v14109_v43, %v8672_v51  ;;  %v9652_v31 = vpack.c.bf16 %v8703_v44, %v8701_v46  ;;  %v8659_v50 = vadd.f32 %v8643_v61, %v8616_v54  ;;  %v8583_v10 = vpop.f32.mrb[152].mxu0  ;;  %v8645_v43 = vmul.f32 %v14915_v52, %v14919_v11 }
 0x340   :  { %v8705_v8 = vmax.f32 %v14117_v34, %v8673_v41  ;;  %v8674_v48 = vmax.f32 %v8658_v24, 0.0  ;;  %v8617_v55 = vmul.f32 %v13918_v47, %v8583_v10  ;;  %v8585_v30 = vpop.f32.mrb[153].mxu0  ;;  %v8646_v26 = vmul.f32 %v14918_v58, %v14920_v9 }
 0x341   :  { %9653 = vmatprep.subr.bf16.mxu1 %v9652_v31  ;;  %v8675_v45 = vmax.f32 %v8659_v50, 0.0  ;;  %v8618_v17 = vmul.f32 %v13942_v2, %v8585_v30  ;;  %v8647_v21 = vmul.f32 %v14915_v52, %v14920_v9  ;;  %v8747_v52 = vld [vmem:[%s14219_s2 + $0x78] sm:$0xff]  ;;  %v8765_v41 = vpop.permute.xlu0 %8764 }
 0x342   :  { %9655 = vmatpush1.bf16.msra.mxu1 %v9654_v25  ;;  %v8706_v38 = vmax.f32 %v14127_v16, %v8674_v48  ;;  %v8660_v34 = vadd.f32 %v8644_v22, %v8617_v55 }
 0x343   :  { %v8707_v3 = vmax.f32 %v14133_v12, %v8675_v45  ;;  %v8661_v13 = vadd.f32 %v8645_v43, %v8618_v17  ;;  %v8589_v7 = vpop.f32.mrb[154].mxu0  ;;  %v8882_v17 = vld [vmem:[%s14219_s2 + $0x80] sm:$0xff]  ;;  %v8883_v43 = vld [vmem:[%s14219_s2 + $0x88] sm:$0xff] }
 0x344   :  { %v9658_v20 = vpack.c.bf16 %v8706_v38, %v8704_v33  ;;  %v8676_v62 = vmax.f32 %v8660_v34, 0.0  ;;  %v8619_v46 = vmul.f32 %v13918_v47, %v8589_v7  ;;  %v8591_v27 = vpop.f32.mrb[155].mxu0  ;;  %v8770_v33 = vpop.permute.xlu1 %8769 }
 0x345   :  { %v8677_v37 = vmax.f32 %v8661_v13, 0.0  ;;  %v8620_v15 = vmul.f32 %v13942_v2, %v8591_v27  ;;  %v9656_v16 = vpack.c.bf16 %v8707_v3, %v8705_v8  ;;  %v8744_v2 = vld [vmem:[%s14219_s2 + $0x60] sm:$0xff]  ;;  %v8889_v3 = vpop.permute.xlu0 %8888 }
 0x346   :  { %v8708_v60 = vmax.f32 %v14143_v14, %v8676_v62  ;;  %v8662_v12 = vadd.f32 %v8646_v26, %v8619_v46  ;;  %v14921_v14 = vmov 0.0  }
 0x347   :  { %v8709_v32 = vmax.f32 %v14149_v35, %v8677_v37  ;;  %v8663_v1 = vadd.f32 %v8647_v21, %v8620_v15  ;;  %9657 = vmatprep.subr.bf16.mxu1 %v9656_v16  ;;  %v8745_v35 = vld [vmem:[%s14219_s2 + $0x68] sm:$0xff] }
 0x348   :  { %v8678_v36 = vmax.f32 %v8662_v12, 0.0  ;;  %9659 = vmatpush1.bf16.msra.mxu1 %v9658_v20  ;;  %v8894_v7 = vpop.permute.xlu1 %8893  ;;  %v8984_v12 = vld [vmem:[%s14219_s2 + $0x90] sm:$0x7] }
 0x349   :  { %v8679_v47 = vmax.f32 %v8663_v1, 0.0 }
 0x34a   :  { %v8710_v6 = vmax.f32 %v8440_v63, %v8678_v36 }
 0x34b   :  { %v8711_v57 = vmax.f32 %v8441_v29, %v8679_v47 }
 0x34c   :  { %v9662_v49 = vpack.c.bf16 %v8710_v6, %v8708_v60 }
 0x34d   :  { %v9660_v56 = vpack.c.bf16 %v8711_v57, %v8709_v32  ;;  %v8989_v32 = vpop.permute.xlu0 %8988 }
 0x34f   :  { %9661 = vmatprep.subr.bf16.mxu1 %v9660_v56 }
 0x350   :  { %9663 = vmatpush1.bf16.msra.mxu1 %v9662_v49 }
 0x353   :  { %9377 = vmatmul.mubr.msk.f32.vlgmr.msra.gmra.mrb[140].mxu1 %vm8772_vm2, %v8744_v2 }
 0x354   :  { %8855 = vmatprep.mubr.f32.mxu1 %v14921_v14 }
 0x357   :  { %9378 = vmatmul.mubr.msk.f32.gmra.mrb[142].mxu1 %vm8772_vm2, %v8745_v35 }
 0x358   :  { %8861 = vmatprep.mubr.f32.mxu1 %v14921_v14 }
 0x35b   :  { %9379 = vmatmul.mubr.msk.f32.gmra.mrb[144].mxu1 %vm8772_vm2, %v8746_v4 }
 0x35c   :  { %8867 = vmatprep.mubr.f32.mxu1 %v14921_v14 }
 0x35f   :  { %9380 = vmatmul.mubr.msk.f32.gmra.mrb[146].mxu1 %vm8772_vm2, %v8747_v52 }
 0x360   :  { %8967 = vmatprep.mubr.f32.mxu1 %v14921_v14 }
 0x426   :  { %v8851_v5 = vpop.f32.mrb[140].mxu1 }
 0x427   :  { %v8853_v63 = vpop.f32.mrb[141].mxu1  ;;  %v8852_v18 = vadd.f32 %v8851_v5, %v8755_v59 }
 0x428   :  { %v8854_v53 = vadd.f32 %v8853_v63, %v8755_v59 }
 0x429   :  { %v8874_v51 = vmax.f32 %v8852_v18, 0.0 }
 0x42a   :  { %v8857_v29 = vpop.f32.mrb[142].mxu1  ;;  %v8875_v0 = vmax.f32 %v8854_v53, 0.0 }
 0x42b   :  { %v8858_v23 = vadd.f32 %v8857_v29, %v8760_v28  ;;  %v8859_v19 = vpop.f32.mrb[143].mxu1 }
 0x42c   :  { %v8860_v44 = vadd.f32 %v8859_v19, %v8760_v28 }
 0x42d   :  { %v8876_v40 = vmax.f32 %v8858_v23, 0.0 }
 0x42e   :  { %v8877_v58 = vmax.f32 %v8860_v44, 0.0  ;;  %v8863_v39 = vpop.f32.mrb[144].mxu1 }
 0x42f   :  { %v9666_v42 = vpack.c.bf16 %v8876_v40, %v8874_v51  ;;  %v8865_v25 = vpop.f32.mrb[145].mxu1  ;;  %v8864_v61 = vadd.f32 %v8863_v39, %v8765_v41 }
 0x430   :  { %v9664_v54 = vpack.c.bf16 %v8877_v58, %v8875_v0  ;;  %v8866_v24 = vadd.f32 %v8865_v25, %v8765_v41 }
 0x431   :  { %v8878_v48 = vmax.f32 %v8864_v61, 0.0 }
 0x432   :  { %v8869_v31 = vpop.f32.mrb[146].mxu1  ;;  %9665 = vmatprep.subr.bf16.mxu1 %v9664_v54  ;;  %v8879_v11 = vmax.f32 %v8866_v24, 0.0 }
 0x433   :  { %v8870_v8 = vadd.f32 %v8869_v31, %v8770_v33  ;;  %v8871_v50 = vpop.f32.mrb[147].mxu1  ;;  %9667 = vmatpush1.bf16.msra.mxu1 %v9666_v42 }
 0x434   :  { %v8872_v10 = vadd.f32 %v8871_v50, %v8770_v33 }
 0x435   :  { %v8880_v55 = vmax.f32 %v8870_v8, 0.0 }
 0x436   :  { %v8881_v22 = vmax.f32 %v8872_v10, 0.0 }
 0x437   :  { %v9670_v30 = vpack.c.bf16 %v8880_v55, %v8878_v48 }
 0x438   :  { %v9668_v45 = vpack.c.bf16 %v8881_v22, %v8879_v11 }
 0x43a   :  { %9669 = vmatprep.subr.bf16.mxu1 %v9668_v45 }
 0x43b   :  { %9671 = vmatpush1.bf16.msra.mxu1 %v9670_v30 }
 0x43e   :  { %9381 = vmatmul.mubr.msk.f32.vlgmr.msra.gmra.mrb[148].mxu1 %vm8896_vm8, %v8882_v17 }
 0x43f   :  { %8973 = vmatprep.mubr.f32.mxu1 %v14921_v14 }
 0x442   :  { %9382 = vmatmul.mubr.msk.f32.gmra.mrb[150].mxu1 %vm8896_vm8, %v8883_v43 }
 0x443   :  { %9059 = vmatprep.mubr.f32.mxu1 %v14921_v14 }
 0x511   :  { %v8969_v38 = vpop.f32.mrb[148].mxu1 }
 0x512   :  { %v8971_v34 = vpop.f32.mrb[149].mxu1  ;;  %v8970_v13 = vadd.f32 %v8969_v38, %v8889_v3 }
 0x513   :  { %v8972_v20 = vadd.f32 %v8971_v34, %v8889_v3 }
 0x514   :  { %v8980_v27 = vmax.f32 %v8970_v13, 0.0 }
 0x515   :  { %v8975_v62 = vpop.f32.mrb[150].mxu1  ;;  %v8981_v15 = vmax.f32 %v8972_v20, 0.0 }
 0x516   :  { %v8976_v46 = vadd.f32 %v8975_v62, %v8894_v7  ;;  %v8977_v9 = vpop.f32.mrb[151].mxu1 }
 0x517   :  { %v8978_v26 = vadd.f32 %v8977_v9, %v8894_v7 }
 0x518   :  { %v8982_v37 = vmax.f32 %v8976_v46, 0.0 }
 0x519   :  { %v8983_v21 = vmax.f32 %v8978_v26, 0.0 }
 0x51a   :  { %v9674_v16 = vpack.c.bf16 %v8982_v37, %v8980_v27 }
 0x51b   :  { %v9672_v60 = vpack.c.bf16 %v8983_v21, %v8981_v15 }
 0x51d   :  { %9673 = vmatprep.subr.bf16.mxu1 %v9672_v60 }
 0x51e   :  { %9675 = vmatpush1.bf16.msra.mxu1 %v9674_v16 }
 0x521   :  { %9383 = vmatmul.mubr.msk.f32.vlgmr.msra.gmra.mrb[152].mxu1 %vm8991_vm4, %v8984_v12 }
 0x5f4   :  { %v9061_v1 = vpop.f32.mrb[152].mxu1 }
 0x5f5   :  { %v9062_v36 = vadd.f32 %v9061_v1, %v8989_v32  ;;  %v9063_v47 = vpop.f32.mrb[153].mxu1 }
 0x5f6   :  { %v9064_v6 = vadd.f32 %v9063_v47, %v8989_v32 }
 0x5f8   :  { %v9068_v57 = vcombine.low %v9062_v36, %v9064_v6 }
 0x5fa   :  { %9070 = vst [vmem:[%s14222_s4] sm:$0x77] %v9068_v57 }

</bundles_post_ra>
